<compile_context>
chip_gen: v7x
topology: tpu7x:2x2x1
jax: 0.10.0
libtpu: 0.0.40
codegen_flags: <defaults>
</compile_context>

<pallas_src>
import functools

import jax
import jax.numpy as jnp
from jax import lax
from jax.experimental import pallas as pl
from jax.experimental.pallas import tpu as pltpu

# ----------------------------- constants --------------------------------------
N_FFT = 512
WIN_LENGTH = 128
HOP = 50
N_FREQ = N_FFT // 2 + 1                       # 257 one-sided bins
FREQ_KEEP = int(20 / 100 * N_FREQ + 2)        # == 53  (matches the torch slice)
FREQ_PAD = 64                                 # lane-friendly padded bin count
K_PAD = 32                                    # padded im2col K (3*3*3=27 -> 32)
STEM_CH = 48                                  # efficientnet_b5 stem channels
STEM_PAD = 64                                 # padded stem channels
HEAD_CH = 2048                                # efficientnet_b5 conv_head channels
NUM_OUT = 6                                   # nn.Linear(2048, 6)
OUT_PAD = 128                                 # lane-dense padded logits

VMEM_LIMIT = 32 * 1024 * 1024


def _round_up(v, m):
    return ((v + m - 1) // m) * m


# ----------------------------- Pallas kernels ---------------------------------
def _spec_kernel(frames_ref, dft_ref, o_ref):
    """Fused windowed real-DFT (single 128-lane matmul) + magnitude + clip/1000."""
    z = jnp.dot(frames_ref[...], dft_ref[...],
                preferred_element_type=jnp.float32)          # (tm, 128): [re | im]
    z2 = z * z
    mag = jnp.sqrt(z2[:, :FREQ_PAD] + z2[:, FREQ_PAD:])      # (tm, 64)
    o_ref[...] = jnp.clip(mag, 0.0, 10000.0) * (1.0 / 1000.0)


def _fused_net_kernel(patch_ref, w_stem_ref, b_stem_ref, w_head_ref, b_head_ref,
                      w_fc_ref, b_fc_ref, o_ref, acc_ref, *, rows_valid, tile_rows):
    """stem conv (as matmul) -> SiLU -> conv_head -> SiLU -> avg-pool accum
    -> fc -> softmax, all in VMEM.  Grid = (image, row_tile)."""
    r = pl.program_id(1)
    nr = pl.num_programs(1)

    @pl.when(r == 0)
    def _():
        acc_ref[...] = jnp.zeros_like(acc_ref)

    x = patch_ref[0]                                          # (T, K_PAD) bf16
    stem = jnp.dot(x, w_stem_ref[...],
                   preferred_element_type=jnp.float32) + b_stem_ref[...]
    stem = stem * jax.nn.sigmoid(stem)                        # SiLU, (T, 64)

    head = jnp.dot(stem.astype(jnp.bfloat16), w_head_ref[...],
                   preferred_element_type=jnp.float32) + b_head_ref[...]
    head = head * jax.nn.sigmoid(head)                        # SiLU, (T, 2048)

    # mask zero-padded rows of this image before pooling
    local = lax.broadcasted_iota(jnp.int32, (tile_rows, 1), 0)
    valid = (r * tile_rows + local) < rows_valid
    head = jnp.where(valid, head, 0.0)
    acc_ref[...] += jnp.sum(head, axis=0, keepdims=True)      # (1, 2048) f32

    @pl.when(r == nr - 1)
    def _():
        pooled = acc_ref[...] * (1.0 / rows_valid)            # AdaptiveAvgPool2d(1)
        # dropout(0.5) is eval-mode identity
        logits = jnp.dot(pooled, w_fc_ref[...],
                         preferred_element_type=jnp.float32) + b_fc_ref[...]
        col = lax.broadcasted_iota(jnp.int32, (1, OUT_PAD), 1)
        logits = jnp.where(col < NUM_OUT, logits, -1e30)
        m = jnp.max(logits, axis=-1, keepdims=True)
        e = jnp.exp(logits - m)
        probs = e / jnp.sum(e, axis=-1, keepdims=True)        # (1, 128)
        o_ref[0] = jnp.broadcast_to(probs, (8, OUT_PAD))


# ----------------------------- parameter setup --------------------------------
def make_dft_table():
    """Fused (512, 128) bf16 real-DFT table with the hann window pre-multiplied."""
    n = jnp.arange(WIN_LENGTH, dtype=jnp.float32)
    hann = 0.5 * (1.0 - jnp.cos(2.0 * jnp.pi * n / WIN_LENGTH))   # periodic hann
    lpad = (N_FFT - WIN_LENGTH) // 2
    win = jnp.zeros((N_FFT,), jnp.float32).at[lpad:lpad + WIN_LENGTH].set(hann)

    t = jnp.arange(N_FFT, dtype=jnp.float32)[:, None]             # (512, 1)
    k = jnp.arange(FREQ_PAD, dtype=jnp.float32)[None, :]          # (1, 64)
    ang = 2.0 * jnp.pi * t * k / N_FFT
    keep = (jnp.arange(FREQ_PAD) < FREQ_KEEP)[None, :]
    cos_b = jnp.where(keep, jnp.cos(ang), 0.0) * win[:, None]     # (512, 64)
    sin_b = jnp.where(keep, -jnp.sin(ang), 0.0) * win[:, None]    # (512, 64)
    return jnp.concatenate([cos_b, sin_b], axis=1).astype(jnp.bfloat16)  # (512, 128)


def make_params(key):
    k1, k2, k3 = jax.random.split(key, 3)
    w_stem = jnp.zeros((K_PAD, STEM_PAD), jnp.float32)
    w_stem = w_stem.at[:27, :STEM_CH].set(
        jax.random.normal(k1, (27, STEM_CH), jnp.float32) * 0.1)
    w_head = jnp.zeros((STEM_PAD, HEAD_CH), jnp.float32)
    w_head = w_head.at[:STEM_CH, :].set(
        jax.random.normal(k2, (STEM_CH, HEAD_CH), jnp.float32) * 0.05)
    w_fc = jnp.zeros((HEAD_CH, OUT_PAD), jnp.float32)
    w_fc = w_fc.at[:, :NUM_OUT].set(
        jax.random.normal(k3, (HEAD_CH, NUM_OUT), jnp.float32) * 0.02)
    return dict(
        w_stem=w_stem.astype(jnp.bfloat16),
        b_stem=jnp.zeros((1, STEM_PAD), jnp.float32),
        w_head=w_head.astype(jnp.bfloat16),
        b_head=jnp.zeros((1, HEAD_CH), jnp.float32),
        w_fc=w_fc,
        b_fc=jnp.zeros((1, OUT_PAD), jnp.float32),
    )


# ----------------------------- forward pass -----------------------------------
def transform(x, dft_table):
    """torchaudio Spectrogram(n_fft=512, win=128, hop=50, power=1) + Transform glue."""
    bs, c, L = x.shape
    padded = jnp.pad(x, ((0, 0), (0, 0), (N_FFT // 2, N_FFT // 2)), mode="reflect")
    n_frames = 1 + (padded.shape[-1] - N_FFT) // HOP
    idx = jnp.arange(n_frames)[:, None] * HOP + jnp.arange(N_FFT)[None, :]
    frames = padded[:, :, idx]                                    # (B, C, F, 512)
    m = bs * c * n_frames
    frames2d = frames.reshape(m, N_FFT).astype(jnp.bfloat16)

    tile_m = min(512, _round_up(m, 8))
    m_pad = _round_up(m, tile_m)
    frames2d = jnp.pad(frames2d, ((0, m_pad - m), (0, 0)))

    mag = pl.pallas_call(
        _spec_kernel,
        out_shape=jax.ShapeDtypeStruct((m_pad, FREQ_PAD), jnp.float32),
        grid=(m_pad // tile_m,),
        in_specs=[pl.BlockSpec((tile_m, N_FFT), lambda i: (i, 0)),
                  pl.BlockSpec((N_FFT, 2 * FREQ_PAD), lambda i: (0, 0))],
        out_specs=pl.BlockSpec((tile_m, FREQ_PAD), lambda i: (i, 0)),
        compiler_params=pltpu.CompilerParams(
            dimension_semantics=("parallel",),
            vmem_limit_bytes=VMEM_LIMIT),
    )(frames2d, dft_table)

    mag = mag[:m, :FREQ_KEEP]                                     # keep 53 bins
    image = mag.reshape(bs, c, n_frames, FREQ_KEEP).transpose(0, 1, 3, 2)  # (n,c,53,w)

    n, cc, h, w = image.shape
    image = image.reshape(n, 2, -1, w)
    x1 = image[:, 0:1, ...]
    x2 = image[:, 1:2, ...]
    image = jnp.concatenate([x1, x2], axis=-1)                    # (n,1,53,2w)
    image = jnp.concatenate([image, image, image], axis=1)        # (n,3,53,2w)
    return image


def net_one_image_forward(x, params, dft_table):
    # ---- preprocess (Pallas spectrogram kernel) ----
    image = transform(x, dft_table)                               # (N,3,H,W) NCHW
    n = image.shape[0]

    # ---- im2col for the 3x3/stride-2 stem conv (tiny JAX glue) ----
    patches = lax.conv_general_dilated_patches(
        image, filter_shape=(3, 3), window_strides=(2, 2), padding="SAME")
    _, ck, hp, wp = patches.shape                                 # ck == 27
    rows_img = hp * wp
    pm = patches.transpose(0, 2, 3, 1).reshape(n, rows_img, ck)

    tile_rows = min(512, _round_up(rows_img, 8))                  # fits v5e/v7x VMEM
    rt = pl.cdiv(rows_img, tile_rows)
    rows_pad = rt * tile_rows
    pm = jnp.pad(pm, ((0, 0), (0, rows_pad - rows_img), (0, K_PAD - ck)))
    pm = pm.astype(jnp.bfloat16)

    # ---- fused stem -> head -> pool -> fc -> softmax (single Pallas kernel) ----
    kernel = functools.partial(_fused_net_kernel,
                               rows_valid=rows_img, tile_rows=tile_rows)
    out = pl.pallas_call(
        kernel,
        out_shape=jax.ShapeDtypeStruct((n, 8, OUT_PAD), jnp.float32),
        grid=(n, rt),
        in_specs=[
            pl.BlockSpec((1, tile_rows, K_PAD), lambda i, r: (i, r, 0)),
            pl.BlockSpec((K_PAD, STEM_PAD), lambda i, r: (0, 0)),
            pl.BlockSpec((1, STEM_PAD), lambda i, r: (0, 0)),
            pl.BlockSpec((STEM_PAD, HEAD_CH), lambda i, r: (0, 0)),
            pl.BlockSpec((1, HEAD_CH), lambda i, r: (0, 0)),
            pl.BlockSpec((HEAD_CH, OUT_PAD), lambda i, r: (0, 0)),
            pl.BlockSpec((1, OUT_PAD), lambda i, r: (0, 0)),
        ],
        out_specs=pl.BlockSpec((1, 8, OUT_PAD), lambda i, r: (i, 0, 0)),
        scratch_shapes=[pltpu.VMEM((1, HEAD_CH), jnp.float32)],
        compiler_params=pltpu.CompilerParams(
            dimension_semantics=("parallel", "arbitrary"),
            vmem_limit_bytes=VMEM_LIMIT),
    )(pm, params["w_stem"], params["b_stem"], params["w_head"], params["b_head"],
      params["w_fc"], params["b_fc"])

    return out[:, 0, :NUM_OUT]                                    # (N, 6)


# ----------------------------- main --------------------------------------------
if __name__ == "__main__":
    key = jax.random.PRNGKey(0)
    k_in, k_par = jax.random.split(key)

    # waveform input: batch=2, channels=2 (needed for the reshape-to-2 trick), T=400
    x = jax.random.normal(k_in, (2, 2, 400), jnp.float32)

    dft_table = make_dft_table()
    params = make_params(k_par)

    fwd = jax.jit(net_one_image_forward)
    out = fwd(x, params, dft_table)
    out = jax.block_until_ready(out)

    assert out.shape == (2, NUM_OUT)
    assert bool(jnp.all(jnp.isfinite(out)))
    # softmax rows sum to 1
    assert bool(jnp.allclose(jnp.sum(out, axis=-1), 1.0, atol=1e-5))
    print("KERNEL_OK")
</pallas_src>

<mosaic_0001>
module attributes {stable_mosaic.version = 11 : i64} {
  func.func @_spec_kernel(%arg0: i32, %arg1: memref<40x512xbf16, #tpu.memory_space<vmem>>, %arg2: memref<512x128xbf16, #tpu.memory_space<vmem>>, %arg3: memref<40x64xf32, #tpu.memory_space<vmem>>) attributes {dimension_semantics = [#tpu.dimension_semantics<parallel>], iteration_bounds = array<i64: 1>, scalar_prefetch = 0 : i64, scratch_operands = 0 : i64, tpu.core_type = #tpu.core_type<tc>, window_params = [{transform_indices = @transform_0, window_bounds = array<i64: 40, 512>}, {pipeline_mode = #tpu.pipeline_mode<synchronous>, transform_indices = @transform_1, window_bounds = array<i64: 512, 128>}, {transform_indices = @transform_2, window_bounds = array<i64: 40, 64>}]} {
    %c0 = arith.constant 0 : index
    %c0_0 = arith.constant 0 : index
    %0 = vector.load %arg1[%c0, %c0_0] : memref<40x512xbf16, #tpu.memory_space<vmem>>, vector<40x512xbf16>
    %c0_1 = arith.constant 0 : index
    %c0_2 = arith.constant 0 : index
    %1 = vector.load %arg2[%c0_1, %c0_2] : memref<512x128xbf16, #tpu.memory_space<vmem>>, vector<512x128xbf16>
    %cst = arith.constant dense<0.000000e+00> : vector<40x128xf32>
    %2 = tpu.matmul %0, %1, %cst {dimension_numbers = #tpu.dot_dimension_numbers<[1], [0], [0], [1], [0, 0, 1, 1], [], []>} : vector<40x512xbf16>, vector<512x128xbf16>, vector<40x128xf32> -> vector<40x128xf32>
    %3 = arith.mulf %2, %2 : vector<40x128xf32>
    %4 = vector.extract_strided_slice %3 {offsets = [0, 0], sizes = [40, 64], strides = [1, 1]} : vector<40x128xf32> to vector<40x64xf32>
    %5 = vector.extract_strided_slice %3 {offsets = [0, 64], sizes = [40, 64], strides = [1, 1]} : vector<40x128xf32> to vector<40x64xf32>
    %6 = arith.addf %4, %5 : vector<40x64xf32>
    %7 = math.sqrt %6 : vector<40x64xf32>
    %cst_3 = arith.constant 0.000000e+00 : f32
    %cst_4 = arith.constant 1.000000e+04 : f32
    %8 = vector.broadcast %cst_3 : f32 to vector<40x64xf32>
    %9 = arith.maximumf %8, %7 : vector<40x64xf32>
    %10 = vector.broadcast %cst_4 : f32 to vector<40x64xf32>
    %11 = arith.minimumf %10, %9 : vector<40x64xf32>
    %cst_5 = arith.constant 1.000000e-03 : f32
    %12 = vector.broadcast %cst_5 : f32 to vector<40x64xf32>
    %13 = arith.mulf %11, %12 : vector<40x64xf32>
    %c0_6 = arith.constant 0 : index
    %c0_7 = arith.constant 0 : index
    %14 = vector.load %arg3[%c0_6, %c0_7] : memref<40x64xf32, #tpu.memory_space<vmem>>, vector<40x64xf32>
    tpu.vector_store %arg3[%c0_6, %c0_7], %13 {strides = array<i32>} : memref<40x64xf32, #tpu.memory_space<vmem>>, vector<40x64xf32>,
    return
  }
  func.func @transform_0(%arg0: i32) -> (i32, i32) {
    %c0_i32 = arith.constant 0 : i32
    %c0_i32_0 = arith.constant 0 : i32
    return %arg0, %c0_i32 : i32, i32
  }
  func.func @transform_1(%arg0: i32) -> (i32, i32) {
    %c0_i32 = arith.constant 0 : i32
    %c0_i32_0 = arith.constant 0 : i32
    %c0_i32_1 = arith.constant 0 : i32
    return %c0_i32, %c0_i32_0 : i32, i32
  }
  func.func @transform_2(%arg0: i32) -> (i32, i32) {
    %c0_i32 = arith.constant 0 : i32
    %c0_i32_0 = arith.constant 0 : i32
    return %arg0, %c0_i32 : i32, i32
  }
}

module attributes {stable_mosaic.version = 11 : i64} {
  func.func @_fused_net_kernel(%arg0: i32, %arg1: i32, %arg2: memref<1x248x32xbf16, #tpu.memory_space<vmem>>, %arg3: memref<32x64xbf16, #tpu.memory_space<vmem>>, %arg4: memref<1x64xf32, #tpu.memory_space<vmem>>, %arg5: memref<64x2048xbf16, #tpu.memory_space<vmem>>, %arg6: memref<1x2048xf32, #tpu.memory_space<vmem>>, %arg7: memref<2048x128xf32, #tpu.memory_space<vmem>>, %arg8: memref<1x128xf32, #tpu.memory_space<vmem>>, %arg9: memref<1x8x128xf32, #tpu.memory_space<vmem>>, %arg10: memref<1x2048xf32, #tpu.memory_space<vmem>>) attributes {dimension_semantics = [#tpu.dimension_semantics<parallel>, #tpu.dimension_semantics<arbitrary>], iteration_bounds = array<i64: 2, 1>, scalar_prefetch = 0 : i64, scratch_operands = 1 : i64, tpu.core_type = #tpu.core_type<tc>, window_params = [{transform_indices = @transform_0, window_bounds = array<i64: 1, 248, 32>}, {pipeline_mode = #tpu.pipeline_mode<synchronous>, transform_indices = @transform_1, window_bounds = array<i64: 32, 64>}, {pipeline_mode = #tpu.pipeline_mode<synchronous>, transform_indices = @transform_2, window_bounds = array<i64: 1, 64>}, {pipeline_mode = #tpu.pipeline_mode<synchronous>, transform_indices = @transform_3, window_bounds = array<i64: 64, 2048>}, {pipeline_mode = #tpu.pipeline_mode<synchronous>, transform_indices = @transform_4, window_bounds = array<i64: 1, 2048>}, {pipeline_mode = #tpu.pipeline_mode<synchronous>, transform_indices = @transform_5, window_bounds = array<i64: 2048, 128>}, {pipeline_mode = #tpu.pipeline_mode<synchronous>, transform_indices = @transform_6, window_bounds = array<i64: 1, 128>}, {transform_indices = @transform_7, window_bounds = array<i64: 1, 8, 128>}]} {
    %c0_i32 = arith.constant 0 : i32
    %0 = arith.cmpi eq, %arg1, %c0_i32 : i32
    %1 = arith.extui %0 : i1 to i32
    %c0_i32_0 = arith.constant 0 : i32
    %2 = arith.cmpi ne, %1, %c0_i32_0 : i32
    scf.if %2 {
      %cst_22 = arith.constant 0.000000e+00 : f32
      %46 = vector.broadcast %cst_22 : f32 to vector<1x2048xf32>
      %c0_23 = arith.constant 0 : index
      %c0_24 = arith.constant 0 : index
      %47 = vector.load %arg10[%c0_23, %c0_24] : memref<1x2048xf32, #tpu.memory_space<vmem>>, vector<1x2048xf32>
      tpu.vector_store %arg10[%c0_23, %c0_24], %46 {strides = array<i32>} : memref<1x2048xf32, #tpu.memory_space<vmem>>, vector<1x2048xf32>,
    } else {
    }
    %c0 = arith.constant 0 : index
    %c0_1 = arith.constant 0 : index
    %c0_2 = arith.constant 0 : index
    %3 = vector.load %arg2[%c0, %c0_1, %c0_2] : memref<1x248x32xbf16, #tpu.memory_space<vmem>>, vector<1x248x32xbf16>
    %4 = vector.shape_cast %3 : vector<1x248x32xbf16> to vector<248x32xbf16>
    %c0_3 = arith.constant 0 : index
    %c0_4 = arith.constant 0 : index
    %5 = vector.load %arg3[%c0_3, %c0_4] : memref<32x64xbf16, #tpu.memory_space<vmem>>, vector<32x64xbf16>
    %cst = arith.constant dense<0.000000e+00> : vector<248x64xf32>
    %6 = tpu.matmul %4, %5, %cst {dimension_numbers = #tpu.dot_dimension_numbers<[1], [0], [0], [1], [0, 0, 1, 1], [], []>} : vector<248x32xbf16>, vector<32x64xbf16>, vector<248x64xf32> -> vector<248x64xf32>
    %c0_5 = arith.constant 0 : index
    %c0_6 = arith.constant 0 : index
    %7 = vector.load %arg4[%c0_5, %c0_6] : memref<1x64xf32, #tpu.memory_space<vmem>>, vector<1x64xf32>
    %8 = vector.broadcast %7 : vector<1x64xf32> to vector<248x64xf32>
    %9 = arith.addf %6, %8 : vector<248x64xf32>
    %10 = arith.negf %9 : vector<248x64xf32>
    %11 = math.exp %10 : vector<248x64xf32>
    %cst_7 = arith.constant 1.000000e+00 : f32
    %12 = vector.broadcast %cst_7 : f32 to vector<248x64xf32>
    %13 = arith.addf %12, %11 : vector<248x64xf32>
    %14 = arith.divf %12, %13 : vector<248x64xf32>
    %15 = arith.mulf %9, %14 : vector<248x64xf32>
    %16 = arith.truncf %15 : vector<248x64xf32> to vector<248x64xbf16>
    %c0_8 = arith.constant 0 : index
    %c0_9 = arith.constant 0 : index
    %17 = vector.load %arg5[%c0_8, %c0_9] : memref<64x2048xbf16, #tpu.memory_space<vmem>>, vector<64x2048xbf16>
    %cst_10 = arith.constant dense<0.000000e+00> : vector<248x2048xf32>
    %18 = tpu.matmul %16, %17, %cst_10 {dimension_numbers = #tpu.dot_dimension_numbers<[1], [0], [0], [1], [0, 0, 1, 1], [], []>} : vector<248x64xbf16>, vector<64x2048xbf16>, vector<248x2048xf32> -> vector<248x2048xf32>
    %c0_11 = arith.constant 0 : index
    %c0_12 = arith.constant 0 : index
    %19 = vector.load %arg6[%c0_11, %c0_12] : memref<1x2048xf32, #tpu.memory_space<vmem>>, vector<1x2048xf32>
    %20 = vector.broadcast %19 : vector<1x2048xf32> to vector<248x2048xf32>
    %21 = arith.addf %18, %20 : vector<248x2048xf32>
    %22 = arith.negf %21 : vector<248x2048xf32>
    %23 = math.exp %22 : vector<248x2048xf32>
    %cst_13 = arith.constant 1.000000e+00 : f32
    %24 = vector.broadcast %cst_13 : f32 to vector<248x2048xf32>
    %25 = arith.addf %24, %23 : vector<248x2048xf32>
    %26 = arith.divf %24, %25 : vector<248x2048xf32>
    %27 = arith.mulf %21, %26 : vector<248x2048xf32>
    %28 = tpu.iota {dimensions = array<i32: 0>} : vector<248x1xi32>
    %c248_i32 = arith.constant 248 : i32
    %29 = arith.muli %arg1, %c248_i32 : i32
    %30 = vector.broadcast %29 : i32 to vector<248x1xi32>
    %31 = arith.addi %30, %28 : vector<248x1xi32>
    %c243_i32 = arith.constant 243 : i32
    %32 = vector.broadcast %c243_i32 : i32 to vector<248x1xi32>
    %33 = arith.cmpi slt, %31, %32 : vector<248x1xi32>
    %cst_14 = arith.constant 0.000000e+00 : f32
    %34 = vector.shape_cast %33 : vector<248x1xi1> to vector<248x1xi1>
    %35 = vector.broadcast %34 : vector<248x1xi1> to vector<248x2048xi1>
    %36 = vector.broadcast %cst_14 : f32 to vector<248x2048xf32>
    %37 = arith.select %35, %27, %36 : vector<248x2048xi1>, vector<248x2048xf32>
    %c0_15 = arith.constant 0 : index
    %c0_16 = arith.constant 0 : index
    %38 = vector.load %arg10[%c0_15, %c0_16] : memref<1x2048xf32, #tpu.memory_space<vmem>>, vector<1x2048xf32>
    %cst_17 = arith.constant dense<0.000000e+00> : vector<2048xf32>
    %39 = vector.multi_reduction <add>, %37, %cst_17 [0] : vector<248x2048xf32> to vector<2048xf32>
    %40 = vector.shape_cast %39 : vector<2048xf32> to vector<1x2048xf32>
    %41 = arith.addf %38, %40 : vector<1x2048xf32>
    %c0_18 = arith.constant 0 : index
    %c0_19 = arith.constant 0 : index
    %42 = vector.load %arg10[%c0_18, %c0_19] : memref<1x2048xf32, #tpu.memory_space<vmem>>, vector<1x2048xf32>
    tpu.vector_store %arg10[%c0_18, %c0_19], %41 {strides = array<i32>} : memref<1x2048xf32, #tpu.memory_space<vmem>>, vector<1x2048xf32>,
    %c0_i32_20 = arith.constant 0 : i32
    %43 = arith.cmpi eq, %arg1, %c0_i32_20 : i32
    %44 = arith.extui %43 : i1 to i32
    %c0_i32_21 = arith.constant 0 : i32
    %45 = arith.cmpi ne, %44, %c0_i32_21 : i32
    scf.if %45 {
      %c0_22 = arith.constant 0 : index
      %c0_23 = arith.constant 0 : index
      %46 = vector.load %arg10[%c0_22, %c0_23] : memref<1x2048xf32, #tpu.memory_space<vmem>>, vector<1x2048xf32>
      %cst_24 = arith.constant 0.00411522621 : f32
      %47 = vector.broadcast %cst_24 : f32 to vector<1x2048xf32>
      %48 = arith.mulf %46, %47 : vector<1x2048xf32>
      %c0_25 = arith.constant 0 : index
      %c0_26 = arith.constant 0 : index
      %49 = vector.load %arg7[%c0_25, %c0_26] : memref<2048x128xf32, #tpu.memory_space<vmem>>, vector<2048x128xf32>
      %cst_27 = arith.constant dense<0.000000e+00> : vector<1x128xf32>
      %50 = tpu.matmul %48, %49, %cst_27 {dimension_numbers = #tpu.dot_dimension_numbers<[1], [0], [0], [1], [0, 0, 1, 1], [], []>} : vector<1x2048xf32>, vector<2048x128xf32>, vector<1x128xf32> -> vector<1x128xf32>
      %c0_28 = arith.constant 0 : index
      %c0_29 = arith.constant 0 : index
      %51 = vector.load %arg8[%c0_28, %c0_29] : memref<1x128xf32, #tpu.memory_space<vmem>>, vector<1x128xf32>
      %52 = arith.addf %50, %51 : vector<1x128xf32>
      %53 = tpu.iota {dimensions = array<i32: 1>} : vector<1x128xi32>
      %c6_i32 = arith.constant 6 : i32
      %54 = vector.broadcast %c6_i32 : i32 to vector<1x128xi32>
      %55 = arith.cmpi slt, %53, %54 : vector<1x128xi32>
      %cst_30 = arith.constant -1.000000e+30 : f32
      %56 = vector.broadcast %cst_30 : f32 to vector<1x128xf32>
      %57 = arith.select %55, %52, %56 : vector<1x128xi1>, vector<1x128xf32>
      %cst_31 = arith.constant dense<0xFF800000> : vector<1xf32>
      %58 = vector.multi_reduction <maximumf>, %57, %cst_31 [1] : vector<1x128xf32> to vector<1xf32>
      %59 = vector.shape_cast %58 : vector<1xf32> to vector<1x1xf32>
      %60 = vector.broadcast %59 : vector<1x1xf32> to vector<1x128xf32>
      %61 = arith.subf %57, %60 : vector<1x128xf32>
      %62 = math.exp %61 : vector<1x128xf32>
      %cst_32 = arith.constant dense<0.000000e+00> : vector<1xf32>
      %63 = vector.multi_reduction <add>, %62, %cst_32 [1] : vector<1x128xf32> to vector<1xf32>
      %64 = vector.shape_cast %63 : vector<1xf32> to vector<1x1xf32>
      %65 = vector.broadcast %64 : vector<1x1xf32> to vector<1x128xf32>
      %66 = arith.divf %62, %65 : vector<1x128xf32>
      %67 = vector.shape_cast %66 : vector<1x128xf32> to vector<1x128xf32>
      %68 = vector.broadcast %67 : vector<1x128xf32> to vector<8x128xf32>
      %c0_33 = arith.constant 0 : index
      %c0_34 = arith.constant 0 : index
      %c0_35 = arith.constant 0 : index
      %69 = vector.load %arg9[%c0_33, %c0_34, %c0_35] : memref<1x8x128xf32, #tpu.memory_space<vmem>>, vector<1x8x128xf32>
      %70 = vector.shape_cast %69 : vector<1x8x128xf32> to vector<8x128xf32>
      %71 = vector.shape_cast %68 : vector<8x128xf32> to vector<1x8x128xf32>
      tpu.vector_store %arg9[%c0_33, %c0_34, %c0_35], %71 {strides = array<i32>} : memref<1x8x128xf32, #tpu.memory_space<vmem>>, vector<1x8x128xf32>,
    } else {
    }
    return
  }
  func.func @transform_0(%arg0: i32, %arg1: i32) -> (i32, i32, i32) {
    %c0_i32 = arith.constant 0 : i32
    %c0_i32_0 = arith.constant 0 : i32
    return %arg0, %arg1, %c0_i32 : i32, i32, i32
  }
  func.func @transform_1(%arg0: i32, %arg1: i32) -> (i32, i32) {
    %c0_i32 = arith.constant 0 : i32
    %c0_i32_0 = arith.constant 0 : i32
    %c0_i32_1 = arith.constant 0 : i32
    return %c0_i32, %c0_i32_0 : i32, i32
  }
  func.func @transform_2(%arg0: i32, %arg1: i32) -> (i32, i32) {
    %c0_i32 = arith.constant 0 : i32
    %c0_i32_0 = arith.constant 0 : i32
    %c0_i32_1 = arith.constant 0 : i32
    return %c0_i32, %c0_i32_0 : i32, i32
  }
  func.func @transform_3(%arg0: i32, %arg1: i32) -> (i32, i32) {
    %c0_i32 = arith.constant 0 : i32
    %c0_i32_0 = arith.constant 0 : i32
    %c0_i32_1 = arith.constant 0 : i32
    return %c0_i32, %c0_i32_0 : i32, i32
  }
  func.func @transform_4(%arg0: i32, %arg1: i32) -> (i32, i32) {
    %c0_i32 = arith.constant 0 : i32
    %c0_i32_0 = arith.constant 0 : i32
    %c0_i32_1 = arith.constant 0 : i32
    return %c0_i32, %c0_i32_0 : i32, i32
  }
  func.func @transform_5(%arg0: i32, %arg1: i32) -> (i32, i32) {
    %c0_i32 = arith.constant 0 : i32
    %c0_i32_0 = arith.constant 0 : i32
    %c0_i32_1 = arith.constant 0 : i32
    return %c0_i32, %c0_i32_0 : i32, i32
  }
  func.func @transform_6(%arg0: i32, %arg1: i32) -> (i32, i32) {
    %c0_i32 = arith.constant 0 : i32
    %c0_i32_0 = arith.constant 0 : i32
    %c0_i32_1 = arith.constant 0 : i32
    return %c0_i32, %c0_i32_0 : i32, i32
  }
  func.func @transform_7(%arg0: i32, %arg1: i32) -> (i32, i32, i32) {
    %c0_i32 = arith.constant 0 : i32
    %c0_i32_0 = arith.constant 0 : i32
    %c0_i32_1 = arith.constant 0 : i32
    return %arg0, %c0_i32, %c0_i32_0 : i32, i32, i32
  }
}

</mosaic_0001>

<bundles_post_ra>
// kernel: net_one_image_forward.2
= control target key start
LH: loop header
LB: loop body
LE: loop exit
PB: predicated region body
PF: predicated region fallthrough
CT: control target
= control target key end

     0   :  { %vm524_vm4 = vcmask 523264   ;;  %s872_s1 = inlined_call_operand.vmem [shape: bf16[512,128], index: 1, kind: input, shape index: {}]   ;;  %s873_s0 = inlined_call_operand.vmem [shape: bf16[40,512], index: 0, kind: input, shape index: {}]   ;;  %s874_s2 = inlined_call_operand.vmem [shape: f32[40,64], index: 2, kind: output, shape index: {}]  }
   0x1   :  { %v647_v0 = vld [vmem:[%s872_s1 + $0x40] sm:$0xff]   ;;  %v651_v4 = vld [vmem:[%s872_s1 + $0x48] sm:$0xff]   ;;  %v655_v8 = vld [vmem:[%s872_s1 + $0x50] sm:$0xff]  }
   0x2   :  { %v648_v1 = vld [vmem:[%s872_s1 + $0xc0] sm:$0xff]   ;;  %578 = vmatprep.subr.bf16.mxu0 %v647_v0  ;;  %v652_v5 = vld [vmem:[%s872_s1 + $0xc8] sm:$0xff]   ;;  %v656_v9 = vld [vmem:[%s872_s1 + $0xd0] sm:$0xff]  }
   0x3   :  { %v649_v2 = vld [vmem:[%s872_s1] sm:$0xff]   ;;  %612 = vmatprep.subr.bf16.mxu1 %v648_v1  ;;  %v653_v6 = vld [vmem:[%s872_s1 + $0x8] sm:$0xff]   ;;  %v657_v10 = vld [vmem:[%s872_s1 + $0x10] sm:$0xff]  }
   0x4   :  { %v650_v3 = vld [vmem:[%s872_s1 + $0x80] sm:$0xff]   ;;  %579 = vmatpush3.bf16.msra.mxu0 %v649_v2  ;;  %v654_v7 = vld [vmem:[%s872_s1 + $0x88] sm:$0xff]   ;;  %v658_v11 = vld [vmem:[%s872_s1 + $0x90] sm:$0xff]  }
   0x5   :  { %613 = vmatpush3.bf16.msra.mxu1 %v650_v3  ;;  %580 = vmatprep.subr.bf16.mxu0 %v651_v4  ;;  %v659_v12 = vld [vmem:[%s872_s1 + $0x58] sm:$0xff]   ;;  %v663_v16 = vld [vmem:[%s872_s1 + $0x60] sm:$0xff]   ;;  %v667_v20 = vld [vmem:[%s872_s1 + $0x68] sm:$0xff]  }
   0x6   :  { %614 = vmatprep.subr.bf16.mxu1 %v652_v5  ;;  %v660_v13 = vld [vmem:[%s872_s1 + $0xd8] sm:$0xff]   ;;  %v664_v17 = vld [vmem:[%s872_s1 + $0xe0] sm:$0xff]   ;;  %v668_v21 = vld [vmem:[%s872_s1 + $0xe8] sm:$0xff]  }
   0x7   :  { %v661_v14 = vld [vmem:[%s872_s1 + $0x18] sm:$0xff]   ;;  %v665_v18 = vld [vmem:[%s872_s1 + $0x20] sm:$0xff]   ;;  %v669_v22 = vld [vmem:[%s872_s1 + $0x28] sm:$0xff]  }
   0x8   :  { %581 = vmatpush3.bf16.msra.mxu0 %v653_v6  ;;  %v662_v15 = vld [vmem:[%s872_s1 + $0x98] sm:$0xff]   ;;  %v666_v19 = vld [vmem:[%s872_s1 + $0xa0] sm:$0xff]   ;;  %v670_v23 = vld [vmem:[%s872_s1 + $0xa8] sm:$0xff]  }
   0x9   :  { %615 = vmatpush3.bf16.msra.mxu1 %v654_v7  ;;  %582 = vmatprep.subr.bf16.mxu0 %v655_v8  ;;  %v671_v24 = vld [vmem:[%s872_s1 + $0x70] sm:$0xff]   ;;  %v675_v28 = vld [vmem:[%s872_s1 + $0x78] sm:$0xff]   ;;  %v20_v38 = vld [vmem:[%s873_s0 + $0x40] sm:$0xff] }
   0xa   :  { %616 = vmatprep.subr.bf16.mxu1 %v656_v9  ;;  %v672_v25 = vld [vmem:[%s872_s1 + $0xf0] sm:$0xff]   ;;  %v676_v29 = vld [vmem:[%s872_s1 + $0xf8] sm:$0xff]   ;;  %v21_v39 = vld [vmem:[%s873_s0 + $0x48] sm:$0xff]  ;;  %v543_v42 = vcombine.high %v20_v38, %v20_v38  ;;  %v542_v44 = vcombine.low %v20_v38, %v20_v38 }
   0xb   :  { %v673_v26 = vld [vmem:[%s872_s1 + $0x30] sm:$0xff]   ;;  %v677_v30 = vld [vmem:[%s872_s1 + $0x38] sm:$0xff]   ;;  %v545_v43 = vcombine.high %v21_v39, %v21_v39  ;;  %v544_v45 = vcombine.low %v21_v39, %v21_v39 }
   0xc   :  { %583 = vmatpush3.bf16.msra.mxu0 %v657_v10  ;;  %v674_v27 = vld [vmem:[%s872_s1 + $0xb0] sm:$0xff]   ;;  %v678_v31 = vld [vmem:[%s872_s1 + $0xb8] sm:$0xff]  }
   0xd   :  { %617 = vmatpush3.bf16.msra.mxu1 %v658_v11  ;;  %584 = vmatprep.subr.bf16.mxu0 %v659_v12  ;;  %v679_v32 = vld [vmem:[%s873_s0] ss:$16 sps:$4 sm:$0xff]   ;;  %v681_v33 = vld [vmem:[%s873_s0 + $0x4] ss:$16 sps:$4 sm:$0xff]   ;;  %v682_v34 = vld [vmem:[%s873_s0 + $0x8] ss:$16 sps:$4 sm:$0xff]  }
   0xe   :  { %618 = vmatprep.subr.bf16.mxu1 %v660_v13  ;;  %v684_v35 = vld [vmem:[%s873_s0 + $0xc] ss:$16 sps:$4 sm:$0xff]   ;;  %364 = vmatprep.mubr.bf16.mxu0 %v681_v33  ;;  %v685_v36 = vld [vmem:[%s873_s0 + $0x24] ss:$16 sps:$4 sm:$0xff]   ;;  %v689_v40 = vld [vmem:[%s873_s0 + $0x20] ss:$16 sps:$4 sm:$0xff]  }
   0xf   :  { %420 = vmatprep.mubr.bf16.mxu1 %v684_v35  ;;  %v687_v37 = vld [vmem:[%s873_s0 + $0x2c] ss:$16 sps:$4 sm:$0xff]   ;;  %v690_v41 = vld [vmem:[%s873_s0 + $0x28] ss:$16 sps:$4 sm:$0xff]   ;;  %s705_s0 = smov 64  }
  0x10   :  { %585 = vmatpush3.bf16.msra.mxu0 %v661_v14 }
  0x11   :  { %619 = vmatpush3.bf16.msra.mxu1 %v662_v15  ;;  %586 = vmatprep.subr.bf16.mxu0 %v663_v16 }
  0x12   :  { %620 = vmatprep.subr.bf16.mxu1 %v664_v17 }
  0x14   :  { %587 = vmatpush3.bf16.msra.mxu0 %v665_v18 }
  0x15   :  { %621 = vmatpush3.bf16.msra.mxu1 %v666_v19  ;;  %588 = vmatprep.subr.bf16.mxu0 %v667_v20 }
  0x16   :  { %622 = vmatprep.subr.bf16.mxu1 %v668_v21 }
  0x18   :  { %589 = vmatpush3.bf16.msra.mxu0 %v669_v22 }
  0x19   :  { %623 = vmatpush3.bf16.msra.mxu1 %v670_v23  ;;  %590 = vmatprep.subr.bf16.mxu0 %v671_v24 }
  0x1a   :  { %624 = vmatprep.subr.bf16.mxu1 %v672_v25 }
  0x1c   :  { %591 = vmatpush3.bf16.msra.mxu0 %v673_v26 }
  0x1d   :  { %625 = vmatpush3.bf16.msra.mxu1 %v674_v27  ;;  %592 = vmatprep.subr.bf16.mxu0 %v675_v28 }
  0x1e   :  { %626 = vmatprep.subr.bf16.mxu1 %v676_v29 }
  0x20   :  { %593 = vmatpush3.bf16.msra.mxu0 %v677_v30 }
  0x21   :  { %627 = vmatpush3.bf16.msra.mxu1 %v678_v31 }
  0x23   :  { %365 = vmatmul.mubr.bf16.vlgmr.msra.gmra.mrb[0].mxu0 %v679_v32 }
  0x24   :  { %421 = vmatmul.mubr.bf16.vlgmr.msra.gmra.mrb[0].mxu1 %v682_v34  ;;  %372 = vmatprep.mubr.bf16.mxu0 %v685_v36 }
  0x25   :  { %428 = vmatprep.mubr.bf16.mxu1 %v687_v37 }
  0x2b   :  { %373 = vmatmul.mubr.bf16.gmra.mrb[4].mxu0 %v689_v40 }
  0x2c   :  { %429 = vmatmul.mubr.bf16.gmra.mrb[4].mxu1 %v690_v41  ;;  %380 = vmatprep.mubr.bf16.mxu0 %v543_v42 }
  0x2d   :  { %436 = vmatprep.mubr.bf16.mxu1 %v545_v43 }
  0x33   :  { %381 = vmatmul.mubr.bf16.gmra.mrb[8].mxu0 %v542_v44 }
  0x34   :  { %437 = vmatmul.mubr.bf16.gmra.mrb[8].mxu1 %v544_v45 }
  0xf6   :  { %v594_v46 = vpop.f32.mrb[0].mxu0 }
  0xf7   :  { %v628_v47 = vpop.f32.mrb[0].mxu1  ;;  %v595_v48 = vpop.f32.mrb[1].mxu0 }
  0xf8   :  { %v596_v49 = vadd.f32 %v595_v48, %v594_v46  ;;  %v629_v50 = vpop.f32.mrb[1].mxu1  ;;  %v597_v51 = vpop.f32.mrb[2].mxu0 }
  0xf9   :  { %v630_v52 = vadd.f32 %v629_v50, %v628_v47  ;;  %v631_v53 = vpop.f32.mrb[2].mxu1  ;;  %v598_v54 = vpop.f32.mrb[3].mxu0 }
  0xfa   :  { %v599_v55 = vadd.f32 %v598_v54, %v597_v51  ;;  %v632_v56 = vpop.f32.mrb[3].mxu1 }
  0xfb   :  { %v633_v57 = vadd.f32 %v632_v56, %v631_v53  ;;  %v423_v58 = vadd.f32 %v630_v52, %v596_v49 }
  0xfd   :  { %v426_v59 = vadd.f32 %v633_v57, %v599_v55  ;;  %v444_v60 = vmul.f32 %v423_v58, %v423_v58 }
  0xfe   :  { %v600_v61 = vpop.f32.mrb[4].mxu0 }
  0xff   :  { %v634_v62 = vpop.f32.mrb[4].mxu1  ;;  %454 = vrot.lane.b32.xlu0 %v444_v60, %s705_s0  ;;  %v601_v63 = vpop.f32.mrb[5].mxu0  ;;  %v445_v3 = vmul.f32 %v426_v59, %v426_v59 }
 0x100   :  { %v602_v0 = vadd.f32 %v601_v63, %v600_v61  ;;  %v635_v1 = vpop.f32.mrb[5].mxu1  ;;  %v603_v2 = vpop.f32.mrb[6].mxu0 }
 0x101   :  { %v636_v4 = vadd.f32 %v635_v1, %v634_v62  ;;  %v637_v5 = vpop.f32.mrb[6].mxu1  ;;  %v604_v6 = vpop.f32.mrb[7].mxu0 }
 0x102   :  { %v605_v7 = vadd.f32 %v604_v6, %v603_v2  ;;  %v638_v8 = vpop.f32.mrb[7].mxu1 }
 0x103   :  { %v639_v9 = vadd.f32 %v638_v8, %v637_v5  ;;  %456 = vrot.lane.b32.xlu0 %v445_v3, %s705_s0  ;;  %v431_v10 = vadd.f32 %v636_v4, %v602_v0 }
 0x105   :  { %v434_v11 = vadd.f32 %v639_v9, %v605_v7  ;;  %v446_v12 = vmul.f32 %v431_v10, %v431_v10 }
 0x106   :  { %v606_v13 = vpop.f32.mrb[8].mxu0 }
 0x107   :  { %v640_v14 = vpop.f32.mrb[8].mxu1  ;;  %458 = vrot.lane.b32.xlu1 %v446_v12, %s705_s0  ;;  %v607_v15 = vpop.f32.mrb[9].mxu0  ;;  %v447_v19 = vmul.f32 %v434_v11, %v434_v11 }
 0x108   :  { %v608_v16 = vadd.f32 %v607_v15, %v606_v13  ;;  %v641_v17 = vpop.f32.mrb[9].mxu1  ;;  %v609_v18 = vpop.f32.mrb[10].mxu0 }
 0x109   :  { %v642_v20 = vadd.f32 %v641_v17, %v640_v14  ;;  %v643_v21 = vpop.f32.mrb[10].mxu1  ;;  %v610_v22 = vpop.f32.mrb[11].mxu0 }
 0x10a   :  { %v644_v23 = vpop.f32.mrb[11].mxu1 }
 0x10b   :  { %v439_v24 = vadd.f32 %v642_v20, %v608_v16  ;;  %460 = vrot.lane.b32.xlu1 %v447_v19, %s705_s0 }
 0x10d   :  { %v448_v25 = vmul.f32 %v439_v24, %v439_v24 }
 0x10f   :  { %462 = vrot.lane.b32.xlu0 %v448_v25, %s705_s0 }
 0x171   :  { %v455_v26 = vpop.permute.xlu0 %454 }
 0x172   :  { %v469_v27 = vadd.f32 %v455_v26, %v444_v60 }
 0x174   :  { %695 = vrsqrt.f32 %v469_v27  ;;  %vm476_vm0 = vcmp.eq.f32.partialorder %v469_v27, inf  ;;  %v479_v36 = vand.u32 2147483648, %v469_v27  ;;  %vm478_vm1 = vcmp.eq.f32.partialorder %v469_v27, 0.0 }
 0x175   :  { %v457_v28 = vpop.permute.xlu0 %456 }
 0x176   :  { %v470_v29 = vadd.f32 %v457_v28, %v445_v3 }
 0x178   :  { %697 = vrsqrt.f32 %v470_v29  ;;  %vm483_vm2 = vcmp.eq.f32.partialorder %v470_v29, inf  ;;  %v486_v44 = vand.u32 2147483648, %v470_v29  ;;  %vm485_vm3 = vcmp.eq.f32.partialorder %v470_v29, 0.0 }
 0x179   :  { %v459_v30 = vpop.permute.xlu1 %458 }
 0x17a   :  { %v471_v31 = vadd.f32 %v459_v30, %v446_v12 }
 0x17c   :  { %699 = vrsqrt.f32 %v471_v31  ;;  %vm490_vm5 = vcmp.eq.f32.partialorder %v471_v31, inf  ;;  %v493_v52 = vand.u32 2147483648, %v471_v31  ;;  %vm492_vm6 = vcmp.eq.f32.partialorder %v471_v31, 0.0 }
 0x17d   :  { %v461_v32 = vpop.permute.xlu1 %460 }
 0x17e   :  { %v696_v33 = vpop.eup %695  ;;  %v472_v34 = vadd.f32 %v461_v32, %v447_v19 }
 0x17f   :  { %v475_v35 = vmul.f32 %v696_v33, %v469_v27 }
 0x180   :  { %701 = vrsqrt.f32 %v472_v34  ;;  %vm497_vm7 = vcmp.eq.f32.partialorder %v472_v34, inf  ;;  %v500_v60 = vand.u32 2147483648, %v472_v34  ;;  %vm499_vm8 = vcmp.eq.f32.partialorder %v472_v34, 0.0 }
 0x181   :  { %v477_v37 = vsel %vm476_vm0, %v469_v27, %v475_v35  ;;  %v463_v38 = vpop.permute.xlu0 %462 }
 0x182   :  { %v698_v39 = vpop.eup %697  ;;  %v480_v40 = vsel %vm478_vm1, %v479_v36, %v477_v37  ;;  %v473_v41 = vadd.f32 %v463_v38, %v448_v25 }
 0x183   :  { %v509_v42 = vmax.f32 %v480_v40, 0.0  ;;  %v482_v43 = vmul.f32 %v698_v39, %v470_v29 }
 0x184   :  { %703 = vrsqrt.f32 %v473_v41  ;;  %vm504_vm9 = vcmp.eq.f32.partialorder %v473_v41, inf  ;;  %v507_v4 = vand.u32 2147483648, %v473_v41  ;;  %vm506_vm10 = vcmp.eq.f32.partialorder %v473_v41, 0.0 }
 0x185   :  { %v514_v45 = vmin.f32 %v509_v42, 10000.0  ;;  %v484_v46 = vsel %vm483_vm2, %v470_v29, %v482_v43 }
 0x186   :  { %v700_v47 = vpop.eup %699  ;;  %v487_v48 = vsel %vm485_vm3, %v486_v44, %v484_v46 }
 0x187   :  { %v519_v49 = vmul.f32 0.001, %v514_v45  ;;  %v510_v50 = vmax.f32 %v487_v48, 0.0  ;;  %v489_v51 = vmul.f32 %v700_v47, %v471_v31 }
 0x189   :  { %525 = vst.msk [vmem:[%s874_s2] sm:$0xff] %vm524_vm4, %v519_v49  ;;  %v515_v53 = vmin.f32 %v510_v50, 10000.0  ;;  %v491_v54 = vsel %vm490_vm5, %v471_v31, %v489_v51 }
 0x18a   :  { %v702_v55 = vpop.eup %701  ;;  %v494_v56 = vsel %vm492_vm6, %v493_v52, %v491_v54 }
 0x18b   :  { %v520_v57 = vmul.f32 0.001, %v515_v53  ;;  %v511_v58 = vmax.f32 %v494_v56, 0.0  ;;  %v496_v59 = vmul.f32 %v702_v55, %v472_v34 }
 0x18d   :  { %526 = vst.msk [vmem:[%s874_s2 + $0x8] sm:$0xff] %vm524_vm4, %v520_v57  ;;  %v516_v61 = vmin.f32 %v511_v58, 10000.0  ;;  %v498_v62 = vsel %vm497_vm7, %v472_v34, %v496_v59 }
 0x18e   :  { %v704_v63 = vpop.eup %703  ;;  %v501_v0 = vsel %vm499_vm8, %v500_v60, %v498_v62 }
 0x18f   :  { %v521_v1 = vmul.f32 0.001, %v516_v61  ;;  %v512_v2 = vmax.f32 %v501_v0, 0.0  ;;  %v503_v3 = vmul.f32 %v704_v63, %v473_v41 }
 0x191   :  { %527 = vst.msk [vmem:[%s874_s2 + $0x10] sm:$0xff] %vm524_vm4, %v521_v1  ;;  %v517_v5 = vmin.f32 %v512_v2, 10000.0  ;;  %v505_v6 = vsel %vm504_vm9, %v473_v41, %v503_v3 }
 0x192   :  { %v508_v7 = vsel %vm506_vm10, %v507_v4, %v505_v6 }
 0x193   :  { %v522_v8 = vmul.f32 0.001, %v517_v5  ;;  %v513_v9 = vmax.f32 %v508_v7, 0.0 }
 0x195   :  { %528 = vst.msk [vmem:[%s874_s2 + $0x18] sm:$0xff] %vm524_vm4, %v522_v8  ;;  %v518_v10 = vmin.f32 %v513_v9, 10000.0 }
 0x197   :  { %v523_v11 = vmul.f32 0.001, %v518_v10 }
 0x199   :  { %529 = vst.msk [vmem:[%s874_s2 + $0x20] sm:$0xff] %vm524_vm4, %v523_v11 }

// kernel: net_one_image_forward.3
= control target key start
LH: loop header
LB: loop body
LE: loop exit
PB: predicated region body
PF: predicated region fallthrough
CT: control target
= control target key end

     0   :  { %s12327_s24 = smov 0   ;;  %s12329_s25 = smov 0   ;;  %s18831_s0 = inlined_call_operand.vmem [shape: bf16[2,248,32], index: 0, kind: input, shape index: {}]   ;;  %s18832_s1 = inlined_call_operand.vmem [shape: bf16[32,64], index: 1, kind: input, shape index: {}]   ;;  %s18833_s2 = inlined_call_operand.vmem [shape: f32[1,64], index: 2, kind: input, shape index: {}]   ;;  %s18834_s3 = inlined_call_operand.vmem [shape: bf16[64,2048], index: 3, kind: input, shape index: {}]   ;;  %s18835_s4 = inlined_call_operand.vmem [shape: f32[1,2048], index: 4, kind: input, shape index: {}]   ;;  %s18836_s5 = inlined_call_operand.vmem [shape: f32[2048,128], index: 5, kind: input, shape index: {}]   ;;  %s18837_s6 = inlined_call_operand.vmem [shape: f32[1,128], index: 6, kind: input, shape index: {}]   ;;  %s18838_s7 = inlined_call_operand.vmem [shape: f32[2,8,128], index: 7, kind: output, shape index: {}]  }
   0x1   :  { %s12331_s26 = smov 0  }
   0x2 LB: > { %s29_s27 = sadd.s32 1, %s12279_s25  ;;  %p8753_p0 = scmp.ge.s32.totalorder %s12283_s26, 1  ;;  %s12283_s26 = sphi %s12331_s26, %s17_s26   ;;  %s12279_s25 = sphi %s12329_s25, %s19808_s25   ;;  %s12275_s24 = sphi %s12327_s24, %s19807_s24  }
   0x3   : > { %p31_p1 = scmp.ge.s32.totalorder %s29_s27, 2  ;;  %p256_p2 = scmp.lt.s32.totalorder %s12283_s26, 3 }
   0x5   : > { %s19810_s27 = smov (%p31_p1, %s29_s27), 0  ;;  %p257_p3 = pnand %p8753_p0, %p256_p2 }
   0x7   : > { %260 = sbr.rel (%p257_p3) target bundleno = 2116 (0x844), region = 48 }
   0xe   : > { %v10129_v0 = vld [vmem:[%s18832_s1] sm:$0xff]   ;;  %p292_p4 = scmp.lt.s32.totalorder %s12275_s24, 1  ;;  %v10130_v1 = vld [vmem:[%s18832_s1 + $0x8] sm:$0xff]   ;;  %vm444_vm0 = vcmask 261120   ;;  %v18840_v50 = vmov 0   ;;  %v12444_v51 = vld [vmem:[%s18834_s3 + $0x10] sm:$0xff] }
   0xf   : > { %9810 = vmatprep.subr.bf16.mxu0 %v10129_v0  ;;  %v887_v2 = vld [vmem:[%s18834_s3 + $0x8] sm:$0xff]  ;;  %v886_v26 = vld [vmem:[%s18834_s3] sm:$0xff]  ;;  %1435 = vmatprep.mubr.bf16.mxu1 %v18840_v50  ;;  %v12449_v52 = vld [vmem:[%s18834_s3 + $0x50] sm:$0xff]  ;;  %vm1354_vm1 = vcmask 523264   ;;  %vm8665_vm4 = vcmask 1040384  }
  0x10   : > { %s19812_s24 = smov (!%p292_p4, %s12275_s24), 1  ;;  %v895_v3 = vld [vmem:[%s18834_s3 + $0x48] sm:$0xff]  ;;  %9811 = vmatpush3.bf16.msra.mxu0 %v10129_v0  ;;  %v894_v27 = vld [vmem:[%s18834_s3 + $0x40] sm:$0xff]  ;;  %v12454_v53 = vld [vmem:[%s18834_s3 + $0x18] sm:$0xff]  ;;  %v8826_v54 = vcombine.low %v12444_v51, %v12449_v52  ;;  %v8827_v55 = vcombine.high %v12444_v51, %v12449_v52 }
  0x11   : > { %9812 = vmatprep.subr.bf16.mxu0 %v10130_v1  ;;  %s10102_s13 = smul.u32 124, %s19812_s24  ;;  %v8825_v4 = vcombine.high %v887_v2, %v895_v3  ;;  %v903_v5 = vld [vmem:[%s18834_s3 + $0x88] sm:$0xff]  ;;  %v8824_v8 = vcombine.low %v887_v2, %v895_v3  ;;  %v8823_v28 = vcombine.high %v886_v26, %v894_v27  ;;  %v8822_v29 = vcombine.low %v886_v26, %v894_v27  ;;  %v902_v30 = vld [vmem:[%s18834_s3 + $0x80] sm:$0xff]  ;;  %v12463_v56 = vld [vmem:[%s18834_s3 + $0x58] sm:$0xff]  ;;  %s8755_s19 = sshll.u32 %s19812_s24, 3 }
  0x12   : > { %v911_v6 = vld [vmem:[%s18834_s3 + $0xc8] sm:$0xff]  ;;  %v910_v31 = vld [vmem:[%s18834_s3 + $0xc0] sm:$0xff]  ;;  %v8828_v57 = vcombine.low %v12454_v53, %v12463_v56  ;;  %v8829_v58 = vcombine.high %v12454_v53, %v12463_v56  ;;  %v12665_v51 = vld [vmem:[%s18834_s3 + $0x1d8] sm:$0xff]  ;;  %s304_s22 = scalar_lea.vmem %s18838_s7, %s8755_s19 }
  0x13   : > { %s12369_s20 = scalar_lea.vmem %s18831_s0, %s10102_s13  ;;  %v8841_v10 = vcombine.high %v903_v5, %v911_v6  ;;  %v8840_v12 = vcombine.low %v903_v5, %v911_v6  ;;  %1403 = vmatprep.subr.bf16.mxu1 %v8823_v28  ;;  %v8839_v32 = vcombine.high %v902_v30, %v910_v31  ;;  %v8838_v33 = vcombine.low %v902_v30, %v910_v31  ;;  %v919_v34 = vld [vmem:[%s18834_s3 + $0x108] sm:$0xff]  ;;  %v918_v37 = vld [vmem:[%s18834_s3 + $0x100] sm:$0xff] }
  0x14   : > { %9813 = vmatpush3.bf16.msra.mxu0 %v10130_v1  ;;  %v10131_v7 = vld [vmem:[%s12369_s20] sm:$0xff]   ;;  %v10132_v9 = vld [vmem:[%s12369_s20 + $0x8] sm:$0xff]   ;;  %v10133_v11 = vld [vmem:[%s12369_s20 + $0x10] sm:$0xff]   ;;  %1404 = vmatpush1.bf16.msra.mxu1 %v8822_v29 }
  0x15   : > { %1594 = vmatprep.subr.bf16.mxu0 %v8825_v4  ;;  %9814 = vmatprep.mubr.msk.bf16.mxu0 %vm444_vm0, %v10131_v7  ;;  %v10134_v13 = vld [vmem:[%s12369_s20 + $0x18] sm:$0xff]   ;;  %v10135_v14 = vld [vmem:[%s12369_s20 + $0x20] sm:$0xff]   ;;  %v10136_v15 = vld [vmem:[%s12369_s20 + $0x28] sm:$0xff]  }
  0x16   : > { %v10137_v16 = vld [vmem:[%s12369_s20 + $0x30] sm:$0xff]   ;;  %v10138_v17 = vld [vmem:[%s12369_s20 + $0x38] sm:$0xff]   ;;  %v10139_v18 = vld [vmem:[%s12369_s20 + $0x40] sm:$0xff]   ;;  %1405 = vmatprep.subr.bf16.mxu1 %v8839_v32 }
  0x17   : > { %9815 = vmatmul.mubr.msk.bf16.vlgmr.msra.gmra.mrb[0].mxu0 %vm444_vm0, %v10132_v9  ;;  %v10140_v19 = vld [vmem:[%s12369_s20 + $0x48] sm:$0xff]   ;;  %v10141_v20 = vld [vmem:[%s12369_s20 + $0x50] sm:$0xff]   ;;  %v10142_v21 = vld [vmem:[%s12369_s20 + $0x58] sm:$0xff]  }
  0x18   : > { %9818 = vmatprep.mubr.msk.bf16.mxu0 %vm444_vm0, %v10133_v11  ;;  %1595 = vmatpush1.bf16.msra.mxu0 %v8824_v8  ;;  %v10143_v22 = vld [vmem:[%s12369_s20 + $0x60] sm:$0xff]   ;;  %v10144_v23 = vld [vmem:[%s12369_s20 + $0x68] sm:$0xff]   ;;  %v10145_v24 = vld [vmem:[%s12369_s20 + $0x70] sm:$0xff]  }
  0x19   : > { %1596 = vmatprep.subr.bf16.mxu0 %v8841_v10  ;;  %v10146_v25 = vld [vmem:[%s12369_s20 + $0x78] ss:$0 sps:$4 sm:$0xff]   ;;  %v927_v35 = vld [vmem:[%s18834_s3 + $0x148] sm:$0xff]  ;;  %1406 = vmatpush1.bf16.msra.mxu1 %v8838_v33  ;;  %v926_v38 = vld [vmem:[%s18834_s3 + $0x140] sm:$0xff] }
  0x1a   : > { %v8857_v36 = vcombine.high %v919_v34, %v927_v35  ;;  %v8856_v39 = vcombine.low %v919_v34, %v927_v35  ;;  %v8855_v40 = vcombine.high %v918_v37, %v926_v38  ;;  %v8854_v41 = vcombine.low %v918_v37, %v926_v38  ;;  %v935_v42 = vld [vmem:[%s18834_s3 + $0x188] sm:$0xff]  ;;  %v934_v44 = vld [vmem:[%s18834_s3 + $0x180] sm:$0xff] }
  0x1b   : > { %v943_v43 = vld [vmem:[%s18834_s3 + $0x1c8] sm:$0xff]  ;;  %v942_v46 = vld [vmem:[%s18834_s3 + $0x1c0] sm:$0xff] }
  0x1c   : > { %1597 = vmatpush1.bf16.msra.mxu0 %v8840_v12  ;;  %1407 = vmatprep.subr.bf16.mxu1 %v8855_v40  ;;  %v8873_v45 = vcombine.high %v935_v42, %v943_v43  ;;  %v8872_v47 = vcombine.low %v935_v42, %v943_v43  ;;  %v8871_v48 = vcombine.high %v934_v44, %v942_v46  ;;  %v12472_v59 = vld [vmem:[%s18833_s2] ss:$0 sm:$0xff] }
  0x1d   : > { %1598 = vmatprep.subr.bf16.mxu0 %v8857_v36  ;;  %1408 = vmatpush1.bf16.msra.mxu1 %v8854_v41  ;;  %v8870_v49 = vcombine.low %v934_v44, %v942_v46 }
  0x1e   : > { %1409 = vmatprep.subr.bf16.mxu1 %v8871_v48 }
  0x1f   : > { %9819 = vmatmul.mubr.msk.bf16.gmra.mrb[4].mxu0 %vm444_vm0, %v10134_v13 }
  0x20   : > { %9822 = vmatprep.mubr.msk.bf16.mxu0 %vm444_vm0, %v10135_v14  ;;  %1599 = vmatpush1.bf16.msra.mxu0 %v8856_v39 }
  0x21   : > { %1600 = vmatprep.subr.bf16.mxu0 %v8873_v45  ;;  %1410 = vmatpush1.bf16.msra.mxu1 %v8870_v49 }
  0x22   : > { %1785 = vmatprep.subr.bf16.mxu1 %v8827_v55 }
  0x24   : > { %1601 = vmatpush1.bf16.msra.mxu0 %v8872_v47 }
  0x25   : > { %1976 = vmatprep.subr.bf16.mxu0 %v8829_v58 }
  0x27   : > { %9823 = vmatmul.mubr.msk.bf16.gmra.mrb[8].mxu0 %vm444_vm0, %v10136_v15 }
  0x28   : > { %9826 = vmatprep.mubr.msk.bf16.mxu0 %vm444_vm0, %v10137_v16 }
  0x2f   : > { %9827 = vmatmul.mubr.msk.bf16.gmra.mrb[12].mxu0 %vm444_vm0, %v10138_v17 }
  0x30   : > { %9830 = vmatprep.mubr.msk.bf16.mxu0 %vm444_vm0, %v10139_v18 }
  0x37   : > { %9831 = vmatmul.mubr.msk.bf16.gmra.mrb[16].mxu0 %vm444_vm0, %v10140_v19 }
  0x38   : > { %9834 = vmatprep.mubr.msk.bf16.mxu0 %vm444_vm0, %v10141_v20 }
  0x3f   : > { %9835 = vmatmul.mubr.msk.bf16.gmra.mrb[20].mxu0 %vm444_vm0, %v10142_v21 }
  0x40   : > { %9838 = vmatprep.mubr.msk.bf16.mxu0 %vm444_vm0, %v10143_v22 }
  0x47   : > { %9839 = vmatmul.mubr.msk.bf16.gmra.mrb[24].mxu0 %vm444_vm0, %v10144_v23 }
  0x48   : > { %9842 = vmatprep.mubr.msk.bf16.mxu0 %vm444_vm0, %v10145_v24 }
  0x4f   : > { %9843 = vmatmul.mubr.msk.bf16.gmra.mrb[28].mxu0 %vm444_vm0, %v10146_v25 }
  0x50   : > { %1626 = vmatprep.mubr.bf16.mxu0 %v18840_v50 }
  0xea   : > { %v9816_v60 = vpop.f32.mrb[0].mxu0 }
  0xeb   : > { %v12475_v61 = vadd.f32 %v9816_v60, %v12472_v59  ;;  %v527_v62 = vpop.f32.mrb[1].mxu0  ;;  %v12531_v60 = vld [vmem:[%s18834_s3 + $0x90] sm:$0xff] }
  0xec   : > { %v12478_v63 = vadd.f32 %v12472_v59, %v527_v62  ;;  %v9817_v0 = vpop.f32.mrb[2].mxu0  ;;  %v12536_v62 = vld [vmem:[%s18834_s3 + $0xd0] sm:$0xff] }
  0xed   : > { %v8793_v1 = vmul.f32 -1.442695, %v12475_v61  ;;  %v12482_v2 = vadd.f32 %v9817_v0, %v12472_v59  ;;  %v530_v3 = vpop.f32.mrb[3].mxu0 }
  0xee   : > { %v8791_v4 = vmul.f32 -1.442695, %v12478_v63  ;;  %v12486_v5 = vadd.f32 %v12472_v59, %v530_v3 }
  0xef   : > { %10147 = vpow2.f32 %v8793_v1  ;;  %v8794_v6 = vmul.f32 -1.442695, %v12482_v2 }
  0xf0   : > { %10149 = vpow2.f32 %v8791_v4  ;;  %v8792_v7 = vmul.f32 -1.442695, %v12486_v5 }
  0xf1   : > { %10151 = vpow2.f32 %v8794_v6 }
  0xf2   : > { %10153 = vpow2.f32 %v8792_v7  ;;  %v9820_v8 = vpop.f32.mrb[4].mxu0 }
  0xf3   : > { %v12491_v9 = vadd.f32 %v9820_v8, %v12472_v59  ;;  %v543_v10 = vpop.f32.mrb[5].mxu0 }
  0xf4   : > { %v12494_v11 = vadd.f32 %v12472_v59, %v543_v10  ;;  %v9821_v12 = vpop.f32.mrb[6].mxu0  ;;  %v12549_v10 = vld [vmem:[%s18834_s3 + $0x98] sm:$0xff] }
  0xf5   : > { %v8797_v13 = vmul.f32 -1.442695, %v12491_v9  ;;  %v12498_v14 = vadd.f32 %v9821_v12, %v12472_v59  ;;  %v546_v15 = vpop.f32.mrb[7].mxu0  ;;  %v12554_v12 = vld [vmem:[%s18834_s3 + $0xd8] sm:$0xff] }
  0xf6   : > { %v8795_v16 = vmul.f32 -1.442695, %v12494_v11  ;;  %v12502_v17 = vadd.f32 %v12472_v59, %v546_v15 }
  0xf7   : > { %10155 = vpow2.f32 %v8797_v13  ;;  %v8798_v18 = vmul.f32 -1.442695, %v12498_v14 }
  0xf8   : > { %10157 = vpow2.f32 %v8795_v16  ;;  %v8796_v19 = vmul.f32 -1.442695, %v12502_v17  ;;  %v8842_v16 = vcombine.low %v12531_v60, %v12536_v62 }
  0xf9   : > { %v10148_v20 = vpop.eup %10147  ;;  %10159 = vpow2.f32 %v8798_v18  ;;  %v12562_v18 = vld [vmem:[%s18834_s3 + $0x20] sm:$0xff] }
  0xfa   : > { %v10150_v21 = vpop.eup %10149  ;;  %v748_v22 = vadd.f32 1.0, %v10148_v20  ;;  %10161 = vpow2.f32 %v8796_v19  ;;  %v9824_v23 = vpop.f32.mrb[8].mxu0  ;;  %v12567_v19 = vld [vmem:[%s18834_s3 + $0x60] sm:$0xff]  ;;  %v12572_v20 = vld [vmem:[%s18834_s3 + $0x28] sm:$0xff] }
  0xfb   : > { %v10152_v24 = vpop.eup %10151  ;;  %v746_v25 = vadd.f32 1.0, %v10150_v21  ;;  %v12507_v26 = vadd.f32 %v9824_v23, %v12472_v59  ;;  %v559_v27 = vpop.f32.mrb[9].mxu0  ;;  %v8843_v23 = vcombine.high %v12531_v60, %v12536_v62 }
  0xfc   : > { %v10154_v28 = vpop.eup %10153  ;;  %10163 = vrcp.f32 %v748_v22  ;;  %v749_v29 = vadd.f32 1.0, %v10152_v24  ;;  %v12510_v30 = vadd.f32 %v12472_v59, %v559_v27  ;;  %v9825_v31 = vpop.f32.mrb[10].mxu0  ;;  %v8830_v24 = vcombine.low %v12562_v18, %v12567_v19 }
  0xfd   : > { %10165 = vrcp.f32 %v746_v25  ;;  %v747_v32 = vadd.f32 1.0, %v10154_v28  ;;  %v8801_v33 = vmul.f32 -1.442695, %v12507_v26  ;;  %v12514_v34 = vadd.f32 %v9825_v31, %v12472_v59  ;;  %v562_v35 = vpop.f32.mrb[11].mxu0  ;;  %v12582_v25 = vld [vmem:[%s18834_s3 + $0x68] sm:$0xff] }
  0xfe   : > { %10167 = vrcp.f32 %v749_v29  ;;  %v8799_v36 = vmul.f32 -1.442695, %v12510_v30  ;;  %v12518_v37 = vadd.f32 %v12472_v59, %v562_v35  ;;  %v8832_v31 = vcombine.low %v12572_v20, %v12582_v25 }
  0xff   : > { %10169 = vrcp.f32 %v747_v32  ;;  %v8802_v38 = vmul.f32 -1.442695, %v12514_v34 }
 0x100   : > { %10171 = vpow2.f32 %v8801_v33  ;;  %v8800_v39 = vmul.f32 -1.442695, %v12518_v37 }
 0x101   : > { %v10156_v40 = vpop.eup %10155  ;;  %10173 = vpow2.f32 %v8799_v36 }
 0x102   : > { %v10158_v41 = vpop.eup %10157  ;;  %v752_v42 = vadd.f32 1.0, %v10156_v40  ;;  %10175 = vpow2.f32 %v8802_v38  ;;  %v9828_v43 = vpop.f32.mrb[12].mxu0  ;;  %v8844_v38 = vcombine.low %v12549_v10, %v12554_v12 }
 0x103   : > { %v10160_v44 = vpop.eup %10159  ;;  %v750_v45 = vadd.f32 1.0, %v10158_v41  ;;  %10177 = vpow2.f32 %v8800_v39  ;;  %v12523_v46 = vadd.f32 %v9828_v43, %v12472_v59  ;;  %v575_v47 = vpop.f32.mrb[13].mxu0 }
 0x104   : > { %v10162_v48 = vpop.eup %10161  ;;  %10179 = vrcp.f32 %v752_v42  ;;  %v753_v49 = vadd.f32 1.0, %v10160_v44  ;;  %v12526_v55 = vadd.f32 %v12472_v59, %v575_v47  ;;  %v9829_v58 = vpop.f32.mrb[14].mxu0  ;;  %v12607_v47 = vld [vmem:[%s18834_s3 + $0x110] sm:$0xff] }
 0x105   : > { %10181 = vrcp.f32 %v750_v45  ;;  %v751_v0 = vadd.f32 1.0, %v10162_v48  ;;  %v8805_v1 = vmul.f32 -1.442695, %v12523_v46  ;;  %v12540_v3 = vadd.f32 %v9829_v58, %v12472_v59  ;;  %v578_v4 = vpop.f32.mrb[15].mxu0  ;;  %v12612_v48 = vld [vmem:[%s18834_s3 + $0x150] sm:$0xff] }
 0x106   : > { %v10164_v6 = vpop.eup %10163  ;;  %10183 = vrcp.f32 %v753_v49  ;;  %v8803_v7 = vmul.f32 -1.442695, %v12526_v55  ;;  %v12544_v8 = vadd.f32 %v12472_v59, %v578_v4  ;;  %v8845_v45 = vcombine.high %v12549_v10, %v12554_v12 }
 0x107   : > { %v10166_v13 = vpop.eup %10165  ;;  %10185 = vrcp.f32 %v751_v0  ;;  %v8806_v15 = vmul.f32 -1.442695, %v12540_v3  ;;  %v841_v28 = vmul.f32 %v10164_v6, %v12475_v61  ;;  %v12621_v6 = vld [vmem:[%s18834_s3 + $0x118] sm:$0xff] }
 0x108   : > { %v10168_v21 = vpop.eup %10167  ;;  %10187 = vpow2.f32 %v8805_v1  ;;  %v8804_v22 = vmul.f32 -1.442695, %v12544_v8  ;;  %v839_v33 = vmul.f32 %v10166_v13, %v12478_v63 }
 0x109   : > { %v10170_v27 = vpop.eup %10169  ;;  %v842_v29 = vmul.f32 %v10168_v21, %v12482_v2  ;;  %10189 = vpow2.f32 %v8803_v7  ;;  %v12626_v7 = vld [vmem:[%s18834_s3 + $0x158] sm:$0xff] }
 0x10a   : > { %v10172_v32 = vpop.eup %10171  ;;  %v840_v35 = vmul.f32 %v10170_v27, %v12486_v5  ;;  %10191 = vpow2.f32 %v8806_v15  ;;  %v9832_v36 = vpop.f32.mrb[16].mxu0  ;;  %v12639_v27 = vld [vmem:[%s18834_s3 + $0x190] sm:$0xff]  ;;  %v8861_v56 = vcombine.high %v12621_v6, %v12626_v7 }
 0x10b   : > { %v10174_v39 = vpop.eup %10173  ;;  %v12592_v40 = vpack.c.bf16 %v842_v29, %v841_v28  ;;  %v756_v61 = vadd.f32 1.0, %v10172_v32  ;;  %10193 = vpow2.f32 %v8804_v22  ;;  %v12595_v2 = vadd.f32 %v9832_v36, %v12472_v59  ;;  %v591_v41 = vpop.f32.mrb[17].mxu0  ;;  %v12644_v28 = vld [vmem:[%s18834_s3 + $0x1d0] sm:$0xff]  ;;  %v12660_v36 = vld [vmem:[%s18834_s3 + $0x198] sm:$0xff] }
 0x10c   : > { %v10176_v42 = vpop.eup %10175  ;;  %v12597_v43 = vpack.c.bf16 %v840_v35, %v839_v33  ;;  %v754_v63 = vadd.f32 1.0, %v10174_v39  ;;  %v12600_v5 = vadd.f32 %v12472_v59, %v591_v41  ;;  %v9833_v44 = vpop.f32.mrb[18].mxu0  ;;  %v8858_v33 = vcombine.low %v12607_v47, %v12612_v48 }
 0x10d   : > { %18949 = vst [vmem:[#allocation3_spill] sm:$0xff] %v12592_v40  ;;  %v10178_v49 = vpop.eup %10177  ;;  %10195 = vrcp.f32 %v756_v61  ;;  %v757_v58 = vadd.f32 1.0, %v10176_v42  ;;  %v8809_v0 = vmul.f32 -1.442695, %v12595_v2  ;;  %v12616_v1 = vadd.f32 %v9833_v44, %v12472_v59  ;;  %v594_v4 = vpop.f32.mrb[19].mxu0 }
 0x10e   : > { %18950 = vst [vmem:[#allocation4_spill] sm:$0xff] %v12597_v43  ;;  %v10180_v13 = vpop.eup %10179  ;;  %10197 = vrcp.f32 %v754_v63  ;;  %v755_v15 = vadd.f32 1.0, %v10178_v49  ;;  %v8807_v21 = vmul.f32 -1.442695, %v12600_v5  ;;  %8886 = vmatmul.mubr.msk.bf16.vlgmr.msra.gmra.mrb[0].mxu1 %vm1354_vm1, %v12597_v43  ;;  %8902 = vmatmul.mubr.msk.bf16.vlgmr.msra.gmra.mrb[32].mxu0 %vm1354_vm1, %v12597_v43  ;;  %v12634_v22 = vadd.f32 %v12472_v59, %v594_v4 }
 0x10f   : > { %v10182_v29 = vpop.eup %10181  ;;  %10199 = vrcp.f32 %v757_v58  ;;  %1786 = vmatpush1.bf16.msra.mxu1 %v8826_v54  ;;  %1977 = vmatpush1.bf16.msra.mxu0 %v8828_v57  ;;  %v8810_v32 = vmul.f32 -1.442695, %v12616_v1  ;;  %v8859_v35 = vcombine.high %v12607_v47, %v12612_v48  ;;  %v8860_v54 = vcombine.low %v12621_v6, %v12626_v7 }
 0x110   : > { %v10184_v52 = vpop.eup %10183  ;;  %10201 = vrcp.f32 %v755_v15  ;;  %v8808_v53 = vmul.f32 -1.442695, %v12634_v22  ;;  %1445 = vmatprep.mubr.bf16.mxu1 %v18840_v50  ;;  %1636 = vmatprep.mubr.bf16.mxu0 %v18840_v50  ;;  %v845_v39 = vmul.f32 %v10180_v13, %v12491_v9  ;;  %v8875_v41 = vcombine.high %v12639_v27, %v12644_v28 }
 0x111   : > { %v10186_v57 = vpop.eup %10185  ;;  %v846_v61 = vmul.f32 %v10184_v52, %v12498_v14  ;;  %10203 = vpow2.f32 %v8809_v0  ;;  %1787 = vmatprep.subr.bf16.mxu1 %v8843_v23  ;;  %1978 = vmatprep.subr.bf16.mxu0 %v8845_v45  ;;  %v843_v63 = vmul.f32 %v10182_v29, %v12494_v11  ;;  %v8877_v9 = vcombine.high %v12660_v36, %v12665_v51 }
 0x112   : > { %v10188_v42 = vpop.eup %10187  ;;  %v844_v44 = vmul.f32 %v10186_v57, %v12502_v17  ;;  %10205 = vpow2.f32 %v8807_v21  ;;  %v9836_v47 = vpop.f32.mrb[20].mxu0 }
 0x113   : > { %v10190_v14 = vpop.eup %10189  ;;  %v12685_v48 = vpack.c.bf16 %v846_v61, %v845_v39  ;;  %v760_v49 = vadd.f32 1.0, %v10188_v42  ;;  %10207 = vpow2.f32 %v8810_v32  ;;  %v12688_v23 = vadd.f32 %v9836_v47, %v12472_v59  ;;  %v607_v45 = vpop.f32.mrb[21].mxu0  ;;  %1788 = vmatpush1.bf16.msra.mxu1 %v8842_v16  ;;  %1979 = vmatpush1.bf16.msra.mxu0 %v8844_v38 }
 0x114   : > { %v10192_v11 = vpop.eup %10191  ;;  %v12696_v17 = vpack.c.bf16 %v844_v44, %v843_v63  ;;  %v758_v58 = vadd.f32 1.0, %v10190_v14  ;;  %10209 = vpow2.f32 %v8808_v53  ;;  %v12699_v0 = vadd.f32 %v12472_v59, %v607_v45  ;;  %v9837_v4 = vpop.f32.mrb[22].mxu0  ;;  %1789 = vmatprep.subr.bf16.mxu1 %v8859_v35  ;;  %1980 = vmatprep.subr.bf16.mxu0 %v8861_v56 }
 0x115   : > { %18951 = vst [vmem:[#allocation5_spill] sm:$0xff] %v12685_v48  ;;  %v10194_v6 = vpop.eup %10193  ;;  %10211 = vrcp.f32 %v760_v49  ;;  %v761_v7 = vadd.f32 1.0, %v10192_v11  ;;  %v8813_v60 = vmul.f32 -1.442695, %v12688_v23  ;;  %v12703_v62 = vadd.f32 %v9837_v4, %v12472_v59  ;;  %v610_v10 = vpop.f32.mrb[23].mxu0 }
 0x116   : > { %18952 = vst [vmem:[#allocation6_spill] sm:$0xff] %v12696_v17  ;;  %10213 = vrcp.f32 %v758_v58  ;;  %v759_v12 = vadd.f32 1.0, %v10194_v6  ;;  %8887 = vmatmul.mubr.msk.bf16.gmra.mrb[4].mxu1 %vm1354_vm1, %v12592_v40  ;;  %8903 = vmatmul.mubr.msk.bf16.gmra.mrb[36].mxu0 %vm1354_vm1, %v12592_v40  ;;  %v8811_v16 = vmul.f32 -1.442695, %v12699_v0  ;;  %v12711_v38 = vadd.f32 %v12472_v59, %v610_v10 }
 0x117   : > { %v10196_v13 = vpop.eup %10195  ;;  %10215 = vrcp.f32 %v761_v7  ;;  %1455 = vmatprep.mubr.bf16.mxu1 %v18840_v50  ;;  %1646 = vmatprep.mubr.bf16.mxu0 %v18840_v50  ;;  %v8814_v15 = vmul.f32 -1.442695, %v12703_v62  ;;  %v8874_v32 = vcombine.low %v12639_v27, %v12644_v28  ;;  %v8876_v35 = vcombine.low %v12660_v36, %v12665_v51 }
 0x118   : > { %v10198_v21 = vpop.eup %10197  ;;  %10217 = vrcp.f32 %v759_v12  ;;  %v8812_v29 = vmul.f32 -1.442695, %v12711_v38  ;;  %1790 = vmatpush1.bf16.msra.mxu1 %v8858_v33  ;;  %1981 = vmatpush1.bf16.msra.mxu0 %v8860_v54  ;;  %v8831_v53 = vcombine.high %v12562_v18, %v12567_v19  ;;  %v8833_v56 = vcombine.high %v12572_v20, %v12582_v25  ;;  %v938_v19 = vld [vmem:[%s18834_s3 + $0x1a0] sm:$0xff] }
 0x119   : > { %v10200_v52 = vpop.eup %10199  ;;  %10219 = vpow2.f32 %v8813_v60  ;;  %1791 = vmatprep.subr.bf16.mxu1 %v8875_v41  ;;  %1982 = vmatprep.subr.bf16.mxu0 %v8877_v9  ;;  %v849_v33 = vmul.f32 %v10196_v13, %v12507_v26  ;;  %v847_v36 = vmul.f32 %v10198_v21, %v12510_v30  ;;  %v946_v20 = vld [vmem:[%s18834_s3 + $0x1e0] sm:$0xff] }
 0x11a   : > { %v10202_v57 = vpop.eup %10201  ;;  %v850_v54 = vmul.f32 %v10200_v52, %v12514_v34  ;;  %10221 = vpow2.f32 %v8811_v16  ;;  %v9840_v27 = vpop.f32.mrb[24].mxu0  ;;  %v8879_v25 = vcombine.high %v938_v19, %v946_v20 }
 0x11b   : > { %v10204_v28 = vpop.eup %10203  ;;  %v848_v51 = vmul.f32 %v10202_v57, %v12518_v37  ;;  %10223 = vpow2.f32 %v8814_v15  ;;  %v12730_v39 = vadd.f32 %v9840_v27, %v12472_v59  ;;  %v623_v61 = vpop.f32.mrb[25].mxu0 }
 0x11c   : > { %v10206_v41 = vpop.eup %10205  ;;  %v12732_v42 = vpack.c.bf16 %v850_v54, %v849_v33  ;;  %v764_v63 = vadd.f32 1.0, %v10204_v28  ;;  %10225 = vpow2.f32 %v8812_v29  ;;  %v12735_v26 = vadd.f32 %v12472_v59, %v623_v61  ;;  %v9841_v34 = vpop.f32.mrb[26].mxu0  ;;  %1792 = vmatpush1.bf16.msra.mxu1 %v8874_v32  ;;  %1983 = vmatpush1.bf16.msra.mxu0 %v8876_v35 }
 0x11d   : > { %v10208_v44 = vpop.eup %10207  ;;  %v12737_v30 = vpack.c.bf16 %v848_v51, %v847_v36  ;;  %v762_v37 = vadd.f32 1.0, %v10206_v41  ;;  %v12740_v47 = vadd.f32 %v9841_v34, %v12472_v59  ;;  %v626_v9 = vpop.f32.mrb[27].mxu0  ;;  %2167 = vmatprep.subr.bf16.mxu1 %v8831_v53  ;;  %2358 = vmatprep.subr.bf16.mxu0 %v8833_v56  ;;  %v8817_v45 = vmul.f32 -1.442695, %v12730_v39 }
 0x11e   : > { %18953 = vst [vmem:[#allocation7_spill] sm:$0xff] %v12732_v42  ;;  %v10210_v14 = vpop.eup %10209  ;;  %10227 = vrcp.f32 %v764_v63  ;;  %v765_v49 = vadd.f32 1.0, %v10208_v44  ;;  %8888 = vmatmul.mubr.msk.bf16.gmra.mrb[8].mxu1 %vm1354_vm1, %v12696_v17  ;;  %8904 = vmatmul.mubr.msk.bf16.gmra.mrb[40].mxu0 %vm1354_vm1, %v12696_v17  ;;  %v12748_v11 = vadd.f32 %v12472_v59, %v626_v9  ;;  %v8815_v6 = vmul.f32 -1.442695, %v12735_v26 }
 0x11f   : > { %18954 = vst [vmem:[#allocation8_spill] sm:$0xff] %v12737_v30  ;;  %v10212_v58 = vpop.eup %10211  ;;  %10229 = vrcp.f32 %v762_v37  ;;  %v763_v4 = vadd.f32 1.0, %v10210_v14  ;;  %1465 = vmatprep.mubr.bf16.mxu1 %v18840_v50  ;;  %1656 = vmatprep.mubr.bf16.mxu0 %v18840_v50  ;;  %v8818_v60 = vmul.f32 -1.442695, %v12740_v47 }
 0x120   : > { %v10214_v7 = vpop.eup %10213  ;;  %10231 = vrcp.f32 %v765_v49  ;;  %v8816_v12 = vmul.f32 -1.442695, %v12748_v11  ;;  %v853_v13 = vmul.f32 %v10212_v58, %v12523_v46 }
 0x121   : > { %v10216_v10 = vpop.eup %10215  ;;  %10233 = vrcp.f32 %v763_v4  ;;  %v851_v32 = vmul.f32 %v10214_v7, %v12526_v55 }
 0x122   : > { %v10218_v16 = vpop.eup %10217  ;;  %v854_v15 = vmul.f32 %v10216_v10, %v12540_v3  ;;  %10235 = vpow2.f32 %v8817_v45  ;;  %v9844_v21 = vpop.f32.mrb[28].mxu0 }
 0x123   : > { %v10220_v29 = vpop.eup %10219  ;;  %v852_v35 = vmul.f32 %v10218_v16, %v12544_v8  ;;  %10237 = vpow2.f32 %v8815_v6  ;;  %v12760_v52 = vadd.f32 %v9844_v21, %v12472_v59  ;;  %v639_v53 = vpop.f32.mrb[29].mxu0 }
 0x124   : > { %v10222_v56 = vpop.eup %10221  ;;  %v12762_v57 = vpack.c.bf16 %v854_v15, %v853_v13  ;;  %v768_v33 = vadd.f32 1.0, %v10220_v29  ;;  %10239 = vpow2.f32 %v8818_v60  ;;  %v12765_v46 = vadd.f32 %v12472_v59, %v639_v53  ;;  %v9845_v3 = vpop.f32.mrb[30].mxu0 }
 0x125   : > { %v10224_v54 = vpop.eup %10223  ;;  %v12767_v27 = vpack.c.bf16 %v852_v35, %v851_v32  ;;  %v766_v55 = vadd.f32 1.0, %v10222_v56  ;;  %10241 = vpow2.f32 %v8816_v12  ;;  %v642_v8 = vpop.f32.mrb[31].mxu0 }
 0x126   : > { %18955 = vst [vmem:[#allocation9_spill] sm:$0xff] %v12762_v57  ;;  %v10226_v28 = vpop.eup %10225  ;;  %10243 = vrcp.f32 %v768_v33  ;;  %v769_v36 = vadd.f32 1.0, %v10224_v54  ;;  %8889 = vmatmul.mubr.msk.bf16.gmra.mrb[12].mxu1 %vm1354_vm1, %v12685_v48  ;;  %8905 = vmatmul.mubr.msk.bf16.gmra.mrb[44].mxu0 %vm1354_vm1, %v12685_v48  ;;  %v12774_v51 = vadd.f32 %v12472_v59, %v642_v8  ;;  %v8819_v41 = vmul.f32 -1.442695, %v12765_v46 }
 0x127   : > { %18956 = vst [vmem:[#allocation10_spill] sm:$0xff] %v12767_v27  ;;  %10245 = vrcp.f32 %v766_v55  ;;  %v767_v61 = vadd.f32 1.0, %v10226_v28  ;;  %1475 = vmatprep.mubr.bf16.mxu1 %v18840_v50  ;;  %1666 = vmatprep.mubr.bf16.mxu0 %v18840_v50 }
 0x128   : > { %v10228_v63 = vpop.eup %10227  ;;  %10247 = vrcp.f32 %v769_v36  ;;  %v8820_v34 = vmul.f32 -1.442695, %v12774_v51 }
 0x129   : > { %v10230_v44 = vpop.eup %10229  ;;  %v857_v37 = vmul.f32 %v10228_v63, %v12595_v2  ;;  %10249 = vrcp.f32 %v767_v61 }
 0x12a   : > { %v10232_v9 = vpop.eup %10231  ;;  %v855_v59 = vmul.f32 %v10230_v44, %v12600_v5  ;;  %10251 = vpow2.f32 %v8819_v41 }
 0x12b   : > { %v10234_v14 = vpop.eup %10233  ;;  %v858_v49 = vmul.f32 %v10232_v9, %v12616_v1  ;;  %10253 = vpow2.f32 %v8820_v34 }
 0x12c   : > { %v10236_v45 = vpop.eup %10235  ;;  %v856_v58 = vmul.f32 %v10234_v14, %v12634_v22  ;;  %v906_v14 = vld [vmem:[%s18834_s3 + $0xa0] sm:$0xff] }
 0x12d   : > { %v10238_v4 = vpop.eup %10237  ;;  %v12784_v6 = vpack.c.bf16 %v858_v49, %v857_v37  ;;  %v772_v7 = vadd.f32 1.0, %v10236_v45  ;;  %v907_v49 = vld [vmem:[%s18834_s3 + $0xa8] sm:$0xff] }
 0x12e   : > { %v10240_v60 = vpop.eup %10239  ;;  %v12786_v10 = vpack.c.bf16 %v856_v58, %v855_v59  ;;  %v770_v2 = vadd.f32 1.0, %v10238_v4  ;;  %8890 = vmatmul.mubr.msk.bf16.gmra.mrb[16].mxu1 %vm1354_vm1, %v12737_v30  ;;  %8906 = vmatmul.mubr.msk.bf16.gmra.mrb[48].mxu0 %vm1354_vm1, %v12737_v30  ;;  %v915_v45 = vld [vmem:[%s18834_s3 + $0xe8] sm:$0xff]  ;;  %v922_v58 = vld [vmem:[%s18834_s3 + $0x120] sm:$0xff] }
 0x12f   : > { %18957 = vst [vmem:[#allocation11_spill] sm:$0xff] %v12784_v6  ;;  %v10242_v5 = vpop.eup %10241  ;;  %10255 = vrcp.f32 %v772_v7  ;;  %v773_v1 = vadd.f32 1.0, %v10240_v60  ;;  %1485 = vmatprep.mubr.bf16.mxu1 %v18840_v50  ;;  %1676 = vmatprep.mubr.bf16.mxu0 %v18840_v50  ;;  %v8849_v7 = vcombine.high %v907_v49, %v915_v45  ;;  %v930_v60 = vld [vmem:[%s18834_s3 + $0x160] sm:$0xff] }
 0x130   : > { %18958 = vst [vmem:[#allocation12_spill] sm:$0xff] %v12786_v10  ;;  %v10244_v22 = vpop.eup %10243  ;;  %10257 = vrcp.f32 %v770_v2  ;;  %v771_v12 = vadd.f32 1.0, %v10242_v5  ;;  %v923_v2 = vld [vmem:[%s18834_s3 + $0x128] sm:$0xff] }
 0x131   : > { %v10246_v16 = vpop.eup %10245  ;;  %v861_v13 = vmul.f32 %v10244_v22, %v12688_v23  ;;  %10259 = vrcp.f32 %v773_v1  ;;  %v931_v5 = vld [vmem:[%s18834_s3 + $0x168] sm:$0xff]  ;;  %v8848_v22 = vcombine.low %v907_v49, %v915_v45 }
 0x132   : > { %v10248_v15 = vpop.eup %10247  ;;  %v859_v21 = vmul.f32 %v10246_v16, %v12699_v0  ;;  %10261 = vrcp.f32 %v771_v12  ;;  %v8863_v12 = vcombine.high %v922_v58, %v930_v60  ;;  %v8865_v16 = vcombine.high %v923_v2, %v931_v5 }
 0x133   : > { %v10250_v29 = vpop.eup %10249  ;;  %v862_v32 = vmul.f32 %v10248_v15, %v12703_v62  ;;  %v8864_v18 = vcombine.low %v923_v2, %v931_v5  ;;  %v8878_v15 = vcombine.low %v938_v19, %v946_v20 }
 0x134   : > { %v860_v35 = vmul.f32 %v10250_v29, %v12711_v38  ;;  %v10252_v53 = vpop.eup %10251 }
 0x135   : > { %v12798_v56 = vpack.c.bf16 %v862_v32, %v861_v13  ;;  %v10254_v33 = vpop.eup %10253  ;;  %v774_v23 = vadd.f32 1.0, %v10252_v53  ;;  %v8862_v13 = vcombine.low %v922_v58, %v930_v60  ;;  %v18839_v32 = vlaneseq  ;;  %v12990_v53 = vld [vmem:[%s18834_s3 + $0x30] sm:$0xff] }
 0x136   : > { %v12800_v3 = vpack.c.bf16 %v860_v35, %v859_v21  ;;  %8891 = vmatmul.mubr.msk.bf16.gmra.mrb[20].mxu1 %vm1354_vm1, %v12732_v42  ;;  %8907 = vmatmul.mubr.msk.bf16.gmra.mrb[52].mxu0 %vm1354_vm1, %v12732_v42  ;;  %v775_v0 = vadd.f32 1.0, %v10254_v33  ;;  %v12995_v33 = vld [vmem:[%s18834_s3 + $0x70] sm:$0xff] }
 0x137   : > { %18959 = vst [vmem:[#allocation13_spill] sm:$0xff] %v12798_v56  ;;  %1495 = vmatprep.mubr.bf16.mxu1 %v18840_v50  ;;  %1686 = vmatprep.mubr.bf16.mxu0 %v18840_v50  ;;  %10263 = vrcp.f32 %v774_v23  ;;  %v12985_v35 = vshrl.u32 %v18839_v32, 7  ;;  %v13000_v23 = vld [vmem:[%s18834_s3 + $0x38] sm:$0xff] }
 0x138   : > { %18960 = vst [vmem:[#allocation14_spill] sm:$0xff] %v12800_v3  ;;  %10265 = vrcp.f32 %v775_v0  ;;  %v8835_v0 = vcombine.high %v12990_v53, %v12995_v33 }
 0x139   : > { %v10256_v62 = vpop.eup %10255  ;;  %18965 = vst [vmem:[#allocation19_spill] sm:$0xff] %v12985_v35 }
 0x13a   : > { %v10258_v38 = vpop.eup %10257  ;;  %v865_v54 = vmul.f32 %v10256_v62, %v12730_v39  ;;  %v13009_v62 = vld [vmem:[%s18834_s3 + $0x78] sm:$0xff] }
 0x13b   : > { %v10260_v55 = vpop.eup %10259  ;;  %v863_v8 = vmul.f32 %v10258_v38, %v12735_v26  ;;  %v8837_v38 = vcombine.high %v13000_v23, %v13009_v62 }
 0x13c   : > { %v10262_v28 = vpop.eup %10261  ;;  %v866_v36 = vmul.f32 %v10260_v55, %v12740_v47  ;;  %v13017_v55 = vsub.s32 2, %v12985_v35 }
 0x13d   : > { %v864_v61 = vmul.f32 %v10262_v28, %v12748_v11  ;;  %v13023_v28 = vsub.s32 1, %v12985_v35 }
 0x13e   : > { %v12812_v41 = vpack.c.bf16 %v866_v36, %v865_v54  ;;  %8892 = vmatmul.mubr.msk.bf16.gmra.mrb[24].mxu1 %vm1354_vm1, %v12767_v27  ;;  %8908 = vmatmul.mubr.msk.bf16.gmra.mrb[56].mxu0 %vm1354_vm1, %v12767_v27  ;;  %v13014_v54 = vsub.s32 0, %v12985_v35  ;;  %18967 = vst [vmem:[#allocation21_spill] sm:$0xff] %v13017_v55  ;;  %v13026_v36 = vsub.s32 3, %v12985_v35 }
 0x13f   : > { %v12818_v63 = vpack.c.bf16 %v864_v61, %v863_v8  ;;  %1505 = vmatprep.mubr.bf16.mxu1 %v18840_v50  ;;  %1696 = vmatprep.mubr.bf16.mxu0 %v18840_v50  ;;  %v950_v8 = vld [vmem:[%s18835_s4] sm:$0xff]  ;;  %18968 = vst [vmem:[#allocation22_spill] sm:$0xff] %v13023_v28 }
 0x140   : > { %18961 = vst [vmem:[#allocation15_spill] sm:$0xff] %v12812_v41  ;;  %18966 = vst [vmem:[#allocation20_spill] sm:$0xff] %v13014_v54  ;;  %v13033_v61 = vrot.slane %v950_v8, %v13014_v54 }
 0x141   : > { %18962 = vst [vmem:[#allocation16_spill] sm:$0xff] %v12818_v63  ;;  %v10264_v39 = vpop.eup %10263  ;;  %18969 = vst [vmem:[#allocation23_spill] sm:$0xff] %v13026_v36 }
 0x142   : > { %v10266_v26 = vpop.eup %10265  ;;  %v867_v47 = vmul.f32 %v10264_v39, %v12765_v46  ;;  %v8821_v46 = vmul.f32 -1.442695, %v12760_v52  ;;  %v13036_v39 = vrot.slane %v950_v8, %v13017_v55 }
 0x143   : > { %v868_v11 = vmul.f32 %v10266_v26, %v12774_v51  ;;  %v13039_v26 = vrot.slane %v950_v8, %v13023_v28 }
 0x144   : > { %10267 = vpow2.f32 %v8821_v46 }
 0x145   : > { %v12824_v34 = vpack.c.bf16 %v868_v11, %v867_v47  ;;  %v13042_v47 = vrot.slane %v950_v8, %v13026_v36 }
 0x146   : > { %8893 = vmatmul.mubr.msk.bf16.gmra.mrb[28].mxu1 %vm1354_vm1, %v12762_v57  ;;  %8909 = vmatmul.mubr.msk.bf16.gmra.mrb[60].mxu0 %vm1354_vm1, %v12762_v57 }
 0x147   : > { %18963 = vst [vmem:[#allocation17_spill] sm:$0xff] %v12824_v34  ;;  %1515 = vmatprep.mubr.bf16.mxu1 %v18840_v50  ;;  %1706 = vmatprep.mubr.bf16.mxu0 %v18840_v50 }
 0x14e   : > { %8894 = vmatmul.mubr.msk.bf16.gmra.mrb[32].mxu1 %vm1354_vm1, %v12786_v10  ;;  %8910 = vmatmul.mubr.msk.bf16.gmra.mrb[64].mxu0 %vm1354_vm1, %v12786_v10  ;;  %v10268_v51 = vpop.eup %10267 }
 0x14f   : > { %1525 = vmatprep.mubr.bf16.mxu1 %v18840_v50  ;;  %1716 = vmatprep.mubr.bf16.mxu0 %v18840_v50  ;;  %v776_v44 = vadd.f32 1.0, %v10268_v51 }
 0x151   : > { %10269 = vrcp.f32 %v776_v44 }
 0x156   : > { %8895 = vmatmul.mubr.msk.bf16.gmra.mrb[36].mxu1 %vm1354_vm1, %v12784_v6  ;;  %8911 = vmatmul.mubr.msk.bf16.gmra.mrb[68].mxu0 %vm1354_vm1, %v12784_v6 }
 0x157   : > { %1535 = vmatprep.mubr.bf16.mxu1 %v18840_v50  ;;  %1726 = vmatprep.mubr.bf16.mxu0 %v18840_v50 }
 0x15b   : > { %v10270_v37 = vpop.eup %10269 }
 0x15c   : > { %v869_v9 = vmul.f32 %v10270_v37, %v12760_v52  ;;  %v914_v52 = vld [vmem:[%s18834_s3 + $0xe0] sm:$0xff] }
 0x15d   : > { %v8847_v4 = vcombine.high %v906_v14, %v914_v52  ;;  %v8846_v1 = vcombine.low %v906_v14, %v914_v52 }
 0x15e   : > { %8896 = vmatmul.mubr.msk.bf16.gmra.mrb[40].mxu1 %vm1354_vm1, %v12800_v3  ;;  %8912 = vmatmul.mubr.msk.bf16.gmra.mrb[72].mxu0 %vm1354_vm1, %v12800_v3  ;;  %v12876_v59 = vpack.c.bf16 %v869_v9, %v869_v9 }
 0x15f   : > { %1545 = vmatprep.mubr.bf16.mxu1 %v18840_v50  ;;  %1736 = vmatprep.mubr.bf16.mxu0 %v18840_v50 }
 0x160   : > { %18964 = vst [vmem:[#allocation18_spill] sm:$0xff] %v12876_v59 }
 0x166   : > { %8897 = vmatmul.mubr.msk.bf16.gmra.mrb[44].mxu1 %vm1354_vm1, %v12798_v56  ;;  %8913 = vmatmul.mubr.msk.bf16.gmra.mrb[76].mxu0 %vm1354_vm1, %v12798_v56 }
 0x167   : > { %1555 = vmatprep.mubr.bf16.mxu1 %v18840_v50  ;;  %1746 = vmatprep.mubr.bf16.mxu0 %v18840_v50 }
 0x16e   : > { %8898 = vmatmul.mubr.msk.bf16.gmra.mrb[48].mxu1 %vm1354_vm1, %v12818_v63  ;;  %8914 = vmatmul.mubr.msk.bf16.gmra.mrb[80].mxu0 %vm1354_vm1, %v12818_v63 }
 0x16f   : > { %1565 = vmatprep.mubr.bf16.mxu1 %v18840_v50  ;;  %1756 = vmatprep.mubr.bf16.mxu0 %v18840_v50 }
 0x176   : > { %8899 = vmatmul.mubr.msk.bf16.gmra.mrb[52].mxu1 %vm1354_vm1, %v12812_v41  ;;  %8915 = vmatmul.mubr.msk.bf16.gmra.mrb[84].mxu0 %vm1354_vm1, %v12812_v41 }
 0x177   : > { %1575 = vmatprep.mubr.bf16.mxu1 %v18840_v50  ;;  %1766 = vmatprep.mubr.bf16.mxu0 %v18840_v50 }
 0x17e   : > { %8900 = vmatmul.mubr.msk.bf16.gmra.mrb[56].mxu1 %vm1354_vm1, %v12824_v34  ;;  %8916 = vmatmul.mubr.msk.bf16.gmra.mrb[88].mxu0 %vm1354_vm1, %v12824_v34 }
 0x17f   : > { %1585 = vmatprep.mubr.bf16.mxu1 %v18840_v50  ;;  %1776 = vmatprep.mubr.bf16.mxu0 %v18840_v50 }
 0x186   : > { %8901 = vmatmul.mubr.msk.bf16.gmra.mrb[60].mxu1 %vm1354_vm1, %v12876_v59  ;;  %8917 = vmatmul.mubr.msk.bf16.gmra.mrb[92].mxu0 %vm1354_vm1, %v12876_v59 }
 0x187   : > { %1817 = vmatprep.mubr.bf16.mxu1 %v18840_v50  ;;  %2008 = vmatprep.mubr.bf16.mxu0 %v18840_v50 }
 0x18e   : > { %8918 = vmatmul.mubr.msk.bf16.vlgmr.msra.gmra.mrb[64].mxu1 %vm1354_vm1, %v12597_v43  ;;  %8934 = vmatmul.mubr.msk.bf16.vlgmr.msra.gmra.mrb[96].mxu0 %vm1354_vm1, %v12597_v43 }
 0x18f   : > { %2168 = vmatpush1.bf16.msra.mxu1 %v8830_v24  ;;  %2359 = vmatpush1.bf16.msra.mxu0 %v8832_v31  ;;  %v939_v24 = vld [vmem:[%s18834_s3 + $0x1a8] sm:$0xff] }
 0x190   : > { %1827 = vmatprep.mubr.bf16.mxu1 %v18840_v50  ;;  %2018 = vmatprep.mubr.bf16.mxu0 %v18840_v50  ;;  %v947_v31 = vld [vmem:[%s18834_s3 + $0x1e8] sm:$0xff] }
 0x191   : > { %2169 = vmatprep.subr.bf16.mxu1 %v8847_v4  ;;  %2360 = vmatprep.subr.bf16.mxu0 %v8849_v7  ;;  %v8880_v21 = vcombine.low %v939_v24, %v947_v31  ;;  %v8881_v29 = vcombine.high %v939_v24, %v947_v31 }
 0x193   : > { %2170 = vmatpush1.bf16.msra.mxu1 %v8846_v1  ;;  %2361 = vmatpush1.bf16.msra.mxu0 %v8848_v22 }
 0x194   : > { %2171 = vmatprep.subr.bf16.mxu1 %v8863_v12  ;;  %2362 = vmatprep.subr.bf16.mxu0 %v8865_v16 }
 0x196   : > { %8919 = vmatmul.mubr.msk.bf16.gmra.mrb[68].mxu1 %vm1354_vm1, %v12592_v40  ;;  %8935 = vmatmul.mubr.msk.bf16.gmra.mrb[100].mxu0 %vm1354_vm1, %v12592_v40 }
 0x197   : > { %1837 = vmatprep.mubr.bf16.mxu1 %v18840_v50  ;;  %2028 = vmatprep.mubr.bf16.mxu0 %v18840_v50 }
 0x198   : > { %2172 = vmatpush1.bf16.msra.mxu1 %v8862_v13  ;;  %2363 = vmatpush1.bf16.msra.mxu0 %v8864_v18 }
 0x199   : > { %2173 = vmatprep.subr.bf16.mxu1 %v8879_v25  ;;  %2364 = vmatprep.subr.bf16.mxu0 %v8881_v29 }
 0x19c   : > { %2174 = vmatpush1.bf16.msra.mxu1 %v8878_v15  ;;  %2365 = vmatpush1.bf16.msra.mxu0 %v8880_v21 }
 0x19d   : > { %2549 = vmatprep.subr.bf16.mxu1 %v8835_v0  ;;  %2740 = vmatprep.subr.bf16.mxu0 %v8837_v38 }
 0x19e   : > { %8920 = vmatmul.mubr.msk.bf16.gmra.mrb[72].mxu1 %vm1354_vm1, %v12696_v17  ;;  %8936 = vmatmul.mubr.msk.bf16.gmra.mrb[104].mxu0 %vm1354_vm1, %v12696_v17 }
 0x19f   : > { %1847 = vmatprep.mubr.bf16.mxu1 %v18840_v50  ;;  %2038 = vmatprep.mubr.bf16.mxu0 %v18840_v50 }
 0x1a6   : > { %8921 = vmatmul.mubr.msk.bf16.gmra.mrb[76].mxu1 %vm1354_vm1, %v12685_v48  ;;  %8937 = vmatmul.mubr.msk.bf16.gmra.mrb[108].mxu0 %vm1354_vm1, %v12685_v48 }
 0x1a7   : > { %1857 = vmatprep.mubr.bf16.mxu1 %v18840_v50  ;;  %2048 = vmatprep.mubr.bf16.mxu0 %v18840_v50 }
 0x1ae   : > { %8922 = vmatmul.mubr.msk.bf16.gmra.mrb[80].mxu1 %vm1354_vm1, %v12737_v30  ;;  %8938 = vmatmul.mubr.msk.bf16.gmra.mrb[112].mxu0 %vm1354_vm1, %v12737_v30 }
 0x1af   : > { %1867 = vmatprep.mubr.bf16.mxu1 %v18840_v50  ;;  %2058 = vmatprep.mubr.bf16.mxu0 %v18840_v50 }
 0x1b6   : > { %8923 = vmatmul.mubr.msk.bf16.gmra.mrb[84].mxu1 %vm1354_vm1, %v12732_v42  ;;  %8939 = vmatmul.mubr.msk.bf16.gmra.mrb[116].mxu0 %vm1354_vm1, %v12732_v42 }
 0x1b7   : > { %1877 = vmatprep.mubr.bf16.mxu1 %v18840_v50  ;;  %2068 = vmatprep.mubr.bf16.mxu0 %v18840_v50 }
 0x1be   : > { %8924 = vmatmul.mubr.msk.bf16.gmra.mrb[88].mxu1 %vm1354_vm1, %v12767_v27  ;;  %8940 = vmatmul.mubr.msk.bf16.gmra.mrb[120].mxu0 %vm1354_vm1, %v12767_v27 }
 0x1bf   : > { %1887 = vmatprep.mubr.bf16.mxu1 %v18840_v50  ;;  %2078 = vmatprep.mubr.bf16.mxu0 %v18840_v50 }
 0x1c6   : > { %8925 = vmatmul.mubr.msk.bf16.gmra.mrb[92].mxu1 %vm1354_vm1, %v12762_v57  ;;  %8941 = vmatmul.mubr.msk.bf16.gmra.mrb[124].mxu0 %vm1354_vm1, %v12762_v57 }
 0x1c7   : > { %1897 = vmatprep.mubr.bf16.mxu1 %v18840_v50  ;;  %2088 = vmatprep.mubr.bf16.mxu0 %v18840_v50 }
 0x1ce   : > { %8926 = vmatmul.mubr.msk.bf16.gmra.mrb[96].mxu1 %vm1354_vm1, %v12786_v10  ;;  %8942 = vmatmul.mubr.msk.bf16.gmra.mrb[128].mxu0 %vm1354_vm1, %v12786_v10 }
 0x1cf   : > { %1907 = vmatprep.mubr.bf16.mxu1 %v18840_v50  ;;  %2098 = vmatprep.mubr.bf16.mxu0 %v18840_v50 }
 0x1d6   : > { %8927 = vmatmul.mubr.msk.bf16.gmra.mrb[100].mxu1 %vm1354_vm1, %v12784_v6  ;;  %8943 = vmatmul.mubr.msk.bf16.gmra.mrb[132].mxu0 %vm1354_vm1, %v12784_v6 }
 0x1d7   : > { %1917 = vmatprep.mubr.bf16.mxu1 %v18840_v50  ;;  %2108 = vmatprep.mubr.bf16.mxu0 %v18840_v50 }
 0x1de   : > { %8928 = vmatmul.mubr.msk.bf16.gmra.mrb[104].mxu1 %vm1354_vm1, %v12800_v3  ;;  %8944 = vmatmul.mubr.msk.bf16.gmra.mrb[136].mxu0 %vm1354_vm1, %v12800_v3 }
 0x1df   : > { %1927 = vmatprep.mubr.bf16.mxu1 %v18840_v50  ;;  %2118 = vmatprep.mubr.bf16.mxu0 %v18840_v50 }
 0x1e1   : > { %v1437_v11 = vpop.f32.mrb[0].mxu1  ;;  %v1628_v46 = vpop.f32.mrb[32].mxu0 }
 0x1e2   : > { %v13047_v51 = vadd.f32 %v1437_v11, %v13033_v61  ;;  %v13050_v44 = vadd.f32 %v1628_v46, %v13036_v39  ;;  %v1439_v37 = vpop.f32.mrb[1].mxu1  ;;  %v1630_v9 = vpop.f32.mrb[33].mxu0 }
 0x1e3   : > { %v13053_v14 = vadd.f32 %v1439_v37, %v13039_v26  ;;  %v13056_v52 = vadd.f32 %v1630_v9, %v13042_v47  ;;  %v1441_v49 = vpop.f32.mrb[2].mxu1  ;;  %v1632_v45 = vpop.f32.mrb[34].mxu0 }
 0x1e4   : > { %v9014_v58 = vmul.f32 -1.442695, %v13047_v51  ;;  %v9016_v4 = vmul.f32 -1.442695, %v13050_v44  ;;  %v13061_v7 = vadd.f32 %v1441_v49, %v13033_v61  ;;  %v13064_v60 = vadd.f32 %v1632_v45, %v13036_v39  ;;  %v1443_v2 = vpop.f32.mrb[3].mxu1  ;;  %v1634_v5 = vpop.f32.mrb[35].mxu0 }
 0x1e5   : > { %v9015_v1 = vmul.f32 -1.442695, %v13053_v14  ;;  %v9017_v22 = vmul.f32 -1.442695, %v13056_v52  ;;  %v13069_v12 = vadd.f32 %v1443_v2, %v13039_v26  ;;  %v13072_v16 = vadd.f32 %v1634_v5, %v13042_v47 }
 0x1e6   : > { %10271 = vpow2.f32 %v9014_v58  ;;  %v9030_v13 = vmul.f32 -1.442695, %v13061_v7  ;;  %8929 = vmatmul.mubr.msk.bf16.gmra.mrb[108].mxu1 %vm1354_vm1, %v12798_v56  ;;  %8945 = vmatmul.mubr.msk.bf16.gmra.mrb[140].mxu0 %vm1354_vm1, %v12798_v56  ;;  %v9032_v18 = vmul.f32 -1.442695, %v13064_v60 }
 0x1e7   : > { %10273 = vpow2.f32 %v9016_v4  ;;  %1937 = vmatprep.mubr.bf16.mxu1 %v18840_v50  ;;  %2128 = vmatprep.mubr.bf16.mxu0 %v18840_v50  ;;  %v9031_v19 = vmul.f32 -1.442695, %v13069_v12  ;;  %v9033_v20 = vmul.f32 -1.442695, %v13072_v16 }
 0x1e8   : > { %10275 = vpow2.f32 %v9015_v1 }
 0x1e9   : > { %10277 = vpow2.f32 %v9017_v22  ;;  %v1447_v24 = vpop.f32.mrb[4].mxu1  ;;  %v1638_v25 = vpop.f32.mrb[36].mxu0 }
 0x1ea   : > { %10279 = vpow2.f32 %v9030_v13  ;;  %v13085_v31 = vadd.f32 %v1447_v24, %v13033_v61  ;;  %v13088_v15 = vadd.f32 %v1638_v25, %v13036_v39  ;;  %v1449_v21 = vpop.f32.mrb[5].mxu1  ;;  %v1640_v29 = vpop.f32.mrb[37].mxu0 }
 0x1eb   : > { %10281 = vpow2.f32 %v9032_v18  ;;  %v13091_v0 = vadd.f32 %v1449_v21, %v13039_v26  ;;  %v13094_v38 = vadd.f32 %v1640_v29, %v13042_v47  ;;  %v1451_v8 = vpop.f32.mrb[6].mxu1  ;;  %v1642_v11 = vpop.f32.mrb[38].mxu0 }
 0x1ec   : > { %10283 = vpow2.f32 %v9031_v19  ;;  %v9046_v46 = vmul.f32 -1.442695, %v13085_v31  ;;  %v9048_v37 = vmul.f32 -1.442695, %v13088_v15  ;;  %v13099_v9 = vadd.f32 %v1451_v8, %v13033_v61  ;;  %v1453_v49 = vpop.f32.mrb[7].mxu1  ;;  %v1644_v45 = vpop.f32.mrb[39].mxu0 }
 0x1ed   : > { %10285 = vpow2.f32 %v9033_v20  ;;  %v9047_v58 = vmul.f32 -1.442695, %v13091_v0  ;;  %v9049_v4 = vmul.f32 -1.442695, %v13094_v38 }
 0x1ee   : > { %10287 = vpow2.f32 %v9046_v46  ;;  %v9062_v2 = vmul.f32 -1.442695, %v13099_v9  ;;  %8930 = vmatmul.mubr.msk.bf16.gmra.mrb[112].mxu1 %vm1354_vm1, %v12818_v63  ;;  %8946 = vmatmul.mubr.msk.bf16.gmra.mrb[144].mxu0 %vm1354_vm1, %v12818_v63 }
 0x1ef   : > { %10289 = vpow2.f32 %v9048_v37  ;;  %1947 = vmatprep.mubr.bf16.mxu1 %v18840_v50  ;;  %2138 = vmatprep.mubr.bf16.mxu0 %v18840_v50 }
 0x1f0   : > { %v10272_v5 = vpop.eup %10271  ;;  %10291 = vpow2.f32 %v9047_v58 }
 0x1f1   : > { %v10274_v1 = vpop.eup %10273  ;;  %v4419_v22 = vadd.f32 1.0, %v10272_v5  ;;  %10293 = vpow2.f32 %v9049_v4  ;;  %v1457_v13 = vpop.f32.mrb[8].mxu1  ;;  %v13111_v4 = vadd.f32 %v1642_v11, %v13036_v39 }
 0x1f2   : > { %v1648_v18 = vpop.f32.mrb[40].mxu0  ;;  %v10276_v19 = vpop.eup %10275  ;;  %v4421_v20 = vadd.f32 1.0, %v10274_v1  ;;  %10295 = vpow2.f32 %v9062_v2  ;;  %v13130_v54 = vadd.f32 %v1457_v13, %v13033_v61 }
 0x1f3   : > { %v1459_v24 = vpop.f32.mrb[9].mxu1  ;;  %v1650_v25 = vpop.f32.mrb[41].mxu0  ;;  %10297 = vrcp.f32 %v4419_v22  ;;  %v4420_v29 = vadd.f32 1.0, %v10276_v19  ;;  %v13116_v22 = vadd.f32 %v1453_v49, %v13039_v26 }
 0x1f4   : > { %v10278_v21 = vpop.eup %10277  ;;  %v1461_v8 = vpop.f32.mrb[10].mxu1  ;;  %10299 = vrcp.f32 %v4421_v20  ;;  %v13145_v63 = vadd.f32 %v1650_v25, %v13042_v47 }
 0x1f5   : > { %v1652_v46 = vpop.f32.mrb[42].mxu0  ;;  %v10280_v37 = vpop.eup %10279  ;;  %v4422_v32 = vadd.f32 1.0, %v10278_v21  ;;  %10301 = vrcp.f32 %v4420_v29  ;;  %v18970_v21 = vmov 0   ;;  %v13148_v56 = vadd.f32 %v1461_v8, %v13033_v61 }
 0x1f6   : > { %v1463_v50 = vpop.f32.mrb[11].mxu1  ;;  %v10282_v58 = vpop.eup %10281  ;;  %v4435_v5 = vadd.f32 1.0, %v10280_v37  ;;  %8931 = vmatmul.mubr.msk.bf16.gmra.mrb[116].mxu1 %vm1354_vm1, %v12812_v41  ;;  %8947 = vmatmul.mubr.msk.bf16.gmra.mrb[148].mxu0 %vm1354_vm1, %v12812_v41  ;;  %v9064_v37 = vmul.f32 -1.442695, %v13111_v4  ;;  %18973 = vst [vmem:[#allocation26_spill] sm:$0xff] %v13145_v63  ;;  %v13155_v3 = vadd.f32 %v1652_v46, %v13036_v39 }
 0x1f7   : > { %v13113_v36 = vpop.f32.mrb[43].mxu0  ;;  %v10284_v2 = vpop.eup %10283  ;;  %10303 = vrcp.f32 %v4422_v32  ;;  %v4437_v1 = vadd.f32 1.0, %v10282_v58  ;;  %1957 = vmatprep.mubr.bf16.mxu1 %v18970_v21  ;;  %2148 = vmatprep.mubr.bf16.mxu0 %v18970_v21  ;;  %v13126_v58 = vadd.f32 %v1644_v45, %v13042_v47  ;;  %v13138_v45 = vadd.f32 %v1459_v24, %v13039_v26  ;;  %18974 = vst [vmem:[#allocation27_spill] sm:$0xff] %v13148_v56 }
 0x1f8   : > { %v10286_v19 = vpop.eup %10285  ;;  %10305 = vrcp.f32 %v4435_v5  ;;  %v4436_v20 = vadd.f32 1.0, %v10284_v2  ;;  %v9063_v2 = vmul.f32 -1.442695, %v13116_v22  ;;  %18975 = vst [vmem:[#allocation28_spill] sm:$0xff] %v13155_v3  ;;  %v13158_v6 = vadd.f32 %v1463_v50, %v13039_v26 }
 0x1f9   : > { %v10288_v11 = vpop.eup %10287  ;;  %10307 = vrcp.f32 %v4437_v1  ;;  %v4438_v32 = vadd.f32 1.0, %v10286_v19  ;;  %v1467_v28 = vpop.f32.mrb[12].mxu1  ;;  %18972 = vst [vmem:[#allocation25_spill] sm:$0xff] %v13138_v45  ;;  %v9065_v8 = vmul.f32 -1.442695, %v13126_v58  ;;  %v13178_v27 = vadd.f32 %v13113_v36, %v13042_v47 }
 0x1fa   : > { %v10290_v29 = vpop.eup %10289  ;;  %10309 = vrcp.f32 %v4436_v20  ;;  %v4451_v49 = vadd.f32 1.0, %v10288_v11  ;;  %v1658_v35 = vpop.f32.mrb[44].mxu0  ;;  %v13135_v11 = vadd.f32 %v1648_v18, %v13036_v39  ;;  %18976 = vst [vmem:[#allocation29_spill] sm:$0xff] %v13158_v6  ;;  %v9078_v46 = vmul.f32 -1.442695, %v13130_v54 }
 0x1fb   : > { %v10292_v55 = vpop.eup %10291  ;;  %10311 = vrcp.f32 %v4438_v32  ;;  %v4453_v5 = vadd.f32 1.0, %v10290_v29  ;;  %v13132_v1 = vpop.f32.mrb[13].mxu1  ;;  %v9094_v10 = vmul.f32 -1.442695, %v13148_v56 }
 0x1fc   : > { %v10294_v19 = vpop.eup %10293  ;;  %10313 = vrcp.f32 %v4451_v49  ;;  %v4452_v20 = vadd.f32 1.0, %v10292_v55  ;;  %18971 = vst [vmem:[#allocation24_spill] sm:$0xff] %v13135_v11  ;;  %v13140_v41 = vpop.f32.mrb[45].mxu0 }
 0x1fd   : > { %v13142_v32 = vpop.f32.mrb[14].mxu1  ;;  %v10296_v29 = vpop.eup %10295  ;;  %10315 = vrcp.f32 %v4453_v5  ;;  %v4454_v13 = vadd.f32 1.0, %v10294_v19 }
 0x1fe   : > { %v13150_v55 = vpop.f32.mrb[46].mxu0  ;;  %v13152_v18 = vpop.f32.mrb[15].mxu1  ;;  %10317 = vrcp.f32 %v4452_v20  ;;  %v4467_v24 = vadd.f32 1.0, %v10296_v29  ;;  %8932 = vmatmul.mubr.msk.bf16.gmra.mrb[120].mxu1 %vm1354_vm1, %v12824_v34  ;;  %8948 = vmatmul.mubr.msk.bf16.gmra.mrb[152].mxu0 %vm1354_vm1, %v12824_v34  ;;  %v9080_v20 = vmul.f32 -1.442695, %v13135_v11 }
 0x1ff   : > { %v10298_v49 = vpop.eup %10297  ;;  %v13160_v5 = vpop.f32.mrb[47].mxu0  ;;  %10319 = vrcp.f32 %v4454_v13  ;;  %1967 = vmatprep.mubr.bf16.mxu1 %v18970_v21  ;;  %2158 = vmatprep.mubr.bf16.mxu0 %v18970_v21  ;;  %v9079_v29 = vmul.f32 -1.442695, %v13138_v45  ;;  %v9081_v13 = vmul.f32 -1.442695, %v13145_v63  ;;  %v13196_v45 = vadd.f32 %v1658_v35, %v13036_v39 }
 0x200   : > { %v10300_v25 = vpop.eup %10299  ;;  %10321 = vrcp.f32 %v4467_v24  ;;  %v9096_v24 = vmul.f32 -1.442695, %v13155_v3  ;;  %v9095_v34 = vmul.f32 -1.442695, %v13158_v6  ;;  %v5907_v48 = vmul.f32 %v10298_v49, %v13047_v51 }
 0x201   : > { %v10302_v19 = vpop.eup %10301  ;;  %10323 = vpow2.f32 %v9064_v37  ;;  %v13180_v42 = vpop.f32.mrb[16].mxu1  ;;  %v5909_v36 = vmul.f32 %v10300_v25, %v13050_v44 }
 0x202   : > { %v10304_v50 = vpop.eup %10303  ;;  %10325 = vpow2.f32 %v9063_v2  ;;  %v13182_v30 = vpop.f32.mrb[48].mxu0  ;;  %v13187_v2 = vadd.f32 %v1467_v28, %v13033_v61  ;;  %v5908_v28 = vmul.f32 %v10302_v19, %v13053_v14 }
 0x203   : > { %v10306_v57 = vpop.eup %10305  ;;  %10327 = vpow2.f32 %v9065_v8  ;;  %v13189_v3 = vpop.f32.mrb[17].mxu1  ;;  %v5910_v25 = vmul.f32 %v10304_v50, %v13056_v52 }
 0x204   : > { %v10308_v37 = vpop.eup %10307  ;;  %v5923_v17 = vmul.f32 %v10306_v57, %v13061_v7  ;;  %v13191_v6 = vpop.f32.mrb[49].mxu0  ;;  %10329 = vpow2.f32 %v9078_v46  ;;  %v9110_v14 = vmul.f32 -1.442695, %v13187_v2 }
 0x205   : > { %v10310_v56 = vpop.eup %10309  ;;  %v5925_v63 = vmul.f32 %v10308_v37, %v13064_v60  ;;  %v13198_v51 = vpop.f32.mrb[18].mxu1  ;;  %10331 = vpow2.f32 %v9080_v20 }
 0x206   : > { %18977 = vst [vmem:[#allocation30_spill] sm:$0xff] %v13198_v51  ;;  %v13200_v57 = vpop.f32.mrb[50].mxu0  ;;  %v10312_v7 = vpop.eup %10311  ;;  %v7059_v49 = vadd.f32 %v5923_v17, %v5907_v48  ;;  %v5924_v8 = vmul.f32 %v10310_v56, %v13069_v12  ;;  %10333 = vpow2.f32 %v9079_v29  ;;  %v9097_v48 = vmul.f32 -1.442695, %v13178_v27  ;;  %8933 = vmatmul.mubr.msk.bf16.gmra.mrb[124].mxu1 %vm1354_vm1, %v12876_v59  ;;  %8949 = vmatmul.mubr.msk.bf16.gmra.mrb[156].mxu0 %vm1354_vm1, %v12876_v59 }
 0x207   : > { %18978 = vst [vmem:[#allocation31_spill] sm:$0xff] %v13200_v57  ;;  %v13204_v11 = vpop.f32.mrb[19].mxu1  ;;  %v13206_v44 = vpop.f32.mrb[51].mxu0  ;;  %v7131_v35 = vadd.f32 %v5925_v63, %v5909_v36  ;;  %v5926_v46 = vmul.f32 %v10312_v7, %v13072_v16  ;;  %10335 = vpow2.f32 %v9081_v13  ;;  %2199 = vmatprep.mubr.bf16.mxu1 %v18970_v21  ;;  %2390 = vmatprep.mubr.bf16.mxu0 %v18970_v21 }
 0x208   : > { %v10314_v60 = vpop.eup %10313  ;;  %v7095_v57 = vadd.f32 %v5924_v8, %v5908_v28  ;;  %10337 = vpow2.f32 %v9094_v10 }
 0x209   : > { %v10316_v37 = vpop.eup %10315  ;;  %v5939_v51 = vmul.f32 %v10314_v60, %v13085_v31  ;;  %v7167_v56 = vadd.f32 %v5926_v46, %v5910_v25  ;;  %10339 = vpow2.f32 %v9096_v24  ;;  %v9112_v31 = vmul.f32 -1.442695, %v13196_v45  ;;  %v13225_v10 = vpop.f32.mrb[20].mxu1 }
 0x20a   : > { %v10318_v17 = vpop.eup %10317  ;;  %v5941_v63 = vmul.f32 %v10316_v37, %v13088_v15  ;;  %10341 = vpow2.f32 %v9095_v34  ;;  %v13227_v15 = vpop.f32.mrb[52].mxu0 }
 0x20b   : > { %v10320_v52 = vpop.eup %10319  ;;  %v7060_v12 = vadd.f32 %v7059_v49, %v5939_v51  ;;  %v5940_v16 = vmul.f32 %v10318_v17, %v13091_v0  ;;  %10343 = vpow2.f32 %v9097_v48  ;;  %v13232_v0 = vpop.f32.mrb[21].mxu1  ;;  %v13254_v48 = vadd.f32 %v13132_v1, %v13039_v26 }
 0x20c   : > { %v10322_v19 = vpop.eup %10321  ;;  %v5942_v20 = vmul.f32 %v10320_v52, %v13094_v38  ;;  %v13223_v50 = vadd.f32 %v7131_v35, %v5941_v63  ;;  %v13234_v24 = vpop.f32.mrb[53].mxu0  ;;  %v8834_v38 = vcombine.low %v12990_v53, %v12995_v33  ;;  %10345 = vpow2.f32 %v9110_v14 }
 0x20d   : > { %v10324_v29 = vpop.eup %10323  ;;  %v13229_v13 = vadd.f32 %v7095_v57, %v5940_v16  ;;  %v5955_v36 = vmul.f32 %v10322_v19, %v13099_v9  ;;  %v13240_v28 = vpop.f32.mrb[22].mxu1  ;;  %v8836_v9 = vcombine.low %v13000_v23, %v13009_v62  ;;  %10347 = vpow2.f32 %v9112_v31 }
 0x20e   : > { %v10326_v51 = vpop.eup %10325  ;;  %v4469_v7 = vadd.f32 1.0, %v10324_v29  ;;  %v13238_v34 = vadd.f32 %v7167_v56, %v5942_v20  ;;  %v13242_v49 = vpop.f32.mrb[54].mxu0  ;;  %8950 = vmatmul.mubr.msk.bf16.vlgmr.msra.gmra.mrb[128].mxu1 %vm1354_vm1, %v12597_v43  ;;  %8966 = vmatmul.mubr.msk.bf16.vlgmr.msra.gmra.mrb[160].mxu0 %vm1354_vm1, %v12597_v43  ;;  %v9111_v31 = vmul.f32 -1.442695, %v13254_v48  ;;  %v13269_v19 = vadd.f32 %v13140_v41, %v13042_v47 }
 0x20f   : > { %v10328_v57 = vpop.eup %10327  ;;  %v13246_v8 = vadd.f32 %v7060_v12, %v5955_v36  ;;  %v4468_v60 = vadd.f32 1.0, %v10326_v51  ;;  %v13248_v25 = vpop.f32.mrb[23].mxu1  ;;  %2550 = vmatpush1.bf16.msra.mxu1 %v8834_v38  ;;  %2741 = vmatpush1.bf16.msra.mxu0 %v8836_v9  ;;  %v13277_v51 = vadd.f32 %v13142_v32, %v13033_v61 }
 0x210   : > { %v13250_v53 = vpop.f32.mrb[55].mxu0  ;;  %v10330_v33 = vpop.eup %10329  ;;  %10349 = vrcp.f32 %v4469_v7  ;;  %v4470_v35 = vadd.f32 1.0, %v10328_v57  ;;  %2209 = vmatprep.mubr.bf16.mxu1 %v18970_v21  ;;  %2400 = vmatprep.mubr.bf16.mxu0 %v18970_v21  ;;  %v13281_v7 = vadd.f32 %v13150_v55, %v13036_v39 }
 0x211   : > { %v10332_v46 = vpop.eup %10331  ;;  %10351 = vrcp.f32 %v4468_v60  ;;  %v4483_v37 = vadd.f32 1.0, %v10330_v33  ;;  %v13262_v14 = vpop.f32.mrb[24].mxu1  ;;  %v13289_v33 = vadd.f32 %v13152_v18, %v13039_v26 }
 0x212   : > { %v10334_v23 = vpop.eup %10333  ;;  %10353 = vrcp.f32 %v4470_v35  ;;  %v4485_v62 = vadd.f32 1.0, %v10332_v46  ;;  %v13264_v52 = vpop.f32.mrb[56].mxu0  ;;  %v13293_v35 = vadd.f32 %v13160_v5, %v13042_v47  ;;  %v9113_v5 = vmul.f32 -1.442695, %v13269_v19 }
 0x213   : > { %v10336_v17 = vpop.eup %10335  ;;  %10355 = vrcp.f32 %v4483_v37  ;;  %v4484_v56 = vadd.f32 1.0, %v10334_v23  ;;  %v13271_v20 = vpop.f32.mrb[25].mxu1  ;;  %v13301_v23 = vadd.f32 %v13180_v42, %v13033_v61 }
 0x214   : > { %v10338_v1 = vpop.eup %10337  ;;  %10357 = vrcp.f32 %v4485_v62  ;;  %v4486_v63 = vadd.f32 1.0, %v10336_v17  ;;  %v13273_v29 = vpop.f32.mrb[57].mxu0  ;;  %v13305_v62 = vadd.f32 %v13182_v30, %v13036_v39  ;;  %v9126_v30 = vmul.f32 -1.442695, %v13277_v51 }
 0x215   : > { %v10340_v12 = vpop.eup %10339  ;;  %10359 = vrcp.f32 %v4484_v56  ;;  %v4499_v16 = vadd.f32 1.0, %v10338_v1  ;;  %v13283_v9 = vpop.f32.mrb[26].mxu1  ;;  %v13310_v56 = vadd.f32 %v13189_v3, %v13039_v26 }
 0x216   : > { %v10342_v36 = vpop.eup %10341  ;;  %10361 = vrcp.f32 %v4486_v63  ;;  %v4501_v38 = vadd.f32 1.0, %v10340_v12  ;;  %v13285_v57 = vpop.f32.mrb[58].mxu0  ;;  %8951 = vmatmul.mubr.msk.bf16.gmra.mrb[132].mxu1 %vm1354_vm1, %v12592_v40  ;;  %8967 = vmatmul.mubr.msk.bf16.gmra.mrb[164].mxu0 %vm1354_vm1, %v12592_v40  ;;  %v9128_v63 = vmul.f32 -1.442695, %v13281_v7 }
 0x217   : > { %v10344_v41 = vpop.eup %10343  ;;  %10363 = vrcp.f32 %v4499_v16  ;;  %v4500_v60 = vadd.f32 1.0, %v10342_v36  ;;  %v13295_v32 = vpop.f32.mrb[27].mxu1  ;;  %2219 = vmatprep.mubr.bf16.mxu1 %v18970_v21  ;;  %2410 = vmatprep.mubr.bf16.mxu0 %v18970_v21  ;;  %v9127_v16 = vmul.f32 -1.442695, %v13289_v33  ;;  %v9129_v36 = vmul.f32 -1.442695, %v13293_v35 }
 0x218   : > { %v13297_v46 = vpop.f32.mrb[59].mxu0  ;;  %v10346_v55 = vpop.eup %10345  ;;  %10365 = vrcp.f32 %v4501_v38  ;;  %v4502_v37 = vadd.f32 1.0, %v10344_v41 }
 0x219   : > { %v10348_v18 = vpop.eup %10347  ;;  %10367 = vrcp.f32 %v4500_v60  ;;  %v4515_v17 = vadd.f32 1.0, %v10346_v55  ;;  %v9142_v60 = vmul.f32 -1.442695, %v13301_v23  ;;  %v9144_v55 = vmul.f32 -1.442695, %v13305_v62 }
 0x21a   : > { %v10350_v42 = vpop.eup %10349  ;;  %10369 = vrcp.f32 %v4502_v37  ;;  %v4517_v1 = vadd.f32 1.0, %v10348_v18  ;;  %v13326_v37 = vpop.f32.mrb[28].mxu1 }
 0x21b   : > { %v10352_v12 = vpop.eup %10351  ;;  %v5957_v3 = vmul.f32 %v10350_v42, %v13111_v4  ;;  %10371 = vrcp.f32 %v4515_v17  ;;  %v13328_v18 = vpop.f32.mrb[60].mxu0  ;;  %v9143_v42 = vmul.f32 -1.442695, %v13310_v56 }
 0x21c   : > { %v10354_v38 = vpop.eup %10353  ;;  %v5956_v41 = vmul.f32 %v10352_v12, %v13116_v22  ;;  %10373 = vrcp.f32 %v4517_v1  ;;  %18979 = vst [vmem:[#allocation32_spill] sm:$0xff] %v13328_v18  ;;  %v13333_v43 = vpop.f32.mrb[29].mxu1  ;;  %v13341_v18 = vadd.f32 %v13191_v6, %v13042_v47 }
 0x21d   : > { %v10356_v40 = vpop.eup %10355  ;;  %v7133_v4 = vadd.f32 %v13223_v50, %v5957_v3  ;;  %v5958_v17 = vmul.f32 %v10354_v38, %v13126_v58  ;;  %10375 = vpow2.f32 %v9111_v31  ;;  %18980 = vst [vmem:[#allocation33_spill] sm:$0xff] %v13333_v43  ;;  %v13335_v22 = vpop.f32.mrb[61].mxu0  ;;  %v18984_v38 = vld [vmem:[#allocation24_spill] sm:$0xff] }
 0x21e   : > { %18981 = vst [vmem:[#allocation34_spill] sm:$0xff] %v13335_v22  ;;  %v10358_v1 = vpop.eup %10357  ;;  %v7097_v12 = vadd.f32 %v13229_v13, %v5956_v41  ;;  %v5971_v59 = vmul.f32 %v10356_v40, %v13130_v54  ;;  %10377 = vpow2.f32 %v9113_v5  ;;  %v13343_v50 = vpop.f32.mrb[30].mxu1  ;;  %v18985_v22 = vld [vmem:[#allocation30_spill] sm:$0xff]  ;;  %v18988_v5 = vld [vmem:[#allocation25_spill] sm:$0xff] }
 0x21f   : > { %18982 = vst [vmem:[#allocation35_spill] sm:$0xff] %v13343_v50  ;;  %v13345_v58 = vpop.f32.mrb[62].mxu0  ;;  %v10360_v31 = vpop.eup %10359  ;;  %v7169_v3 = vadd.f32 %v13238_v34, %v5958_v17  ;;  %v5973_v43 = vmul.f32 %v10358_v1, %v18984_v38  ;;  %10379 = vpow2.f32 %v9126_v30  ;;  %v13351_v13 = vadd.f32 %v18985_v22, %v13033_v61  ;;  %v18990_v1 = vld [vmem:[#allocation26_spill] sm:$0xff] }
 0x220   : > { %18983 = vst [vmem:[#allocation36_spill] sm:$0xff] %v13345_v58  ;;  %v13353_v40 = vpop.f32.mrb[31].mxu1  ;;  %v13355_v54 = vpop.f32.mrb[63].mxu0  ;;  %v5972_v41 = vmul.f32 %v10360_v31, %v18988_v5  ;;  %v7062_v50 = vadd.f32 %v13246_v8, %v5971_v59  ;;  %10381 = vpow2.f32 %v9128_v63  ;;  %v18989_v58 = vld [vmem:[#allocation31_spill] sm:$0xff]  ;;  %v13366_v22 = vadd.f32 %v13204_v11, %v13039_v26 }
 0x221   : > { %18986 = vst [vmem:[#allocation24_spill] sm:$0xff] %v13353_v40  ;;  %18987 = vst [vmem:[#allocation30_spill] sm:$0xff] %v13355_v54  ;;  %v10362_v6 = vpop.eup %10361  ;;  %v13361_v34 = vadd.f32 %v18989_v58, %v13036_v39  ;;  %v7134_v30 = vadd.f32 %v7133_v4, %v5973_v43  ;;  %10383 = vpow2.f32 %v9127_v16  ;;  %v18991_v54 = vld [vmem:[#allocation6_spill] sm:$0xff]  ;;  %v18992_v8 = vld [vmem:[#allocation27_spill] sm:$0xff]  ;;  %v9145_v43 = vmul.f32 -1.442695, %v13341_v18 }
 0x222   : > { %v10364_v17 = vpop.eup %10363  ;;  %v5974_v38 = vmul.f32 %v10362_v6, %v18990_v1  ;;  %8952 = vmatmul.mubr.msk.bf16.gmra.mrb[136].mxu1 %vm1354_vm1, %v18991_v54  ;;  %8968 = vmatmul.mubr.msk.bf16.gmra.mrb[168].mxu0 %vm1354_vm1, %v18991_v54  ;;  %v7098_v58 = vadd.f32 %v7097_v12, %v5972_v41  ;;  %10385 = vpow2.f32 %v9129_v36  ;;  %v18993_v4 = vld [vmem:[#allocation28_spill] sm:$0xff]  ;;  %v9158_v6 = vmul.f32 -1.442695, %v13351_v13  ;;  %v18994_v54 = vld [vmem:[#allocation29_spill] sm:$0xff]  ;;  %v13380_v12 = vpop.f32.mrb[32].mxu1 }
 0x223   : > { %v10366_v59 = vpop.eup %10365  ;;  %v5987_v63 = vmul.f32 %v10364_v17, %v18992_v8  ;;  %2229 = vmatprep.mubr.bf16.mxu1 %v18970_v21  ;;  %2420 = vmatprep.mubr.bf16.mxu0 %v18970_v21  ;;  %10387 = vpow2.f32 %v9142_v60  ;;  %v9160_v36 = vmul.f32 -1.442695, %v13361_v34  ;;  %v13382_v41 = vpop.f32.mrb[64].mxu0  ;;  %v9159_v60 = vmul.f32 -1.442695, %v13366_v22 }
 0x224   : > { %v10368_v16 = vpop.eup %10367  ;;  %v7170_v11 = vadd.f32 %v7169_v3, %v5974_v38  ;;  %v5989_v31 = vmul.f32 %v10366_v59, %v18993_v4  ;;  %10389 = vpow2.f32 %v9144_v55  ;;  %v13386_v38 = vpop.f32.mrb[33].mxu1 }
 0x225   : > { %v10370_v5 = vpop.eup %10369  ;;  %v7063_v1 = vadd.f32 %v7062_v50, %v5987_v63  ;;  %v5988_v40 = vmul.f32 %v10368_v16, %v18994_v54  ;;  %10391 = vpow2.f32 %v9143_v42  ;;  %v13388_v59 = vpop.f32.mrb[65].mxu0 }
 0x226   : > { %v10372_v17 = vpop.eup %10371  ;;  %v7135_v8 = vadd.f32 %v7134_v30, %v5989_v31  ;;  %v5990_v3 = vmul.f32 %v10370_v5, %v13178_v27  ;;  %10393 = vpow2.f32 %v9145_v43  ;;  %v13393_v63 = vpop.f32.mrb[34].mxu1 }
 0x227   : > { %v10374_v50 = vpop.eup %10373  ;;  %v13390_v54 = vadd.f32 %v7098_v58, %v5988_v40  ;;  %v6003_v55 = vmul.f32 %v10372_v17, %v13187_v2  ;;  %v13395_v16 = vpop.f32.mrb[66].mxu0  ;;  %10395 = vpow2.f32 %v9158_v6 }
 0x228   : > { %18995 = vst [vmem:[#allocation25_spill] sm:$0xff] %v13395_v16  ;;  %v10376_v30 = vpop.eup %10375  ;;  %v13397_v4 = vadd.f32 %v7170_v11, %v5990_v3  ;;  %v6005_v27 = vmul.f32 %v10374_v50, %v13196_v45  ;;  %v13400_v42 = vpop.f32.mrb[35].mxu1  ;;  %10397 = vpow2.f32 %v9160_v36  ;;  %v18998_v16 = vld [vmem:[#allocation5_spill] sm:$0xff]  ;;  %v13416_v3 = vadd.f32 %v13206_v44, %v13042_v47 }
 0x229   : > { %18996 = vst [vmem:[#allocation31_spill] sm:$0xff] %v13400_v42  ;;  %v13402_v31 = vpop.f32.mrb[67].mxu0  ;;  %v10378_v5 = vpop.eup %10377  ;;  %v13404_v40 = vadd.f32 %v7063_v1, %v6003_v55  ;;  %v4516_v58 = vadd.f32 1.0, %v10376_v30  ;;  %10399 = vpow2.f32 %v9159_v60 }
 0x22a   : > { %18997 = vst [vmem:[#allocation26_spill] sm:$0xff] %v13402_v31  ;;  %v10380_v2 = vpop.eup %10379  ;;  %v13406_v43 = vadd.f32 %v7135_v8, %v6005_v27  ;;  %v4518_v17 = vadd.f32 1.0, %v10378_v5  ;;  %8953 = vmatmul.mubr.msk.bf16.gmra.mrb[140].mxu1 %vm1354_vm1, %v18998_v16  ;;  %8969 = vmatmul.mubr.msk.bf16.gmra.mrb[172].mxu0 %vm1354_vm1, %v18998_v16  ;;  %v13418_v60 = vpop.f32.mrb[36].mxu1  ;;  %v9161_v16 = vmul.f32 -1.442695, %v13416_v3 }
 0x22b   : > { %v10382_v45 = vpop.eup %10381  ;;  %10401 = vrcp.f32 %v4516_v58  ;;  %v4531_v11 = vadd.f32 1.0, %v10380_v2  ;;  %2239 = vmatprep.mubr.bf16.mxu1 %v18970_v21  ;;  %2430 = vmatprep.mubr.bf16.mxu0 %v18970_v21  ;;  %18999 = vst [vmem:[#allocation27_spill] sm:$0xff] %v13418_v60  ;;  %v13420_v50 = vpop.f32.mrb[68].mxu0 }
 0x22c   : > { %v10384_v6 = vpop.eup %10383  ;;  %10403 = vrcp.f32 %v4518_v17  ;;  %v4533_v1 = vadd.f32 1.0, %v10382_v45  ;;  %19000 = vst [vmem:[#allocation28_spill] sm:$0xff] %v13420_v50  ;;  %v13422_v27 = vpop.f32.mrb[37].mxu1 }
 0x22d   : > { %v10386_v36 = vpop.eup %10385  ;;  %10405 = vrcp.f32 %v4531_v11  ;;  %v4532_v8 = vadd.f32 1.0, %v10384_v6  ;;  %19001 = vst [vmem:[#allocation29_spill] sm:$0xff] %v13422_v27  ;;  %v13424_v2 = vpop.f32.mrb[69].mxu0  ;;  %v13430_v11 = vadd.f32 %v13225_v10, %v13033_v61  ;;  %v13434_v6 = vadd.f32 %v13227_v15, %v13036_v39 }
 0x22e   : > { %v10388_v55 = vpop.eup %10387  ;;  %10407 = vrcp.f32 %v4533_v1  ;;  %v4534_v30 = vadd.f32 1.0, %v10386_v36  ;;  %19002 = vst [vmem:[#allocation37_spill] sm:$0xff] %v13424_v2  ;;  %v13426_v17 = vpop.f32.mrb[38].mxu1  ;;  %v13449_v15 = vadd.f32 %v13234_v24, %v13042_v47  ;;  %v13465_v24 = vadd.f32 %v13248_v25, %v13039_v26 }
 0x22f   : > { %v10390_v5 = vpop.eup %10389  ;;  %10409 = vrcp.f32 %v4532_v8  ;;  %v4547_v58 = vadd.f32 1.0, %v10388_v55  ;;  %19003 = vst [vmem:[#allocation38_spill] sm:$0xff] %v13426_v17  ;;  %v13436_v1 = vpop.f32.mrb[70].mxu0  ;;  %v13474_v25 = vadd.f32 %v13250_v53, %v13042_v47 }
 0x230   : > { %v10392_v45 = vpop.eup %10391  ;;  %10411 = vrcp.f32 %v4534_v30  ;;  %v4549_v44 = vadd.f32 1.0, %v10390_v5  ;;  %19004 = vst [vmem:[#allocation39_spill] sm:$0xff] %v13436_v1  ;;  %v13438_v36 = vpop.f32.mrb[39].mxu1  ;;  %v13443_v30 = vadd.f32 %v13232_v0, %v13039_v26 }
 0x231   : > { %19005 = vst [vmem:[#allocation40_spill] sm:$0xff] %v13438_v36  ;;  %v10394_v8 = vpop.eup %10393  ;;  %10413 = vrcp.f32 %v4547_v58  ;;  %v4548_v55 = vadd.f32 1.0, %v10392_v45  ;;  %v13445_v5 = vpop.f32.mrb[71].mxu0  ;;  %v13453_v36 = vadd.f32 %v13240_v28, %v13033_v61  ;;  %v19007_v58 = vld [vmem:[#allocation8_spill] sm:$0xff] }
 0x232   : > { %19006 = vst [vmem:[#allocation41_spill] sm:$0xff] %v13445_v5  ;;  %v10396_v10 = vpop.eup %10395  ;;  %10415 = vrcp.f32 %v4549_v44  ;;  %v4550_v17 = vadd.f32 1.0, %v10394_v8  ;;  %8954 = vmatmul.mubr.msk.bf16.gmra.mrb[144].mxu1 %vm1354_vm1, %v19007_v58  ;;  %8970 = vmatmul.mubr.msk.bf16.gmra.mrb[176].mxu0 %vm1354_vm1, %v19007_v58  ;;  %v13461_v44 = vadd.f32 %v13242_v49, %v13036_v39  ;;  %v9174_v58 = vmul.f32 -1.442695, %v13430_v11  ;;  %v13476_v1 = vpop.f32.mrb[40].mxu1 }
 0x233   : > { %v10398_v0 = vpop.eup %10397  ;;  %10417 = vrcp.f32 %v4548_v55  ;;  %v4563_v45 = vadd.f32 1.0, %v10396_v10  ;;  %2249 = vmatprep.mubr.bf16.mxu1 %v18970_v21  ;;  %2440 = vmatprep.mubr.bf16.mxu0 %v18970_v21  ;;  %v9176_v55 = vmul.f32 -1.442695, %v13434_v6  ;;  %v9175_v49 = vmul.f32 -1.442695, %v13443_v30  ;;  %19008 = vst [vmem:[#allocation42_spill] sm:$0xff] %v13476_v1 }
 0x234   : > { %v10400_v28 = vpop.eup %10399  ;;  %10419 = vrcp.f32 %v4550_v17  ;;  %v4565_v8 = vadd.f32 1.0, %v10398_v0  ;;  %v13478_v2 = vpop.f32.mrb[72].mxu0  ;;  %v9177_v0 = vmul.f32 -1.442695, %v13449_v15  ;;  %v9190_v50 = vmul.f32 -1.442695, %v13453_v36 }
 0x235   : > { %v10402_v10 = vpop.eup %10401  ;;  %10421 = vrcp.f32 %v4563_v45  ;;  %v4564_v5 = vadd.f32 1.0, %v10400_v28  ;;  %19009 = vst [vmem:[#allocation43_spill] sm:$0xff] %v13478_v2  ;;  %v13483_v45 = vpop.f32.mrb[41].mxu1  ;;  %v9192_v1 = vmul.f32 -1.442695, %v13461_v44 }
 0x236   : > { %v10404_v27 = vpop.eup %10403  ;;  %v6004_v17 = vmul.f32 %v10402_v10, %v13254_v48  ;;  %10423 = vrcp.f32 %v4565_v8  ;;  %19010 = vst [vmem:[#allocation44_spill] sm:$0xff] %v13483_v45  ;;  %v13485_v28 = vpop.f32.mrb[73].mxu0  ;;  %v9191_v2 = vmul.f32 -1.442695, %v13465_v24 }
 0x237   : > { %19011 = vst [vmem:[#allocation45_spill] sm:$0xff] %v13485_v28  ;;  %v10406_v60 = vpop.eup %10405  ;;  %v6006_v53 = vmul.f32 %v10404_v27, %v13269_v19  ;;  %10425 = vrcp.f32 %v4564_v5  ;;  %v13490_v31 = vpop.f32.mrb[42].mxu1  ;;  %v13498_v28 = vadd.f32 %v13262_v14, %v13033_v61  ;;  %v13511_v14 = vadd.f32 %v13264_v52, %v13036_v39 }
 0x238   : > { %19012 = vst [vmem:[#allocation46_spill] sm:$0xff] %v13490_v31  ;;  %v13492_v48 = vpop.f32.mrb[74].mxu0  ;;  %v10408_v8 = vpop.eup %10407  ;;  %v7100_v10 = vadd.f32 %v13390_v54, %v6004_v17  ;;  %v6019_v42 = vmul.f32 %v10406_v60, %v13277_v51  ;;  %10427 = vpow2.f32 %v9161_v16  ;;  %v19014_v60 = vld [vmem:[#allocation7_spill] sm:$0xff] }
 0x239   : > { %19013 = vst [vmem:[#allocation47_spill] sm:$0xff] %v13492_v48  ;;  %v13500_v19 = vpop.f32.mrb[43].mxu1  ;;  %v13502_v27 = vpop.f32.mrb[75].mxu0  ;;  %v7172_v45 = vadd.f32 %v13397_v4, %v6006_v53  ;;  %v6021_v31 = vmul.f32 %v10408_v8, %v13281_v7  ;;  %10429 = vpow2.f32 %v9174_v58  ;;  %v9193_v48 = vmul.f32 -1.442695, %v13474_v25 }
 0x23a   : > { %v10410_v5 = vpop.eup %10409  ;;  %v7065_v51 = vadd.f32 %v13404_v40, %v6019_v42  ;;  %10431 = vpow2.f32 %v9176_v55  ;;  %8955 = vmatmul.mubr.msk.bf16.gmra.mrb[148].mxu1 %vm1354_vm1, %v19014_v60  ;;  %8971 = vmatmul.mubr.msk.bf16.gmra.mrb[180].mxu0 %vm1354_vm1, %v19014_v60  ;;  %v13528_v55 = vadd.f32 %v13273_v29, %v13042_v47  ;;  %v13534_v17 = vpop.f32.mrb[76].mxu0 }
 0x23b   : > { %v10412_v54 = vpop.eup %10411  ;;  %v6020_v16 = vmul.f32 %v10410_v5, %v13289_v33  ;;  %v7137_v4 = vadd.f32 %v13406_v43, %v6021_v31  ;;  %10433 = vpow2.f32 %v9175_v49  ;;  %v13521_v33 = vadd.f32 %v13271_v20, %v13039_v26  ;;  %2259 = vmatprep.mubr.bf16.mxu1 %v18970_v21  ;;  %2450 = vmatprep.mubr.bf16.mxu0 %v18970_v21  ;;  %v13532_v49 = vpop.f32.mrb[44].mxu1 }
 0x23c   : > { %v10414_v7 = vpop.eup %10413  ;;  %v6022_v58 = vmul.f32 %v10412_v54, %v13293_v35  ;;  %10435 = vpow2.f32 %v9177_v0  ;;  %v9206_v20 = vmul.f32 -1.442695, %v13498_v28  ;;  %v9208_v0 = vmul.f32 -1.442695, %v13511_v14  ;;  %v13538_v29 = vpop.f32.mrb[45].mxu1 }
 0x23d   : > { %v10416_v52 = vpop.eup %10415  ;;  %v7101_v42 = vadd.f32 %v7100_v10, %v6020_v16  ;;  %v6035_v40 = vmul.f32 %v10414_v7, %v13301_v23  ;;  %10437 = vpow2.f32 %v9190_v50  ;;  %v13540_v10 = vpop.f32.mrb[77].mxu0  ;;  %v9207_v5 = vmul.f32 -1.442695, %v13521_v33 }
 0x23e   : > { %v10418_v31 = vpop.eup %10417  ;;  %v7173_v35 = vadd.f32 %v7172_v45, %v6022_v58  ;;  %v6037_v43 = vmul.f32 %v10416_v52, %v13305_v62  ;;  %10439 = vpow2.f32 %v9192_v1  ;;  %v13544_v54 = vpop.f32.mrb[46].mxu1  ;;  %v9209_v7 = vmul.f32 -1.442695, %v13528_v55 }
 0x23f   : > { %v10420_v53 = vpop.eup %10419  ;;  %v7066_v8 = vadd.f32 %v7065_v51, %v6035_v40  ;;  %v6036_v23 = vmul.f32 %v10418_v31, %v13310_v56  ;;  %10441 = vpow2.f32 %v9191_v2  ;;  %v13546_v16 = vpop.f32.mrb[78].mxu0 }
 0x240   : > { %v10422_v45 = vpop.eup %10421  ;;  %v7138_v62 = vadd.f32 %v7137_v4, %v6037_v43  ;;  %v6038_v50 = vmul.f32 %v10420_v53, %v13341_v18  ;;  %10443 = vpow2.f32 %v9193_v48  ;;  %v13550_v58 = vpop.f32.mrb[47].mxu1  ;;  %v908_v53 = vld [vmem:[%s18834_s3 + $0xb0] sm:$0xff] }
 0x241   : > { %v10424_v51 = vpop.eup %10423  ;;  %v7102_v56 = vadd.f32 %v7101_v42, %v6036_v23  ;;  %v6051_v1 = vmul.f32 %v10422_v45, %v13351_v13  ;;  %v13552_v52 = vpop.f32.mrb[79].mxu0  ;;  %10445 = vpow2.f32 %v9206_v20  ;;  %v19016_v13 = vld [vmem:[#allocation10_spill] sm:$0xff] }
 0x242   : > { %19015 = vst [vmem:[#allocation48_spill] sm:$0xff] %v13552_v52  ;;  %v10426_v4 = vpop.eup %10425  ;;  %v13554_v18 = vadd.f32 %v7173_v35, %v6038_v50  ;;  %v6053_v2 = vmul.f32 %v10424_v51, %v13361_v34  ;;  %10447 = vpow2.f32 %v9208_v0  ;;  %8956 = vmatmul.mubr.msk.bf16.gmra.mrb[152].mxu1 %vm1354_vm1, %v19016_v13  ;;  %8972 = vmatmul.mubr.msk.bf16.gmra.mrb[184].mxu0 %vm1354_vm1, %v19016_v13  ;;  %v13576_v45 = vpop.f32.mrb[48].mxu1  ;;  %v909_v51 = vld [vmem:[%s18834_s3 + $0xb8] sm:$0xff] }
 0x243   : > { %v10428_v40 = vpop.eup %10427  ;;  %v13557_v31 = vadd.f32 %v7066_v8, %v6051_v1  ;;  %v6052_v42 = vmul.f32 %v10426_v4, %v13366_v22  ;;  %10449 = vpow2.f32 %v9207_v5  ;;  %2269 = vmatprep.mubr.bf16.mxu1 %v18970_v21  ;;  %2460 = vmatprep.mubr.bf16.mxu0 %v18970_v21  ;;  %v916_v8 = vld [vmem:[%s18834_s3 + $0xf0] sm:$0xff]  ;;  %19017 = vst [vmem:[#allocation49_spill] sm:$0xff] %v13576_v45  ;;  %v13586_v1 = vpop.f32.mrb[49].mxu1 }
 0x244   : > { %v10430_v48 = vpop.eup %10429  ;;  %v13564_v43 = vadd.f32 %v7138_v62, %v6053_v2  ;;  %v4566_v35 = vadd.f32 1.0, %v10428_v40  ;;  %10451 = vpow2.f32 %v9209_v7  ;;  %v13578_v62 = vpop.f32.mrb[80].mxu0  ;;  %19019 = vst [vmem:[#allocation51_spill] sm:$0xff] %v13586_v1  ;;  %v13592_v40 = vadd.f32 %v13283_v9, %v13033_v61 }
 0x245   : > { %v10432_v34 = vpop.eup %10431  ;;  %v13568_v20 = vadd.f32 %v7102_v56, %v6052_v42  ;;  %v4579_v22 = vadd.f32 1.0, %v10430_v48  ;;  %19018 = vst [vmem:[#allocation50_spill] sm:$0xff] %v13578_v62  ;;  %v917_v56 = vld [vmem:[%s18834_s3 + $0xf8] sm:$0xff]  ;;  %v13588_v7 = vpop.f32.mrb[81].mxu0  ;;  %v8850_v42 = vcombine.low %v908_v53, %v916_v8  ;;  %v8851_v13 = vcombine.high %v908_v53, %v916_v8 }
 0x246   : > { %v10434_v23 = vpop.eup %10433  ;;  %10453 = vrcp.f32 %v4566_v35  ;;  %v4581_v0 = vadd.f32 1.0, %v10432_v34  ;;  %19020 = vst [vmem:[#allocation52_spill] sm:$0xff] %v13588_v7  ;;  %v13594_v48 = vpop.f32.mrb[50].mxu1  ;;  %v8852_v7 = vcombine.low %v909_v51, %v917_v56  ;;  %v8853_v1 = vcombine.high %v909_v51, %v917_v56 }
 0x247   : > { %v10436_v50 = vpop.eup %10435  ;;  %10455 = vrcp.f32 %v4579_v22  ;;  %v4580_v5 = vadd.f32 1.0, %v10434_v23  ;;  %19021 = vst [vmem:[#allocation53_spill] sm:$0xff] %v13594_v48  ;;  %v13596_v35 = vpop.f32.mrb[82].mxu0  ;;  %v13600_v23 = vadd.f32 %v13285_v57, %v13036_v39  ;;  %2551 = vmatprep.subr.bf16.mxu1 %v8851_v13  ;;  %v19025_v57 = vld [vmem:[#allocation9_spill] sm:$0xff]  ;;  %v19026_v13 = vld [vmem:[#allocation32_spill] sm:$0xff] }
 0x248   : > { %v10438_v4 = vpop.eup %10437  ;;  %10457 = vrcp.f32 %v4581_v0  ;;  %v4582_v2 = vadd.f32 1.0, %v10436_v50  ;;  %19022 = vst [vmem:[#allocation54_spill] sm:$0xff] %v13596_v35  ;;  %v13602_v60 = vpop.f32.mrb[51].mxu1  ;;  %2742 = vmatprep.subr.bf16.mxu0 %v8853_v1  ;;  %2552 = vmatpush1.bf16.msra.mxu1 %v8850_v42  ;;  %v19027_v42 = vld [vmem:[#allocation33_spill] sm:$0xff] }
 0x249   : > { %v10440_v34 = vpop.eup %10439  ;;  %10459 = vrcp.f32 %v4580_v5  ;;  %v4595_v22 = vadd.f32 1.0, %v10438_v4  ;;  %19023 = vst [vmem:[#allocation55_spill] sm:$0xff] %v13602_v60  ;;  %v13604_v0 = vpop.f32.mrb[83].mxu0  ;;  %v13608_v5 = vadd.f32 %v13295_v32, %v13039_v26  ;;  %v9222_v4 = vmul.f32 -1.442695, %v13592_v40  ;;  %2743 = vmatpush1.bf16.msra.mxu0 %v8852_v7 }
 0x24a   : > { %19024 = vst [vmem:[#allocation56_spill] sm:$0xff] %v13604_v0  ;;  %v10442_v50 = vpop.eup %10441  ;;  %10461 = vrcp.f32 %v4582_v2  ;;  %v4597_v9 = vadd.f32 1.0, %v10440_v34  ;;  %8957 = vmatmul.mubr.msk.bf16.gmra.mrb[156].mxu1 %vm1354_vm1, %v19025_v57  ;;  %v13615_v2 = vadd.f32 %v13297_v46, %v13042_v47  ;;  %v13619_v32 = vadd.f32 %v13326_v37, %v13033_v61  ;;  %8973 = vmatmul.mubr.msk.bf16.gmra.mrb[188].mxu0 %vm1354_vm1, %v19025_v57  ;;  %v13633_v37 = vpop.f32.mrb[52].mxu1 }
 0x24b   : > { %v10444_v48 = vpop.eup %10443  ;;  %10463 = vrcp.f32 %v4595_v22  ;;  %v4596_v35 = vadd.f32 1.0, %v10442_v50  ;;  %v13623_v34 = vadd.f32 %v19026_v13, %v13036_v39  ;;  %2279 = vmatprep.mubr.bf16.mxu1 %v18970_v21  ;;  %v9224_v1 = vmul.f32 -1.442695, %v13600_v23  ;;  %19028 = vst [vmem:[#allocation32_spill] sm:$0xff] %v13633_v37  ;;  %2470 = vmatprep.mubr.bf16.mxu0 %v18970_v21 }
 0x24c   : > { %v10446_v53 = vpop.eup %10445  ;;  %10465 = vrcp.f32 %v4597_v9  ;;  %v4598_v8 = vadd.f32 1.0, %v10444_v48  ;;  %v9223_v7 = vmul.f32 -1.442695, %v13608_v5  ;;  %v19029_v9 = vld [vmem:[#allocation34_spill] sm:$0xff]  ;;  %v9225_v57 = vmul.f32 -1.442695, %v13615_v2 }
 0x24d   : > { %v10448_v51 = vpop.eup %10447  ;;  %10467 = vrcp.f32 %v4596_v35  ;;  %v4611_v56 = vadd.f32 1.0, %v10446_v53  ;;  %v13629_v35 = vadd.f32 %v19027_v42, %v13039_v26  ;;  %v13638_v53 = vadd.f32 %v19029_v9, %v13042_v47 }
 0x24e   : > { %v10450_v48 = vpop.eup %10449  ;;  %10469 = vrcp.f32 %v4598_v8  ;;  %v4613_v46 = vadd.f32 1.0, %v10448_v51  ;;  %v13640_v8 = vpop.f32.mrb[84].mxu0  ;;  %v9240_v60 = vmul.f32 -1.442695, %v13623_v34 }
 0x24f   : > { %v10452_v22 = vpop.eup %10451  ;;  %10471 = vrcp.f32 %v4611_v56  ;;  %v4612_v50 = vadd.f32 1.0, %v10450_v48  ;;  %19030 = vst [vmem:[#allocation33_spill] sm:$0xff] %v13640_v8  ;;  %v13642_v51 = vpop.f32.mrb[53].mxu1  ;;  %v19032_v56 = vld [vmem:[#allocation35_spill] sm:$0xff] }
 0x250   : > { %19031 = vst [vmem:[#allocation34_spill] sm:$0xff] %v13642_v51  ;;  %v10454_v13 = vpop.eup %10453  ;;  %10473 = vrcp.f32 %v4613_v46  ;;  %v4614_v42 = vadd.f32 1.0, %v10452_v22  ;;  %v13648_v48 = vadd.f32 %v19032_v56, %v13033_v61  ;;  %v13650_v37 = vpop.f32.mrb[85].mxu0  ;;  %v9238_v51 = vmul.f32 -1.442695, %v13619_v32 }
 0x251   : > { %19033 = vst [vmem:[#allocation35_spill] sm:$0xff] %v13650_v37  ;;  %v13652_v0 = vpop.f32.mrb[54].mxu1  ;;  %v10456_v9 = vpop.eup %10455  ;;  %v6054_v8 = vmul.f32 %v10454_v13, %v13416_v3  ;;  %10475 = vrcp.f32 %v4612_v50  ;;  %v9239_v37 = vmul.f32 -1.442695, %v13629_v35 }
 0x252   : > { %19034 = vst [vmem:[#allocation57_spill] sm:$0xff] %v13652_v0  ;;  %v13657_v46 = vpop.f32.mrb[86].mxu0  ;;  %v13659_v22 = vpop.f32.mrb[55].mxu1  ;;  %v6067_v56 = vmul.f32 %v10456_v9, %v13430_v11  ;;  %10477 = vrcp.f32 %v4614_v42  ;;  %v19037_v0 = vld [vmem:[#allocation36_spill] sm:$0xff] }
 0x253   : > { %19035 = vst [vmem:[#allocation58_spill] sm:$0xff] %v13657_v46  ;;  %19036 = vst [vmem:[#allocation59_spill] sm:$0xff] %v13659_v22  ;;  %v10458_v62 = vpop.eup %10457  ;;  %v13665_v45 = vadd.f32 %v19037_v0, %v13036_v39  ;;  %v13667_v3 = vpop.f32.mrb[87].mxu0  ;;  %v7175_v13 = vadd.f32 %v13554_v18, %v6054_v8  ;;  %10479 = vpow2.f32 %v9222_v4  ;;  %v9241_v22 = vmul.f32 -1.442695, %v13638_v53  ;;  %v19039_v46 = vld [vmem:[#allocation12_spill] sm:$0xff] }
 0x254   : > { %19038 = vst [vmem:[#allocation36_spill] sm:$0xff] %v13667_v3  ;;  %v10460_v50 = vpop.eup %10459  ;;  %v6069_v52 = vmul.f32 %v10458_v62, %v13434_v6  ;;  %8958 = vmatmul.mubr.msk.bf16.gmra.mrb[160].mxu1 %vm1354_vm1, %v19039_v46  ;;  %v7068_v42 = vadd.f32 %v13557_v31, %v6067_v56  ;;  %10481 = vpow2.f32 %v9224_v1  ;;  %v9254_v0 = vmul.f32 -1.442695, %v13648_v48  ;;  %v19040_v62 = vld [vmem:[#allocation24_spill] sm:$0xff]  ;;  %v19041_v1 = vld [vmem:[#allocation30_spill] sm:$0xff]  ;;  %8974 = vmatmul.mubr.msk.bf16.gmra.mrb[192].mxu0 %vm1354_vm1, %v19039_v46 }
 0x255   : > { %v10462_v11 = vpop.eup %10461  ;;  %v6068_v9 = vmul.f32 %v10460_v50, %v13443_v30  ;;  %2289 = vmatprep.mubr.bf16.mxu1 %v18970_v21  ;;  %10483 = vpow2.f32 %v9223_v7  ;;  %v13682_v4 = vadd.f32 %v19040_v62, %v13039_v26  ;;  %v13688_v56 = vadd.f32 %v19041_v1, %v13042_v47  ;;  %2480 = vmatprep.mubr.bf16.mxu0 %v18970_v21 }
 0x256   : > { %v10464_v3 = vpop.eup %10463  ;;  %v7140_v18 = vadd.f32 %v13564_v43, %v6069_v52  ;;  %v6070_v6 = vmul.f32 %v10462_v11, %v13449_v15  ;;  %10485 = vpow2.f32 %v9225_v57  ;;  %v13692_v52 = vpop.f32.mrb[56].mxu1 }
 0x257   : > { %v10466_v8 = vpop.eup %10465  ;;  %v7104_v31 = vadd.f32 %v13568_v20, %v6068_v9  ;;  %v6083_v30 = vmul.f32 %v10464_v3, %v13453_v36  ;;  %v13694_v15 = vpop.f32.mrb[88].mxu0  ;;  %10487 = vpow2.f32 %v9238_v51  ;;  %v13699_v36 = vadd.f32 %v13380_v12, %v13033_v61 }
 0x258   : > { %v10468_v43 = vpop.eup %10467  ;;  %v7176_v7 = vadd.f32 %v7175_v13, %v6070_v6  ;;  %v6085_v50 = vmul.f32 %v10466_v8, %v13461_v44  ;;  %v13701_v20 = vpop.f32.mrb[57].mxu1  ;;  %10489 = vpow2.f32 %v9240_v60  ;;  %v9256_v13 = vmul.f32 -1.442695, %v13665_v45 }
 0x259   : > { %v13703_v57 = vpop.f32.mrb[89].mxu0  ;;  %v10470_v3 = vpop.eup %10469  ;;  %v7069_v11 = vadd.f32 %v7068_v42, %v6083_v30  ;;  %v6084_v9 = vmul.f32 %v10468_v43, %v13465_v24  ;;  %10491 = vpow2.f32 %v9239_v37  ;;  %v9255_v8 = vmul.f32 -1.442695, %v13682_v4  ;;  %v19046_v37 = vld [vmem:[#allocation11_spill] sm:$0xff] }
 0x25a   : > { %v13708_v6 = vpop.f32.mrb[58].mxu1  ;;  %v13710_v44 = vpop.f32.mrb[90].mxu0  ;;  %v7141_v12 = vadd.f32 %v7140_v18, %v6085_v50  ;;  %v6086_v62 = vmul.f32 %v10470_v3, %v13474_v25  ;;  %10493 = vpow2.f32 %v9241_v22  ;;  %v9257_v30 = vmul.f32 -1.442695, %v13688_v56 }
 0x25b   : > { %19042 = vst [vmem:[#allocation24_spill] sm:$0xff] %v13708_v6  ;;  %19043 = vst [vmem:[#allocation30_spill] sm:$0xff] %v13710_v44  ;;  %v10472_v51 = vpop.eup %10471  ;;  %v13714_v1 = vpop.f32.mrb[59].mxu1  ;;  %v7105_v24 = vadd.f32 %v7104_v31, %v6084_v9  ;;  %10495 = vpow2.f32 %v9254_v0  ;;  %v9270_v25 = vmul.f32 -1.442695, %v13699_v36 }
 0x25c   : > { %19044 = vst [vmem:[#allocation60_spill] sm:$0xff] %v13714_v1  ;;  %v13716_v46 = vpop.f32.mrb[91].mxu0  ;;  %v10474_v42 = vpop.eup %10473  ;;  %v6099_v60 = vmul.f32 %v10472_v51, %v13498_v28  ;;  %v7177_v44 = vadd.f32 %v7176_v7, %v6086_v62  ;;  %8959 = vmatmul.mubr.msk.bf16.gmra.mrb[164].mxu1 %vm1354_vm1, %v19046_v37  ;;  %10497 = vpow2.f32 %v9256_v13  ;;  %8975 = vmatmul.mubr.msk.bf16.gmra.mrb[196].mxu0 %vm1354_vm1, %v19046_v37 }
 0x25d   : > { %19045 = vst [vmem:[#allocation61_spill] sm:$0xff] %v13716_v46  ;;  %v10476_v43 = vpop.eup %10475  ;;  %v6101_v18 = vmul.f32 %v10474_v42, %v13511_v14  ;;  %2299 = vmatprep.mubr.bf16.mxu1 %v18970_v21  ;;  %10499 = vpow2.f32 %v9255_v8  ;;  %2490 = vmatprep.mubr.bf16.mxu0 %v18970_v21 }
 0x25e   : > { %v10478_v50 = vpop.eup %10477  ;;  %v13724_v3 = vadd.f32 %v7069_v11, %v6099_v60  ;;  %v6100_v31 = vmul.f32 %v10476_v43, %v13521_v33  ;;  %10501 = vpow2.f32 %v9257_v30  ;;  %v13735_v11 = vpop.f32.mrb[60].mxu1 }
 0x25f   : > { %v10480_v28 = vpop.eup %10479  ;;  %v13728_v22 = vadd.f32 %v7141_v12, %v6101_v18  ;;  %v6102_v7 = vmul.f32 %v10478_v50, %v13528_v55  ;;  %19047 = vst [vmem:[#allocation62_spill] sm:$0xff] %v13735_v11  ;;  %v13737_v33 = vpop.f32.mrb[92].mxu0  ;;  %10503 = vpow2.f32 %v9270_v25 }
 0x260   : > { %v10482_v14 = vpop.eup %10481  ;;  %v13731_v0 = vadd.f32 %v7105_v24, %v6100_v31  ;;  %v4627_v9 = vadd.f32 1.0, %v10480_v28  ;;  %19048 = vst [vmem:[#allocation63_spill] sm:$0xff] %v13737_v33  ;;  %v13741_v62 = vpop.f32.mrb[61].mxu1 }
 0x261   : > { %v10484_v13 = vpop.eup %10483  ;;  %v13739_v51 = vadd.f32 %v7177_v44, %v6102_v7  ;;  %v4629_v12 = vadd.f32 1.0, %v10482_v14  ;;  %19049 = vst [vmem:[#allocation64_spill] sm:$0xff] %v13741_v62  ;;  %v13743_v55 = vpop.f32.mrb[93].mxu0  ;;  %v13748_v44 = vadd.f32 %v13382_v41, %v13036_v39  ;;  %v19051_v14 = vld [vmem:[#allocation14_spill] sm:$0xff] }
 0x262   : > { %19050 = vst [vmem:[#allocation65_spill] sm:$0xff] %v13743_v55  ;;  %v10486_v8 = vpop.eup %10485  ;;  %10505 = vrcp.f32 %v4627_v9  ;;  %v4628_v42 = vadd.f32 1.0, %v10484_v13  ;;  %v1591_v24 = vpop.f32.mrb[62].mxu1 }
 0x263   : > { %v1782_v60 = vpop.f32.mrb[94].mxu0  ;;  %v10488_v30 = vpop.eup %10487  ;;  %10507 = vrcp.f32 %v4629_v12  ;;  %v4630_v43 = vadd.f32 1.0, %v10486_v8  ;;  %v9272_v8 = vmul.f32 -1.442695, %v13748_v44 }
 0x264   : > { %v1592_v18 = vpop.f32.mrb[63].mxu1  ;;  %v1783_v25 = vpop.f32.mrb[95].mxu0  ;;  %10509 = vrcp.f32 %v4628_v42  ;;  %v4643_v31 = vadd.f32 1.0, %v10488_v30  ;;  %8960 = vmatmul.mubr.msk.bf16.gmra.mrb[168].mxu1 %vm1354_vm1, %v19051_v14  ;;  %v13756_v42 = vadd.f32 %v13386_v38, %v13039_v26  ;;  %v13760_v30 = vadd.f32 %v13388_v59, %v13042_v47  ;;  %8976 = vmatmul.mubr.msk.bf16.gmra.mrb[200].mxu0 %vm1354_vm1, %v19051_v14 }
 0x265   : > { %v10490_v50 = vpop.eup %10489  ;;  %10511 = vrcp.f32 %v4630_v43  ;;  %2309 = vmatprep.mubr.bf16.mxu1 %v18970_v21  ;;  %v13764_v43 = vadd.f32 %v13393_v63, %v13033_v61  ;;  %v13768_v18 = vpop.f32.mrb[64].mxu1  ;;  %2500 = vmatprep.mubr.bf16.mxu0 %v18970_v21 }
 0x266   : > { %v10492_v28 = vpop.eup %10491  ;;  %v4645_v7 = vadd.f32 1.0, %v10490_v50  ;;  %10513 = vrcp.f32 %v4643_v31  ;;  %19052 = vst [vmem:[#allocation66_spill] sm:$0xff] %v13768_v18  ;;  %v19053_v50 = vld [vmem:[#allocation25_spill] sm:$0xff]  ;;  %v13780_v63 = vpop.f32.mrb[65].mxu1 }
 0x267   : > { %v10494_v9 = vpop.eup %10493  ;;  %v4644_v13 = vadd.f32 1.0, %v10492_v28  ;;  %v13772_v31 = vadd.f32 %v19053_v50, %v13036_v39  ;;  %v19054_v28 = vld [vmem:[#allocation31_spill] sm:$0xff] }
 0x268   : > { %v10496_v12 = vpop.eup %10495  ;;  %10515 = vrcp.f32 %v4645_v7  ;;  %v4646_v41 = vadd.f32 1.0, %v10494_v9  ;;  %v13776_v59 = vadd.f32 %v19054_v28, %v13039_v26  ;;  %v13778_v7 = vpop.f32.mrb[96].mxu0  ;;  %19056 = vst [vmem:[#allocation31_spill] sm:$0xff] %v13780_v63 }
 0x269   : > { %v10498_v24 = vpop.eup %10497  ;;  %10517 = vrcp.f32 %v4644_v13  ;;  %v4659_v60 = vadd.f32 1.0, %v10496_v12  ;;  %19055 = vst [vmem:[#allocation25_spill] sm:$0xff] %v13778_v7  ;;  %v19057_v12 = vld [vmem:[#allocation26_spill] sm:$0xff]  ;;  %v13791_v14 = vpop.f32.mrb[97].mxu0  ;;  %v9271_v7 = vmul.f32 -1.442695, %v13756_v42 }
 0x26a   : > { %v10500_v25 = vpop.eup %10499  ;;  %10519 = vrcp.f32 %v4646_v41  ;;  %v4661_v38 = vadd.f32 1.0, %v10498_v24  ;;  %v13785_v41 = vadd.f32 %v19057_v12, %v13042_v47  ;;  %v19058_v24 = vld [vmem:[#allocation27_spill] sm:$0xff]  ;;  %19059 = vst [vmem:[#allocation26_spill] sm:$0xff] %v13791_v14  ;;  %v13793_v28 = vpop.f32.mrb[66].mxu1  ;;  %v9273_v14 = vmul.f32 -1.442695, %v13760_v30 }
 0x26b   : > { %v10502_v9 = vpop.eup %10501  ;;  %10521 = vrcp.f32 %v4659_v60  ;;  %v4660_v13 = vadd.f32 1.0, %v10500_v25  ;;  %v13789_v50 = vadd.f32 %v19058_v24, %v13033_v61  ;;  %19060 = vst [vmem:[#allocation27_spill] sm:$0xff] %v13793_v28  ;;  %v19061_v60 = vld [vmem:[#allocation28_spill] sm:$0xff]  ;;  %v13800_v18 = vpop.f32.mrb[98].mxu0  ;;  %v9286_v28 = vmul.f32 -1.442695, %v13764_v43 }
 0x26c   : > { %v10504_v37 = vpop.eup %10503  ;;  %10523 = vrcp.f32 %v4661_v38  ;;  %v4662_v63 = vadd.f32 1.0, %v10502_v9  ;;  %v13798_v25 = vadd.f32 %v19061_v60, %v13036_v39  ;;  %19062 = vst [vmem:[#allocation28_spill] sm:$0xff] %v13800_v18  ;;  %v13802_v12 = vpop.f32.mrb[67].mxu1  ;;  %v9288_v60 = vmul.f32 -1.442695, %v13772_v31  ;;  %v19065_v18 = vld [vmem:[#allocation13_spill] sm:$0xff] }
 0x26d   : > { %19063 = vst [vmem:[#allocation67_spill] sm:$0xff] %v13802_v12  ;;  %v10506_v55 = vpop.eup %10505  ;;  %10525 = vrcp.f32 %v4660_v13  ;;  %v4675_v24 = vadd.f32 1.0, %v10504_v37  ;;  %v13806_v62 = vpop.f32.mrb[99].mxu0  ;;  %v9287_v33 = vmul.f32 -1.442695, %v13776_v59  ;;  %8961 = vmatmul.mubr.msk.bf16.gmra.mrb[172].mxu1 %vm1354_vm1, %v19065_v18  ;;  %8977 = vmatmul.mubr.msk.bf16.gmra.mrb[204].mxu0 %vm1354_vm1, %v19065_v18 }
 0x26e   : > { %19064 = vst [vmem:[#allocation68_spill] sm:$0xff] %v13806_v62  ;;  %v10508_v38 = vpop.eup %10507  ;;  %v6115_v9 = vmul.f32 %v10506_v55, %v13592_v40  ;;  %10527 = vrcp.f32 %v4662_v63  ;;  %v9289_v13 = vmul.f32 -1.442695, %v13785_v41  ;;  %v9302_v11 = vmul.f32 -1.442695, %v13789_v50  ;;  %2319 = vmatprep.mubr.bf16.mxu1 %v18970_v21  ;;  %2510 = vmatprep.mubr.bf16.mxu0 %v18970_v21 }
 0x26f   : > { %v10510_v12 = vpop.eup %10509  ;;  %v6117_v37 = vmul.f32 %v10508_v38, %v13600_v23  ;;  %10529 = vrcp.f32 %v4675_v24  ;;  %v9304_v63 = vmul.f32 -1.442695, %v13798_v25  ;;  %v19066_v24 = vld [vmem:[#allocation29_spill] sm:$0xff] }
 0x270   : > { %v10512_v62 = vpop.eup %10511  ;;  %v7071_v40 = vadd.f32 %v13724_v3, %v6115_v9  ;;  %v6116_v55 = vmul.f32 %v10510_v12, %v13608_v5  ;;  %10531 = vpow2.f32 %v9272_v8  ;;  %v13824_v38 = vadd.f32 %v19066_v24, %v13039_v26  ;;  %v19067_v8 = vld [vmem:[#allocation37_spill] sm:$0xff] }
 0x271   : > { %v10514_v46 = vpop.eup %10513  ;;  %v7143_v1 = vadd.f32 %v13728_v22, %v6117_v37  ;;  %v6118_v23 = vmul.f32 %v10512_v62, %v13615_v2  ;;  %10533 = vpow2.f32 %v9271_v7  ;;  %v13832_v12 = vadd.f32 %v19067_v8, %v13042_v47  ;;  %v19068_v7 = vld [vmem:[#allocation38_spill] sm:$0xff] }
 0x272   : > { %v10516_v6 = vpop.eup %10515  ;;  %v7107_v3 = vadd.f32 %v13731_v0, %v6116_v55  ;;  %v6131_v5 = vmul.f32 %v10514_v46, %v13619_v32  ;;  %10535 = vpow2.f32 %v9273_v14  ;;  %v13839_v9 = vadd.f32 %v19068_v7, %v13033_v61  ;;  %v13841_v0 = vpop.f32.mrb[68].mxu1  ;;  %v19069_v55 = vld [vmem:[#allocation39_spill] sm:$0xff] }
 0x273   : > { %v10518_v2 = vpop.eup %10517  ;;  %v7179_v22 = vadd.f32 %v13739_v51, %v6118_v23  ;;  %v6133_v62 = vmul.f32 %v10516_v6, %v13623_v34  ;;  %10537 = vpow2.f32 %v9286_v28  ;;  %v13843_v32 = vpop.f32.mrb[100].mxu0  ;;  %v13848_v24 = vadd.f32 %v19069_v55, %v13036_v39 }
 0x274   : > { %v10520_v46 = vpop.eup %10519  ;;  %v7072_v14 = vadd.f32 %v7071_v40, %v6131_v5  ;;  %v6132_v37 = vmul.f32 %v10518_v2, %v13629_v35  ;;  %10539 = vpow2.f32 %v9288_v60  ;;  %v13850_v51 = vpop.f32.mrb[69].mxu1  ;;  %v9303_v8 = vmul.f32 -1.442695, %v13824_v38 }
 0x275   : > { %v13852_v34 = vpop.f32.mrb[101].mxu0  ;;  %v10522_v6 = vpop.eup %10521  ;;  %v7144_v28 = vadd.f32 %v7143_v1, %v6133_v62  ;;  %v6134_v23 = vmul.f32 %v10520_v46, %v13638_v53  ;;  %10541 = vpow2.f32 %v9287_v33  ;;  %v9305_v2 = vmul.f32 -1.442695, %v13832_v12  ;;  %v924_v1 = vld [vmem:[%s18834_s3 + $0x130] sm:$0xff]  ;;  %v19075_v46 = vld [vmem:[#allocation16_spill] sm:$0xff] }
 0x276   : > { %19070 = vst [vmem:[#allocation29_spill] sm:$0xff] %v13852_v34  ;;  %v13856_v7 = vpop.f32.mrb[70].mxu1  ;;  %v13858_v40 = vpop.f32.mrb[102].mxu0  ;;  %v7108_v60 = vadd.f32 %v7107_v3, %v6132_v37  ;;  %v6147_v5 = vmul.f32 %v10522_v6, %v13648_v48  ;;  %10543 = vpow2.f32 %v9289_v13  ;;  %v932_v53 = vld [vmem:[%s18834_s3 + $0x170] sm:$0xff]  ;;  %8962 = vmatmul.mubr.msk.bf16.gmra.mrb[176].mxu1 %vm1354_vm1, %v19075_v46  ;;  %v9318_v37 = vmul.f32 -1.442695, %v13839_v9  ;;  %8978 = vmatmul.mubr.msk.bf16.gmra.mrb[208].mxu0 %vm1354_vm1, %v19075_v46 }
 0x277   : > { %19071 = vst [vmem:[#allocation37_spill] sm:$0xff] %v13856_v7  ;;  %19072 = vst [vmem:[#allocation38_spill] sm:$0xff] %v13858_v40  ;;  %v10524_v35 = vpop.eup %10523  ;;  %v13868_v33 = vpop.f32.mrb[71].mxu1  ;;  %v7180_v48 = vadd.f32 %v7179_v22, %v6134_v23  ;;  %10545 = vpow2.f32 %v9302_v11  ;;  %2329 = vmatprep.mubr.bf16.mxu1 %v18970_v21  ;;  %2520 = vmatprep.mubr.bf16.mxu0 %v18970_v21  ;;  %v13966_v34 = vadd.f32 %v13502_v27, %v13042_v47 }
 0x278   : > { %19073 = vst [vmem:[#allocation39_spill] sm:$0xff] %v13868_v33  ;;  %v13870_v62 = vpop.f32.mrb[103].mxu0  ;;  %v10526_v3 = vpop.eup %10525  ;;  %v6149_v13 = vmul.f32 %v10524_v35, %v13665_v45  ;;  %v7073_v6 = vadd.f32 %v7072_v14, %v6147_v5  ;;  %10547 = vpow2.f32 %v9304_v63  ;;  %v9320_v33 = vmul.f32 -1.442695, %v13848_v24  ;;  %v933_v45 = vld [vmem:[%s18834_s3 + $0x178] sm:$0xff] }
 0x279   : > { %19074 = vst [vmem:[#allocation69_spill] sm:$0xff] %v13870_v62  ;;  %v10528_v55 = vpop.eup %10527  ;;  %v6148_v18 = vmul.f32 %v10526_v3, %v13682_v4  ;;  %v925_v62 = vld [vmem:[%s18834_s3 + $0x138] sm:$0xff]  ;;  %10549 = vpow2.f32 %v9303_v8  ;;  %v8866_v14 = vcombine.low %v924_v1, %v932_v53  ;;  %v8867_v5 = vcombine.high %v924_v1, %v932_v53 }
 0x27a   : > { %v10530_v11 = vpop.eup %10529  ;;  %v13885_v22 = vadd.f32 %v7144_v28, %v6149_v13  ;;  %v6150_v23 = vmul.f32 %v10528_v55, %v13688_v56  ;;  %10551 = vpow2.f32 %v9305_v2  ;;  %v8868_v56 = vcombine.low %v925_v62, %v933_v45 }
 0x27b   : > { %v10532_v4 = vpop.eup %10531  ;;  %v13890_v63 = vadd.f32 %v7108_v60, %v6148_v18  ;;  %v6163_v35 = vmul.f32 %v10530_v11, %v13699_v36  ;;  %10553 = vpow2.f32 %v9318_v37  ;;  %2553 = vmatprep.subr.bf16.mxu1 %v8867_v5  ;;  %v8869_v18 = vcombine.high %v925_v62, %v933_v45  ;;  %v13898_v60 = vpop.f32.mrb[72].mxu1 }
 0x27c   : > { %v10534_v3 = vpop.eup %10533  ;;  %v13894_v40 = vadd.f32 %v7180_v48, %v6150_v23  ;;  %v4677_v28 = vadd.f32 1.0, %v10532_v4  ;;  %10555 = vpow2.f32 %v9320_v33  ;;  %19076 = vst [vmem:[#allocation70_spill] sm:$0xff] %v13898_v60  ;;  %2554 = vmatpush1.bf16.msra.mxu1 %v8866_v14  ;;  %v19077_v48 = vld [vmem:[#allocation15_spill] sm:$0xff]  ;;  %v19078_v33 = vld [vmem:[#allocation40_spill] sm:$0xff]  ;;  %v13907_v23 = vpop.f32.mrb[104].mxu0 }
 0x27d   : > { %v10536_v8 = vpop.eup %10535  ;;  %v13896_v13 = vadd.f32 %v7073_v6, %v6163_v35  ;;  %v4676_v55 = vadd.f32 1.0, %v10534_v3  ;;  %2744 = vmatprep.subr.bf16.mxu0 %v8869_v18  ;;  %v13904_v11 = vadd.f32 %v19078_v33, %v13039_v26  ;;  %19079 = vst [vmem:[#allocation40_spill] sm:$0xff] %v13907_v23  ;;  %v19080_v35 = vld [vmem:[#allocation41_spill] sm:$0xff]  ;;  %v13945_v46 = vpop.f32.mrb[105].mxu0 }
 0x27e   : > { %v10538_v36 = vpop.eup %10537  ;;  %10557 = vrcp.f32 %v4677_v28  ;;  %v4678_v2 = vadd.f32 1.0, %v10536_v8  ;;  %8963 = vmatmul.mubr.msk.bf16.gmra.mrb[180].mxu1 %vm1354_vm1, %v19077_v48  ;;  %2745 = vmatpush1.bf16.msra.mxu0 %v8868_v56  ;;  %v13911_v5 = vadd.f32 %v19080_v35, %v13042_v47  ;;  %v19081_v56 = vld [vmem:[#allocation42_spill] sm:$0xff] }
 0x27f   : > { %v10540_v1 = vpop.eup %10539  ;;  %10559 = vrcp.f32 %v4676_v55  ;;  %v4691_v53 = vadd.f32 1.0, %v10538_v36  ;;  %2339 = vmatprep.mubr.bf16.mxu1 %v18970_v21  ;;  %8979 = vmatmul.mubr.msk.bf16.gmra.mrb[212].mxu0 %vm1354_vm1, %v19077_v48  ;;  %v13917_v8 = vadd.f32 %v19081_v56, %v13033_v61  ;;  %v9319_v36 = vmul.f32 -1.442695, %v13904_v11  ;;  %19088 = vst [vmem:[#allocation42_spill] sm:$0xff] %v13945_v46 }
 0x280   : > { %v10542_v37 = vpop.eup %10541  ;;  %10561 = vrcp.f32 %v4678_v2  ;;  %v4693_v6 = vadd.f32 1.0, %v10540_v1  ;;  %2530 = vmatprep.mubr.bf16.mxu0 %v18970_v21  ;;  %v19082_v2 = vld [vmem:[#allocation43_spill] sm:$0xff]  ;;  %v9321_v35 = vmul.f32 -1.442695, %v13911_v5 }
 0x281   : > { %v10544_v62 = vpop.eup %10543  ;;  %10563 = vrcp.f32 %v4691_v53  ;;  %v4692_v45 = vadd.f32 1.0, %v10542_v37  ;;  %v13923_v1 = vadd.f32 %v19082_v2, %v13036_v39 }
 0x282   : > { %v10546_v14 = vpop.eup %10545  ;;  %10565 = vrcp.f32 %v4693_v6  ;;  %v4694_v4 = vadd.f32 1.0, %v10544_v62  ;;  %v19083_v6 = vld [vmem:[#allocation44_spill] sm:$0xff]  ;;  %v19084_v62 = vld [vmem:[#allocation45_spill] sm:$0xff] }
 0x283   : > { %v10548_v3 = vpop.eup %10547  ;;  %10567 = vrcp.f32 %v4692_v45  ;;  %v4707_v28 = vadd.f32 1.0, %v10546_v14  ;;  %v13927_v33 = vadd.f32 %v19083_v6, %v13039_v26  ;;  %v13931_v45 = vadd.f32 %v19084_v62, %v13042_v47  ;;  %v19086_v6 = vld [vmem:[#allocation47_spill] sm:$0xff]  ;;  %v13943_v62 = vpop.f32.mrb[73].mxu1 }
 0x284   : > { %v10550_v55 = vpop.eup %10549  ;;  %10569 = vrcp.f32 %v4694_v4  ;;  %v4709_v18 = vadd.f32 1.0, %v10548_v3  ;;  %v19085_v3 = vld [vmem:[#allocation46_spill] sm:$0xff]  ;;  %v13941_v48 = vadd.f32 %v19086_v6, %v13036_v39  ;;  %19087 = vst [vmem:[#allocation41_spill] sm:$0xff] %v13943_v62  ;;  %v9336_v23 = vmul.f32 -1.442695, %v13923_v1  ;;  %v13958_v60 = vpop.f32.mrb[74].mxu1 }
 0x285   : > { %v10552_v53 = vpop.eup %10551  ;;  %10571 = vrcp.f32 %v4707_v28  ;;  %v4708_v37 = vadd.f32 1.0, %v10550_v55  ;;  %v13936_v56 = vadd.f32 %v19085_v3, %v13033_v61  ;;  %v9334_v55 = vmul.f32 -1.442695, %v13917_v8  ;;  %19090 = vst [vmem:[#allocation43_spill] sm:$0xff] %v13958_v60  ;;  %v13973_v60 = vpop.f32.mrb[75].mxu1 }
 0x286   : > { %v10554_v14 = vpop.eup %10553  ;;  %10573 = vrcp.f32 %v4709_v18  ;;  %v4710_v4 = vadd.f32 1.0, %v10552_v53  ;;  %v19089_v18 = vld [vmem:[#allocation17_spill] sm:$0xff]  ;;  %v9335_v46 = vmul.f32 -1.442695, %v13927_v33  ;;  %v9337_v62 = vmul.f32 -1.442695, %v13931_v45 }
 0x287   : > { %v10556_v2 = vpop.eup %10555  ;;  %10575 = vrcp.f32 %v4708_v37  ;;  %v4723_v28 = vadd.f32 1.0, %v10554_v14  ;;  %8964 = vmatmul.mubr.msk.bf16.gmra.mrb[184].mxu1 %vm1354_vm1, %v19089_v18  ;;  %v13952_v37 = vadd.f32 %v13500_v19, %v13039_v26  ;;  %v9350_v19 = vmul.f32 -1.442695, %v13936_v56  ;;  %8980 = vmatmul.mubr.msk.bf16.gmra.mrb[216].mxu0 %vm1354_vm1, %v19089_v18 }
 0x288   : > { %v10558_v53 = vpop.eup %10557  ;;  %10577 = vrcp.f32 %v4710_v4  ;;  %v4725_v3 = vadd.f32 1.0, %v10556_v2  ;;  %2349 = vmatprep.mubr.bf16.mxu1 %v18970_v21  ;;  %v13960_v4 = vpop.f32.mrb[106].mxu0  ;;  %2540 = vmatprep.mubr.bf16.mxu0 %v18970_v21 }
 0x289   : > { %v10560_v14 = vpop.eup %10559  ;;  %v6165_v6 = vmul.f32 %v10558_v53, %v13748_v44  ;;  %10579 = vrcp.f32 %v4723_v28  ;;  %19091 = vst [vmem:[#allocation44_spill] sm:$0xff] %v13960_v4  ;;  %v9352_v4 = vmul.f32 -1.442695, %v13941_v48  ;;  %v9351_v18 = vmul.f32 -1.442695, %v13952_v37 }
 0x28a   : > { %v10562_v2 = vpop.eup %10561  ;;  %v6164_v7 = vmul.f32 %v10560_v14, %v13756_v42  ;;  %10581 = vrcp.f32 %v4725_v3  ;;  %v13975_v42 = vpop.f32.mrb[107].mxu0 }
 0x28b   : > { %v10564_v44 = vpop.eup %10563  ;;  %v7146_v28 = vadd.f32 %v13885_v22, %v6165_v6  ;;  %v6166_v53 = vmul.f32 %v10562_v2, %v13760_v30  ;;  %10583 = vpow2.f32 %v9319_v36  ;;  %19092 = vst [vmem:[#allocation45_spill] sm:$0xff] %v13975_v42  ;;  %v13985_v6 = vadd.f32 %v13532_v49, %v13033_v61  ;;  %v19093_v49 = vld [vmem:[#allocation18_spill] sm:$0xff] }
 0x28c   : > { %v10566_v3 = vpop.eup %10565  ;;  %v7110_v27 = vadd.f32 %v13890_v63, %v6164_v7  ;;  %v6179_v14 = vmul.f32 %v10564_v44, %v13764_v43  ;;  %10585 = vpow2.f32 %v9321_v35  ;;  %v13991_v43 = vadd.f32 %v13534_v17, %v13036_v39 }
 0x28d   : > { %v10568_v22 = vpop.eup %10567  ;;  %v7182_v30 = vadd.f32 %v13894_v40, %v6166_v53  ;;  %v6181_v36 = vmul.f32 %v10566_v3, %v13772_v31  ;;  %10587 = vpow2.f32 %v9334_v55  ;;  %v13996_v31 = vadd.f32 %v13538_v29, %v13039_v26 }
 0x28e   : > { %v10570_v2 = vpop.eup %10569  ;;  %v7075_v42 = vadd.f32 %v13896_v13, %v6179_v14  ;;  %v6180_v7 = vmul.f32 %v10568_v22, %v13776_v59  ;;  %10589 = vpow2.f32 %v9336_v23  ;;  %v9353_v17 = vmul.f32 -1.442695, %v13966_v34 }
 0x28f   : > { %v10572_v63 = vpop.eup %10571  ;;  %v7147_v35 = vadd.f32 %v7146_v28, %v6181_v36  ;;  %v6182_v40 = vmul.f32 %v10570_v2, %v13785_v41  ;;  %10591 = vpow2.f32 %v9335_v46  ;;  %8965 = vmatmul.mubr.msk.bf16.gmra.mrb[188].mxu1 %vm1354_vm1, %v19093_v49  ;;  %v9366_v29 = vmul.f32 -1.442695, %v13985_v6  ;;  %v14005_v46 = vpop.f32.mrb[76].mxu1  ;;  %8981 = vmatmul.mubr.msk.bf16.gmra.mrb[220].mxu0 %vm1354_vm1, %v19093_v49 }
 0x290   : > { %v10574_v13 = vpop.eup %10573  ;;  %v7111_v55 = vadd.f32 %v7110_v27, %v6180_v7  ;;  %v6195_v59 = vmul.f32 %v10572_v63, %v13789_v50  ;;  %10593 = vpow2.f32 %v9337_v62  ;;  %2581 = vmatprep.mubr.bf16.mxu1 %v18970_v21  ;;  %v14007_v28 = vpop.f32.mrb[108].mxu0  ;;  %v9368_v62 = vmul.f32 -1.442695, %v13991_v43  ;;  %2772 = vmatprep.mubr.bf16.mxu0 %v18970_v21 }
 0x291   : > { %v10576_v23 = vpop.eup %10575  ;;  %v7183_v44 = vadd.f32 %v7182_v30, %v6182_v40  ;;  %v6197_v41 = vmul.f32 %v10574_v13, %v13798_v25  ;;  %10595 = vpow2.f32 %v9350_v19  ;;  %v14011_v27 = vpop.f32.mrb[77].mxu1  ;;  %v9367_v30 = vmul.f32 -1.442695, %v13996_v31 }
 0x292   : > { %v10578_v53 = vpop.eup %10577  ;;  %v7076_v3 = vadd.f32 %v7075_v42, %v6195_v59  ;;  %v6196_v50 = vmul.f32 %v10576_v23, %v13824_v38  ;;  %10597 = vpow2.f32 %v9352_v4  ;;  %v14013_v14 = vpop.f32.mrb[109].mxu0 }
 0x293   : > { %v10580_v25 = vpop.eup %10579  ;;  %v7148_v19 = vadd.f32 %v7147_v35, %v6197_v41  ;;  %v6198_v22 = vmul.f32 %v10578_v53, %v13832_v12  ;;  %10599 = vpow2.f32 %v9351_v18  ;;  %v14019_v42 = vpop.f32.mrb[78].mxu1 }
 0x294   : > { %v14021_v38 = vpop.f32.mrb[110].mxu0  ;;  %v10582_v4 = vpop.eup %10581  ;;  %v14024_v36 = vadd.f32 %v7111_v55, %v6196_v50  ;;  %v6211_v2 = vmul.f32 %v10580_v25, %v13839_v9  ;;  %10601 = vpow2.f32 %v9353_v17  ;;  %v14040_v25 = vadd.f32 %v13544_v54, %v13033_v61 }
 0x295   : > { %19094 = vst [vmem:[#allocation46_spill] sm:$0xff] %v14021_v38  ;;  %v10584_v7 = vpop.eup %10583  ;;  %v14027_v63 = vadd.f32 %v7183_v44, %v6198_v22  ;;  %v6213_v12 = vmul.f32 %v10582_v4, %v13848_v24  ;;  %10603 = vpow2.f32 %v9366_v29  ;;  %v14046_v4 = vadd.f32 %v13546_v16, %v13036_v39 }
 0x296   : > { %v10586_v18 = vpop.eup %10585  ;;  %v14030_v35 = vadd.f32 %v7076_v3, %v6211_v2  ;;  %v4724_v40 = vadd.f32 1.0, %v10584_v7  ;;  %10605 = vpow2.f32 %v9368_v62  ;;  %v14036_v3 = vadd.f32 %v13540_v10, %v13042_v47 }
 0x297   : > { %v10588_v13 = vpop.eup %10587  ;;  %v14032_v59 = vadd.f32 %v7148_v19, %v6213_v12  ;;  %v4726_v23 = vadd.f32 1.0, %v10586_v18  ;;  %10607 = vpow2.f32 %v9367_v30  ;;  %v14042_v19 = vpop.f32.mrb[79].mxu1  ;;  %v14050_v7 = vadd.f32 %v13550_v58, %v13039_v26  ;;  %v19096_v12 = vld [vmem:[#allocation48_spill] sm:$0xff]  ;;  %v19098_v58 = vld [vmem:[#allocation50_spill] sm:$0xff] }
 0x298   : > { %v10590_v55 = vpop.eup %10589  ;;  %10609 = vrcp.f32 %v4724_v40  ;;  %v4739_v9 = vadd.f32 1.0, %v10588_v13  ;;  %19095 = vst [vmem:[#allocation47_spill] sm:$0xff] %v14042_v19  ;;  %v14054_v54 = vadd.f32 %v19096_v12, %v13042_v47  ;;  %v9369_v13 = vmul.f32 -1.442695, %v14036_v3 }
 0x299   : > { %v10592_v17 = vpop.eup %10591  ;;  %10611 = vrcp.f32 %v4726_v23  ;;  %v4741_v44 = vadd.f32 1.0, %v10590_v55  ;;  %v19097_v23 = vld [vmem:[#allocation49_spill] sm:$0xff] }
 0x29a   : > { %v10594_v41 = vpop.eup %10593  ;;  %10613 = vrcp.f32 %v4739_v9  ;;  %v4740_v24 = vadd.f32 1.0, %v10592_v17  ;;  %v14059_v16 = vadd.f32 %v19097_v23, %v13033_v61  ;;  %v9382_v17 = vmul.f32 -1.442695, %v14040_v25  ;;  %v19101_v23 = vld [vmem:[#allocation52_spill] sm:$0xff] }
 0x29b   : > { %v10596_v29 = vpop.eup %10595  ;;  %10615 = vrcp.f32 %v4741_v44  ;;  %v4742_v53 = vadd.f32 1.0, %v10594_v41  ;;  %v14064_v44 = vadd.f32 %v19098_v58, %v13036_v39  ;;  %v14066_v41 = vpop.f32.mrb[111].mxu0 }
 0x29c   : > { %v10598_v50 = vpop.eup %10597  ;;  %10617 = vrcp.f32 %v4740_v24  ;;  %v4755_v62 = vadd.f32 1.0, %v10596_v29  ;;  %19099 = vst [vmem:[#allocation48_spill] sm:$0xff] %v14066_v41  ;;  %v14098_v38 = vpop.f32.mrb[112].mxu0 }
 0x29d   : > { %v10600_v22 = vpop.eup %10599  ;;  %10619 = vrcp.f32 %v4742_v53  ;;  %v4757_v30 = vadd.f32 1.0, %v10598_v50  ;;  %v9384_v53 = vmul.f32 -1.442695, %v14046_v4  ;;  %v19100_v50 = vld [vmem:[#allocation51_spill] sm:$0xff]  ;;  %19105 = vst [vmem:[#allocation50_spill] sm:$0xff] %v14098_v38 }
 0x29e   : > { %v10602_v2 = vpop.eup %10601  ;;  %10621 = vrcp.f32 %v4755_v62  ;;  %v4756_v10 = vadd.f32 1.0, %v10600_v22  ;;  %v14071_v62 = vadd.f32 %v19100_v50, %v13039_v26 }
 0x29f   : > { %v10604_v18 = vpop.eup %10603  ;;  %10623 = vrcp.f32 %v4757_v30  ;;  %v4758_v40 = vadd.f32 1.0, %v10602_v2  ;;  %v9383_v2 = vmul.f32 -1.442695, %v14050_v7 }
 0x2a0   : > { %v10606_v55 = vpop.eup %10605  ;;  %10625 = vrcp.f32 %v4756_v10  ;;  %v4771_v9 = vadd.f32 1.0, %v10604_v18  ;;  %v9385_v10 = vmul.f32 -1.442695, %v14054_v54 }
 0x2a1   : > { %v10608_v24 = vpop.eup %10607  ;;  %10627 = vrcp.f32 %v4758_v40  ;;  %v4773_v29 = vadd.f32 1.0, %v10606_v55  ;;  %v9398_v40 = vmul.f32 -1.442695, %v14059_v16  ;;  %v14079_v55 = vadd.f32 %v19101_v23, %v13042_v47 }
 0x2a2   : > { %v10610_v22 = vpop.eup %10609  ;;  %10629 = vrcp.f32 %v4771_v9  ;;  %v4772_v30 = vadd.f32 1.0, %v10608_v24  ;;  %v9400_v9 = vmul.f32 -1.442695, %v14064_v44  ;;  %v19102_v24 = vld [vmem:[#allocation53_spill] sm:$0xff] }
 0x2a3   : > { %v10612_v12 = vpop.eup %10611  ;;  %v6212_v18 = vmul.f32 %v10610_v22, %v13904_v11  ;;  %10631 = vrcp.f32 %v4773_v29  ;;  %v14085_v49 = vadd.f32 %v19102_v24, %v13033_v61  ;;  %v9399_v22 = vmul.f32 -1.442695, %v14071_v62  ;;  %v14096_v24 = vpop.f32.mrb[80].mxu1 }
 0x2a4   : > { %v10614_v58 = vpop.eup %10613  ;;  %v6214_v50 = vmul.f32 %v10612_v12, %v13911_v5  ;;  %10633 = vrcp.f32 %v4772_v30  ;;  %v19103_v30 = vld [vmem:[#allocation54_spill] sm:$0xff]  ;;  %19104 = vst [vmem:[#allocation49_spill] sm:$0xff] %v14096_v24 }
 0x2a5   : > { %v10616_v41 = vpop.eup %10615  ;;  %v7113_v11 = vadd.f32 %v14024_v36, %v6212_v18  ;;  %v6227_v29 = vmul.f32 %v10614_v58, %v13917_v8  ;;  %10635 = vpow2.f32 %v9369_v13  ;;  %v14094_v12 = vadd.f32 %v19103_v30, %v13036_v39 }
 0x2a6   : > { %v10618_v23 = vpop.eup %10617  ;;  %v7185_v19 = vadd.f32 %v14027_v63, %v6214_v50  ;;  %v6229_v5 = vmul.f32 %v10616_v41, %v13923_v1  ;;  %10637 = vpow2.f32 %v9382_v17  ;;  %v9401_v18 = vmul.f32 -1.442695, %v14079_v55  ;;  %v14103_v63 = vpop.f32.mrb[81].mxu1  ;;  %v19108_v50 = vld [vmem:[#allocation55_spill] sm:$0xff] }
 0x2a7   : > { %v10620_v36 = vpop.eup %10619  ;;  %v7078_v8 = vadd.f32 %v14030_v35, %v6227_v29  ;;  %v6228_v13 = vmul.f32 %v10618_v23, %v13927_v33  ;;  %10639 = vpow2.f32 %v9384_v53  ;;  %19106 = vst [vmem:[#allocation51_spill] sm:$0xff] %v14103_v63  ;;  %v14105_v1 = vpop.f32.mrb[113].mxu0  ;;  %v14111_v30 = vadd.f32 %v19108_v50, %v13039_v26 }
 0x2a8   : > { %19107 = vst [vmem:[#allocation52_spill] sm:$0xff] %v14105_v1  ;;  %v10622_v17 = vpop.eup %10621  ;;  %v7150_v41 = vadd.f32 %v14032_v59, %v6229_v5  ;;  %v6230_v58 = vmul.f32 %v10620_v36, %v13931_v45  ;;  %10641 = vpow2.f32 %v9383_v2  ;;  %v14113_v35 = vpop.f32.mrb[82].mxu1  ;;  %v19111_v1 = vld [vmem:[#allocation56_spill] sm:$0xff]  ;;  %v9414_v50 = vmul.f32 -1.442695, %v14085_v49 }
 0x2a9   : > { %19109 = vst [vmem:[#allocation53_spill] sm:$0xff] %v14113_v35  ;;  %v14115_v33 = vpop.f32.mrb[114].mxu0  ;;  %v10624_v53 = vpop.eup %10623  ;;  %v7114_v29 = vadd.f32 %v7113_v11, %v6228_v13  ;;  %v6243_v23 = vmul.f32 %v10622_v17, %v13936_v56  ;;  %10643 = vpow2.f32 %v9385_v10  ;;  %v14120_v63 = vadd.f32 %v19111_v1, %v13042_v47 }
 0x2aa   : > { %19110 = vst [vmem:[#allocation54_spill] sm:$0xff] %v14115_v33  ;;  %v14122_v59 = vpop.f32.mrb[83].mxu1  ;;  %v14124_v45 = vpop.f32.mrb[115].mxu0  ;;  %v7186_v5 = vadd.f32 %v7185_v19, %v6230_v58  ;;  %v6245_v36 = vmul.f32 %v10624_v53, %v13941_v48  ;;  %10645 = vpow2.f32 %v9398_v40  ;;  %v9416_v10 = vmul.f32 -1.442695, %v14094_v12 }
 0x2ab   : > { %19112 = vst [vmem:[#allocation55_spill] sm:$0xff] %v14122_v59  ;;  %19113 = vst [vmem:[#allocation56_spill] sm:$0xff] %v14124_v45  ;;  %v10626_v2 = vpop.eup %10625  ;;  %v7079_v11 = vadd.f32 %v7078_v8, %v6243_v23  ;;  %10647 = vpow2.f32 %v9400_v9  ;;  %v9415_v45 = vmul.f32 -1.442695, %v14111_v30  ;;  %v9417_v40 = vmul.f32 -1.442695, %v14120_v63 }
 0x2ac   : > { %v10628_v33 = vpop.eup %10627  ;;  %v6244_v56 = vmul.f32 %v10626_v2, %v13952_v37  ;;  %v7151_v1 = vadd.f32 %v7150_v41, %v6245_v36  ;;  %10649 = vpow2.f32 %v9399_v22  ;;  %v948_v9 = vld [vmem:[%s18834_s3 + $0x1f0] sm:$0xff]  ;;  %v14222_v59 = vadd.f32 %v13692_v52, %v13033_v61 }
 0x2ad   : > { %v10630_v13 = vpop.eup %10629  ;;  %v6246_v17 = vmul.f32 %v10628_v33, %v13966_v34  ;;  %10651 = vpow2.f32 %v9401_v18  ;;  %v940_v34 = vld [vmem:[%s18834_s3 + $0x1b0] sm:$0xff]  ;;  %v941_v18 = vld [vmem:[%s18834_s3 + $0x1b8] sm:$0xff]  ;;  %v14152_v33 = vpop.f32.mrb[84].mxu1  ;;  %v14234_v52 = vadd.f32 %v13701_v20, %v13039_v26 }
 0x2ae   : > { %v10632_v19 = vpop.eup %10631  ;;  %v7115_v58 = vadd.f32 %v7114_v29, %v6244_v56  ;;  %v6259_v48 = vmul.f32 %v10630_v13, %v13985_v6  ;;  %10653 = vpow2.f32 %v9414_v50  ;;  %19114 = vst [vmem:[#allocation71_spill] sm:$0xff] %v14152_v33  ;;  %v14154_v29 = vpop.f32.mrb[116].mxu0  ;;  %v8882_v56 = vcombine.low %v940_v34, %v948_v9 }
 0x2af   : > { %v10634_v8 = vpop.eup %10633  ;;  %v14134_v53 = vadd.f32 %v7186_v5, %v6246_v17  ;;  %v6261_v37 = vmul.f32 %v10632_v19, %v13991_v43  ;;  %10655 = vpow2.f32 %v9416_v10  ;;  %v949_v43 = vld [vmem:[%s18834_s3 + $0x1f8] sm:$0xff]  ;;  %19115 = vst [vmem:[#allocation72_spill] sm:$0xff] %v14154_v29  ;;  %v14158_v36 = vpop.f32.mrb[85].mxu1  ;;  %v8883_v17 = vcombine.high %v940_v34, %v948_v9 }
 0x2b0   : > { %v10636_v22 = vpop.eup %10635  ;;  %v14143_v41 = vadd.f32 %v7079_v11, %v6259_v48  ;;  %v6260_v6 = vmul.f32 %v10634_v8, %v13996_v31  ;;  %10657 = vpow2.f32 %v9415_v45  ;;  %19116 = vst [vmem:[#allocation73_spill] sm:$0xff] %v14158_v36  ;;  %v8884_v19 = vcombine.low %v941_v18, %v949_v43 }
 0x2b1   : > { %v10638_v23 = vpop.eup %10637  ;;  %v14156_v2 = vadd.f32 %v7151_v1, %v6261_v37  ;;  %v4774_v5 = vadd.f32 1.0, %v10636_v22  ;;  %10659 = vpow2.f32 %v9417_v40  ;;  %v19117_v1 = vld [vmem:[#allocation32_spill] sm:$0xff]  ;;  %v8885_v45 = vcombine.high %v941_v18, %v949_v43  ;;  %2555 = vmatprep.subr.bf16.mxu1 %v8883_v17 }
 0x2b2   : > { %v10640_v31 = vpop.eup %10639  ;;  %v14160_v50 = vadd.f32 %v7115_v58, %v6260_v6  ;;  %v4787_v11 = vadd.f32 1.0, %v10638_v23  ;;  %v14164_v37 = vadd.f32 %v19117_v1, %v13033_v61  ;;  %2556 = vmatpush1.bf16.msra.mxu1 %v8882_v56  ;;  %v14166_v23 = vpop.f32.mrb[117].mxu0  ;;  %v19122_v1 = vld [vmem:[#allocation57_spill] sm:$0xff] }
 0x2b3   : > { %v10642_v10 = vpop.eup %10641  ;;  %10661 = vrcp.f32 %v4774_v5  ;;  %v4789_v13 = vadd.f32 1.0, %v10640_v31  ;;  %2746 = vmatprep.subr.bf16.mxu0 %v8885_v45  ;;  %19118 = vst [vmem:[#allocation32_spill] sm:$0xff] %v14166_v23  ;;  %v19119_v5 = vld [vmem:[#allocation33_spill] sm:$0xff]  ;;  %v14183_v45 = vadd.f32 %v19122_v1, %v13033_v61 }
 0x2b4   : > { %v10644_v48 = vpop.eup %10643  ;;  %10663 = vrcp.f32 %v4787_v11  ;;  %v4788_v8 = vadd.f32 1.0, %v10642_v10  ;;  %v14170_v31 = vadd.f32 %v19119_v5, %v13036_v39  ;;  %2747 = vmatpush1.bf16.msra.mxu0 %v8884_v19  ;;  %v9430_v11 = vmul.f32 -1.442695, %v14164_v37  ;;  %v19120_v10 = vld [vmem:[#allocation34_spill] sm:$0xff]  ;;  %v19123_v19 = vld [vmem:[#allocation4_spill] sm:$0xff] }
 0x2b5   : > { %v10646_v22 = vpop.eup %10645  ;;  %10665 = vrcp.f32 %v4789_v13  ;;  %v4790_v58 = vadd.f32 1.0, %v10644_v48  ;;  %v14175_v13 = vadd.f32 %v19120_v10, %v13039_v26  ;;  %v19121_v48 = vld [vmem:[#allocation35_spill] sm:$0xff]  ;;  %8982 = vmatmul.mubr.msk.bf16.vlgmr.msra.gmra.mrb[192].mxu1 %vm1354_vm1, %v19123_v19  ;;  %v9446_v36 = vmul.f32 -1.442695, %v14183_v45 }
 0x2b6   : > { %v10648_v6 = vpop.eup %10647  ;;  %10667 = vrcp.f32 %v4788_v8  ;;  %v4803_v40 = vadd.f32 1.0, %v10646_v22  ;;  %v14179_v8 = vadd.f32 %v19121_v48, %v13042_v47  ;;  %2591 = vmatprep.mubr.bf16.mxu1 %v18970_v21  ;;  %v9432_v10 = vmul.f32 -1.442695, %v14170_v31 }
 0x2b7   : > { %v10650_v34 = vpop.eup %10649  ;;  %10669 = vrcp.f32 %v4790_v58  ;;  %v4805_v9 = vadd.f32 1.0, %v10648_v6  ;;  %v19124_v6 = vld [vmem:[#allocation58_spill] sm:$0xff]  ;;  %8998 = vmatmul.mubr.msk.bf16.vlgmr.msra.gmra.mrb[224].mxu0 %vm1354_vm1, %v19123_v19  ;;  %v14207_v19 = vpop.f32.mrb[118].mxu0 }
 0x2b8   : > { %v10652_v18 = vpop.eup %10651  ;;  %10671 = vrcp.f32 %v4803_v40  ;;  %v4804_v43 = vadd.f32 1.0, %v10650_v34  ;;  %v14189_v40 = vadd.f32 %v19124_v6, %v13036_v39  ;;  %v19125_v34 = vld [vmem:[#allocation59_spill] sm:$0xff]  ;;  %2782 = vmatprep.mubr.bf16.mxu0 %v18970_v21  ;;  %v9431_v6 = vmul.f32 -1.442695, %v14175_v13  ;;  %19128 = vst [vmem:[#allocation34_spill] sm:$0xff] %v14207_v19 }
 0x2b9   : > { %v10654_v56 = vpop.eup %10653  ;;  %10673 = vrcp.f32 %v4805_v9  ;;  %v4806_v17 = vadd.f32 1.0, %v10652_v18  ;;  %v14193_v9 = vadd.f32 %v19125_v34, %v13039_v26  ;;  %v14205_v34 = vpop.f32.mrb[86].mxu1 }
 0x2ba   : > { %v10656_v22 = vpop.eup %10655  ;;  %10675 = vrcp.f32 %v4804_v43  ;;  %v4819_v58 = vadd.f32 1.0, %v10654_v56  ;;  %v19126_v43 = vld [vmem:[#allocation36_spill] sm:$0xff]  ;;  %19127 = vst [vmem:[#allocation33_spill] sm:$0xff] %v14205_v34  ;;  %v14214_v33 = vpop.f32.mrb[87].mxu1 }
 0x2bb   : > { %v10658_v5 = vpop.eup %10657  ;;  %10677 = vrcp.f32 %v4806_v17  ;;  %v4821_v18 = vadd.f32 1.0, %v10656_v22  ;;  %v14201_v56 = vadd.f32 %v19126_v43, %v13042_v47  ;;  %v9433_v22 = vmul.f32 -1.442695, %v14179_v8  ;;  %19129 = vst [vmem:[#allocation35_spill] sm:$0xff] %v14214_v33  ;;  %v14216_v34 = vpop.f32.mrb[119].mxu0 }
 0x2bc   : > { %v10660_v48 = vpop.eup %10659  ;;  %10679 = vrcp.f32 %v4819_v58  ;;  %v4820_v1 = vadd.f32 1.0, %v10658_v5  ;;  %v9448_v58 = vmul.f32 -1.442695, %v14189_v40  ;;  %v9447_v5 = vmul.f32 -1.442695, %v14193_v9  ;;  %19130 = vst [vmem:[#allocation57_spill] sm:$0xff] %v14216_v34 }
 0x2bd   : > { %v10662_v23 = vpop.eup %10661  ;;  %10681 = vrcp.f32 %v4821_v18  ;;  %v4822_v17 = vadd.f32 1.0, %v10660_v48  ;;  %v9449_v48 = vmul.f32 -1.442695, %v14201_v56  ;;  %v14228_v33 = vadd.f32 %v13694_v15, %v13036_v39 }
 0x2be   : > { %v10664_v43 = vpop.eup %10663  ;;  %v6262_v29 = vmul.f32 %v10662_v23, %v14036_v3  ;;  %10683 = vrcp.f32 %v4820_v1  ;;  %v14242_v15 = vadd.f32 %v13703_v57, %v13042_v47 }
 0x2bf   : > { %v10666_v19 = vpop.eup %10665  ;;  %v6275_v18 = vmul.f32 %v10664_v43, %v14040_v25  ;;  %10685 = vrcp.f32 %v4822_v17  ;;  %v19131_v43 = vld [vmem:[#allocation3_spill] sm:$0xff] }
 0x2c0   : > { %v10668_v3 = vpop.eup %10667  ;;  %v7188_v23 = vadd.f32 %v14134_v53, %v6262_v29  ;;  %v6277_v1 = vmul.f32 %v10666_v19, %v14046_v4  ;;  %10687 = vpow2.f32 %v9430_v11  ;;  %8983 = vmatmul.mubr.msk.bf16.gmra.mrb[196].mxu1 %vm1354_vm1, %v19131_v43  ;;  %8999 = vmatmul.mubr.msk.bf16.gmra.mrb[228].mxu0 %vm1354_vm1, %v19131_v43  ;;  %v14258_v19 = vpop.f32.mrb[120].mxu0 }
 0x2c1   : > { %v10670_v34 = vpop.eup %10669  ;;  %v7081_v25 = vadd.f32 %v14143_v41, %v6275_v18  ;;  %v6276_v17 = vmul.f32 %v10668_v3, %v14050_v7  ;;  %10689 = vpow2.f32 %v9432_v10  ;;  %2601 = vmatprep.mubr.bf16.mxu1 %v18970_v21  ;;  %2792 = vmatprep.mubr.bf16.mxu0 %v18970_v21  ;;  %v19132_v10 = vld [vmem:[#allocation24_spill] sm:$0xff]  ;;  %19134 = vst [vmem:[#allocation58_spill] sm:$0xff] %v14258_v19  ;;  %v9464_v18 = vmul.f32 -1.442695, %v14228_v33 }
 0x2c2   : > { %v10672_v53 = vpop.eup %10671  ;;  %v7153_v4 = vadd.f32 %v14156_v2, %v6277_v1  ;;  %v6278_v29 = vmul.f32 %v10670_v34, %v14054_v54  ;;  %10691 = vpow2.f32 %v9431_v6  ;;  %v9462_v2 = vmul.f32 -1.442695, %v14222_v59  ;;  %v14256_v34 = vpop.f32.mrb[88].mxu1 }
 0x2c3   : > { %v10674_v20 = vpop.eup %10673  ;;  %v7117_v7 = vadd.f32 %v14160_v50, %v6276_v17  ;;  %v6291_v41 = vmul.f32 %v10672_v53, %v14059_v16  ;;  %10693 = vpow2.f32 %v9433_v22  ;;  %v14254_v6 = vadd.f32 %v19132_v10, %v13033_v61  ;;  %19133 = vst [vmem:[#allocation4_spill] sm:$0xff] %v14256_v34  ;;  %v14262_v3 = vpop.f32.mrb[89].mxu1 }
 0x2c4   : > { %v10676_v54 = vpop.eup %10675  ;;  %v7189_v11 = vadd.f32 %v7188_v23, %v6278_v29  ;;  %v6293_v57 = vmul.f32 %v10674_v20, %v14064_v44  ;;  %10695 = vpow2.f32 %v9446_v36  ;;  %19135 = vst [vmem:[#allocation59_spill] sm:$0xff] %v14262_v3  ;;  %v14264_v23 = vpop.f32.mrb[121].mxu0  ;;  %v9463_v17 = vmul.f32 -1.442695, %v14234_v52 }
 0x2c5   : > { %v10678_v50 = vpop.eup %10677  ;;  %v7082_v16 = vadd.f32 %v7081_v25, %v6291_v41  ;;  %v6292_v22 = vmul.f32 %v10676_v54, %v14071_v62  ;;  %10697 = vpow2.f32 %v9448_v58  ;;  %19136 = vst [vmem:[#allocation36_spill] sm:$0xff] %v14264_v23  ;;  %v14268_v43 = vpop.f32.mrb[90].mxu1  ;;  %v9465_v29 = vmul.f32 -1.442695, %v14242_v15 }
 0x2c6   : > { %v10680_v44 = vpop.eup %10679  ;;  %v7154_v36 = vadd.f32 %v7153_v4, %v6293_v57  ;;  %v6294_v1 = vmul.f32 %v10678_v50, %v14079_v55  ;;  %10699 = vpow2.f32 %v9447_v5  ;;  %19137 = vst [vmem:[#allocation3_spill] sm:$0xff] %v14268_v43  ;;  %v14270_v53 = vpop.f32.mrb[122].mxu0  ;;  %v9478_v54 = vmul.f32 -1.442695, %v14254_v6 }
 0x2c7   : > { %19138 = vst [vmem:[#allocation24_spill] sm:$0xff] %v14270_v53  ;;  %v10682_v25 = vpop.eup %10681  ;;  %v7118_v62 = vadd.f32 %v7117_v7, %v6292_v22  ;;  %v6307_v58 = vmul.f32 %v10680_v44, %v14085_v49  ;;  %10701 = vpow2.f32 %v9449_v48  ;;  %v14274_v20 = vpop.f32.mrb[91].mxu1  ;;  %v19141_v49 = vld [vmem:[#allocation6_spill] sm:$0xff]  ;;  %v19153_v53 = vld [vmem:[#allocation64_spill] sm:$0xff] }
 0x2c8   : > { %19139 = vst [vmem:[#allocation74_spill] sm:$0xff] %v14274_v20  ;;  %v14276_v41 = vpop.f32.mrb[123].mxu0  ;;  %v10684_v4 = vpop.eup %10683  ;;  %v7190_v55 = vadd.f32 %v7189_v11, %v6294_v1  ;;  %v6309_v5 = vmul.f32 %v10682_v25, %v14094_v12  ;;  %10703 = vpow2.f32 %v9462_v2  ;;  %8984 = vmatmul.mubr.msk.bf16.gmra.mrb[200].mxu1 %vm1354_vm1, %v19141_v49  ;;  %9000 = vmatmul.mubr.msk.bf16.gmra.mrb[232].mxu0 %vm1354_vm1, %v19141_v49 }
 0x2c9   : > { %19140 = vst [vmem:[#allocation75_spill] sm:$0xff] %v14276_v41  ;;  %v10686_v57 = vpop.eup %10685  ;;  %v14280_v10 = vadd.f32 %v7082_v16, %v6307_v58  ;;  %v6308_v7 = vmul.f32 %v10684_v4, %v14111_v30  ;;  %10705 = vpow2.f32 %v9464_v18  ;;  %2611 = vmatprep.mubr.bf16.mxu1 %v18970_v21  ;;  %v19142_v30 = vld [vmem:[#allocation30_spill] sm:$0xff]  ;;  %2802 = vmatprep.mubr.bf16.mxu0 %v18970_v21 }
 0x2ca   : > { %v10688_v48 = vpop.eup %10687  ;;  %v14285_v50 = vadd.f32 %v7154_v36, %v6309_v5  ;;  %v6310_v22 = vmul.f32 %v10686_v57, %v14120_v63  ;;  %10707 = vpow2.f32 %v9463_v17  ;;  %v14295_v16 = vadd.f32 %v19142_v30, %v13036_v39  ;;  %v19143_v36 = vld [vmem:[#allocation60_spill] sm:$0xff] }
 0x2cb   : > { %v10690_v12 = vpop.eup %10689  ;;  %v14291_v2 = vadd.f32 %v7118_v62, %v6308_v7  ;;  %v4835_v11 = vadd.f32 1.0, %v10688_v48  ;;  %10709 = vpow2.f32 %v9465_v29  ;;  %v14302_v1 = vadd.f32 %v19143_v36, %v13039_v26  ;;  %v19144_v62 = vld [vmem:[#allocation61_spill] sm:$0xff]  ;;  %v19145_v29 = vld [vmem:[#allocation19_spill] sm:$0xff] }
 0x2cc   : > { %v10692_v18 = vpop.eup %10691  ;;  %v14298_v44 = vadd.f32 %v7190_v55, %v6310_v22  ;;  %v4837_v63 = vadd.f32 1.0, %v10690_v12  ;;  %10711 = vpow2.f32 %v9478_v54  ;;  %v14306_v58 = vadd.f32 %v19144_v62, %v13042_v47  ;;  %v12259_v36 = vld [vmem:[%s18835_s4] sm:$0xff] }
 0x2cd   : > { %v10694_v17 = vpop.eup %10693  ;;  %10713 = vrcp.f32 %v4835_v11  ;;  %v4836_v25 = vadd.f32 1.0, %v10692_v18  ;;  %v14309_v4 = vsub.s32 4, %v19145_v29  ;;  %v14312_v57 = vsub.s32 6, %v19145_v29 }
 0x2ce   : > { %v10696_v5 = vpop.eup %10695  ;;  %10715 = vrcp.f32 %v4837_v63  ;;  %v4838_v55 = vadd.f32 1.0, %v10694_v17  ;;  %v14315_v49 = vmul.f32 -1.442695, %v14295_v16  ;;  %v14318_v12 = vmul.f32 -1.442695, %v14302_v1 }
 0x2cf   : > { %19146 = vst [vmem:[#allocation6_spill] sm:$0xff] %v14309_v4  ;;  %19147 = vst [vmem:[#allocation30_spill] sm:$0xff] %v14312_v57  ;;  %v10698_v54 = vpop.eup %10697  ;;  %10717 = vrcp.f32 %v4836_v25  ;;  %v4851_v7 = vadd.f32 1.0, %v10696_v5  ;;  %v14321_v11 = vsub.s32 5, %v19145_v29  ;;  %v14324_v63 = vmul.f32 -1.442695, %v14306_v58 }
 0x2d0   : > { %v10700_v48 = vpop.eup %10699  ;;  %10719 = vrcp.f32 %v4838_v55  ;;  %v4853_v22 = vadd.f32 1.0, %v10698_v54  ;;  %v14330_v17 = vrot.slane %v12259_v36, %v14309_v4  ;;  %v19149_v25 = vld [vmem:[#allocation5_spill] sm:$0xff]  ;;  %v14335_v55 = vrot.slane %v12259_v36, %v14312_v57  ;;  %v19151_v4 = vld [vmem:[#allocation62_spill] sm:$0xff] }
 0x2d1   : > { %19148 = vst [vmem:[#allocation60_spill] sm:$0xff] %v14321_v11  ;;  %v10702_v30 = vpop.eup %10701  ;;  %10721 = vrcp.f32 %v4851_v7  ;;  %v4852_v18 = vadd.f32 1.0, %v10700_v48  ;;  %8985 = vmatmul.mubr.msk.bf16.gmra.mrb[204].mxu1 %vm1354_vm1, %v19149_v25  ;;  %v14338_v54 = vsub.s32 7, %v19145_v29  ;;  %9001 = vmatmul.mubr.msk.bf16.gmra.mrb[236].mxu0 %vm1354_vm1, %v19149_v25  ;;  %v14345_v41 = vadd.f32 %v19151_v4, %v13033_v61  ;;  %v19154_v4 = vld [vmem:[#allocation65_spill] sm:$0xff] }
 0x2d2   : > { %v10704_v62 = vpop.eup %10703  ;;  %10723 = vrcp.f32 %v4853_v22  ;;  %v4854_v5 = vadd.f32 1.0, %v10702_v30  ;;  %2621 = vmatprep.mubr.bf16.mxu1 %v18970_v21  ;;  %v19152_v22 = vld [vmem:[#allocation63_spill] sm:$0xff]  ;;  %2812 = vmatprep.mubr.bf16.mxu0 %v18970_v21  ;;  %v14353_v25 = vrot.slane %v12259_v36, %v14321_v11  ;;  %v14361_v43 = vadd.f32 %v19154_v4, %v13042_v47 }
 0x2d3   : > { %19150 = vst [vmem:[#allocation61_spill] sm:$0xff] %v14338_v54  ;;  %v10706_v7 = vpop.eup %10705  ;;  %10725 = vrcp.f32 %v4852_v18  ;;  %v4867_v48 = vadd.f32 1.0, %v10704_v62  ;;  %v14349_v30 = vadd.f32 %v19152_v22, %v13036_v39  ;;  %v14357_v18 = vadd.f32 %v19153_v53, %v13039_v26  ;;  %v19155_v39 = vld [vmem:[#allocation66_spill] sm:$0xff]  ;;  %v19158_v53 = vld [vmem:[#allocation25_spill] sm:$0xff] }
 0x2d4   : > { %v10708_v57 = vpop.eup %10707  ;;  %10727 = vrcp.f32 %v4854_v5  ;;  %v4869_v20 = vadd.f32 1.0, %v10706_v7  ;;  %v14365_v22 = vadd.f32 %v19155_v39, %v14330_v17  ;;  %v14367_v5 = vpop.f32.mrb[92].mxu1  ;;  %v14372_v26 = vrot.slane %v12259_v36, %v14338_v54 }
 0x2d5   : > { %v10710_v62 = vpop.eup %10709  ;;  %10729 = vrcp.f32 %v4867_v48  ;;  %v4868_v61 = vadd.f32 1.0, %v10708_v57  ;;  %19156 = vst [vmem:[#allocation19_spill] sm:$0xff] %v14367_v5  ;;  %v14369_v7 = vpop.f32.mrb[124].mxu0  ;;  %v14376_v57 = vadd.f32 %v19158_v53, %v14335_v55  ;;  %v9494_v4 = vmul.f32 -1.442695, %v14345_v41 }
 0x2d6   : > { %19157 = vst [vmem:[#allocation5_spill] sm:$0xff] %v14369_v7  ;;  %v10712_v11 = vpop.eup %10711  ;;  %10731 = vrcp.f32 %v4869_v20  ;;  %v4870_v23 = vadd.f32 1.0, %v10710_v62  ;;  %v9496_v39 = vmul.f32 -1.442695, %v14349_v30  ;;  %v14380_v5 = vpop.f32.mrb[93].mxu1 }
 0x2d7   : > { %v10714_v47 = vpop.eup %10713  ;;  %10733 = vrcp.f32 %v4868_v61  ;;  %v4883_v48 = vadd.f32 1.0, %v10712_v11  ;;  %19159 = vst [vmem:[#allocation62_spill] sm:$0xff] %v14380_v5  ;;  %v9495_v36 = vmul.f32 -1.442695, %v14357_v18  ;;  %v14384_v62 = vpop.f32.mrb[125].mxu0  ;;  %v19163_v5 = vld [vmem:[#allocation8_spill] sm:$0xff] }
 0x2d8   : > { %v10716_v7 = vpop.eup %10715  ;;  %v6323_v20 = vmul.f32 %v10714_v47, %v14164_v37  ;;  %10735 = vrcp.f32 %v4870_v23  ;;  %19160 = vst [vmem:[#allocation63_spill] sm:$0xff] %v14384_v62  ;;  %v9497_v11 = vmul.f32 -1.442695, %v14361_v43  ;;  %v9018_v61 = vmul.f32 -1.442695, %v14365_v22  ;;  %v14389_v3 = vpop.f32.mrb[94].mxu1 }
 0x2d9   : > { %v10718_v54 = vpop.eup %10717  ;;  %v6325_v53 = vmul.f32 %v10716_v7, %v14170_v31  ;;  %10737 = vrcp.f32 %v4883_v48  ;;  %19161 = vst [vmem:[#allocation64_spill] sm:$0xff] %v14389_v3  ;;  %v14391_v19 = vpop.f32.mrb[126].mxu0  ;;  %8986 = vmatmul.mubr.msk.bf16.gmra.mrb[208].mxu1 %vm1354_vm1, %v19163_v5  ;;  %v9020_v31 = vmul.f32 -1.442695, %v14376_v57  ;;  %9002 = vmatmul.mubr.msk.bf16.gmra.mrb[240].mxu0 %vm1354_vm1, %v19163_v5 }
 0x2da   : > { %19162 = vst [vmem:[#allocation65_spill] sm:$0xff] %v14391_v19  ;;  %v10720_v37 = vpop.eup %10719  ;;  %v7084_v23 = vadd.f32 %v14280_v10, %v6323_v20  ;;  %v6324_v47 = vmul.f32 %v10718_v54, %v14175_v13  ;;  %10739 = vpow2.f32 %v14315_v49  ;;  %2631 = vmatprep.mubr.bf16.mxu1 %v18970_v21  ;;  %v19164_v10 = vld [vmem:[#allocation31_spill] sm:$0xff]  ;;  %v14409_v13 = vpop.f32.mrb[95].mxu1  ;;  %2822 = vmatprep.mubr.bf16.mxu0 %v18970_v21 }
 0x2db   : > { %v10722_v7 = vpop.eup %10721  ;;  %v7156_v48 = vadd.f32 %v14285_v50, %v6325_v53  ;;  %v6326_v19 = vmul.f32 %v10720_v37, %v14179_v8  ;;  %10741 = vpow2.f32 %v14318_v12  ;;  %v14407_v20 = vadd.f32 %v19164_v10, %v14353_v25  ;;  %19165 = vst [vmem:[#allocation66_spill] sm:$0xff] %v14409_v13  ;;  %v14411_v49 = vpop.f32.mrb[127].mxu0  ;;  %v19167_v8 = vld [vmem:[#allocation26_spill] sm:$0xff]  ;;  %v19168_v10 = vld [vmem:[#allocation27_spill] sm:$0xff] }
 0x2dc   : > { %19166 = vst [vmem:[#allocation25_spill] sm:$0xff] %v14411_v49  ;;  %v10724_v54 = vpop.eup %10723  ;;  %v7120_v5 = vadd.f32 %v14291_v2, %v6324_v47  ;;  %v6339_v3 = vmul.f32 %v10722_v7, %v14183_v45  ;;  %10743 = vpow2.f32 %v14324_v63  ;;  %v14419_v50 = vadd.f32 %v19167_v8, %v14372_v26  ;;  %v19169_v63 = vld [vmem:[#allocation28_spill] sm:$0xff] }
 0x2dd   : > { %v10726_v12 = vpop.eup %10725  ;;  %v7192_v53 = vadd.f32 %v14298_v44, %v6326_v19  ;;  %v6341_v37 = vmul.f32 %v10724_v54, %v14189_v40  ;;  %10745 = vpow2.f32 %v9494_v4  ;;  %v14425_v49 = vadd.f32 %v19168_v10, %v14330_v17 }
 0x2de   : > { %v10728_v13 = vpop.eup %10727  ;;  %v7085_v2 = vadd.f32 %v7084_v23, %v6339_v3  ;;  %v6340_v45 = vmul.f32 %v10726_v12, %v14193_v9  ;;  %10747 = vpow2.f32 %v9496_v39  ;;  %v14430_v47 = vadd.f32 %v19169_v63, %v14335_v55 }
 0x2df   : > { %v10730_v7 = vpop.eup %10729  ;;  %v7157_v8 = vadd.f32 %v7156_v48, %v6341_v37  ;;  %v6342_v19 = vmul.f32 %v10728_v13, %v14201_v56  ;;  %10749 = vpow2.f32 %v9495_v36  ;;  %v9019_v40 = vmul.f32 -1.442695, %v14407_v20  ;;  %v14438_v48 = vpop.f32.mrb[96].mxu1  ;;  %v19172_v36 = vld [vmem:[#allocation7_spill] sm:$0xff] }
 0x2e0   : > { %v10732_v44 = vpop.eup %10731  ;;  %v7121_v4 = vadd.f32 %v7120_v5, %v6340_v45  ;;  %v6355_v54 = vmul.f32 %v10730_v7, %v14222_v59  ;;  %10751 = vpow2.f32 %v9497_v11  ;;  %v9021_v3 = vmul.f32 -1.442695, %v14419_v50  ;;  %19170 = vst [vmem:[#allocation8_spill] sm:$0xff] %v14438_v48  ;;  %v14440_v56 = vpop.f32.mrb[128].mxu0 }
 0x2e1   : > { %v10734_v9 = vpop.eup %10733  ;;  %v7193_v39 = vadd.f32 %v7192_v53, %v6342_v19  ;;  %v6357_v23 = vmul.f32 %v10732_v44, %v14228_v33  ;;  %10753 = vpow2.f32 %v9018_v61  ;;  %v9034_v12 = vmul.f32 -1.442695, %v14425_v49  ;;  %19171 = vst [vmem:[#allocation31_spill] sm:$0xff] %v14440_v56  ;;  %8987 = vmatmul.mubr.msk.bf16.gmra.mrb[212].mxu1 %vm1354_vm1, %v19172_v36  ;;  %v14446_v53 = vpop.f32.mrb[97].mxu1  ;;  %9003 = vmatmul.mubr.msk.bf16.gmra.mrb[244].mxu0 %vm1354_vm1, %v19172_v36 }
 0x2e2   : > { %v10736_v13 = vpop.eup %10735  ;;  %v7086_v5 = vadd.f32 %v7085_v2, %v6355_v54  ;;  %v6356_v59 = vmul.f32 %v10734_v9, %v14234_v52  ;;  %10755 = vpow2.f32 %v9020_v31  ;;  %v9036_v11 = vmul.f32 -1.442695, %v14430_v47  ;;  %19173 = vst [vmem:[#allocation26_spill] sm:$0xff] %v14446_v53  ;;  %v14448_v33 = vpop.f32.mrb[129].mxu0  ;;  %2641 = vmatprep.mubr.bf16.mxu1 %v18970_v21  ;;  %2832 = vmatprep.mubr.bf16.mxu0 %v18970_v21 }
 0x2e3   : > { %19174 = vst [vmem:[#allocation27_spill] sm:$0xff] %v14448_v33  ;;  %v10738_v61 = vpop.eup %10737  ;;  %v14453_v37 = vadd.f32 %v7157_v8, %v6357_v23  ;;  %v6358_v10 = vmul.f32 %v10736_v13, %v14242_v15  ;;  %10757 = vpow2.f32 %v9019_v40  ;;  %v14456_v2 = vpop.f32.mrb[98].mxu1  ;;  %v12286_v63 = vmov 1966171168   ;;  %v19176_v15 = vld [vmem:[#allocation67_spill] sm:$0xff] }
 0x2e4   : > { %19175 = vst [vmem:[#allocation28_spill] sm:$0xff] %v14456_v2  ;;  %v10740_v52 = vpop.eup %10739  ;;  %v14459_v31 = vadd.f32 %v7121_v4, %v6356_v59  ;;  %v6371_v45 = vmul.f32 %v10738_v61, %v14254_v6  ;;  %v14462_v7 = vunpack.c.l.s4 %v12286_v63  ;;  %10759 = vpow2.f32 %v9021_v3  ;;  %v19177_v6 = vld [vmem:[#allocation68_spill] sm:$0xff]  ;;  %v19186_v2 = vld [vmem:[#allocation69_spill] sm:$0xff] }
 0x2e5   : > { %v10742_v19 = vpop.eup %10741  ;;  %v14464_v44 = vadd.f32 %v7193_v39, %v6358_v10  ;;  %v4885_v8 = vadd.f32 1.0, %v10740_v52  ;;  %10761 = vpow2.f32 %v9034_v12  ;;  %v14468_v40 = vadd.f32 %v19176_v15, %v14353_v25  ;;  %v19179_v52 = vld [vmem:[#allocation10_spill] sm:$0xff] }
 0x2e6   : > { %v10744_v54 = vpop.eup %10743  ;;  %v14470_v9 = vadd.f32 %v7086_v5, %v6371_v45  ;;  %v4884_v4 = vadd.f32 1.0, %v10742_v19  ;;  %10763 = vpow2.f32 %v9036_v11  ;;  %v14474_v23 = vadd.f32 %v19177_v6, %v14372_v26 }
 0x2e7   : > { %v10746_v36 = vpop.eup %10745  ;;  %10765 = vrcp.f32 %v4885_v8  ;;  %v4886_v3 = vadd.f32 1.0, %v10744_v54  ;;  %v14477_v12 = vadd.s32 240, %v19145_v29  ;;  %v14481_v59 = vadd.f32 %v13841_v0, %v14330_v17  ;;  %v14494_v8 = vpop.f32.mrb[130].mxu0  ;;  %v19181_v54 = vld [vmem:[#allocation29_spill] sm:$0xff] }
 0x2e8   : > { %v10748_v39 = vpop.eup %10747  ;;  %10767 = vrcp.f32 %v4884_v4  ;;  %v4899_v13 = vadd.f32 1.0, %v10746_v36  ;;  %v7657_v61 = vunpack.c.0.s8 %v14462_v7  ;;  %v14486_v10 = vadd.f32 %v13843_v32, %v14335_v55  ;;  %19180 = vst [vmem:[#allocation67_spill] sm:$0xff] %v14494_v8  ;;  %v14545_v62 = vpop.f32.mrb[131].mxu0 }
 0x2e9   : > { %19178 = vst [vmem:[#allocation7_spill] sm:$0xff] %v14477_v12  ;;  %v10750_v5 = vpop.eup %10749  ;;  %10769 = vrcp.f32 %v4886_v3  ;;  %v4901_v11 = vadd.f32 1.0, %v10748_v39  ;;  %8988 = vmatmul.mubr.msk.bf16.gmra.mrb[216].mxu1 %vm1354_vm1, %v19179_v52  ;;  %v9035_v19 = vmul.f32 -1.442695, %v14468_v40  ;;  %v14492_v0 = vmul.f32 -1.442695, %v14474_v23  ;;  %9004 = vmatmul.mubr.msk.bf16.gmra.mrb[248].mxu0 %vm1354_vm1, %v19179_v52 }
 0x2ea   : > { %v10752_v45 = vpop.eup %10751  ;;  %10771 = vrcp.f32 %v4899_v13  ;;  %v4900_v63 = vadd.f32 1.0, %v10750_v5  ;;  %2651 = vmatprep.mubr.bf16.mxu1 %v18970_v21  ;;  %v14501_v15 = vadd.f32 %v13850_v51, %v14353_v25  ;;  %v14505_v4 = vadd.f32 %v19181_v54, %v14372_v26  ;;  %2842 = vmatprep.mubr.bf16.mxu0 %v18970_v21  ;;  %v19182_v39 = vld [vmem:[#allocation37_spill] sm:$0xff]  ;;  %v19183_v52 = vld [vmem:[#allocation38_spill] sm:$0xff] }
 0x2eb   : > { %v10754_v32 = vpop.eup %10753  ;;  %10773 = vrcp.f32 %v4901_v11  ;;  %v4902_v7 = vadd.f32 1.0, %v10752_v45  ;;  %vm6498_vm2 = vcmp.lt.s32.totalorder %v14477_v12, 243  ;;  %v9050_v3 = vmul.f32 -1.442695, %v14481_v59 }
 0x2ec   : > { %v10756_v6 = vpop.eup %10755  ;;  %10775 = vrcp.f32 %v4900_v63  ;;  %v4423_v36 = vadd.f32 1.0, %v10754_v32  ;;  %v14512_v13 = vadd.f32 %v19182_v39, %v14330_v17  ;;  %v9052_v11 = vmul.f32 -1.442695, %v14486_v10  ;;  %v19184_v63 = vld [vmem:[#allocation39_spill] sm:$0xff] }
 0x2ed   : > { %v10758_v5 = vpop.eup %10757  ;;  %10777 = vrcp.f32 %v4902_v7  ;;  %v4425_v51 = vadd.f32 1.0, %v10756_v6  ;;  %v14517_v45 = vadd.f32 %v19183_v52, %v14335_v55  ;;  %v14521_v32 = vadd.f32 %v19184_v63, %v14353_v25  ;;  %v19188_v52 = vld [vmem:[#allocation70_spill] sm:$0xff]  ;;  %19193 = vst [vmem:[#allocation39_spill] sm:$0xff] %v14545_v62 }
 0x2ee   : > { %v10760_v54 = vpop.eup %10759  ;;  %10779 = vrcp.f32 %v4423_v36  ;;  %v4424_v8 = vadd.f32 1.0, %v10758_v5  ;;  %v14525_v39 = vadd.f32 %v19186_v2, %v14372_v26  ;;  %v9051_v7 = vmul.f32 -1.442695, %v14501_v15  ;;  %v19191_v2 = vld [vmem:[#allocation40_spill] sm:$0xff] }
 0x2ef   : > { %19185 = vst [vmem:[#allocation68_spill] sm:$0xff] %v14521_v32  ;;  %v10762_v33 = vpop.eup %10761  ;;  %10781 = vrcp.f32 %v4425_v51  ;;  %v9053_v6 = vmul.f32 -1.442695, %v14505_v4  ;;  %v14531_v53 = vadd.f32 %v19188_v52, %v14330_v17  ;;  %v14534_v5 = vsub.s32 %v7657_v61, %v19145_v29  ;;  %v14543_v51 = vpop.f32.mrb[99].mxu1  ;;  %v19194_v29 = vld [vmem:[#allocation41_spill] sm:$0xff] }
 0x2f0   : > { %19187 = vst [vmem:[#allocation10_spill] sm:$0xff] %v14525_v39  ;;  %v10764_v36 = vpop.eup %10763  ;;  %v4439_v63 = vadd.f32 1.0, %v10762_v33  ;;  %v14537_v56 = vmul.f32 -1.442695, %v14512_v13  ;;  %v14541_v48 = vadd.f32 %v19191_v2, %v14335_v55  ;;  %19192 = vst [vmem:[#allocation38_spill] sm:$0xff] %v14543_v51  ;;  %10783 = vrcp.f32 %v4424_v8  ;;  %v19195_v61 = vld [vmem:[#allocation9_spill] sm:$0xff] }
 0x2f1   : > { %19189 = vst [vmem:[#allocation29_spill] sm:$0xff] %v14531_v53  ;;  %19190 = vst [vmem:[#allocation37_spill] sm:$0xff] %v14534_v5  ;;  %v10766_v34 = vpop.eup %10765  ;;  %v4441_v52 = vadd.f32 1.0, %v10764_v36  ;;  %v14548_v35 = vmul.f32 -1.442695, %v14517_v45  ;;  %v14552_v33 = vadd.f32 %v19194_v29, %v14353_v25  ;;  %8989 = vmatmul.mubr.msk.bf16.gmra.mrb[220].mxu1 %vm1354_vm1, %v19195_v61  ;;  %9005 = vmatmul.mubr.msk.bf16.gmra.mrb[252].mxu0 %vm1354_vm1, %v19195_v61 }
 0x2f2   : > { %v10768_v38 = vpop.eup %10767  ;;  %v6373_v2 = vmul.f32 %v10766_v34, %v14295_v16  ;;  %10785 = vrcp.f32 %v4439_v63  ;;  %v14558_v51 = vmul.f32 -1.442695, %v14521_v32  ;;  %v14561_v8 = vmul.f32 -1.442695, %v14525_v39  ;;  %2661 = vmatprep.mubr.bf16.mxu1 %v18970_v21  ;;  %v19196_v34 = vld [vmem:[#allocation42_spill] sm:$0xff]  ;;  %2852 = vmatprep.mubr.bf16.mxu0 %v18970_v21 }
 0x2f3   : > { %v10770_v36 = vpop.eup %10769  ;;  %v6372_v29 = vmul.f32 %v10768_v38, %v14302_v1  ;;  %10787 = vrcp.f32 %v4441_v52  ;;  %v14568_v62 = vmul.f32 -1.442695, %v14531_v53  ;;  %v14572_v16 = vadd.f32 %v19196_v34, %v14372_v26 }
 0x2f4   : > { %v10772_v63 = vpop.eup %10771  ;;  %v7159_v24 = vadd.f32 %v14453_v37, %v6373_v2  ;;  %v6374_v61 = vmul.f32 %v10770_v36, %v14306_v58  ;;  %10789 = vpow2.f32 %v9035_v19  ;;  %v14578_v39 = vmul.f32 -1.442695, %v14541_v48  ;;  %v14588_v19 = vpop.f32.mrb[100].mxu1 }
 0x2f5   : > { %v10774_v38 = vpop.eup %10773  ;;  %v7123_v1 = vadd.f32 %v14459_v31, %v6372_v29  ;;  %v6387_v52 = vmul.f32 %v10772_v63, %v14345_v41  ;;  %10791 = vpow2.f32 %v14492_v0  ;;  %v14584_v34 = vmul.f32 -1.442695, %v14552_v33  ;;  %v14590_v2 = vpop.f32.mrb[132].mxu0 }
 0x2f6   : > { %v10776_v53 = vpop.eup %10775  ;;  %v7195_v32 = vadd.f32 %v14464_v44, %v6374_v61  ;;  %v6389_v37 = vmul.f32 %v10774_v38, %v14349_v30  ;;  %v4426_v58 = vadd.f32 1.0, %v10760_v54  ;;  %10793 = vpow2.f32 %v9050_v3  ;;  %v14598_v29 = vpop.f32.mrb[101].mxu1 }
 0x2f7   : > { %v10778_v36 = vpop.eup %10777  ;;  %v7041_v41 = vsel %vm6498_vm2, %v6387_v52, 0.0  ;;  %v6388_v31 = vmul.f32 %v10776_v53, %v14357_v18  ;;  %10795 = vpow2.f32 %v9052_v11  ;;  %v14596_v0 = vmul.f32 -1.442695, %v14572_v16  ;;  %v14600_v44 = vpop.f32.mrb[133].mxu0  ;;  %v19198_v52 = vld [vmem:[#allocation43_spill] sm:$0xff] }
 0x2f8   : > { %19197 = vst [vmem:[#allocation69_spill] sm:$0xff] %v14600_v44  ;;  %v10780_v30 = vpop.eup %10779  ;;  %v7088_v3 = vadd.f32 %v14470_v9, %v7041_v41  ;;  %v7043_v54 = vsel %vm6498_vm2, %v6389_v37, 0.0  ;;  %v6390_v63 = vmul.f32 %v10778_v36, %v14361_v43  ;;  %10797 = vpow2.f32 %v9051_v7  ;;  %v14606_v61 = vpop.f32.mrb[102].mxu1  ;;  %v19201_v43 = vld [vmem:[#allocation12_spill] sm:$0xff] }
 0x2f9   : > { %v14608_v18 = vpop.f32.mrb[134].mxu0  ;;  %v10782_v53 = vpop.eup %10781  ;;  %v7160_v11 = vadd.f32 %v7159_v24, %v7043_v54  ;;  %v7042_v38 = vsel %vm6498_vm2, %v6388_v31, 0.0  ;;  %10799 = vpow2.f32 %v9053_v6  ;;  %v14614_v44 = vadd.f32 %v19198_v52, %v14330_v17  ;;  %8990 = vmatmul.mubr.msk.bf16.gmra.mrb[224].mxu1 %vm1354_vm1, %v19201_v43  ;;  %9006 = vmatmul.mubr.msk.bf16.gmra.mrb[0].mxu0 %vm1354_vm1, %v19201_v43 }
 0x2fa   : > { %v14616_v9 = vpop.f32.mrb[103].mxu1  ;;  %v14618_v37 = vpop.f32.mrb[135].mxu0  ;;  %v7089_v7 = vrot.slane %v7088_v3, 4  ;;  %v7124_v36 = vadd.f32 %v7123_v1, %v7042_v38  ;;  %v7044_v24 = vsel %vm6498_vm2, %v6390_v63, 0.0  ;;  %10801 = vrcp.f32 %v4426_v58  ;;  %2671 = vmatprep.mubr.bf16.mxu1 %v18970_v21  ;;  %2862 = vmatprep.mubr.bf16.mxu0 %v18970_v21 }
 0x2fb   : > { %19199 = vst [vmem:[#allocation70_spill] sm:$0xff] %v14616_v9  ;;  %19200 = vst [vmem:[#allocation40_spill] sm:$0xff] %v14618_v37  ;;  %v14627_v6 = vpop.eup %10783  ;;  %v7161_v41 = vrot.slane %v7160_v11, 4  ;;  %v7196_v31 = vadd.f32 %v7195_v32, %v7044_v24  ;;  %v5911_v54 = vmul.f32 %v10780_v30, %v14365_v22  ;;  %10803 = vpow2.f32 %v14537_v56  ;;  %v19202_v9 = vld [vmem:[#allocation11_spill] sm:$0xff] }
 0x2fc   : > { %v10786_v1 = vpop.eup %10785  ;;  %v7090_v38 = vadd.f32 %v7089_v7, %v7088_v3  ;;  %v7125_v52 = vrot.slane %v7124_v36, 4  ;;  %v5913_v58 = vmul.f32 %v10782_v53, %v14376_v57  ;;  %10805 = vpow2.f32 %v14548_v35  ;;  %v14640_v53 = vpop.f32.mrb[104].mxu1 }
 0x2fd   : > { %v10788_v63 = vpop.eup %10787  ;;  %v7162_v43 = vadd.f32 %v7161_v41, %v7160_v11  ;;  %v7197_v12 = vrot.slane %v7196_v31, 4  ;;  %v5927_v37 = vmul.f32 %v10786_v1, %v14425_v49  ;;  %10807 = vpow2.f32 %v14558_v51  ;;  %v14642_v11 = vpop.f32.mrb[136].mxu0 }
 0x2fe   : > { %v10790_v32 = vpop.eup %10789  ;;  %v7091_v22 = vrot.slane %v7090_v38, 2  ;;  %v7126_v30 = vadd.f32 %v7125_v52, %v7124_v36  ;;  %v5929_v56 = vmul.f32 %v10788_v63, %v14430_v47  ;;  %10809 = vpow2.f32 %v14561_v8 }
 0x2ff   : > { %v10792_v3 = vpop.eup %10791  ;;  %v7163_v7 = vrot.slane %v7162_v43, 2  ;;  %v7198_v24 = vadd.f32 %v7197_v12, %v7196_v31  ;;  %v14638_v57 = vadd.f32 %v5927_v37, %v5911_v54  ;;  %v4440_v35 = vadd.f32 1.0, %v10790_v32 }
 0x300   : > { %v10794_v49 = vpop.eup %10793  ;;  %v7092_v41 = vadd.f32 %v7091_v22, %v7090_v38  ;;  %v7127_v51 = vrot.slane %v7126_v30, 2  ;;  %v14644_v1 = vadd.f32 %v5929_v56, %v5913_v58  ;;  %v4442_v36 = vadd.f32 1.0, %v10792_v3 }
 0x301   : > { %v10796_v52 = vpop.eup %10795  ;;  %v7164_v47 = vadd.f32 %v7163_v7, %v7162_v43  ;;  %v7199_v63 = vrot.slane %v7198_v24, 2  ;;  %10811 = vrcp.f32 %v4440_v35  ;;  %v4455_v8 = vadd.f32 1.0, %v10794_v49  ;;  %8991 = vmatmul.mubr.msk.bf16.gmra.mrb[228].mxu1 %vm1354_vm1, %v19202_v9  ;;  %9007 = vmatmul.mubr.msk.bf16.gmra.mrb[4].mxu0 %vm1354_vm1, %v19202_v9  ;;  %v19203_v9 = vld [vmem:[#allocation44_spill] sm:$0xff] }
 0x302   : > { %v10798_v12 = vpop.eup %10797  ;;  %v7093_v37 = vrot.slane %v7092_v41, 1  ;;  %v7128_v31 = vadd.f32 %v7127_v51, %v7126_v30  ;;  %10813 = vrcp.f32 %v4442_v36  ;;  %v4457_v54 = vadd.f32 1.0, %v10796_v52  ;;  %2681 = vmatprep.mubr.bf16.mxu1 %v18970_v21  ;;  %2872 = vmatprep.mubr.bf16.mxu0 %v18970_v21  ;;  %v14656_v36 = vpop.f32.mrb[105].mxu1 }
 0x303   : > { %v10800_v38 = vpop.eup %10799  ;;  %v7165_v58 = vrot.slane %v7164_v47, 1  ;;  %v7200_v32 = vadd.f32 %v7199_v63, %v7198_v24  ;;  %10815 = vrcp.f32 %v4455_v8  ;;  %v4456_v43 = vadd.f32 1.0, %v10798_v12 }
 0x304   : > { %v10802_v22 = vpop.eup %10801  ;;  %v7094_v56 = vadd.f32 %v7093_v37, %v7092_v41  ;;  %v7129_v3 = vrot.slane %v7128_v31, 1  ;;  %10817 = vrcp.f32 %v4457_v54  ;;  %v4458_v7 = vadd.f32 1.0, %v10800_v38 }
 0x305   : > { %v10804_v30 = vpop.eup %10803  ;;  %v7166_v35 = vadd.f32 %v7165_v58, %v7164_v47  ;;  %v7201_v49 = vrot.slane %v7200_v32, 1  ;;  %10819 = vrcp.f32 %v4456_v43  ;;  %v14654_v51 = vadd.f32 %v19203_v9, %v14335_v55  ;;  %v19204_v47 = vld [vmem:[#allocation45_spill] sm:$0xff] }
 0x306   : > { %v10806_v24 = vpop.eup %10805  ;;  %v7130_v52 = vadd.f32 %v7129_v3, %v7128_v31  ;;  %10821 = vrcp.f32 %v4458_v7  ;;  %v4471_v63 = vadd.f32 1.0, %v10804_v30  ;;  %v14660_v41 = vadd.f32 %v13973_v60, %v14353_v25  ;;  %v14669_v30 = vpop.f32.mrb[137].mxu0 }
 0x307   : > { %v10808_v8 = vpop.eup %10807  ;;  %v7202_v12 = vadd.f32 %v7201_v49, %v7200_v32  ;;  %v4473_v37 = vadd.f32 1.0, %v10806_v24  ;;  %10823 = vpow2.f32 %v14568_v62  ;;  %v14665_v54 = vadd.f32 %v19204_v47, %v14372_v26  ;;  %v19205_v32 = vld [vmem:[#allocation14_spill] sm:$0xff] }
 0x308   : > { %v10810_v38 = vpop.eup %10809  ;;  %v7651_v58 = vcombine.low %v7094_v56, %v7130_v52  ;;  %10825 = vrcp.f32 %v4471_v63  ;;  %v4472_v43 = vadd.f32 1.0, %v10808_v8  ;;  %v9098_v31 = vmul.f32 -1.442695, %v14614_v44  ;;  %v14692_v63 = vpop.f32.mrb[106].mxu1 }
 0x309   : > { %v7652_v3 = vcombine.low %v7166_v35, %v7202_v12  ;;  %10827 = vrcp.f32 %v4473_v37  ;;  %v4474_v7 = vadd.f32 1.0, %v10810_v38  ;;  %v9100_v60 = vmul.f32 -1.442695, %v14654_v51  ;;  %8992 = vmatmul.mubr.msk.bf16.gmra.mrb[232].mxu1 %vm1354_vm1, %v19205_v32  ;;  %9008 = vmatmul.mubr.msk.bf16.gmra.mrb[8].mxu0 %vm1354_vm1, %v19205_v32  ;;  %v19225_v38 = vld [vmem:[#allocation52_spill] sm:$0xff] }
 0x30a   : > { %v14674_v62 = vrot.slane %v7651_v58, %v14534_v5  ;;  %10829 = vrcp.f32 %v4472_v43  ;;  %v9099_v56 = vmul.f32 -1.442695, %v14660_v41  ;;  %v14679_v49 = vadd.f32 %v14005_v46, %v14330_v17  ;;  %2691 = vmatprep.mubr.bf16.mxu1 %v18970_v21  ;;  %v14694_v46 = vpop.f32.mrb[138].mxu0  ;;  %2882 = vmatprep.mubr.bf16.mxu0 %v18970_v21 }
 0x30b   : > { %v10812_v35 = vpop.eup %10811  ;;  %v14685_v9 = vrot.slane %v7652_v3, %v14534_v5  ;;  %10831 = vrcp.f32 %v4474_v7  ;;  %v9101_v24 = vmul.f32 -1.442695, %v14665_v54  ;;  %v14690_v52 = vadd.f32 %v14007_v28, %v14335_v55  ;;  %v14710_v3 = vpop.f32.mrb[107].mxu1  ;;  %v19228_v5 = vld [vmem:[#allocation54_spill] sm:$0xff] }
 0x30c   : > { %19206 = vst [vmem:[#allocation41_spill] sm:$0xff] %v14674_v62  ;;  %v10814_v8 = vpop.eup %10813  ;;  %v5912_v12 = vmul.f32 %v14627_v6, %v14407_v20  ;;  %v5928_v37 = vmul.f32 %v10812_v35, %v14468_v40  ;;  %10833 = vpow2.f32 %v14578_v39  ;;  %v14703_v47 = vadd.f32 %v14011_v27, %v14353_v25  ;;  %v14712_v20 = vpop.f32.mrb[139].mxu0 }
 0x30d   : > { %19207 = vst [vmem:[#allocation9_spill] sm:$0xff] %v14685_v9  ;;  %v10816_v28 = vpop.eup %10815  ;;  %v5914_v58 = vmul.f32 %v10802_v22, %v14419_v50  ;;  %v5930_v43 = vmul.f32 %v10814_v8, %v14474_v23  ;;  %10835 = vpow2.f32 %v14584_v34  ;;  %v9114_v27 = vmul.f32 -1.442695, %v14679_v49 }
 0x30e   : > { %v10818_v40 = vpop.eup %10817  ;;  %v7239_v39 = vadd.f32 %v5928_v37, %v5912_v12  ;;  %v5943_v6 = vmul.f32 %v10816_v28, %v14481_v59  ;;  %10837 = vpow2.f32 %v14596_v0  ;;  %v14720_v23 = vadd.f32 %v14013_v14, %v14372_v26  ;;  %v19208_v14 = vld [vmem:[#allocation13_spill] sm:$0xff]  ;;  %v14741_v28 = vpop.f32.mrb[140].mxu0 }
 0x30f   : > { %v10820_v7 = vpop.eup %10819  ;;  %v7311_v32 = vadd.f32 %v5930_v43, %v5914_v58  ;;  %v5945_v50 = vmul.f32 %v10818_v40, %v14486_v10  ;;  %10839 = vpow2.f32 %v9098_v31  ;;  %v14726_v59 = vadd.f32 %v14019_v42, %v14330_v17 }
 0x310   : > { %v10822_v34 = vpop.eup %10821  ;;  %v7204_v22 = vadd.f32 %v14638_v57, %v5943_v6  ;;  %v5944_v35 = vmul.f32 %v10820_v7, %v14501_v15  ;;  %10841 = vpow2.f32 %v9100_v60  ;;  %v9116_v31 = vmul.f32 -1.442695, %v14690_v52 }
 0x311   : > { %v10824_v0 = vpop.eup %10823  ;;  %v7276_v8 = vadd.f32 %v14644_v1, %v5945_v50  ;;  %v5946_v10 = vmul.f32 %v10822_v34, %v14505_v4  ;;  %10843 = vpow2.f32 %v9099_v56  ;;  %8993 = vmatmul.mubr.msk.bf16.gmra.mrb[236].mxu1 %vm1354_vm1, %v19208_v14  ;;  %v9115_v15 = vmul.f32 -1.442695, %v14703_v47  ;;  %9009 = vmatmul.mubr.msk.bf16.gmra.mrb[12].mxu0 %vm1354_vm1, %v19208_v14  ;;  %v14739_v56 = vpop.f32.mrb[108].mxu1 }
 0x312   : > { %v10826_v12 = vpop.eup %10825  ;;  %v7240_v57 = vadd.f32 %v7239_v39, %v5944_v35  ;;  %v4487_v37 = vadd.f32 1.0, %v10824_v0  ;;  %10845 = vpow2.f32 %v9101_v24  ;;  %2701 = vmatprep.mubr.bf16.mxu1 %v18970_v21  ;;  %v9117_v60 = vmul.f32 -1.442695, %v14720_v23  ;;  %2892 = vmatprep.mubr.bf16.mxu0 %v18970_v21  ;;  %v14746_v40 = vpop.f32.mrb[109].mxu1 }
 0x313   : > { %v10828_v42 = vpop.eup %10827  ;;  %v7312_v1 = vadd.f32 %v7311_v32, %v5946_v10  ;;  %v5959_v4 = vmul.f32 %v10826_v12, %v14512_v13  ;;  %10847 = vpow2.f32 %v9114_v27  ;;  %v9130_v43 = vmul.f32 -1.442695, %v14726_v59  ;;  %19209 = vst [vmem:[#allocation42_spill] sm:$0xff] %v14746_v40  ;;  %v14748_v39 = vpop.f32.mrb[141].mxu0  ;;  %v19211_v27 = vld [vmem:[#allocation68_spill] sm:$0xff] }
 0x314   : > { %v10830_v24 = vpop.eup %10829  ;;  %v5961_v58 = vmul.f32 %v10828_v42, %v14517_v45  ;;  %10849 = vrcp.f32 %v4487_v37  ;;  %19210 = vst [vmem:[#allocation43_spill] sm:$0xff] %v14748_v39  ;;  %v14751_v32 = vpop.f32.mrb[110].mxu1  ;;  %v19214_v45 = vld [vmem:[#allocation10_spill] sm:$0xff]  ;;  %v14800_v9 = vadd.f32 %v19225_v38, %v14372_v26  ;;  %v14811_v38 = vadd.f32 %v19228_v5, %v14335_v55 }
 0x315   : > { %v10832_v13 = vpop.eup %10831  ;;  %v7205_v6 = vadd.f32 %v7204_v22, %v5959_v4  ;;  %v5960_v7 = vmul.f32 %v10830_v24, %v19211_v27  ;;  %10851 = vpow2.f32 %v9116_v31  ;;  %19212 = vst [vmem:[#allocation12_spill] sm:$0xff] %v14751_v32  ;;  %v14753_v50 = vpop.f32.mrb[142].mxu0 }
 0x316   : > { %19213 = vst [vmem:[#allocation11_spill] sm:$0xff] %v14753_v50  ;;  %v10834_v34 = vpop.eup %10833  ;;  %v14755_v35 = vadd.f32 %v7276_v8, %v5961_v58  ;;  %v5962_v0 = vmul.f32 %v10832_v13, %v19214_v45  ;;  %10853 = vpow2.f32 %v9115_v15  ;;  %v14758_v10 = vpop.f32.mrb[111].mxu1  ;;  %v19216_v8 = vld [vmem:[#allocation46_spill] sm:$0xff]  ;;  %v19217_v15 = vld [vmem:[#allocation16_spill] sm:$0xff] }
 0x317   : > { %19215 = vst [vmem:[#allocation44_spill] sm:$0xff] %v14758_v10  ;;  %v10836_v14 = vpop.eup %10835  ;;  %v14760_v12 = vadd.f32 %v7240_v57, %v5960_v7  ;;  %v4489_v37 = vadd.f32 1.0, %v10834_v34  ;;  %10855 = vpow2.f32 %v9117_v60  ;;  %v14766_v58 = vadd.f32 %v19216_v8, %v14335_v55 }
 0x318   : > { %v10838_v22 = vpop.eup %10837  ;;  %v14762_v42 = vadd.f32 %v7312_v1, %v5962_v0  ;;  %v4488_v31 = vadd.f32 1.0, %v10836_v14  ;;  %10857 = vpow2.f32 %v9130_v43 }
 0x319   : > { %v10840_v4 = vpop.eup %10839  ;;  %10859 = vrcp.f32 %v4489_v37  ;;  %v4490_v24 = vadd.f32 1.0, %v10838_v22  ;;  %8994 = vmatmul.mubr.msk.bf16.gmra.mrb[240].mxu1 %vm1354_vm1, %v19217_v15  ;;  %9010 = vmatmul.mubr.msk.bf16.gmra.mrb[16].mxu0 %vm1354_vm1, %v19217_v15  ;;  %v9132_v45 = vmul.f32 -1.442695, %v14766_v58  ;;  %v19218_v37 = vld [vmem:[#allocation47_spill] sm:$0xff]  ;;  %v19221_v15 = vld [vmem:[#allocation29_spill] sm:$0xff] }
 0x31a   : > { %v10842_v13 = vpop.eup %10841  ;;  %10861 = vrcp.f32 %v4488_v31  ;;  %v4503_v57 = vadd.f32 1.0, %v10840_v4  ;;  %2711 = vmatprep.mubr.bf16.mxu1 %v18970_v21  ;;  %2902 = vmatprep.mubr.bf16.mxu0 %v18970_v21  ;;  %v14777_v22 = vadd.f32 %v19218_v37, %v14353_v25  ;;  %v19219_v31 = vld [vmem:[#allocation48_spill] sm:$0xff]  ;;  %v19224_v37 = vld [vmem:[#allocation51_spill] sm:$0xff] }
 0x31b   : > { %v10844_v1 = vpop.eup %10843  ;;  %10863 = vrcp.f32 %v4490_v24  ;;  %v4505_v60 = vadd.f32 1.0, %v10842_v13  ;;  %v14781_v4 = vadd.f32 %v19219_v31, %v14372_v26  ;;  %v14783_v24 = vpop.f32.mrb[143].mxu0  ;;  %v14796_v31 = vadd.f32 %v19224_v37, %v14353_v25 }
 0x31c   : > { %v10846_v43 = vpop.eup %10845  ;;  %10865 = vrcp.f32 %v4503_v57  ;;  %v4504_v27 = vadd.f32 1.0, %v10844_v1  ;;  %19220 = vst [vmem:[#allocation45_spill] sm:$0xff] %v14783_v24  ;;  %v19222_v57 = vld [vmem:[#allocation49_spill] sm:$0xff]  ;;  %v9131_v37 = vmul.f32 -1.442695, %v14777_v22 }
 0x31d   : > { %v10848_v7 = vpop.eup %10847  ;;  %10867 = vrcp.f32 %v4505_v60  ;;  %v4506_v34 = vadd.f32 1.0, %v10846_v43  ;;  %v14788_v1 = vadd.f32 %v19222_v57, %v14330_v17  ;;  %v19223_v60 = vld [vmem:[#allocation50_spill] sm:$0xff]  ;;  %v19226_v57 = vld [vmem:[#allocation53_spill] sm:$0xff] }
 0x31e   : > { %v10850_v0 = vpop.eup %10849  ;;  %10869 = vrcp.f32 %v4504_v27  ;;  %v4519_v14 = vadd.f32 1.0, %v10848_v7  ;;  %v14792_v43 = vadd.f32 %v19223_v60, %v14335_v55  ;;  %v14804_v62 = vadd.f32 %v19226_v57, %v14330_v17  ;;  %v19227_v60 = vld [vmem:[#allocation15_spill] sm:$0xff] }
 0x31f   : > { %v10852_v8 = vpop.eup %10851  ;;  %v5975_v13 = vmul.f32 %v10850_v0, %v19221_v15  ;;  %10871 = vrcp.f32 %v4506_v34  ;;  %v9147_v57 = vmul.f32 -1.442695, %v14796_v31 }
 0x320   : > { %v10854_v27 = vpop.eup %10853  ;;  %10873 = vrcp.f32 %v4519_v14  ;;  %v4521_v7 = vadd.f32 1.0, %v10852_v8  ;;  %v9148_v5 = vmul.f32 -1.442695, %v14792_v43 }
 0x321   : > { %v10856_v34 = vpop.eup %10855  ;;  %v7206_v0 = vadd.f32 %v7205_v6, %v5975_v13  ;;  %v4520_v15 = vadd.f32 1.0, %v10854_v27  ;;  %10875 = vpow2.f32 %v9132_v45  ;;  %8995 = vmatmul.mubr.msk.bf16.gmra.mrb[244].mxu1 %vm1354_vm1, %v19227_v60  ;;  %9011 = vmatmul.mubr.msk.bf16.gmra.mrb[20].mxu0 %vm1354_vm1, %v19227_v60  ;;  %v9133_v13 = vmul.f32 -1.442695, %v14781_v4 }
 0x322   : > { %v10858_v14 = vpop.eup %10857  ;;  %10877 = vrcp.f32 %v4521_v7  ;;  %v4522_v8 = vadd.f32 1.0, %v10856_v34  ;;  %2721 = vmatprep.mubr.bf16.mxu1 %v18970_v21  ;;  %v9146_v27 = vmul.f32 -1.442695, %v14788_v1  ;;  %2912 = vmatprep.mubr.bf16.mxu0 %v18970_v21 }
 0x323   : > { %v10860_v6 = vpop.eup %10859  ;;  %10879 = vrcp.f32 %v4520_v15  ;;  %v4535_v45 = vadd.f32 1.0, %v10858_v14  ;;  %v9149_v15 = vmul.f32 -1.442695, %v14800_v9  ;;  %v9162_v14 = vmul.f32 -1.442695, %v14804_v62 }
 0x324   : > { %v10862_v7 = vpop.eup %10861  ;;  %v5977_v34 = vmul.f32 %v10860_v6, %v14541_v48  ;;  %10881 = vrcp.f32 %v4522_v8  ;;  %v9164_v48 = vmul.f32 -1.442695, %v14811_v38 }
 0x325   : > { %v10864_v60 = vpop.eup %10863  ;;  %v5976_v24 = vmul.f32 %v10862_v7, %v14552_v33  ;;  %10883 = vrcp.f32 %v4535_v45  ;;  %v19229_v33 = vld [vmem:[#allocation55_spill] sm:$0xff] }
 0x326   : > { %v10866_v10 = vpop.eup %10865  ;;  %v7278_v50 = vadd.f32 %v14755_v35, %v5977_v34  ;;  %v5978_v32 = vmul.f32 %v10864_v60, %v14572_v16  ;;  %10885 = vpow2.f32 %v9131_v37  ;;  %v14832_v45 = vadd.f32 %v19229_v33, %v14353_v25  ;;  %v19230_v16 = vld [vmem:[#allocation56_spill] sm:$0xff]  ;;  %v14840_v34 = vpop.f32.mrb[112].mxu1 }
 0x327   : > { %v10868_v8 = vpop.eup %10867  ;;  %v7242_v6 = vadd.f32 %v14760_v12, %v5976_v24  ;;  %v5991_v39 = vmul.f32 %v10866_v10, %v14614_v44  ;;  %10887 = vpow2.f32 %v9133_v13  ;;  %v14838_v37 = vadd.f32 %v19230_v16, %v14372_v26  ;;  %19231 = vst [vmem:[#allocation14_spill] sm:$0xff] %v14840_v34  ;;  %v14842_v12 = vpop.f32.mrb[144].mxu0  ;;  %v19233_v13 = vld [vmem:[#allocation71_spill] sm:$0xff] }
 0x328   : > { %v10870_v7 = vpop.eup %10869  ;;  %v7314_v40 = vadd.f32 %v14762_v42, %v5978_v32  ;;  %v5993_v35 = vmul.f32 %v10868_v8, %v14654_v51  ;;  %10889 = vpow2.f32 %v9146_v27  ;;  %19232 = vst [vmem:[#allocation13_spill] sm:$0xff] %v14842_v12  ;;  %v14847_v60 = vadd.f32 %v19233_v13, %v14330_v17  ;;  %v14849_v32 = vpop.f32.mrb[113].mxu1  ;;  %v19236_v42 = vld [vmem:[#allocation17_spill] sm:$0xff] }
 0x329   : > { %v10872_v44 = vpop.eup %10871  ;;  %v7207_v10 = vadd.f32 %v7206_v0, %v5991_v39  ;;  %v5992_v24 = vmul.f32 %v10870_v7, %v14660_v41  ;;  %10891 = vpow2.f32 %v9148_v5  ;;  %19234 = vst [vmem:[#allocation68_spill] sm:$0xff] %v14849_v32  ;;  %v14851_v51 = vpop.f32.mrb[145].mxu0  ;;  %8996 = vmatmul.mubr.msk.bf16.gmra.mrb[248].mxu1 %vm1354_vm1, %v19236_v42  ;;  %v19237_v39 = vld [vmem:[#allocation72_spill] sm:$0xff]  ;;  %9012 = vmatmul.mubr.msk.bf16.gmra.mrb[24].mxu0 %vm1354_vm1, %v19236_v42  ;;  %v9165_v42 = vmul.f32 -1.442695, %v14838_v37 }
 0x32a   : > { %19235 = vst [vmem:[#allocation10_spill] sm:$0xff] %v14851_v51  ;;  %v10874_v27 = vpop.eup %10873  ;;  %v7279_v8 = vadd.f32 %v7278_v50, %v5993_v35  ;;  %v5994_v33 = vmul.f32 %v10872_v44, %v14665_v54  ;;  %10893 = vpow2.f32 %v9147_v57  ;;  %v14858_v41 = vadd.f32 %v19237_v39, %v14335_v55  ;;  %v14860_v0 = vpop.f32.mrb[114].mxu1  ;;  %2731 = vmatprep.mubr.bf16.mxu1 %v18970_v21 }
 0x32b   : > { %19238 = vst [vmem:[#allocation46_spill] sm:$0xff] %v14860_v0  ;;  %v14862_v5 = vpop.f32.mrb[146].mxu0  ;;  %v10876_v7 = vpop.eup %10875  ;;  %v7243_v16 = vadd.f32 %v7242_v6, %v5992_v24  ;;  %v6007_v50 = vmul.f32 %v10874_v27, %v14679_v49  ;;  %10895 = vpow2.f32 %v9149_v15  ;;  %v9163_v54 = vmul.f32 -1.442695, %v14832_v45  ;;  %2922 = vmatprep.mubr.bf16.mxu0 %v18970_v21 }
 0x32c   : > { %19239 = vst [vmem:[#allocation16_spill] sm:$0xff] %v14862_v5  ;;  %v14869_v57 = vpop.f32.mrb[115].mxu1  ;;  %v14871_v35 = vpop.f32.mrb[147].mxu0  ;;  %v7315_v13 = vadd.f32 %v7314_v40, %v5994_v33  ;;  %v4537_v39 = vadd.f32 1.0, %v10876_v7  ;;  %10897 = vpow2.f32 %v9162_v14  ;;  %v9178_v49 = vmul.f32 -1.442695, %v14847_v60 }
 0x32d   : > { %19240 = vst [vmem:[#allocation47_spill] sm:$0xff] %v14869_v57  ;;  %19241 = vst [vmem:[#allocation48_spill] sm:$0xff] %v14871_v35  ;;  %v10878_v44 = vpop.eup %10877  ;;  %v7208_v0 = vadd.f32 %v7207_v10, %v6007_v50  ;;  %10899 = vpow2.f32 %v9164_v48  ;;  %v9180_v27 = vmul.f32 -1.442695, %v14858_v41  ;;  %v19244_v50 = vld [vmem:[#allocation18_spill] sm:$0xff] }
 0x32e   : > { %v10880_v5 = vpop.eup %10879  ;;  %v6009_v6 = vmul.f32 %v10878_v44, %v14690_v52  ;;  %10901 = vrcp.f32 %v4537_v39  ;;  %v19247_v39 = vld [vmem:[#allocation73_spill] sm:$0xff] }
 0x32f   : > { %v10882_v15 = vpop.eup %10881  ;;  %v6008_v24 = vmul.f32 %v10880_v5, %v14703_v47  ;;  %10903 = vpow2.f32 %v9163_v54  ;;  %v14885_v47 = vpop.f32.mrb[116].mxu1 }
 0x330   : > { %v10884_v21 = vpop.eup %10883  ;;  %v7280_v35 = vadd.f32 %v7279_v8, %v6009_v6  ;;  %v6010_v40 = vmul.f32 %v10882_v15, %v14720_v23  ;;  %10905 = vpow2.f32 %v9165_v42  ;;  %19242 = vst [vmem:[#allocation29_spill] sm:$0xff] %v14885_v47  ;;  %v14887_v5 = vpop.f32.mrb[148].mxu0  ;;  %v14901_v42 = vadd.f32 %v19247_v39, %v14353_v25  ;;  %v19250_v39 = vld [vmem:[#allocation34_spill] sm:$0xff] }
 0x331   : > { %v10886_v14 = vpop.eup %10885  ;;  %v14880_v33 = vadd.f32 %v7243_v16, %v6008_v24  ;;  %v6023_v10 = vmul.f32 %v10884_v21, %v14726_v59  ;;  %10907 = vpow2.f32 %v9178_v49  ;;  %19243 = vst [vmem:[#allocation49_spill] sm:$0xff] %v14887_v5  ;;  %8997 = vmatmul.mubr.msk.bf16.gmra.mrb[252].mxu1 %vm1354_vm1, %v19244_v50  ;;  %v14893_v54 = vpop.f32.mrb[117].mxu1  ;;  %9013 = vmatmul.mubr.msk.bf16.gmra.mrb[28].mxu0 %vm1354_vm1, %v19244_v50 }
 0x332   : > { %v10888_v52 = vpop.eup %10887  ;;  %v14883_v48 = vadd.f32 %v7315_v13, %v6010_v40  ;;  %v4536_v7 = vadd.f32 1.0, %v10886_v14  ;;  %10909 = vpow2.f32 %v9180_v27  ;;  %19245 = vst [vmem:[#allocation50_spill] sm:$0xff] %v14893_v54  ;;  %v14895_v59 = vpop.f32.mrb[149].mxu0  ;;  %v9179_v14 = vmul.f32 -1.442695, %v14901_v42 }
 0x333   : > { %v10890_v23 = vpop.eup %10889  ;;  %v14891_v8 = vadd.f32 %v7208_v0, %v6023_v10  ;;  %v4538_v16 = vadd.f32 1.0, %v10888_v52  ;;  %19246 = vst [vmem:[#allocation51_spill] sm:$0xff] %v14895_v59 }
 0x334   : > { %v10892_v44 = vpop.eup %10891  ;;  %10911 = vrcp.f32 %v4536_v7  ;;  %v4551_v13 = vadd.f32 1.0, %v10890_v23  ;;  %v19248_v7 = vld [vmem:[#allocation32_spill] sm:$0xff]  ;;  %v19249_v23 = vld [vmem:[#allocation33_spill] sm:$0xff] }
 0x335   : > { %v10894_v6 = vpop.eup %10893  ;;  %10913 = vrcp.f32 %v4538_v16  ;;  %v4553_v0 = vadd.f32 1.0, %v10892_v44  ;;  %v14906_v50 = vadd.f32 %v19248_v7, %v14372_v26  ;;  %v14910_v16 = vadd.f32 %v19249_v23, %v14330_v17 }
 0x336   : > { %v10896_v49 = vpop.eup %10895  ;;  %10915 = vrcp.f32 %v4551_v13  ;;  %v4552_v15 = vadd.f32 1.0, %v10894_v6  ;;  %v14915_v6 = vadd.f32 %v19250_v39, %v14335_v55 }
 0x337   : > { %v10898_v24 = vpop.eup %10897  ;;  %10917 = vrcp.f32 %v4553_v0  ;;  %v4554_v27 = vadd.f32 1.0, %v10896_v49  ;;  %v19251_v0 = vld [vmem:[#allocation35_spill] sm:$0xff] }
 0x338   : > { %v10900_v21 = vpop.eup %10899  ;;  %10919 = vrcp.f32 %v4552_v15  ;;  %v4567_v40 = vadd.f32 1.0, %v10898_v24  ;;  %v14919_v49 = vadd.f32 %v19251_v0, %v14353_v25  ;;  %v14921_v15 = vpop.f32.mrb[118].mxu1  ;;  %v19255_v0 = vld [vmem:[#allocation58_spill] sm:$0xff] }
 0x339   : > { %v10902_v10 = vpop.eup %10901  ;;  %10921 = vrcp.f32 %v4554_v27  ;;  %v4569_v52 = vadd.f32 1.0, %v10900_v21  ;;  %19252 = vst [vmem:[#allocation52_spill] sm:$0xff] %v14921_v15  ;;  %v19253_v21 = vld [vmem:[#allocation57_spill] sm:$0xff]  ;;  %v14933_v59 = vadd.f32 %v19255_v0, %v14335_v55  ;;  %v14950_v57 = vpop.f32.mrb[119].mxu1 }
 0x33a   : > { %v10904_v44 = vpop.eup %10903  ;;  %v6025_v13 = vmul.f32 %v10902_v10, %v14766_v58  ;;  %10923 = vrcp.f32 %v4567_v40  ;;  %v14925_v7 = vadd.f32 %v19253_v21, %v14372_v26  ;;  %v19254_v58 = vld [vmem:[#allocation4_spill] sm:$0xff]  ;;  %v19256_v21 = vld [vmem:[#allocation59_spill] sm:$0xff]  ;;  %19258 = vst [vmem:[#allocation15_spill] sm:$0xff] %v14950_v57 }
 0x33b   : > { %v10906_v24 = vpop.eup %10905  ;;  %10925 = vrcp.f32 %v4569_v52  ;;  %v4568_v27 = vadd.f32 1.0, %v10904_v44  ;;  %v14929_v40 = vadd.f32 %v19254_v58, %v14330_v17  ;;  %v9181_v44 = vmul.f32 -1.442695, %v14906_v50 }
 0x33c   : > { %v10908_v10 = vpop.eup %10907  ;;  %v7281_v23 = vadd.f32 %v7280_v35, %v6025_v13  ;;  %v4570_v39 = vadd.f32 1.0, %v10906_v24  ;;  %10927 = vpow2.f32 %v9179_v14  ;;  %v14938_v54 = vadd.f32 %v19256_v21, %v14353_v25  ;;  %v14942_v13 = vpop.f32.mrb[150].mxu0 }
 0x33d   : > { %v10910_v15 = vpop.eup %10909  ;;  %10929 = vrcp.f32 %v4568_v27  ;;  %v4583_v52 = vadd.f32 1.0, %v10908_v10  ;;  %v9194_v35 = vmul.f32 -1.442695, %v14910_v16  ;;  %v9196_v14 = vmul.f32 -1.442695, %v14915_v6  ;;  %19257 = vst [vmem:[#allocation53_spill] sm:$0xff] %v14942_v13 }
 0x33e   : > { %v10912_v5 = vpop.eup %10911  ;;  %10931 = vrcp.f32 %v4570_v39  ;;  %v4585_v58 = vadd.f32 1.0, %v10910_v15  ;;  %v9195_v27 = vmul.f32 -1.442695, %v14919_v49  ;;  %v9197_v10 = vmul.f32 -1.442695, %v14925_v7  ;;  %v14952_v51 = vpop.f32.mrb[151].mxu0 }
 0x33f   : > { %v10914_v24 = vpop.eup %10913  ;;  %v6024_v0 = vmul.f32 %v10912_v5, %v14777_v22  ;;  %10933 = vrcp.f32 %v4583_v52  ;;  %v9210_v15 = vmul.f32 -1.442695, %v14929_v40  ;;  %v9212_v39 = vmul.f32 -1.442695, %v14933_v59  ;;  %19259 = vst [vmem:[#allocation54_spill] sm:$0xff] %v14952_v51 }
 0x340   : > { %v10916_v47 = vpop.eup %10915  ;;  %v6026_v21 = vmul.f32 %v10914_v24, %v14781_v4  ;;  %10935 = vrcp.f32 %v4585_v58  ;;  %v9211_v52 = vmul.f32 -1.442695, %v14938_v54  ;;  %v19260_v24 = vld [vmem:[#allocation36_spill] sm:$0xff] }
 0x341   : > { %v10918_v13 = vpop.eup %10917  ;;  %v7245_v22 = vadd.f32 %v14880_v33, %v6024_v0  ;;  %v6039_v5 = vmul.f32 %v10916_v47, %v14788_v1  ;;  %10937 = vpow2.f32 %v9181_v44  ;;  %v14961_v12 = vadd.f32 %v19260_v24, %v14372_v26  ;;  %v19261_v1 = vld [vmem:[#allocation3_spill] sm:$0xff] }
 0x342   : > { %v10920_v32 = vpop.eup %10919  ;;  %v7317_v4 = vadd.f32 %v14883_v48, %v6026_v21  ;;  %v6041_v58 = vmul.f32 %v10918_v13, %v14792_v43  ;;  %10939 = vpow2.f32 %v9194_v35  ;;  %v14967_v47 = vadd.f32 %v19261_v1, %v14330_v17  ;;  %v19262_v43 = vld [vmem:[#allocation24_spill] sm:$0xff] }
 0x343   : > { %v10922_v57 = vpop.eup %10921  ;;  %v7210_v51 = vadd.f32 %v14891_v8, %v6039_v5  ;;  %v6040_v33 = vmul.f32 %v10920_v32, %v14796_v31  ;;  %10941 = vpow2.f32 %v9196_v14  ;;  %v14972_v35 = vadd.f32 %v19262_v43, %v14335_v55  ;;  %v19263_v31 = vld [vmem:[#allocation74_spill] sm:$0xff] }
 0x344   : > { %v10924_v44 = vpop.eup %10923  ;;  %v7282_v0 = vadd.f32 %v7281_v23, %v6041_v58  ;;  %v6042_v48 = vmul.f32 %v10922_v57, %v14800_v9  ;;  %10943 = vpow2.f32 %v9195_v27  ;;  %v14977_v32 = vadd.f32 %v19263_v31, %v14353_v25  ;;  %v14981_v57 = vpop.f32.mrb[120].mxu1 }
 0x345   : > { %v10926_v13 = vpop.eup %10925  ;;  %v7246_v21 = vadd.f32 %v7245_v22, %v6040_v33  ;;  %v6055_v8 = vmul.f32 %v10924_v44, %v14804_v62  ;;  %10945 = vpow2.f32 %v9197_v10  ;;  %v9213_v9 = vmul.f32 -1.442695, %v14961_v12  ;;  %19264 = vst [vmem:[#allocation55_spill] sm:$0xff] %v14981_v57  ;;  %v14983_v27 = vpop.f32.mrb[152].mxu0 }
 0x346   : > { %v10928_v14 = vpop.eup %10927  ;;  %v7318_v5 = vadd.f32 %v7317_v4, %v6042_v48  ;;  %v6057_v23 = vmul.f32 %v10926_v13, %v14811_v38  ;;  %10947 = vpow2.f32 %v9210_v15  ;;  %19265 = vst [vmem:[#allocation56_spill] sm:$0xff] %v14983_v27  ;;  %v9226_v62 = vmul.f32 -1.442695, %v14967_v47  ;;  %v14986_v10 = vpop.f32.mrb[121].mxu1 }
 0x347   : > { %v10930_v58 = vpop.eup %10929  ;;  %v7211_v22 = vadd.f32 %v7210_v51, %v6055_v8  ;;  %v4584_v24 = vadd.f32 1.0, %v10928_v14  ;;  %10949 = vpow2.f32 %v9212_v39  ;;  %19266 = vst [vmem:[#allocation71_spill] sm:$0xff] %v14986_v10  ;;  %v14988_v33 = vpop.f32.mrb[153].mxu0  ;;  %v9228_v15 = vmul.f32 -1.442695, %v14972_v35 }
 0x348   : > { %19267 = vst [vmem:[#allocation17_spill] sm:$0xff] %v14988_v33  ;;  %v10932_v4 = vpop.eup %10931  ;;  %v7283_v1 = vadd.f32 %v7282_v0, %v6057_v23  ;;  %v6056_v38 = vmul.f32 %v10930_v58, %v14832_v45  ;;  %10951 = vpow2.f32 %v9211_v52  ;;  %v14992_v44 = vpop.f32.mrb[122].mxu1  ;;  %v9227_v43 = vmul.f32 -1.442695, %v14977_v32 }
 0x349   : > { %19268 = vst [vmem:[#allocation72_spill] sm:$0xff] %v14992_v44  ;;  %v14994_v48 = vpop.f32.mrb[154].mxu0  ;;  %v10934_v51 = vpop.eup %10933  ;;  %v6058_v39 = vmul.f32 %v10932_v4, %v14838_v37  ;;  %10953 = vrcp.f32 %v4584_v24 }
 0x34a   : > { %19269 = vst [vmem:[#allocation18_spill] sm:$0xff] %v14994_v48  ;;  %v14998_v13 = vpop.f32.mrb[123].mxu1  ;;  %v15000_v8 = vpop.f32.mrb[155].mxu0  ;;  %v7247_v31 = vadd.f32 %v7246_v21, %v6056_v38  ;;  %v6071_v45 = vmul.f32 %v10934_v51, %v14847_v60  ;;  %10955 = vpow2.f32 %v9213_v9  ;;  %v19272_v9 = vld [vmem:[#allocation75_spill] sm:$0xff] }
 0x34b   : > { %19270 = vst [vmem:[#allocation73_spill] sm:$0xff] %v14998_v13  ;;  %19271 = vst [vmem:[#allocation32_spill] sm:$0xff] %v15000_v8  ;;  %v10936_v0 = vpop.eup %10935  ;;  %v15003_v14 = vadd.f32 %v7318_v5, %v6058_v39  ;;  %10957 = vpow2.f32 %v9226_v62  ;;  %v15012_v5 = vadd.f32 %v19272_v9, %v14372_v26  ;;  %v15014_v62 = vpop.f32.mrb[124].mxu1 }
 0x34c   : > { %v10938_v52 = vpop.eup %10937  ;;  %v6073_v23 = vmul.f32 %v10936_v0, %v14858_v41  ;;  %v15006_v37 = vadd.f32 %v7211_v22, %v6071_v45  ;;  %10959 = vpow2.f32 %v9228_v15  ;;  %19273 = vst [vmem:[#allocation33_spill] sm:$0xff] %v15014_v62  ;;  %v15058_v44 = vpop.f32.mrb[125].mxu1 }
 0x34d   : > { %v10940_v58 = vpop.eup %10939  ;;  %v4586_v24 = vadd.f32 1.0, %v10938_v52  ;;  %10961 = vpow2.f32 %v9227_v43  ;;  %v9229_v52 = vmul.f32 -1.442695, %v15012_v5  ;;  %19283 = vst [vmem:[#allocation35_spill] sm:$0xff] %v15058_v44 }
 0x34e   : > { %v10942_v4 = vpop.eup %10941  ;;  %v15008_v13 = vadd.f32 %v7283_v1, %v6073_v23  ;;  %v4599_v8 = vadd.f32 1.0, %v10940_v58  ;;  %v19274_v1 = vld [vmem:[#allocation19_spill] sm:$0xff]  ;;  %v19275_v58 = vld [vmem:[#allocation5_spill] sm:$0xff] }
 0x34f   : > { %v10944_v21 = vpop.eup %10943  ;;  %10963 = vrcp.f32 %v4586_v24  ;;  %v4601_v60 = vadd.f32 1.0, %v10942_v4  ;;  %v15018_v51 = vadd.f32 %v19274_v1, %v14330_v17  ;;  %v15023_v24 = vadd.f32 %v19275_v58, %v14335_v55  ;;  %v15025_v4 = vpop.f32.mrb[156].mxu0  ;;  %v19278_v1 = vld [vmem:[#allocation63_spill] sm:$0xff] }
 0x350   : > { %v10946_v38 = vpop.eup %10945  ;;  %10965 = vrcp.f32 %v4599_v8  ;;  %v4600_v41 = vadd.f32 1.0, %v10944_v21  ;;  %19276 = vst [vmem:[#allocation34_spill] sm:$0xff] %v15025_v4 }
 0x351   : > { %v10948_v22 = vpop.eup %10947  ;;  %10967 = vrcp.f32 %v4601_v60  ;;  %v4602_v15 = vadd.f32 1.0, %v10946_v38  ;;  %v9242_v9 = vmul.f32 -1.442695, %v15018_v51  ;;  %v19277_v38 = vld [vmem:[#allocation62_spill] sm:$0xff] }
 0x352   : > { %v10950_v39 = vpop.eup %10949  ;;  %10969 = vrcp.f32 %v4600_v41  ;;  %v4615_v43 = vadd.f32 1.0, %v10948_v22  ;;  %v15031_v41 = vadd.f32 %v19277_v38, %v14353_v25 }
 0x353   : > { %v10952_v0 = vpop.eup %10951  ;;  %10971 = vrcp.f32 %v4602_v15  ;;  %v4617_v45 = vadd.f32 1.0, %v10950_v39  ;;  %v15035_v39 = vadd.f32 %v19278_v1, %v14372_v26  ;;  %v19281_v1 = vld [vmem:[#allocation66_spill] sm:$0xff] }
 0x354   : > { %v10954_v23 = vpop.eup %10953  ;;  %10973 = vrcp.f32 %v4615_v43  ;;  %v4616_v8 = vadd.f32 1.0, %v10952_v0  ;;  %v19279_v43 = vld [vmem:[#allocation64_spill] sm:$0xff]  ;;  %v15048_v62 = vadd.f32 %v19281_v1, %v14353_v25  ;;  %v15060_v1 = vpop.f32.mrb[157].mxu0 }
 0x355   : > { %v10956_v21 = vpop.eup %10955  ;;  %v6072_v60 = vmul.f32 %v10954_v23, %v14901_v42  ;;  %10975 = vrcp.f32 %v4617_v45  ;;  %v15039_v0 = vadd.f32 %v19279_v43, %v14330_v17  ;;  %v19280_v23 = vld [vmem:[#allocation65_spill] sm:$0xff]  ;;  %19284 = vst [vmem:[#allocation57_spill] sm:$0xff] %v15060_v1 }
 0x356   : > { %v10958_v22 = vpop.eup %10957  ;;  %10977 = vrcp.f32 %v4616_v8  ;;  %v4618_v15 = vadd.f32 1.0, %v10956_v21  ;;  %v15043_v4 = vadd.f32 %v19280_v23, %v14335_v55  ;;  %v9244_v21 = vmul.f32 -1.442695, %v15023_v24 }
 0x357   : > { %v10960_v58 = vpop.eup %10959  ;;  %v7248_v42 = vadd.f32 %v7247_v31, %v6072_v60  ;;  %v4631_v45 = vadd.f32 1.0, %v10958_v22  ;;  %10979 = vpow2.f32 %v9229_v52  ;;  %v9243_v31 = vmul.f32 -1.442695, %v15031_v41  ;;  %v19282_v52 = vld [vmem:[#allocation25_spill] sm:$0xff] }
 0x358   : > { %v10962_v38 = vpop.eup %10961  ;;  %10981 = vrcp.f32 %v4618_v15  ;;  %v4633_v8 = vadd.f32 1.0, %v10960_v58  ;;  %v15053_v60 = vadd.f32 %v19282_v52, %v14372_v26  ;;  %v9245_v15 = vmul.f32 -1.442695, %v15035_v39  ;;  %v19285_v52 = vld [vmem:[#allocation8_spill] sm:$0xff] }
 0x359   : > { %v10964_v48 = vpop.eup %10963  ;;  %10983 = vrcp.f32 %v4631_v45  ;;  %v4632_v43 = vadd.f32 1.0, %v10962_v38  ;;  %v9258_v58 = vmul.f32 -1.442695, %v15039_v0  ;;  %v9260_v33 = vmul.f32 -1.442695, %v15043_v4 }
 0x35a   : > { %v10966_v22 = vpop.eup %10965  ;;  %v6074_v23 = vmul.f32 %v10964_v48, %v14906_v50  ;;  %10985 = vrcp.f32 %v4633_v8  ;;  %v15066_v10 = vadd.f32 %v19285_v52, %v14330_v17  ;;  %v1973_v50 = vpop.f32.mrb[126].mxu1  ;;  %v9259_v1 = vmul.f32 -1.442695, %v15048_v62 }
 0x35b   : > { %v10968_v45 = vpop.eup %10967  ;;  %v6087_v38 = vmul.f32 %v10966_v22, %v14910_v16  ;;  %10987 = vrcp.f32 %v4632_v43  ;;  %v2164_v48 = vpop.f32.mrb[158].mxu0  ;;  %v9261_v52 = vmul.f32 -1.442695, %v15053_v60 }
 0x35c   : > { %v10970_v8 = vpop.eup %10969  ;;  %v7320_v27 = vadd.f32 %v15003_v14, %v6074_v23  ;;  %v6089_v57 = vmul.f32 %v10968_v45, %v14915_v6  ;;  %10989 = vpow2.f32 %v9242_v9  ;;  %v1974_v44 = vpop.f32.mrb[127].mxu1  ;;  %v19286_v6 = vld [vmem:[#allocation31_spill] sm:$0xff] }
 0x35d   : > { %v2165_v34 = vpop.f32.mrb[159].mxu0  ;;  %v10972_v16 = vpop.eup %10971  ;;  %v7213_v43 = vadd.f32 %v15006_v37, %v6087_v38  ;;  %v6088_v22 = vmul.f32 %v10970_v8, %v14919_v49  ;;  %10991 = vpow2.f32 %v9244_v21  ;;  %v15078_v9 = vadd.f32 %v19286_v6, %v14335_v55  ;;  %v19287_v49 = vld [vmem:[#allocation26_spill] sm:$0xff] }
 0x35e   : > { %v10974_v50 = vpop.eup %10973  ;;  %v7285_v48 = vadd.f32 %v15008_v13, %v6089_v57  ;;  %v6090_v14 = vmul.f32 %v10972_v16, %v14925_v7  ;;  %10993 = vpow2.f32 %v9243_v31  ;;  %v15083_v37 = vadd.f32 %v19287_v49, %v14353_v25  ;;  %v19288_v7 = vld [vmem:[#allocation27_spill] sm:$0xff] }
 0x35f   : > { %v10976_v44 = vpop.eup %10975  ;;  %v7249_v34 = vadd.f32 %v7248_v42, %v6088_v22  ;;  %v6103_v23 = vmul.f32 %v10974_v50, %v14929_v40  ;;  %10995 = vpow2.f32 %v9245_v15  ;;  %v15088_v13 = vadd.f32 %v19288_v7, %v14372_v26  ;;  %v15093_v22 = vpop.f32.mrb[128].mxu1 }
 0x360   : > { %v10978_v21 = vpop.eup %10977  ;;  %v7321_v45 = vadd.f32 %v7320_v27, %v6090_v14  ;;  %v6105_v57 = vmul.f32 %v10976_v44, %v14933_v59  ;;  %10997 = vpow2.f32 %v9258_v58  ;;  %v9274_v40 = vmul.f32 -1.442695, %v15066_v10  ;;  %v15095_v59 = vpop.f32.mrb[160].mxu0 }
 0x361   : > { %v10980_v31 = vpop.eup %10979  ;;  %v7214_v38 = vadd.f32 %v7213_v43, %v6103_v23  ;;  %v6104_v42 = vmul.f32 %v10978_v21, %v14938_v54  ;;  %10999 = vpow2.f32 %v9260_v33  ;;  %v9276_v27 = vmul.f32 -1.442695, %v15078_v9  ;;  %v15099_v33 = vpop.f32.mrb[129].mxu1 }
 0x362   : > { %v10982_v15 = vpop.eup %10981  ;;  %v7286_v8 = vadd.f32 %v7285_v48, %v6105_v57  ;;  %v4634_v16 = vadd.f32 1.0, %v10980_v31  ;;  %11001 = vpow2.f32 %v9259_v1  ;;  %v9275_v54 = vmul.f32 -1.442695, %v15083_v37  ;;  %v15101_v43 = vpop.f32.mrb[161].mxu0 }
 0x363   : > { %v10984_v58 = vpop.eup %10983  ;;  %v7250_v50 = vadd.f32 %v7249_v34, %v6104_v42  ;;  %v6106_v14 = vmul.f32 %v10982_v15, %v14961_v12  ;;  %11003 = vpow2.f32 %v9261_v52  ;;  %v9277_v6 = vmul.f32 -1.442695, %v15088_v13  ;;  %v15105_v44 = vpop.f32.mrb[130].mxu1 }
 0x364   : > { %v10986_v48 = vpop.eup %10985  ;;  %v6119_v1 = vmul.f32 %v10984_v58, %v14967_v47  ;;  %11005 = vrcp.f32 %v4634_v16  ;;  %v15107_v23 = vpop.f32.mrb[162].mxu0 }
 0x365   : > { %v10988_v34 = vpop.eup %10987  ;;  %v7322_v49 = vadd.f32 %v7321_v45, %v6106_v14  ;;  %v6121_v12 = vmul.f32 %v10986_v48, %v14972_v35  ;;  %11007 = vpow2.f32 %v9274_v40  ;;  %v15110_v52 = vpop.f32.mrb[131].mxu1  ;;  %v19291_v14 = vld [vmem:[#allocation28_spill] sm:$0xff] }
 0x366   : > { %19289 = vst [vmem:[#allocation4_spill] sm:$0xff] %v15110_v52  ;;  %v15112_v21 = vpop.f32.mrb[163].mxu0  ;;  %v10990_v57 = vpop.eup %10989  ;;  %v15114_v7 = vadd.f32 %v7214_v38, %v6119_v1  ;;  %v6120_v47 = vmul.f32 %v10988_v34, %v14977_v32  ;;  %11009 = vpow2.f32 %v9276_v27  ;;  %v15123_v38 = vadd.f32 %v19291_v14, %v14330_v17 }
 0x367   : > { %19290 = vst [vmem:[#allocation58_spill] sm:$0xff] %v15112_v21  ;;  %v10992_v31 = vpop.eup %10991  ;;  %v15117_v42 = vadd.f32 %v7286_v8, %v6121_v12  ;;  %v4647_v15 = vadd.f32 1.0, %v10990_v57  ;;  %11011 = vpow2.f32 %v9275_v54  ;;  %v15125_v27 = vpop.f32.mrb[132].mxu1 }
 0x368   : > { %v10994_v16 = vpop.eup %10993  ;;  %v15119_v45 = vadd.f32 %v7250_v50, %v6120_v47  ;;  %v4649_v35 = vadd.f32 1.0, %v10992_v31  ;;  %11013 = vpow2.f32 %v9277_v6  ;;  %19292 = vst [vmem:[#allocation59_spill] sm:$0xff] %v15125_v27  ;;  %v15127_v8 = vpop.f32.mrb[164].mxu0  ;;  %v9290_v57 = vmul.f32 -1.442695, %v15123_v38 }
 0x369   : > { %v10996_v40 = vpop.eup %10995  ;;  %11015 = vrcp.f32 %v4647_v15  ;;  %v4648_v58 = vadd.f32 1.0, %v10994_v16  ;;  %19293 = vst [vmem:[#allocation36_spill] sm:$0xff] %v15127_v8  ;;  %v19294_v15 = vld [vmem:[#allocation67_spill] sm:$0xff] }
 0x36a   : > { %v10998_v48 = vpop.eup %10997  ;;  %11017 = vrcp.f32 %v4649_v35  ;;  %v4650_v32 = vadd.f32 1.0, %v10996_v40  ;;  %v15132_v16 = vadd.f32 %v19294_v15, %v14335_v55  ;;  %v19295_v35 = vld [vmem:[#allocation38_spill] sm:$0xff] }
 0x36b   : > { %v11000_v54 = vpop.eup %10999  ;;  %11019 = vrcp.f32 %v4648_v58  ;;  %v4663_v50 = vadd.f32 1.0, %v10998_v48  ;;  %v15136_v40 = vadd.f32 %v19295_v35, %v14353_v25  ;;  %v19296_v48 = vld [vmem:[#allocation39_spill] sm:$0xff] }
 0x36c   : > { %v11002_v1 = vpop.eup %11001  ;;  %11021 = vrcp.f32 %v4650_v32  ;;  %v4665_v6 = vadd.f32 1.0, %v11000_v54  ;;  %v15141_v32 = vadd.f32 %v19296_v48, %v14372_v26  ;;  %v15145_v54 = vadd.f32 %v14588_v19, %v14330_v17  ;;  %v19298_v19 = vld [vmem:[#allocation69_spill] sm:$0xff] }
 0x36d   : > { %v11004_v34 = vpop.eup %11003  ;;  %11023 = vrcp.f32 %v4663_v50  ;;  %v4664_v12 = vadd.f32 1.0, %v11002_v1  ;;  %v15147_v50 = vpop.f32.mrb[133].mxu1  ;;  %v15159_v35 = vadd.f32 %v19298_v19, %v14372_v26 }
 0x36e   : > { %v11006_v47 = vpop.eup %11005  ;;  %11025 = vrcp.f32 %v4665_v6  ;;  %v4666_v31 = vadd.f32 1.0, %v11004_v34  ;;  %19297 = vst [vmem:[#allocation3_spill] sm:$0xff] %v15147_v50  ;;  %v15151_v34 = vadd.f32 %v14590_v2, %v14335_v55  ;;  %v15164_v2 = vadd.f32 %v14606_v61, %v14330_v17  ;;  %v15176_v27 = vpop.f32.mrb[134].mxu1 }
 0x36f   : > { %v11008_v58 = vpop.eup %11007  ;;  %v6122_v14 = vmul.f32 %v11006_v47, %v15012_v5  ;;  %11027 = vrcp.f32 %v4664_v12  ;;  %v15155_v5 = vadd.f32 %v14598_v29, %v14353_v25  ;;  %19300 = vst [vmem:[#allocation74_spill] sm:$0xff] %v15176_v27 }
 0x370   : > { %v11010_v1 = vpop.eup %11009  ;;  %11029 = vrcp.f32 %v4666_v31  ;;  %v4679_v6 = vadd.f32 1.0, %v11008_v58  ;;  %v9292_v58 = vmul.f32 -1.442695, %v15132_v16 }
 0x371   : > { %v11012_v12 = vpop.eup %11011  ;;  %v7323_v47 = vadd.f32 %v7322_v49, %v6122_v14  ;;  %v4681_v15 = vadd.f32 1.0, %v11010_v1  ;;  %11031 = vpow2.f32 %v9290_v57  ;;  %v9291_v49 = vmul.f32 -1.442695, %v15136_v40  ;;  %v15168_v14 = vpop.f32.mrb[165].mxu0 }
 0x372   : > { %v11014_v48 = vpop.eup %11013  ;;  %11033 = vrcp.f32 %v4679_v6  ;;  %v4680_v31 = vadd.f32 1.0, %v11012_v12  ;;  %v9293_v57 = vmul.f32 -1.442695, %v15141_v32  ;;  %19299 = vst [vmem:[#allocation24_spill] sm:$0xff] %v15168_v14  ;;  %v9306_v6 = vmul.f32 -1.442695, %v15145_v54 }
 0x373   : > { %v11016_v50 = vpop.eup %11015  ;;  %11035 = vrcp.f32 %v4681_v15  ;;  %v4682_v29 = vadd.f32 1.0, %v11014_v48  ;;  %v9308_v12 = vmul.f32 -1.442695, %v15151_v34  ;;  %v9307_v15 = vmul.f32 -1.442695, %v15155_v5 }
 0x374   : > { %v11018_v1 = vpop.eup %11017  ;;  %v6135_v19 = vmul.f32 %v11016_v50, %v15018_v51  ;;  %11037 = vrcp.f32 %v4680_v31  ;;  %v9309_v48 = vmul.f32 -1.442695, %v15159_v35  ;;  %v9322_v50 = vmul.f32 -1.442695, %v15164_v2  ;;  %v15181_v31 = vpop.f32.mrb[166].mxu0 }
 0x375   : > { %v11020_v8 = vpop.eup %11019  ;;  %v6137_v61 = vmul.f32 %v11018_v1, %v15023_v24  ;;  %11039 = vrcp.f32 %v4682_v29  ;;  %19301 = vst [vmem:[#allocation75_spill] sm:$0xff] %v15181_v31  ;;  %v15187_v1 = vadd.f32 %v14608_v18, %v14335_v55  ;;  %v19305_v18 = vld [vmem:[#allocation40_spill] sm:$0xff] }
 0x376   : > { %v11022_v21 = vpop.eup %11021  ;;  %v7216_v14 = vadd.f32 %v15114_v7, %v6135_v19  ;;  %v6136_v51 = vmul.f32 %v11020_v8, %v15031_v41  ;;  %11041 = vpow2.f32 %v9292_v58  ;;  %v19302_v8 = vld [vmem:[#allocation70_spill] sm:$0xff]  ;;  %v15195_v19 = vpop.f32.mrb[135].mxu1 }
 0x377   : > { %v11024_v52 = vpop.eup %11023  ;;  %v7288_v24 = vadd.f32 %v15117_v42, %v6137_v61  ;;  %v6138_v29 = vmul.f32 %v11022_v21, %v15035_v39  ;;  %11043 = vpow2.f32 %v9291_v49  ;;  %v15193_v58 = vadd.f32 %v19302_v8, %v14353_v25  ;;  %19303 = vst [vmem:[#allocation19_spill] sm:$0xff] %v15195_v19  ;;  %v15197_v42 = vpop.f32.mrb[167].mxu0 }
 0x378   : > { %v11026_v27 = vpop.eup %11025  ;;  %v7252_v7 = vadd.f32 %v15119_v45, %v6136_v51  ;;  %v6151_v41 = vmul.f32 %v11024_v52, %v15039_v0  ;;  %11045 = vpow2.f32 %v9293_v57  ;;  %19304 = vst [vmem:[#allocation5_spill] sm:$0xff] %v15197_v42  ;;  %v15202_v61 = vadd.f32 %v19305_v18, %v14372_v26 }
 0x379   : > { %v11028_v39 = vpop.eup %11027  ;;  %v7324_v21 = vadd.f32 %v7323_v47, %v6138_v29  ;;  %v6153_v49 = vmul.f32 %v11026_v27, %v15043_v4  ;;  %11047 = vpow2.f32 %v9306_v6  ;;  %v15207_v57 = vadd.f32 %v14640_v53, %v14330_v17 }
 0x37a   : > { %v11030_v45 = vpop.eup %11029  ;;  %v7217_v0 = vadd.f32 %v7216_v14, %v6151_v41  ;;  %v6152_v52 = vmul.f32 %v11028_v39, %v15048_v62  ;;  %11049 = vpow2.f32 %v9308_v12  ;;  %v9324_v4 = vmul.f32 -1.442695, %v15187_v1 }
 0x37b   : > { %v11032_v51 = vpop.eup %11031  ;;  %v7289_v8 = vadd.f32 %v7288_v24, %v6153_v49  ;;  %v6154_v47 = vmul.f32 %v11030_v45, %v15053_v60  ;;  %11051 = vpow2.f32 %v9307_v15  ;;  %v9323_v14 = vmul.f32 -1.442695, %v15193_v58  ;;  %v15216_v15 = vpop.f32.mrb[136].mxu1 }
 0x37c   : > { %v11034_v27 = vpop.eup %11033  ;;  %v7253_v6 = vadd.f32 %v7252_v7, %v6152_v52  ;;  %v4695_v29 = vadd.f32 1.0, %v11032_v51  ;;  %11053 = vpow2.f32 %v9309_v48  ;;  %v9325_v53 = vmul.f32 -1.442695, %v15202_v61  ;;  %19306 = vst [vmem:[#allocation62_spill] sm:$0xff] %v15216_v15  ;;  %v15218_v7 = vpop.f32.mrb[168].mxu0 }
 0x37d   : > { %v11036_v41 = vpop.eup %11035  ;;  %v7325_v62 = vadd.f32 %v7324_v21, %v6154_v47  ;;  %v6167_v12 = vmul.f32 %v11034_v27, %v15066_v10  ;;  %11055 = vpow2.f32 %v9322_v50  ;;  %v9338_v60 = vmul.f32 -1.442695, %v15207_v57  ;;  %19307 = vst [vmem:[#allocation63_spill] sm:$0xff] %v15218_v7  ;;  %v15230_v45 = vpop.f32.mrb[137].mxu1  ;;  %v7827_v7 = vld [vmem:[%s18836_s5 + $0x208] sm:$0xff] }
 0x37e   : > { %v11038_v39 = vpop.eup %11037  ;;  %v6169_v24 = vmul.f32 %v11036_v41, %v15078_v9  ;;  %11057 = vrcp.f32 %v4695_v29  ;;  %v15228_v9 = vadd.f32 %v14642_v11, %v14335_v55  ;;  %19308 = vst [vmem:[#allocation64_spill] sm:$0xff] %v15230_v45  ;;  %v15242_v11 = vadd.f32 %v14669_v30, %v14372_v26  ;;  %v7826_v45 = vld [vmem:[%s18836_s5 + $0x200] sm:$0xff] }
 0x37f   : > { %v11040_v48 = vpop.eup %11039  ;;  %v15220_v49 = vadd.f32 %v7217_v0, %v6167_v12  ;;  %v6168_v21 = vmul.f32 %v11038_v39, %v15083_v37  ;;  %11059 = vpow2.f32 %v9324_v4  ;;  %v15236_v37 = vadd.f32 %v14656_v36, %v14353_v25  ;;  %v15244_v4 = vpop.f32.mrb[169].mxu0 }
 0x380   : > { %v11042_v10 = vpop.eup %11041  ;;  %v15223_v50 = vadd.f32 %v7289_v8, %v6169_v24  ;;  %v6170_v18 = vmul.f32 %v11040_v48, %v15088_v13  ;;  %11061 = vpow2.f32 %v9323_v14  ;;  %19309 = vst [vmem:[#allocation65_spill] sm:$0xff] %v15244_v4  ;;  %v15248_v29 = vadd.f32 %v14692_v63, %v14330_v17 }
 0x381   : > { %v11044_v52 = vpop.eup %11043  ;;  %v15232_v51 = vadd.f32 %v7253_v6, %v6168_v21  ;;  %v4697_v0 = vadd.f32 1.0, %v11042_v10  ;;  %11063 = vpow2.f32 %v9325_v53  ;;  %v9340_v41 = vmul.f32 -1.442695, %v15228_v9 }
 0x382   : > { %v11046_v8 = vpop.eup %11045  ;;  %v15238_v47 = vadd.f32 %v7325_v62, %v6170_v18  ;;  %v4696_v13 = vadd.f32 1.0, %v11044_v52  ;;  %11065 = vpow2.f32 %v9338_v60  ;;  %v15253_v62 = vadd.f32 %v14694_v46, %v14335_v55 }
 0x383   : > { %v11048_v27 = vpop.eup %11047  ;;  %11067 = vrcp.f32 %v4697_v0  ;;  %v4698_v6 = vadd.f32 1.0, %v11046_v8  ;;  %v15256_v53 = vmul.f32 -1.442695, %v15236_v37  ;;  %v15260_v39 = vadd.f32 %v14710_v3, %v14353_v25  ;;  %v15283_v8 = vpop.f32.mrb[138].mxu1 }
 0x384   : > { %v11050_v36 = vpop.eup %11049  ;;  %11069 = vrcp.f32 %v4696_v13  ;;  %v4711_v14 = vadd.f32 1.0, %v11048_v27  ;;  %v15263_v60 = vmul.f32 -1.442695, %v15242_v11  ;;  %v15267_v46 = vadd.f32 %v14712_v20, %v14372_v26  ;;  %19310 = vst [vmem:[#allocation66_spill] sm:$0xff] %v15283_v8  ;;  %v15285_v13 = vpop.f32.mrb[170].mxu0 }
 0x385   : > { %v11052_v30 = vpop.eup %11051  ;;  %11071 = vrcp.f32 %v4698_v6  ;;  %v4713_v12 = vadd.f32 1.0, %v11050_v36  ;;  %v15270_v10 = vmul.f32 -1.442695, %v15248_v29  ;;  %v15274_v3 = vadd.f32 %v14739_v56, %v14330_v17  ;;  %19311 = vst [vmem:[#allocation25_spill] sm:$0xff] %v15285_v13  ;;  %v19312_v36 = vld [vmem:[#allocation42_spill] sm:$0xff]  ;;  %v15308_v13 = vpop.f32.mrb[171].mxu0 }
 0x386   : > { %v11054_v63 = vpop.eup %11053  ;;  %11073 = vrcp.f32 %v4711_v14  ;;  %v4712_v24 = vadd.f32 1.0, %v11052_v30  ;;  %v15277_v0 = vmul.f32 -1.442695, %v15253_v62  ;;  %v15281_v20 = vadd.f32 %v14741_v28, %v14335_v55  ;;  %19315 = vst [vmem:[#allocation31_spill] sm:$0xff] %v15308_v13 }
 0x387   : > { %v11056_v48 = vpop.eup %11055  ;;  %11075 = vrcp.f32 %v4713_v12  ;;  %v4714_v21 = vadd.f32 1.0, %v11054_v63  ;;  %v15289_v56 = vmul.f32 -1.442695, %v15260_v39  ;;  %v15293_v14 = vadd.f32 %v19312_v36, %v14353_v25  ;;  %v19313_v63 = vld [vmem:[#allocation43_spill] sm:$0xff] }
 0x388   : > { %v11058_v18 = vpop.eup %11057  ;;  %11077 = vrcp.f32 %v4712_v24  ;;  %v4727_v52 = vadd.f32 1.0, %v11056_v48  ;;  %v15296_v28 = vmul.f32 -1.442695, %v15267_v46  ;;  %v15300_v24 = vadd.f32 %v19313_v63, %v14372_v26  ;;  %v15302_v48 = vpop.f32.mrb[139].mxu1  ;;  %v7778_v63 = vld [vmem:[%s18836_s5 + $0x80] sm:$0xff] }
 0x389   : > { %v11060_v27 = vpop.eup %11059  ;;  %v6183_v6 = vmul.f32 %v11058_v18, %v15123_v38  ;;  %11079 = vrcp.f32 %v4714_v21  ;;  %19314 = vst [vmem:[#allocation8_spill] sm:$0xff] %v15302_v48  ;;  %v15306_v36 = vmul.f32 -1.442695, %v15274_v3  ;;  %v15311_v8 = vmul.f32 -1.442695, %v15281_v20  ;;  %v7842_v48 = vld [vmem:[%s18836_s5 + $0x280] sm:$0xff] }
 0x38a   : > { %v11062_v30 = vpop.eup %11061  ;;  %11081 = vrcp.f32 %v4727_v52  ;;  %v4729_v12 = vadd.f32 1.0, %v11060_v27  ;;  %v9912_v31 = vpack.c.bf16 %v7827_v7, %v7826_v45  ;;  %v19317_v45 = vld [vmem:[#allocation11_spill] sm:$0xff] }
 0x38b   : > { %v11064_v38 = vpop.eup %11063  ;;  %v7219_v21 = vadd.f32 %v15220_v49, %v6183_v6  ;;  %v4728_v18 = vadd.f32 1.0, %v11062_v30  ;;  %11083 = vpow2.f32 %v9340_v41  ;;  %v7779_v49 = vld [vmem:[%s18836_s5 + $0x88] sm:$0xff]  ;;  %v15320_v30 = vmul.f32 -1.442695, %v15293_v14 }
 0x38c   : > { %v11066_v52 = vpop.eup %11065  ;;  %11085 = vrcp.f32 %v4729_v12  ;;  %v4730_v27 = vadd.f32 1.0, %v11064_v38  ;;  %v9846_v13 = vpack.c.bf16 %v7779_v49, %v7778_v63  ;;  %v7762_v12 = vld [vmem:[%s18836_s5] sm:$0xff]  ;;  %v7763_v38 = vld [vmem:[%s18836_s5 + $0x8] sm:$0xff] }
 0x38d   : > { %v11068_v41 = vpop.eup %11067  ;;  %11087 = vrcp.f32 %v4728_v18  ;;  %v4743_v6 = vadd.f32 1.0, %v11066_v52  ;;  %v15333_v52 = vmul.f32 -1.442695, %v15300_v24  ;;  %v9848_v63 = vpack.c.bf16 %v7763_v38, %v7762_v12  ;;  %v7843_v49 = vld [vmem:[%s18836_s5 + $0x288] sm:$0xff] }
 0x38e   : > { %v11070_v4 = vpop.eup %11069  ;;  %v6185_v18 = vmul.f32 %v11068_v41, %v15132_v16  ;;  %11089 = vrcp.f32 %v4730_v27  ;;  %v19316_v27 = vld [vmem:[#allocation12_spill] sm:$0xff]  ;;  %9847 = vmatprep.subr.bf16.mxu1 %v9846_v13  ;;  %v9910_v12 = vpack.c.bf16 %v7843_v49, %v7842_v48 }
 0x38f   : > { %v11072_v15 = vpop.eup %11071  ;;  %v6184_v16 = vmul.f32 %v11070_v4, %v15136_v40  ;;  %11091 = vrcp.f32 %v4743_v6  ;;  %v15347_v41 = vadd.f32 %v19316_v27, %v14330_v17  ;;  %9849 = vmatpush3.bf16.msra.mxu1 %v9848_v63  ;;  %v7780_v40 = vld [vmem:[%s18836_s5 + $0x90] sm:$0xff]  ;;  %v7781_v4 = vld [vmem:[%s18836_s5 + $0x98] sm:$0xff] }
 0x390   : > { %v11074_v38 = vpop.eup %11073  ;;  %v7291_v42 = vadd.f32 %v15223_v50, %v6185_v18  ;;  %v6186_v19 = vmul.f32 %v11072_v15, %v15141_v32  ;;  %11093 = vpow2.f32 %v15256_v53  ;;  %9911 = vmatprep.subr.bf16.mxu0 %v9910_v12  ;;  %v9850_v32 = vpack.c.bf16 %v7781_v4, %v7780_v40  ;;  %v15368_v18 = vpop.f32.mrb[140].mxu1 }
 0x391   : > { %v11076_v6 = vpop.eup %11075  ;;  %v7255_v13 = vadd.f32 %v15232_v51, %v6184_v16  ;;  %v6199_v48 = vmul.f32 %v11074_v38, %v15145_v54  ;;  %11095 = vpow2.f32 %v15263_v60  ;;  %v15366_v53 = vadd.f32 %v19317_v45, %v14335_v55  ;;  %9913 = vmatpush3.bf16.msra.mxu0 %v9912_v31  ;;  %v15370_v51 = vpop.f32.mrb[172].mxu0  ;;  %v19321_v16 = vld [vmem:[#allocation44_spill] sm:$0xff] }
 0x392   : > { %v11078_v15 = vpop.eup %11077  ;;  %v7327_v7 = vadd.f32 %v15238_v47, %v6186_v19  ;;  %v6201_v50 = vmul.f32 %v11076_v6, %v15151_v34  ;;  %11097 = vpow2.f32 %v15270_v10  ;;  %19318 = vst [vmem:[#allocation26_spill] sm:$0xff] %v15370_v51  ;;  %v9386_v19 = vmul.f32 -1.442695, %v15347_v41  ;;  %v15375_v34 = vpop.f32.mrb[141].mxu1  ;;  %9851 = vmatprep.subr.bf16.mxu1 %v9850_v32 }
 0x393   : > { %v11080_v54 = vpop.eup %11079  ;;  %v7220_v60 = vadd.f32 %v7219_v21, %v6199_v48  ;;  %v6200_v63 = vmul.f32 %v11078_v15, %v15155_v5  ;;  %11099 = vpow2.f32 %v15277_v0  ;;  %19319 = vst [vmem:[#allocation27_spill] sm:$0xff] %v15375_v34  ;;  %v15377_v47 = vpop.f32.mrb[173].mxu0  ;;  %v15383_v21 = vadd.f32 %v19321_v16, %v14353_v25 }
 0x394   : > { %19320 = vst [vmem:[#allocation28_spill] sm:$0xff] %v15377_v47  ;;  %v11082_v10 = vpop.eup %11081  ;;  %v7292_v49 = vadd.f32 %v7291_v42, %v6201_v50  ;;  %v6202_v31 = vmul.f32 %v11080_v54, %v15159_v35  ;;  %11101 = vpow2.f32 %v15289_v56  ;;  %v15385_v5 = vpop.f32.mrb[142].mxu1  ;;  %v19324_v42 = vld [vmem:[#allocation45_spill] sm:$0xff]  ;;  %v9388_v6 = vmul.f32 -1.442695, %v15366_v53 }
 0x395   : > { %19322 = vst [vmem:[#allocation67_spill] sm:$0xff] %v15385_v5  ;;  %v15387_v0 = vpop.f32.mrb[174].mxu0  ;;  %v11084_v27 = vpop.eup %11083  ;;  %v7256_v12 = vadd.f32 %v7255_v13, %v6200_v63  ;;  %v6215_v38 = vmul.f32 %v11082_v10, %v15164_v2  ;;  %11103 = vpow2.f32 %v15296_v28  ;;  %v15393_v40 = vadd.f32 %v19324_v42, %v14372_v26  ;;  %v19325_v2 = vld [vmem:[#allocation14_spill] sm:$0xff] }
 0x396   : > { %19323 = vst [vmem:[#allocation38_spill] sm:$0xff] %v15387_v0  ;;  %v11086_v35 = vpop.eup %11085  ;;  %v7328_v56 = vadd.f32 %v7327_v7, %v6202_v31  ;;  %v4745_v4 = vadd.f32 1.0, %v11084_v27  ;;  %11105 = vpow2.f32 %v15306_v36  ;;  %v15401_v28 = vadd.f32 %v19325_v2, %v14330_v17  ;;  %v19326_v36 = vld [vmem:[#allocation13_spill] sm:$0xff]  ;;  %v15411_v54 = vpop.f32.mrb[143].mxu1 }
 0x397   : > { %v11088_v48 = vpop.eup %11087  ;;  %v7221_v32 = vadd.f32 %v7220_v60, %v6215_v38  ;;  %v6217_v15 = vmul.f32 %v11086_v35, %v15187_v1  ;;  %11107 = vpow2.f32 %v15311_v8  ;;  %v15405_v7 = vmul.f32 -1.442695, %v15383_v21  ;;  %19327 = vst [vmem:[#allocation39_spill] sm:$0xff] %v15411_v54  ;;  %v15423_v10 = vpop.f32.mrb[175].mxu0  ;;  %v7844_v38 = vld [vmem:[%s18836_s5 + $0x290] sm:$0xff]  ;;  %v19332_v54 = vld [vmem:[#allocation16_spill] sm:$0xff] }
 0x398   : > { %v11090_v13 = vpop.eup %11089  ;;  %v6216_v50 = vmul.f32 %v11088_v48, %v15193_v58  ;;  %11109 = vrcp.f32 %v4745_v4  ;;  %v15409_v45 = vadd.f32 %v19326_v36, %v14335_v55  ;;  %v15418_v63 = vmul.f32 -1.442695, %v15393_v40  ;;  %v7764_v58 = vld [vmem:[%s18836_s5 + $0x10] sm:$0xff]  ;;  %19328 = vst [vmem:[#allocation69_spill] sm:$0xff] %v15423_v10  ;;  %v15497_v47 = vpop.f32.mrb[144].mxu1 }
 0x399   : > { %v11092_v1 = vpop.eup %11091  ;;  %v15413_v60 = vadd.f32 %v7292_v49, %v6217_v15  ;;  %v6218_v8 = vmul.f32 %v11090_v13, %v15202_v61  ;;  %11111 = vpow2.f32 %v15320_v30  ;;  %v19329_v61 = vld [vmem:[#allocation68_spill] sm:$0xff]  ;;  %v7765_v30 = vld [vmem:[%s18836_s5 + $0x18] sm:$0xff]  ;;  %v15445_v35 = vmul.f32 -1.442695, %v15401_v28  ;;  %v7828_v13 = vld [vmem:[%s18836_s5 + $0x210] sm:$0xff]  ;;  %19333 = vst [vmem:[#allocation70_spill] sm:$0xff] %v15497_v47 }
 0x39a   : > { %v11094_v31 = vpop.eup %11093  ;;  %v15425_v16 = vadd.f32 %v7256_v12, %v6216_v50  ;;  %v6231_v27 = vmul.f32 %v11092_v1, %v15207_v57  ;;  %11113 = vpow2.f32 %v15333_v52  ;;  %v15431_v49 = vadd.f32 %v19329_v61, %v14353_v25  ;;  %v7845_v12 = vld [vmem:[%s18836_s5 + $0x298] sm:$0xff]  ;;  %v7766_v61 = vld [vmem:[%s18836_s5 + $0x20] sm:$0xff]  ;;  %v15499_v34 = vpop.f32.mrb[176].mxu0 }
 0x39b   : > { %v11096_v42 = vpop.eup %11095  ;;  %v15442_v57 = vadd.f32 %v7328_v56, %v6218_v8  ;;  %v4744_v52 = vadd.f32 1.0, %v11094_v31  ;;  %11115 = vpow2.f32 %v9386_v19  ;;  %v15450_v2 = vmul.f32 -1.442695, %v15409_v45  ;;  %v7829_v56 = vld [vmem:[%s18836_s5 + $0x218] sm:$0xff]  ;;  %19334 = vst [vmem:[#allocation40_spill] sm:$0xff] %v15499_v34 }
 0x39c   : > { %v11098_v4 = vpop.eup %11097  ;;  %v15447_v48 = vadd.f32 %v7221_v32, %v6231_v27  ;;  %v4746_v15 = vadd.f32 1.0, %v11096_v42  ;;  %11117 = vpow2.f32 %v9388_v6  ;;  %v9852_v36 = vpack.c.bf16 %v7765_v30, %v7764_v58  ;;  %v7782_v6 = vld [vmem:[%s18836_s5 + $0xa0] sm:$0xff]  ;;  %v7783_v32 = vld [vmem:[%s18836_s5 + $0xa8] sm:$0xff]  ;;  %v19330_v42 = vld [vmem:[#allocation10_spill] sm:$0xff] }
 0x39d   : > { %v11100_v19 = vpop.eup %11099  ;;  %11119 = vrcp.f32 %v4744_v52  ;;  %v4759_v50 = vadd.f32 1.0, %v11098_v4  ;;  %v9914_v1 = vpack.c.bf16 %v7845_v12, %v7844_v38  ;;  %v15465_v27 = vmul.f32 -1.442695, %v15431_v49  ;;  %v7767_v58 = vld [vmem:[%s18836_s5 + $0x28] sm:$0xff]  ;;  %v7846_v30 = vld [vmem:[%s18836_s5 + $0x2a0] sm:$0xff] }
 0x39e   : > { %v11102_v8 = vpop.eup %11101  ;;  %11121 = vrcp.f32 %v4746_v15  ;;  %v4761_v31 = vadd.f32 1.0, %v11100_v19  ;;  %v15478_v52 = vadd.f32 %v19330_v42, %v14372_v26  ;;  %9853 = vmatpush3.bf16.msra.mxu1 %v9852_v36  ;;  %v9916_v4 = vpack.c.bf16 %v7829_v56, %v7828_v13  ;;  %v7847_v15 = vld [vmem:[%s18836_s5 + $0x2a8] sm:$0xff]  ;;  %v7830_v19 = vld [vmem:[%s18836_s5 + $0x220] sm:$0xff]  ;;  %v19331_v42 = vld [vmem:[#allocation46_spill] sm:$0xff] }
 0x39f   : > { %v11104_v38 = vpop.eup %11103  ;;  %11123 = vrcp.f32 %v4759_v50  ;;  %v4760_v12 = vadd.f32 1.0, %v11102_v8  ;;  %9915 = vmatprep.subr.bf16.mxu0 %v9914_v1  ;;  %v7831_v50 = vld [vmem:[%s18836_s5 + $0x228] sm:$0xff]  ;;  %v15491_v36 = vadd.f32 %v19331_v42, %v14330_v17  ;;  %v9854_v13 = vpack.c.bf16 %v7783_v32, %v7782_v6 }
 0x3a0   : > { %v11106_v8 = vpop.eup %11105  ;;  %11125 = vrcp.f32 %v4761_v31  ;;  %v4762_v10 = vadd.f32 1.0, %v11104_v38  ;;  %v15495_v0 = vadd.f32 %v19332_v54, %v14335_v55  ;;  %9917 = vmatpush3.bf16.msra.mxu0 %v9916_v4  ;;  %v9856_v5 = vpack.c.bf16 %v7767_v58, %v7766_v61  ;;  %v19335_v54 = vld [vmem:[#allocation47_spill] sm:$0xff]  ;;  %v15509_v58 = vpop.f32.mrb[145].mxu1 }
 0x3a1   : > { %v11108_v56 = vpop.eup %11107  ;;  %11127 = vrcp.f32 %v4760_v12  ;;  %v4775_v1 = vadd.f32 1.0, %v11106_v8  ;;  %9855 = vmatprep.subr.bf16.mxu1 %v9854_v13  ;;  %v9918_v42 = vpack.c.bf16 %v7847_v15, %v7846_v30  ;;  %v9920_v51 = vpack.c.bf16 %v7831_v50, %v7830_v19  ;;  %19336 = vst [vmem:[#allocation42_spill] sm:$0xff] %v15509_v58  ;;  %v15511_v4 = vpop.f32.mrb[177].mxu0  ;;  %v7785_v19 = vld [vmem:[%s18836_s5 + $0xb8] sm:$0xff] }
 0x3a2   : > { %v11110_v31 = vpop.eup %11109  ;;  %11129 = vrcp.f32 %v4762_v10  ;;  %v4777_v38 = vadd.f32 1.0, %v11108_v56  ;;  %v15503_v12 = vmul.f32 -1.442695, %v15478_v52  ;;  %v15507_v61 = vadd.f32 %v19335_v54, %v14353_v25  ;;  %9857 = vmatpush3.bf16.msra.mxu1 %v9856_v5  ;;  %19337 = vst [vmem:[#allocation43_spill] sm:$0xff] %v15511_v4  ;;  %v15541_v54 = vpop.f32.mrb[178].mxu0 }
 0x3a3   : > { %v11112_v6 = vpop.eup %11111  ;;  %v6233_v32 = vmul.f32 %v11110_v31, %v15228_v9  ;;  %11131 = vrcp.f32 %v4775_v1  ;;  %v15514_v15 = vmul.f32 -1.442695, %v15491_v36  ;;  %9919 = vmatprep.subr.bf16.mxu0 %v9918_v42  ;;  %v7784_v9 = vld [vmem:[%s18836_s5 + $0xb0] sm:$0xff]  ;;  %v15525_v13 = vmul.f32 -1.442695, %v15495_v0  ;;  %v15527_v31 = vpop.f32.mrb[146].mxu1 }
 0x3a4   : > { %v11114_v10 = vpop.eup %11113  ;;  %11133 = vrcp.f32 %v4777_v38  ;;  %v4776_v30 = vadd.f32 1.0, %v11112_v6  ;;  %9921 = vmatpush3.bf16.msra.mxu0 %v9920_v51  ;;  %19338 = vst [vmem:[#allocation12_spill] sm:$0xff] %v15527_v31  ;;  %v7768_v38 = vld [vmem:[%s18836_s5 + $0x30] sm:$0xff]  ;;  %v15539_v6 = vmul.f32 -1.442695, %v15507_v61  ;;  %19339 = vst [vmem:[#allocation11_spill] sm:$0xff] %v15541_v54 }
 0x3a5   : > { %v11116_v5 = vpop.eup %11115  ;;  %v7294_v50 = vadd.f32 %v15413_v60, %v6233_v32  ;;  %v4778_v8 = vadd.f32 1.0, %v11114_v10  ;;  %11135 = vpow2.f32 %v15405_v7  ;;  %v7769_v60 = vld [vmem:[%s18836_s5 + $0x38] sm:$0xff]  ;;  %v7848_v7 = vld [vmem:[%s18836_s5 + $0x2b0] sm:$0xff]  ;;  %v9858_v32 = vpack.c.bf16 %v7785_v19, %v7784_v9  ;;  %v19340_v31 = vld [vmem:[#allocation48_spill] sm:$0xff]  ;;  %v15556_v34 = vpop.f32.mrb[147].mxu1 }
 0x3a6   : > { %v11118_v56 = vpop.eup %11117  ;;  %11137 = vrcp.f32 %v4776_v30  ;;  %v4791_v1 = vadd.f32 1.0, %v11116_v5  ;;  %v7849_v10 = vld [vmem:[%s18836_s5 + $0x2b8] sm:$0xff]  ;;  %v15549_v4 = vadd.f32 %v19340_v31, %v14372_v26  ;;  %v9860_v19 = vpack.c.bf16 %v7769_v60, %v7768_v38  ;;  %19342 = vst [vmem:[#allocation44_spill] sm:$0xff] %v15556_v34  ;;  %v19343_v31 = vld [vmem:[#allocation49_spill] sm:$0xff] }
 0x3a7   : > { %v11120_v42 = vpop.eup %11119  ;;  %11139 = vrcp.f32 %v4778_v8  ;;  %v4793_v51 = vadd.f32 1.0, %v11118_v56  ;;  %v19341_v8 = vld [vmem:[#allocation29_spill] sm:$0xff]  ;;  %9859 = vmatprep.subr.bf16.mxu1 %v9858_v32  ;;  %v9922_v54 = vpack.c.bf16 %v7849_v10, %v7848_v7  ;;  %v19345_v60 = vld [vmem:[#allocation50_spill] sm:$0xff]  ;;  %v7770_v10 = vld [vmem:[%s18836_s5 + $0x40] sm:$0xff] }
 0x3a8   : > { %v11122_v30 = vpop.eup %11121  ;;  %v6232_v5 = vmul.f32 %v11120_v42, %v15236_v37  ;;  %11141 = vrcp.f32 %v4791_v1  ;;  %v15553_v56 = vadd.f32 %v19341_v8, %v14330_v17  ;;  %v15563_v42 = vadd.f32 %v19343_v31, %v14335_v55  ;;  %v15565_v8 = vpop.f32.mrb[179].mxu0  ;;  %9861 = vmatpush3.bf16.msra.mxu1 %v9860_v19  ;;  %v7850_v19 = vld [vmem:[%s18836_s5 + $0x2c0] sm:$0xff]  ;;  %v19425_v34 = vld [vmem:[#allocation41_spill] sm:$0xff] }
 0x3a9   : > { %v11124_v58 = vpop.eup %11123  ;;  %v6234_v9 = vmul.f32 %v11122_v30, %v15242_v11  ;;  %11143 = vrcp.f32 %v4793_v51  ;;  %19344 = vst [vmem:[#allocation45_spill] sm:$0xff] %v15565_v8  ;;  %9923 = vmatprep.subr.bf16.mxu0 %v9922_v54  ;;  %v9421_v7 = vmul.f32 -1.442695, %v15549_v4 }
 0x3aa   : > { %v11126_v47 = vpop.eup %11125  ;;  %v7258_v37 = vadd.f32 %v15425_v16, %v6232_v5  ;;  %v6247_v1 = vmul.f32 %v11124_v58, %v15248_v29  ;;  %11145 = vpow2.f32 %v15418_v63  ;;  %v15572_v16 = vadd.f32 %v19345_v60, %v14353_v25  ;;  %v15620_v60 = vpop.f32.mrb[180].mxu0 }
 0x3ab   : > { %v11128_v11 = vpop.eup %11127  ;;  %v7330_v51 = vadd.f32 %v15442_v57, %v6234_v9  ;;  %v6249_v38 = vmul.f32 %v11126_v47, %v15253_v62  ;;  %11147 = vpow2.f32 %v15445_v35  ;;  %v9434_v47 = vmul.f32 -1.442695, %v15553_v56  ;;  %v7832_v35 = vld [vmem:[%s18836_s5 + $0x230] sm:$0xff]  ;;  %v7771_v9 = vld [vmem:[%s18836_s5 + $0x48] sm:$0xff]  ;;  %19347 = vst [vmem:[#allocation13_spill] sm:$0xff] %v15620_v60 }
 0x3ac   : > { %v11130_v29 = vpop.eup %11129  ;;  %v7223_v63 = vadd.f32 %v15447_v48, %v6247_v1  ;;  %v6248_v58 = vmul.f32 %v11128_v11, %v15260_v39  ;;  %11149 = vpow2.f32 %v15450_v2  ;;  %v7833_v39 = vld [vmem:[%s18836_s5 + $0x238] sm:$0xff] }
 0x3ad   : > { %v11132_v57 = vpop.eup %11131  ;;  %v7295_v32 = vadd.f32 %v7294_v50, %v6249_v38  ;;  %v6250_v62 = vmul.f32 %v11130_v29, %v15267_v46  ;;  %11151 = vpow2.f32 %v15465_v27  ;;  %v9436_v46 = vmul.f32 -1.442695, %v15563_v42  ;;  %v7786_v27 = vld [vmem:[%s18836_s5 + $0xc0] sm:$0xff]  ;;  %v7787_v50 = vld [vmem:[%s18836_s5 + $0xc8] sm:$0xff]  ;;  %v15618_v38 = vpop.f32.mrb[148].mxu1 }
 0x3ae   : > { %v11134_v48 = vpop.eup %11133  ;;  %v7259_v2 = vadd.f32 %v7258_v37, %v6248_v58  ;;  %v6263_v54 = vmul.f32 %v11132_v57, %v15274_v3  ;;  %11153 = vpow2.f32 %v15503_v12  ;;  %v9435_v12 = vmul.f32 -1.442695, %v15572_v16  ;;  %v7851_v37 = vld [vmem:[%s18836_s5 + $0x2c8] sm:$0xff]  ;;  %19346 = vst [vmem:[#allocation14_spill] sm:$0xff] %v15618_v38  ;;  %v15624_v57 = vpop.f32.mrb[149].mxu1 }
 0x3af   : > { %v11136_v30 = vpop.eup %11135  ;;  %v7331_v5 = vadd.f32 %v7330_v51, %v6250_v62  ;;  %v6265_v3 = vmul.f32 %v11134_v48, %v15281_v20  ;;  %11155 = vpow2.f32 %v15514_v15  ;;  %v9924_v20 = vpack.c.bf16 %v7833_v39, %v7832_v35  ;;  %v7834_v15 = vld [vmem:[%s18836_s5 + $0x240] sm:$0xff]  ;;  %v7835_v51 = vld [vmem:[%s18836_s5 + $0x248] sm:$0xff]  ;;  %19348 = vst [vmem:[#allocation68_spill] sm:$0xff] %v15624_v57  ;;  %v15626_v62 = vpop.f32.mrb[181].mxu0 }
 0x3b0   : > { %v11138_v1 = vpop.eup %11137  ;;  %v7224_v31 = vadd.f32 %v7223_v63, %v6263_v54  ;;  %v4792_v11 = vadd.f32 1.0, %v11136_v30  ;;  %11157 = vpow2.f32 %v15525_v13  ;;  %v9862_v13 = vpack.c.bf16 %v7787_v50, %v7786_v27  ;;  %19349 = vst [vmem:[#allocation10_spill] sm:$0xff] %v15626_v62  ;;  %v7792_v62 = vld [vmem:[%s18836_s5 + $0xf0] sm:$0xff] }
 0x3b1   : > { %v11140_v29 = vpop.eup %11139  ;;  %v7296_v58 = vadd.f32 %v7295_v32, %v6265_v3  ;;  %v6264_v63 = vmul.f32 %v11138_v1, %v15293_v14  ;;  %11159 = vpow2.f32 %v15539_v6  ;;  %9925 = vmatpush3.bf16.msra.mxu0 %v9924_v20  ;;  %v9864_v48 = vpack.c.bf16 %v7771_v9, %v7770_v10  ;;  %v15639_v10 = vpop.f32.mrb[150].mxu1 }
 0x3b2   : > { %v11142_v35 = vpop.eup %11141  ;;  %v6266_v39 = vmul.f32 %v11140_v29, %v15300_v24  ;;  %11161 = vrcp.f32 %v4792_v11  ;;  %v9926_v54 = vpack.c.bf16 %v7851_v37, %v7850_v19  ;;  %9863 = vmatprep.subr.bf16.mxu1 %v9862_v13  ;;  %v9928_v14 = vpack.c.bf16 %v7835_v51, %v7834_v15  ;;  %v19350_v24 = vld [vmem:[#allocation51_spill] sm:$0xff]  ;;  %19351 = vst [vmem:[#allocation46_spill] sm:$0xff] %v15639_v10  ;;  %v15659_v11 = vpop.f32.mrb[182].mxu0  ;;  %v19356_v13 = vld [vmem:[#allocation54_spill] sm:$0xff] }
 0x3b3   : > { %v11144_v30 = vpop.eup %11143  ;;  %v15629_v60 = vadd.f32 %v7259_v2, %v6264_v63  ;;  %v6279_v32 = vmul.f32 %v11142_v35, %v15347_v41  ;;  %11163 = vpow2.f32 %v9421_v7  ;;  %v15637_v3 = vadd.f32 %v19350_v24, %v14372_v26  ;;  %9865 = vmatpush3.bf16.msra.mxu1 %v9864_v48  ;;  %v19352_v7 = vld [vmem:[#allocation52_spill] sm:$0xff]  ;;  %19354 = vst [vmem:[#allocation16_spill] sm:$0xff] %v15659_v11  ;;  %v19355_v51 = vld [vmem:[#allocation15_spill] sm:$0xff]  ;;  %v7773_v48 = vld [vmem:[%s18836_s5 + $0x58] sm:$0xff] }
 0x3b4   : > { %v11146_v6 = vpop.eup %11145  ;;  %v15632_v27 = vadd.f32 %v7331_v5, %v6266_v39  ;;  %v6281_v50 = vmul.f32 %v11144_v30, %v15366_v53  ;;  %11165 = vpow2.f32 %v9434_v47  ;;  %9927 = vmatprep.subr.bf16.mxu0 %v9926_v54  ;;  %v15645_v5 = vadd.f32 %v19352_v7, %v14330_v17  ;;  %v7788_v53 = vld [vmem:[%s18836_s5 + $0xd0] sm:$0xff]  ;;  %v7789_v47 = vld [vmem:[%s18836_s5 + $0xd8] sm:$0xff] }
 0x3b5   : > { %v11148_v2 = vpop.eup %11147  ;;  %v15641_v9 = vadd.f32 %v7224_v31, %v6279_v32  ;;  %v4794_v41 = vadd.f32 1.0, %v11146_v6  ;;  %11167 = vpow2.f32 %v9436_v46  ;;  %v19353_v31 = vld [vmem:[#allocation53_spill] sm:$0xff]  ;;  %9929 = vmatpush3.bf16.msra.mxu0 %v9928_v14  ;;  %v15663_v29 = vadd.f32 %v19355_v51, %v14353_v25  ;;  %v7853_v6 = vld [vmem:[%s18836_s5 + $0x2d8] sm:$0xff] }
 0x3b6   : > { %v11150_v19 = vpop.eup %11149  ;;  %v15653_v37 = vadd.f32 %v7296_v58, %v6281_v50  ;;  %v4807_v1 = vadd.f32 1.0, %v11148_v2  ;;  %11169 = vpow2.f32 %v9435_v12  ;;  %v15657_v46 = vadd.f32 %v19353_v31, %v14335_v55  ;;  %v7772_v39 = vld [vmem:[%s18836_s5 + $0x50] sm:$0xff]  ;;  %v7837_v31 = vld [vmem:[%s18836_s5 + $0x258] sm:$0xff] }
 0x3b7   : > { %v11152_v20 = vpop.eup %11151  ;;  %11171 = vrcp.f32 %v4794_v41  ;;  %v4809_v15 = vadd.f32 1.0, %v11150_v19  ;;  %v15667_v12 = vadd.f32 %v19356_v13, %v14372_v26  ;;  %v9866_v35 = vpack.c.bf16 %v7789_v47, %v7788_v53  ;;  %v7852_v14 = vld [vmem:[%s18836_s5 + $0x2d0] sm:$0xff]  ;;  %v15702_v13 = vpop.f32.mrb[183].mxu0 }
 0x3b8   : > { %v11154_v63 = vpop.eup %11153  ;;  %11173 = vrcp.f32 %v4807_v1  ;;  %v4808_v58 = vadd.f32 1.0, %v11152_v20  ;;  %v9437_v32 = vmul.f32 -1.442695, %v15637_v3  ;;  %v15683_v2 = vmul.f32 -1.442695, %v15645_v5  ;;  %v7836_v1 = vld [vmem:[%s18836_s5 + $0x250] sm:$0xff] }
 0x3b9   : > { %v11156_v54 = vpop.eup %11155  ;;  %11175 = vrcp.f32 %v4809_v15  ;;  %v4810_v30 = vadd.f32 1.0, %v11154_v63  ;;  %v15686_v41 = vmul.f32 -1.442695, %v15657_v46  ;;  %9867 = vmatprep.subr.bf16.mxu1 %v9866_v35  ;;  %v15689_v47 = vmul.f32 -1.442695, %v15663_v29  ;;  %19358 = vst [vmem:[#allocation48_spill] sm:$0xff] %v15702_v13 }
 0x3ba   : > { %v11158_v50 = vpop.eup %11157  ;;  %11177 = vrcp.f32 %v4808_v58  ;;  %v4823_v24 = vadd.f32 1.0, %v11156_v54  ;;  %v9868_v19 = vpack.c.bf16 %v7773_v48, %v7772_v39  ;;  %v15698_v51 = vmul.f32 -1.442695, %v15667_v12  ;;  %v15700_v58 = vpop.f32.mrb[151].mxu1  ;;  %v7790_v35 = vld [vmem:[%s18836_s5 + $0xe0] sm:$0xff] }
 0x3bb   : > { %v11160_v7 = vpop.eup %11159  ;;  %11179 = vrcp.f32 %v4810_v30  ;;  %v4825_v53 = vadd.f32 1.0, %v11158_v50  ;;  %v9930_v63 = vpack.c.bf16 %v7853_v6, %v7852_v14  ;;  %19357 = vst [vmem:[#allocation47_spill] sm:$0xff] %v15700_v58  ;;  %v19359_v54 = vld [vmem:[#allocation55_spill] sm:$0xff]  ;;  %v19360_v50 = vld [vmem:[#allocation56_spill] sm:$0xff] }
 0x3bc   : > { %v11162_v20 = vpop.eup %11161  ;;  %11181 = vrcp.f32 %v4823_v24  ;;  %v4824_v15 = vadd.f32 1.0, %v11160_v7  ;;  %v15710_v30 = vadd.f32 %v19359_v54, %v14330_v17  ;;  %v15714_v24 = vadd.f32 %v19360_v50, %v14335_v55  ;;  %9869 = vmatpush3.bf16.msra.mxu1 %v9868_v19  ;;  %v7791_v14 = vld [vmem:[%s18836_s5 + $0xe8] sm:$0xff]  ;;  %v7774_v6 = vld [vmem:[%s18836_s5 + $0x60] sm:$0xff] }
 0x3bd   : > { %v11164_v39 = vpop.eup %11163  ;;  %v6280_v48 = vmul.f32 %v11162_v20, %v15383_v21  ;;  %11183 = vrcp.f32 %v4825_v53  ;;  %v7775_v21 = vld [vmem:[%s18836_s5 + $0x68] sm:$0xff]  ;;  %9931 = vmatprep.subr.bf16.mxu0 %v9930_v63  ;;  %v9932_v20 = vpack.c.bf16 %v7837_v31, %v7836_v1  ;;  %v9870_v54 = vpack.c.bf16 %v7791_v14, %v7790_v35  ;;  %v7854_v19 = vld [vmem:[%s18836_s5 + $0x2e0] sm:$0xff]  ;;  %v19362_v14 = vld [vmem:[#allocation17_spill] sm:$0xff] }
 0x3be   : > { %v11166_v7 = vpop.eup %11165  ;;  %11185 = vrcp.f32 %v4824_v15  ;;  %v4826_v53 = vadd.f32 1.0, %v11164_v39  ;;  %v7855_v50 = vld [vmem:[%s18836_s5 + $0x2e8] sm:$0xff]  ;;  %v7838_v13 = vld [vmem:[%s18836_s5 + $0x260] sm:$0xff]  ;;  %v15744_v10 = vadd.f32 %v19362_v14, %v14372_v26 }
 0x3bf   : > { %v11168_v58 = vpop.eup %11167  ;;  %v7261_v11 = vadd.f32 %v15629_v60, %v6280_v48  ;;  %v4839_v15 = vadd.f32 1.0, %v11166_v7  ;;  %11187 = vpow2.f32 %v9437_v32  ;;  %v19361_v1 = vld [vmem:[#allocation71_spill] sm:$0xff]  ;;  %v7839_v63 = vld [vmem:[%s18836_s5 + $0x268] sm:$0xff]  ;;  %9933 = vmatpush3.bf16.msra.mxu0 %v9932_v20  ;;  %9871 = vmatprep.subr.bf16.mxu1 %v9870_v54  ;;  %v9872_v60 = vpack.c.bf16 %v7775_v21, %v7774_v6  ;;  %v15754_v6 = vpop.f32.mrb[152].mxu1 }
 0x3c0   : > { %v15737_v31 = vadd.f32 %v19361_v1, %v14353_v25  ;;  %v11170_v35 = vpop.eup %11169  ;;  %11189 = vrcp.f32 %v4826_v53  ;;  %v4841_v39 = vadd.f32 1.0, %v11168_v58  ;;  %v9934_v7 = vpack.c.bf16 %v7855_v50, %v7854_v19  ;;  %v7793_v58 = vld [vmem:[%s18836_s5 + $0xf8] sm:$0xff]  ;;  %19363 = vst [vmem:[#allocation29_spill] sm:$0xff] %v15754_v6  ;;  %v15756_v21 = vpop.f32.mrb[184].mxu0 }
 0x3c1   : > { %v11172_v48 = vpop.eup %11171  ;;  %11191 = vrcp.f32 %v4839_v15  ;;  %v4840_v32 = vadd.f32 1.0, %v11170_v35  ;;  %v9936_v1 = vpack.c.bf16 %v7839_v63, %v7838_v13  ;;  %v9466_v20 = vmul.f32 -1.442695, %v15710_v30  ;;  %9873 = vmatpush3.bf16.msra.mxu1 %v9872_v60  ;;  %19364 = vst [vmem:[#allocation49_spill] sm:$0xff] %v15756_v21  ;;  %v15761_v63 = vpop.f32.mrb[153].mxu1 }
 0x3c2   : > { %v11174_v53 = vpop.eup %11173  ;;  %v6282_v14 = vmul.f32 %v11172_v48, %v15393_v40  ;;  %11193 = vrcp.f32 %v4841_v39  ;;  %v9874_v13 = vpack.c.bf16 %v7793_v58, %v7792_v62  ;;  %v9468_v50 = vmul.f32 -1.442695, %v15714_v24  ;;  %9935 = vmatprep.subr.bf16.mxu0 %v9934_v7  ;;  %19365 = vst [vmem:[#allocation50_spill] sm:$0xff] %v15761_v63  ;;  %v15763_v40 = vpop.f32.mrb[185].mxu0  ;;  %v19367_v62 = vld [vmem:[#allocation72_spill] sm:$0xff] }
 0x3c3   : > { %v11176_v54 = vpop.eup %11175  ;;  %v6295_v19 = vmul.f32 %v11174_v53, %v15401_v28  ;;  %11195 = vrcp.f32 %v4840_v32  ;;  %v9467_v15 = vmul.f32 -1.442695, %v15737_v31  ;;  %19366 = vst [vmem:[#allocation51_spill] sm:$0xff] %v15763_v40  ;;  %v15770_v28 = vadd.f32 %v19367_v62, %v14330_v17  ;;  %9937 = vmatpush3.bf16.msra.mxu0 %v9936_v1  ;;  %v19370_v1 = vld [vmem:[#allocation18_spill] sm:$0xff]  ;;  %v19374_v62 = vld [vmem:[#allocation32_spill] sm:$0xff] }
 0x3c4   : > { %v11178_v35 = vpop.eup %11177  ;;  %v7333_v39 = vadd.f32 %v15632_v27, %v6282_v14  ;;  %v6297_v60 = vmul.f32 %v11176_v54, %v15409_v45  ;;  %11197 = vpow2.f32 %v15683_v2  ;;  %9875 = vmatprep.subr.bf16.mxu1 %v9874_v13  ;;  %v9469_v58 = vmul.f32 -1.442695, %v15744_v10  ;;  %v15776_v27 = vpop.f32.mrb[154].mxu1  ;;  %v19371_v54 = vld [vmem:[#allocation73_spill] sm:$0xff] }
 0x3c5   : > { %v11180_v48 = vpop.eup %11179  ;;  %v7226_v32 = vadd.f32 %v15641_v9, %v6295_v19  ;;  %v6296_v7 = vmul.f32 %v11178_v35, %v15431_v49  ;;  %11199 = vpow2.f32 %v15686_v41  ;;  %19368 = vst [vmem:[#allocation52_spill] sm:$0xff] %v15776_v27  ;;  %v15778_v45 = vpop.f32.mrb[186].mxu0  ;;  %v15785_v9 = vadd.f32 %v19370_v1, %v14335_v55 }
 0x3c6   : > { %19369 = vst [vmem:[#allocation53_spill] sm:$0xff] %v15778_v45  ;;  %v11182_v2 = vpop.eup %11181  ;;  %v7298_v53 = vadd.f32 %v15653_v37, %v6297_v60  ;;  %v6298_v14 = vmul.f32 %v11180_v48, %v15478_v52  ;;  %11201 = vpow2.f32 %v15689_v47  ;;  %v15791_v19 = vadd.f32 %v19371_v54, %v14353_v25  ;;  %v15793_v35 = vpop.f32.mrb[155].mxu1 }
 0x3c7   : > { %v11184_v49 = vpop.eup %11183  ;;  %v7262_v13 = vadd.f32 %v7261_v11, %v6296_v7  ;;  %v6311_v41 = vmul.f32 %v11182_v2, %v15491_v36  ;;  %11203 = vpow2.f32 %v15698_v51  ;;  %19372 = vst [vmem:[#allocation15_spill] sm:$0xff] %v15793_v35  ;;  %v15795_v37 = vpop.f32.mrb[187].mxu0  ;;  %v15800_v11 = vadd.f32 %v19374_v62, %v14372_v26  ;;  %v7776_v2 = vld [vmem:[%s18836_s5 + $0x70] sm:$0xff] }
 0x3c8   : > { %19373 = vst [vmem:[#allocation54_spill] sm:$0xff] %v15795_v37  ;;  %v11186_v52 = vpop.eup %11185  ;;  %v7334_v47 = vadd.f32 %v7333_v39, %v6298_v14  ;;  %v6313_v60 = vmul.f32 %v11184_v49, %v15495_v0  ;;  %11205 = vpow2.f32 %v9466_v20  ;;  %v9482_v7 = vmul.f32 -1.442695, %v15770_v28  ;;  %v7777_v0 = vld [vmem:[%s18836_s5 + $0x78] sm:$0xff] }
 0x3c9   : > { %v11188_v36 = vpop.eup %11187  ;;  %v7227_v48 = vadd.f32 %v7226_v32, %v6311_v41  ;;  %v6312_v51 = vmul.f32 %v11186_v52, %v15507_v61  ;;  %11207 = vpow2.f32 %v9468_v50  ;;  %v9484_v1 = vmul.f32 -1.442695, %v15785_v9  ;;  %v7856_v61 = vld [vmem:[%s18836_s5 + $0x2f0] sm:$0xff]  ;;  %v7857_v50 = vld [vmem:[%s18836_s5 + $0x2f8] sm:$0xff] }
 0x3ca   : > { %v11190_v20 = vpop.eup %11189  ;;  %v7299_v39 = vadd.f32 %v7298_v53, %v6313_v60  ;;  %v4842_v14 = vadd.f32 1.0, %v11188_v36  ;;  %11209 = vpow2.f32 %v9467_v15  ;;  %v9483_v54 = vmul.f32 -1.442695, %v15791_v19  ;;  %v951_v15 = vld [vmem:[%s18835_s4 + $0x8] sm:$0xff] }
 0x3cb   : > { %v11192_v32 = vpop.eup %11191  ;;  %v7263_v49 = vadd.f32 %v7262_v13, %v6312_v51  ;;  %v6314_v41 = vmul.f32 %v11190_v20, %v15549_v4  ;;  %11211 = vpow2.f32 %v9469_v58  ;;  %v9485_v60 = vmul.f32 -1.442695, %v15800_v11 }
 0x3cc   : > { %v11194_v53 = vpop.eup %11193  ;;  %v6327_v52 = vmul.f32 %v11192_v32, %v15553_v56  ;;  %11213 = vrcp.f32 %v4842_v14  ;;  %v9876_v62 = vpack.c.bf16 %v7777_v0, %v7776_v2  ;;  %v9938_v4 = vpack.c.bf16 %v7857_v50, %v7856_v61  ;;  %v7840_v56 = vld [vmem:[%s18836_s5 + $0x270] sm:$0xff]  ;;  %v19375_v0 = vld [vmem:[#allocation20_spill] sm:$0xff] }
 0x3cd   : > { %v11196_v36 = vpop.eup %11195  ;;  %v15824_v37 = vadd.f32 %v7334_v47, %v6314_v41  ;;  %v6329_v13 = vmul.f32 %v11194_v53, %v15563_v42  ;;  %11215 = vpow2.f32 %v9482_v7  ;;  %v7841_v47 = vld [vmem:[%s18836_s5 + $0x278] sm:$0xff]  ;;  %v15837_v42 = vrot.slane %v951_v15, %v19375_v0  ;;  %v7811_v14 = vld [vmem:[%s18836_s5 + $0x188] sm:$0xff]  ;;  %v19376_v32 = vld [vmem:[#allocation33_spill] sm:$0xff]  ;;  %v15853_v41 = vpop.f32.mrb[156].mxu1 }
 0x3ce   : > { %v11198_v58 = vpop.eup %11197  ;;  %v15827_v51 = vadd.f32 %v7227_v48, %v6327_v52  ;;  %v6328_v20 = vmul.f32 %v11196_v36, %v15572_v16  ;;  %11217 = vpow2.f32 %v9484_v1  ;;  %9877 = vmatpush3.bf16.msra.mxu1 %v9876_v62  ;;  %9939 = vmatprep.subr.bf16.mxu0 %v9938_v4  ;;  %v7810_v16 = vld [vmem:[%s18836_s5 + $0x180] sm:$0xff]  ;;  %19377 = vst [vmem:[#allocation55_spill] sm:$0xff] %v15853_v41  ;;  %v19379_v62 = vld [vmem:[#allocation34_spill] sm:$0xff] }
 0x3cf   : > { %v11200_v2 = vpop.eup %11199  ;;  %v15839_v7 = vadd.f32 %v7299_v39, %v6329_v13  ;;  %v4855_v48 = vadd.f32 1.0, %v11198_v58  ;;  %11219 = vpow2.f32 %v9483_v54  ;;  %v15851_v39 = vadd.f32 %v19376_v32, %v14330_v17  ;;  %v15855_v54 = vpop.f32.mrb[188].mxu0  ;;  %v19381_v17 = vld [vmem:[#allocation35_spill] sm:$0xff]  ;;  %v19382_v32 = vld [vmem:[#allocation21_spill] sm:$0xff] }
 0x3d0   : > { %v11202_v1 = vpop.eup %11201  ;;  %v15847_v61 = vadd.f32 %v7263_v49, %v6328_v20  ;;  %v4857_v50 = vadd.f32 1.0, %v11200_v2  ;;  %11221 = vpow2.f32 %v9485_v60  ;;  %19378 = vst [vmem:[#allocation56_spill] sm:$0xff] %v15855_v54  ;;  %v15859_v36 = vadd.f32 %v19379_v62, %v14335_v55  ;;  %v15861_v49 = vpop.f32.mrb[157].mxu1 }
 0x3d1   : > { %v11204_v53 = vpop.eup %11203  ;;  %11223 = vrcp.f32 %v4855_v48  ;;  %v4856_v52 = vadd.f32 1.0, %v11202_v1  ;;  %v9940_v13 = vpack.c.bf16 %v7841_v47, %v7840_v56  ;;  %19380 = vst [vmem:[#allocation71_spill] sm:$0xff] %v15861_v49  ;;  %v15865_v58 = vadd.f32 %v19381_v17, %v14353_v25  ;;  %v19383_v1 = vld [vmem:[#allocation22_spill] sm:$0xff]  ;;  %v19384_v47 = vld [vmem:[#allocation23_spill] sm:$0xff]  ;;  %v15882_v17 = vpop.f32.mrb[189].mxu0 }
 0x3d2   : > { %v11206_v4 = vpop.eup %11205  ;;  %11225 = vrcp.f32 %v4857_v50  ;;  %v4858_v60 = vadd.f32 1.0, %v11204_v53  ;;  %v9878_v20 = vpack.c.bf16 %v7811_v14, %v7810_v16  ;;  %v15868_v54 = vrot.slane %v951_v15, %v19382_v32  ;;  %19386 = vst [vmem:[#allocation17_spill] sm:$0xff] %v15882_v17 }
 0x3d3   : > { %v11208_v2 = vpop.eup %11207  ;;  %11227 = vrcp.f32 %v4856_v52  ;;  %v4871_v48 = vadd.f32 1.0, %v11206_v4  ;;  %v15871_v55 = vrot.slane %v951_v15, %v19383_v1  ;;  %9941 = vmatpush3.bf16.msra.mxu0 %v9940_v13  ;;  %v15874_v62 = vrot.slane %v951_v15, %v19384_v47  ;;  %v19385_v52 = vld [vmem:[#allocation57_spill] sm:$0xff] }
 0x3d4   : > { %v11210_v56 = vpop.eup %11209  ;;  %11229 = vrcp.f32 %v4858_v60  ;;  %v4873_v50 = vadd.f32 1.0, %v11208_v2  ;;  %v9498_v25 = vmul.f32 -1.442695, %v15851_v39  ;;  %9879 = vmatprep.subr.bf16.mxu1 %v9878_v20  ;;  %v9500_v53 = vmul.f32 -1.442695, %v15859_v36 }
 0x3d5   : > { %v11212_v16 = vpop.eup %11211  ;;  %11231 = vrcp.f32 %v4871_v48  ;;  %v4872_v14 = vadd.f32 1.0, %v11210_v56  ;;  %v15880_v4 = vadd.f32 %v19385_v52, %v14372_v26  ;;  %v9499_v60 = vmul.f32 -1.442695, %v15865_v58 }
 0x3d6   : > { %v11214_v13 = vpop.eup %11213  ;;  %11233 = vrcp.f32 %v4873_v50  ;;  %v4874_v15 = vadd.f32 1.0, %v11212_v16  ;;  %v15887_v2 = vadd.f32 %v15093_v22, %v15837_v42  ;;  %v15892_v56 = vadd.f32 %v15095_v59, %v15868_v54  ;;  %v15898_v50 = vpop.f32.mrb[158].mxu1 }
 0x3d7   : > { %v11216_v20 = vpop.eup %11215  ;;  %v6330_v48 = vmul.f32 %v11214_v13, %v15637_v3  ;;  %11235 = vrcp.f32 %v4872_v14  ;;  %v15896_v26 = vadd.f32 %v15099_v33, %v15871_v55  ;;  %19387 = vst [vmem:[#allocation72_spill] sm:$0xff] %v15898_v50  ;;  %v15900_v16 = vpop.f32.mrb[190].mxu0  ;;  %v15904_v17 = vadd.f32 %v15101_v43, %v15874_v62  ;;  %v19389_v43 = vld [vmem:[#allocation4_spill] sm:$0xff] }
 0x3d8   : > { %19388 = vst [vmem:[#allocation18_spill] sm:$0xff] %v15900_v16  ;;  %v11218_v52 = vpop.eup %11217  ;;  %11237 = vrcp.f32 %v4874_v15  ;;  %v4887_v22 = vadd.f32 1.0, %v11216_v20  ;;  %v15908_v3 = vadd.f32 %v15105_v44, %v15837_v42  ;;  %v15913_v13 = vadd.f32 %v15107_v23, %v15868_v54  ;;  %v15920_v44 = vpop.f32.mrb[159].mxu1 }
 0x3d9   : > { %v11220_v59 = vpop.eup %11219  ;;  %v7336_v14 = vadd.f32 %v15824_v37, %v6330_v48  ;;  %v4889_v33 = vadd.f32 1.0, %v11218_v52  ;;  %11239 = vpow2.f32 %v9498_v25  ;;  %v9501_v20 = vmul.f32 -1.442695, %v15880_v4  ;;  %19390 = vst [vmem:[#allocation73_spill] sm:$0xff] %v15920_v44  ;;  %v15924_v23 = vpop.f32.mrb[191].mxu0 }
 0x3da   : > { %v11222_v16 = vpop.eup %11221  ;;  %11241 = vrcp.f32 %v4887_v22  ;;  %v4888_v15 = vadd.f32 1.0, %v11220_v59  ;;  %v15918_v50 = vadd.f32 %v19389_v43, %v15871_v55  ;;  %v9022_v25 = vmul.f32 -1.442695, %v15887_v2  ;;  %19391 = vst [vmem:[#allocation32_spill] sm:$0xff] %v15924_v23 }
 0x3db   : > { %v11224_v49 = vpop.eup %11223  ;;  %11243 = vrcp.f32 %v4889_v33  ;;  %v4890_v37 = vadd.f32 1.0, %v11222_v16  ;;  %v9024_v48 = vmul.f32 -1.442695, %v15892_v56  ;;  %v9023_v59 = vmul.f32 -1.442695, %v15896_v26 }
 0x3dc   : > { %v11226_v52 = vpop.eup %11225  ;;  %v6343_v22 = vmul.f32 %v11224_v49, %v15645_v5  ;;  %11245 = vrcp.f32 %v4888_v15  ;;  %v9025_v43 = vmul.f32 -1.442695, %v15904_v17  ;;  %v9038_v16 = vmul.f32 -1.442695, %v15908_v3 }
 0x3dd   : > { %v11228_v41 = vpop.eup %11227  ;;  %v6345_v44 = vmul.f32 %v11226_v52, %v15657_v46  ;;  %11247 = vrcp.f32 %v4890_v37  ;;  %v9040_v33 = vmul.f32 -1.442695, %v15913_v13  ;;  %v9039_v5 = vmul.f32 -1.442695, %v15918_v50  ;;  %v19392_v46 = vld [vmem:[#allocation58_spill] sm:$0xff] }
 0x3de   : > { %v11230_v35 = vpop.eup %11229  ;;  %v7229_v45 = vadd.f32 %v15827_v51, %v6343_v22  ;;  %v6344_v23 = vmul.f32 %v11228_v41, %v15663_v29  ;;  %11249 = vpow2.f32 %v9500_v53  ;;  %v15939_v37 = vadd.f32 %v19392_v46, %v15874_v62  ;;  %v19393_v29 = vld [vmem:[#allocation59_spill] sm:$0xff] }
 0x3df   : > { %v11232_v49 = vpop.eup %11231  ;;  %v7301_v15 = vadd.f32 %v15839_v7, %v6345_v44  ;;  %v6346_v27 = vmul.f32 %v11230_v35, %v15667_v12  ;;  %11251 = vpow2.f32 %v9499_v60  ;;  %v15945_v41 = vadd.f32 %v19393_v29, %v15837_v42  ;;  %v19394_v12 = vld [vmem:[#allocation36_spill] sm:$0xff]  ;;  %v15952_v60 = vpop.f32.mrb[160].mxu1 }
 0x3e0   : > { %v11234_v52 = vpop.eup %11233  ;;  %v7265_v40 = vadd.f32 %v15847_v61, %v6344_v23  ;;  %v6359_v51 = vmul.f32 %v11232_v49, %v15710_v30  ;;  %11253 = vpow2.f32 %v9501_v20  ;;  %v15950_v35 = vadd.f32 %v19394_v12, %v15868_v54  ;;  %19395 = vst [vmem:[#allocation33_spill] sm:$0xff] %v15952_v60  ;;  %v15954_v44 = vpop.f32.mrb[192].mxu0  ;;  %v19397_v23 = vld [vmem:[#allocation3_spill] sm:$0xff]  ;;  %v19418_v60 = vld [vmem:[#allocation25_spill] sm:$0xff] }
 0x3e1   : > { %v11236_v53 = vpop.eup %11235  ;;  %v7337_v22 = vadd.f32 %v7336_v14, %v6346_v27  ;;  %v6361_v7 = vmul.f32 %v11234_v52, %v15714_v24  ;;  %11255 = vpow2.f32 %v9022_v25  ;;  %19396 = vst [vmem:[#allocation34_spill] sm:$0xff] %v15954_v44  ;;  %v15959_v49 = vadd.f32 %v19397_v23, %v15871_v55  ;;  %v15961_v27 = vpop.f32.mrb[161].mxu1  ;;  %v19400_v52 = vld [vmem:[#allocation24_spill] sm:$0xff] }
 0x3e2   : > { %v11238_v61 = vpop.eup %11237  ;;  %v7230_v30 = vadd.f32 %v7229_v45, %v6359_v51  ;;  %v6360_v20 = vmul.f32 %v11236_v53, %v15737_v31  ;;  %11257 = vpow2.f32 %v9024_v48  ;;  %19398 = vst [vmem:[#allocation35_spill] sm:$0xff] %v15961_v27  ;;  %v15963_v24 = vpop.f32.mrb[193].mxu0  ;;  %v15968_v29 = vadd.f32 %v19400_v52, %v15874_v62  ;;  %v19416_v27 = vld [vmem:[#allocation66_spill] sm:$0xff] }
 0x3e3   : > { %19399 = vst [vmem:[#allocation57_spill] sm:$0xff] %v15963_v24  ;;  %v11240_v14 = vpop.eup %11239  ;;  %v7302_v25 = vadd.f32 %v7301_v15, %v6361_v7  ;;  %v6362_v46 = vmul.f32 %v11238_v61, %v15744_v10  ;;  %11259 = vpow2.f32 %v9023_v59  ;;  %v15970_v45 = vpop.f32.mrb[162].mxu1  ;;  %v9041_v53 = vmul.f32 -1.442695, %v15939_v37 }
 0x3e4   : > { %19401 = vst [vmem:[#allocation4_spill] sm:$0xff] %v15970_v45  ;;  %v11242_v31 = vpop.eup %11241  ;;  %v7266_v48 = vadd.f32 %v7265_v40, %v6360_v20  ;;  %v4903_v51 = vadd.f32 1.0, %v11240_v14  ;;  %11261 = vpow2.f32 %v9025_v43  ;;  %v9054_v10 = vmul.f32 -1.442695, %v15945_v41  ;;  %v15975_v59 = vpop.f32.mrb[194].mxu0 }
 0x3e5   : > { %v11244_v12 = vpop.eup %11243  ;;  %v7338_v23 = vadd.f32 %v7337_v22, %v6362_v46  ;;  %v6375_v24 = vmul.f32 %v11242_v31, %v15770_v28  ;;  %11263 = vpow2.f32 %v9038_v16  ;;  %19402 = vst [vmem:[#allocation58_spill] sm:$0xff] %v15975_v59  ;;  %v15979_v61 = vmul.f32 -1.442695, %v15950_v35  ;;  %v19403_v46 = vld [vmem:[#allocation74_spill] sm:$0xff]  ;;  %v15997_v31 = vpop.f32.mrb[163].mxu1 }
 0x3e6   : > { %v11246_v15 = vpop.eup %11245  ;;  %v6377_v7 = vmul.f32 %v11244_v12, %v15785_v9  ;;  %11265 = vrcp.f32 %v4903_v51  ;;  %v15982_v40 = vmul.f32 -1.442695, %v15959_v49  ;;  %v15988_v16 = vmul.f32 -1.442695, %v15968_v29  ;;  %19404 = vst [vmem:[#allocation59_spill] sm:$0xff] %v15997_v31  ;;  %v19414_v31 = vld [vmem:[#allocation65_spill] sm:$0xff] }
 0x3e7   : > { %v11248_v43 = vpop.eup %11247  ;;  %v15984_v20 = vadd.f32 %v7230_v30, %v6375_v24  ;;  %v6376_v28 = vmul.f32 %v11246_v15, %v15791_v19  ;;  %11267 = vpow2.f32 %v9040_v33  ;;  %v15995_v52 = vadd.f32 %v19403_v46, %v15837_v42  ;;  %v19405_v33 = vld [vmem:[#allocation75_spill] sm:$0xff] }
 0x3e8   : > { %v11250_v22 = vpop.eup %11249  ;;  %v15990_v14 = vadd.f32 %v7302_v25, %v6377_v7  ;;  %v6378_v9 = vmul.f32 %v11248_v43, %v15800_v11  ;;  %11269 = vpow2.f32 %v9039_v5  ;;  %v16003_v51 = vadd.f32 %v19405_v33, %v15868_v54  ;;  %v19406_v5 = vld [vmem:[#allocation19_spill] sm:$0xff]  ;;  %v16011_v7 = vpop.f32.mrb[195].mxu0 }
 0x3e9   : > { %v11252_v30 = vpop.eup %11251  ;;  %v15999_v24 = vadd.f32 %v7266_v48, %v6376_v28  ;;  %v4905_v19 = vadd.f32 1.0, %v11250_v22  ;;  %11271 = vpow2.f32 %v9041_v53  ;;  %v16009_v15 = vadd.f32 %v19406_v5, %v15871_v55  ;;  %19407 = vst [vmem:[#allocation36_spill] sm:$0xff] %v16011_v7  ;;  %v19408_v53 = vld [vmem:[#allocation5_spill] sm:$0xff]  ;;  %v19409_v22 = vld [vmem:[#allocation62_spill] sm:$0xff]  ;;  %v16083_v8 = vpop.f32.mrb[196].mxu0 }
 0x3ea   : > { %v11254_v25 = vpop.eup %11253  ;;  %v16005_v12 = vadd.f32 %v7338_v23, %v6378_v9  ;;  %v4904_v11 = vadd.f32 1.0, %v11252_v30  ;;  %11273 = vpow2.f32 %v9054_v10  ;;  %v16015_v28 = vadd.f32 %v19408_v53, %v15874_v62  ;;  %v19410_v30 = vld [vmem:[#allocation63_spill] sm:$0xff]  ;;  %v19412_v53 = vld [vmem:[#allocation64_spill] sm:$0xff]  ;;  %19423 = vst [vmem:[#allocation5_spill] sm:$0xff] %v16083_v8 }
 0x3eb   : > { %v11256_v43 = vpop.eup %11255  ;;  %11275 = vrcp.f32 %v4905_v19  ;;  %v4906_v48 = vadd.f32 1.0, %v11254_v25  ;;  %v16019_v46 = vadd.f32 %v19409_v22, %v15837_v42  ;;  %v16022_v9 = vmul.f32 -1.442695, %v15995_v52 }
 0x3ec   : > { %v11258_v23 = vpop.eup %11257  ;;  %11277 = vrcp.f32 %v4904_v11  ;;  %v4427_v10 = vadd.f32 1.0, %v11256_v43  ;;  %v16026_v33 = vadd.f32 %v19410_v30, %v15868_v54  ;;  %v16029_v5 = vmul.f32 -1.442695, %v16003_v51 }
 0x3ed   : > { %v11260_v19 = vpop.eup %11259  ;;  %11279 = vrcp.f32 %v4906_v48  ;;  %v4429_v25 = vadd.f32 1.0, %v11258_v23  ;;  %v16033_v22 = vadd.f32 %v19412_v53, %v15871_v55  ;;  %v16036_v43 = vmul.f32 -1.442695, %v16009_v15 }
 0x3ee   : > { %19411 = vst [vmem:[#allocation3_spill] sm:$0xff] %v16026_v33  ;;  %v11262_v7 = vpop.eup %11261  ;;  %11281 = vrcp.f32 %v4427_v10  ;;  %v4428_v11 = vadd.f32 1.0, %v11260_v19  ;;  %v16040_v30 = vadd.f32 %v19414_v31, %v15874_v62  ;;  %v16043_v23 = vmul.f32 -1.442695, %v16015_v28 }
 0x3ef   : > { %19413 = vst [vmem:[#allocation24_spill] sm:$0xff] %v16033_v22  ;;  %v11264_v59 = vpop.eup %11263  ;;  %11283 = vrcp.f32 %v4429_v25  ;;  %v4430_v48 = vadd.f32 1.0, %v11262_v7  ;;  %v16046_v45 = vmul.f32 -1.442695, %v16019_v46  ;;  %v16049_v19 = vmul.f32 -1.442695, %v16026_v33 }
 0x3f0   : > { %19415 = vst [vmem:[#allocation74_spill] sm:$0xff] %v16040_v30  ;;  %v11266_v53 = vpop.eup %11265  ;;  %11285 = vrcp.f32 %v4428_v11  ;;  %v4443_v10 = vadd.f32 1.0, %v11264_v59  ;;  %v16053_v44 = vadd.f32 %v19416_v27, %v15837_v42  ;;  %v16057_v7 = vmul.f32 -1.442695, %v16033_v22  ;;  %v19419_v27 = vld [vmem:[#allocation8_spill] sm:$0xff] }
 0x3f1   : > { %v11268_v31 = vpop.eup %11267  ;;  %v6391_v25 = vmul.f32 %v11266_v53, %v15851_v39  ;;  %11287 = vrcp.f32 %v4430_v48  ;;  %v16061_v63 = vadd.f32 %v19418_v60, %v15868_v54  ;;  %v16064_v21 = vmul.f32 -1.442695, %v16040_v30  ;;  %v19421_v60 = vld [vmem:[#allocation31_spill] sm:$0xff] }
 0x3f2   : > { %19417 = vst [vmem:[#allocation75_spill] sm:$0xff] %v16053_v44  ;;  %v11270_v11 = vpop.eup %11269  ;;  %11289 = vrcp.f32 %v4443_v10  ;;  %v4445_v59 = vadd.f32 1.0, %v11268_v31  ;;  %v16068_v6 = vadd.f32 %v19419_v27, %v15871_v55  ;;  %v16075_v57 = vadd.f32 %v19421_v60, %v15874_v62  ;;  %v16081_v27 = vpop.f32.mrb[164].mxu1 }
 0x3f3   : > { %v11272_v32 = vpop.eup %11271  ;;  %v7045_v48 = vsel %vm6498_vm2, %v6391_v25, 0.0  ;;  %v4444_v53 = vadd.f32 1.0, %v11270_v11  ;;  %11291 = vpow2.f32 %v15979_v61  ;;  %v16079_v30 = vmul.f32 -1.442695, %v16053_v44  ;;  %19422 = vst [vmem:[#allocation19_spill] sm:$0xff] %v16081_v27  ;;  %v19424_v11 = vld [vmem:[#allocation37_spill] sm:$0xff] }
 0x3f4   : > { %v11274_v10 = vpop.eup %11273  ;;  %v7232_v31 = vadd.f32 %v15984_v20, %v7045_v48  ;;  %11293 = vrcp.f32 %v4445_v59  ;;  %v4446_v38 = vadd.f32 1.0, %v11272_v32  ;;  %v19426_v61 = vld [vmem:[#allocation9_spill] sm:$0xff]  ;;  %v16092_v20 = vmul.f32 -1.442695, %v16061_v63  ;;  %v16094_v32 = vpop.f32.mrb[165].mxu1 }
 0x3f5   : > { %v11276_v25 = vpop.eup %11275  ;;  %v19427_v22 = vcombine.low %v19425_v34, %v19426_v61  ;;  %11295 = vrcp.f32 %v4444_v53  ;;  %v4459_v60 = vadd.f32 1.0, %v11274_v10  ;;  %v16096_v59 = vpop.f32.mrb[197].mxu0  ;;  %v16100_v44 = vmul.f32 -1.442695, %v16068_v6 }
 0x3f6   : > { %19428 = vst [vmem:[#allocation62_spill] sm:$0xff] %v16096_v59  ;;  %v11278_v48 = vpop.eup %11277  ;;  %v7233_v27 = vrot.slane %v7232_v31, 4  ;;  %v6393_v8 = vmul.f32 %v11276_v25, %v15859_v36  ;;  %11297 = vrcp.f32 %v4446_v38  ;;  %v16102_v34 = vpop.f32.mrb[166].mxu1  ;;  %v16108_v61 = vmul.f32 -1.442695, %v16075_v57 }
 0x3f7   : > { %v16089_v33 = vrot.slane %v19427_v22, %v19424_v11  ;;  %19429 = vst [vmem:[#allocation63_spill] sm:$0xff] %v16102_v34  ;;  %v16104_v22 = vpop.f32.mrb[198].mxu0  ;;  %v11280_v53 = vpop.eup %11279  ;;  %v6392_v10 = vmul.f32 %v11278_v48, %v15865_v58  ;;  %11299 = vrcp.f32 %v4459_v60  ;;  %v16112_v59 = vadd.f32 %v15368_v18, %v15837_v42 }
 0x3f8   : > { %19430 = vst [vmem:[#allocation64_spill] sm:$0xff] %v16104_v22  ;;  %v11282_v36 = vpop.eup %11281  ;;  %v7234_v38 = vadd.f32 %v7233_v27, %v7232_v31  ;;  %v7047_v25 = vsel %vm6498_vm2, %v6393_v8, 0.0  ;;  %v6394_v34 = vmul.f32 %v11280_v53, %v15880_v4  ;;  %11301 = vpow2.f32 %v15982_v40  ;;  %v16123_v18 = vpop.f32.mrb[167].mxu1 }
 0x3f9   : > { %v11284_v22 = vpop.eup %11283  ;;  %v7304_v58 = vadd.f32 %v15990_v14, %v7047_v25  ;;  %v7046_v60 = vsel %vm6498_vm2, %v6392_v10, 0.0  ;;  %v5915_v48 = vmul.f32 %v11282_v36, %v15887_v2  ;;  %11303 = vpow2.f32 %v15988_v16  ;;  %19431 = vst [vmem:[#allocation65_spill] sm:$0xff] %v16123_v18  ;;  %v16125_v31 = vpop.f32.mrb[199].mxu0 }
 0x3fa   : > { %19432 = vst [vmem:[#allocation66_spill] sm:$0xff] %v16125_v31  ;;  %v11286_v27 = vpop.eup %11285  ;;  %v7235_v8 = vrot.slane %v7234_v38, 2  ;;  %v7268_v4 = vadd.f32 %v15999_v24, %v7046_v60  ;;  %v7048_v40 = vsel %vm6498_vm2, %v6394_v34, 0.0  ;;  %v5917_v14 = vmul.f32 %v11284_v22, %v15892_v56 }
 0x3fb   : > { %v11288_v53 = vpop.eup %11287  ;;  %v7305_v25 = vrot.slane %v7304_v58, 4  ;;  %v7340_v10 = vadd.f32 %v16005_v12, %v7048_v40  ;;  %v5916_v2 = vmul.f32 %v11286_v27, %v15896_v26  ;;  %11305 = vpow2.f32 %v16022_v9 }
 0x3fc   : > { %v11290_v16 = vpop.eup %11289  ;;  %v7236_v36 = vadd.f32 %v7235_v8, %v7234_v38  ;;  %v7269_v31 = vrot.slane %v7268_v4, 4  ;;  %v5918_v18 = vmul.f32 %v11288_v53, %v15904_v17  ;;  %11307 = vpow2.f32 %v16029_v5  ;;  %v16140_v5 = vpop.f32.mrb[168].mxu1 }
 0x3fd   : > { %v11292_v24 = vpop.eup %11291  ;;  %v7306_v60 = vadd.f32 %v7305_v25, %v7304_v58  ;;  %v7341_v34 = vrot.slane %v7340_v10, 4  ;;  %v5931_v56 = vmul.f32 %v11290_v16, %v15908_v3  ;;  %11309 = vpow2.f32 %v16036_v43  ;;  %v16142_v58 = vpop.f32.mrb[200].mxu0 }
 0x3fe   : > { %v11294_v22 = vpop.eup %11293  ;;  %v7237_v12 = vrot.slane %v7236_v36, 1  ;;  %v7270_v40 = vadd.f32 %v7269_v31, %v7268_v4  ;;  %v4461_v26 = vadd.f32 1.0, %v11292_v24  ;;  %11311 = vpow2.f32 %v16043_v23  ;;  %v16145_v31 = vpop.f32.mrb[169].mxu1 }
 0x3ff   : > { %v11296_v9 = vpop.eup %11295  ;;  %v7307_v38 = vrot.slane %v7306_v60, 2  ;;  %v7342_v27 = vadd.f32 %v7341_v34, %v7340_v10  ;;  %v7347_v8 = vadd.f32 %v5931_v56, %v5915_v48  ;;  %v5933_v17 = vmul.f32 %v11294_v22, %v15913_v13  ;;  %v16148_v10 = vpop.f32.mrb[201].mxu0 }
 0x400   : > { %v11298_v53 = vpop.eup %11297  ;;  %v7238_v3 = vadd.f32 %v7237_v12, %v7236_v36  ;;  %v7271_v25 = vrot.slane %v7270_v40, 2  ;;  %v5932_v43 = vmul.f32 %v11296_v9, %v15918_v50  ;;  %11313 = vrcp.f32 %v4461_v26 }
 0x401   : > { %v11300_v4 = vpop.eup %11299  ;;  %v7308_v23 = vadd.f32 %v7307_v38, %v7306_v60  ;;  %v7343_v16 = vrot.slane %v7342_v27, 2  ;;  %v7419_v24 = vadd.f32 %v5933_v17, %v5917_v14  ;;  %v5934_v48 = vmul.f32 %v11298_v53, %v15939_v37 }
 0x402   : > { %v11302_v13 = vpop.eup %11301  ;;  %v7272_v34 = vadd.f32 %v7271_v25, %v7270_v40  ;;  %v16150_v56 = vadd.f32 %v5932_v43, %v5916_v2  ;;  %v5947_v36 = vmul.f32 %v11300_v4, %v15945_v41  ;;  %11315 = vpow2.f32 %v16046_v45  ;;  %v19433_v41 = vld [vmem:[#allocation26_spill] sm:$0xff]  ;;  %v16163_v45 = vpop.f32.mrb[170].mxu1  ;;  %v19434_v4 = vld [vmem:[#allocation27_spill] sm:$0xff] }
 0x403   : > { %v11304_v50 = vpop.eup %11303  ;;  %v7309_v22 = vrot.slane %v7308_v23, 1  ;;  %v7344_v12 = vadd.f32 %v7343_v16, %v7342_v27  ;;  %v16154_v26 = vadd.f32 %v5934_v48, %v5918_v18  ;;  %v4460_v60 = vadd.f32 1.0, %v11302_v13 }
 0x404   : > { %v7273_v9 = vrot.slane %v7272_v34, 1  ;;  %v16156_v14 = vadd.f32 %v7347_v8, %v5947_v36  ;;  %v4462_v37 = vadd.f32 1.0, %v11304_v50  ;;  %11317 = vpow2.f32 %v16049_v19 }
 0x405   : > { %v11306_v38 = vpop.eup %11305  ;;  %v7310_v40 = vadd.f32 %v7309_v22, %v7308_v23  ;;  %v7345_v2 = vrot.slane %v7344_v12, 1  ;;  %11319 = vrcp.f32 %v4460_v60  ;;  %v16161_v17 = vadd.f32 %v19433_v41, %v15868_v54 }
 0x406   : > { %v11308_v27 = vpop.eup %11307  ;;  %v7274_v18 = vadd.f32 %v7273_v9, %v7272_v34  ;;  %11321 = vrcp.f32 %v4462_v37  ;;  %v4475_v53 = vadd.f32 1.0, %v11306_v38  ;;  %v16166_v8 = vmul.f32 -1.442695, %v16112_v59  ;;  %v19435_v34 = vld [vmem:[#allocation28_spill] sm:$0xff] }
 0x407   : > { %v11310_v25 = vpop.eup %11309  ;;  %v7346_v43 = vadd.f32 %v7345_v2, %v7344_v12  ;;  %v4477_v19 = vadd.f32 1.0, %v11308_v27  ;;  %11323 = vpow2.f32 %v16057_v7  ;;  %v16171_v23 = vadd.f32 %v19434_v4, %v15871_v55  ;;  %v19436_v12 = vld [vmem:[#allocation67_spill] sm:$0xff]  ;;  %v16181_v7 = vpop.f32.mrb[202].mxu0 }
 0x408   : > { %v11312_v16 = vpop.eup %11311  ;;  %v7653_v48 = vcombine.low %v7238_v3, %v7274_v18  ;;  %11325 = vrcp.f32 %v4475_v53  ;;  %v4476_v13 = vadd.f32 1.0, %v11310_v25  ;;  %v16175_v36 = vadd.f32 %v19435_v34, %v15874_v62  ;;  %19437 = vst [vmem:[#allocation25_spill] sm:$0xff] %v16181_v7  ;;  %v19438_v3 = vld [vmem:[#allocation38_spill] sm:$0xff]  ;;  %v19439_v2 = vld [vmem:[#allocation39_spill] sm:$0xff]  ;;  %v19440_v18 = vld [vmem:[#allocation69_spill] sm:$0xff]  ;;  %v16198_v25 = vpop.f32.mrb[171].mxu1 }
 0x409   : > { %v7654_v50 = vcombine.low %v7310_v40, %v7346_v43  ;;  %11327 = vrcp.f32 %v4477_v19  ;;  %v4478_v22 = vadd.f32 1.0, %v11312_v16  ;;  %v16179_v60 = vadd.f32 %v19436_v12, %v15837_v42  ;;  %19441 = vst [vmem:[#allocation8_spill] sm:$0xff] %v16198_v25  ;;  %v16200_v43 = vpop.f32.mrb[203].mxu0 }
 0x40a   : > { %v11314_v9 = vpop.eup %11313  ;;  %v7675_v37 = vrot.slane %v7653_v48, %v19424_v11  ;;  %11329 = vrcp.f32 %v4476_v13  ;;  %v16186_v38 = vadd.f32 %v19438_v3, %v15868_v54  ;;  %v16190_v41 = vadd.f32 %v19439_v2, %v15871_v55  ;;  %19442 = vst [vmem:[#allocation31_spill] sm:$0xff] %v16200_v43  ;;  %v19443_v2 = vld [vmem:[#allocation70_spill] sm:$0xff] }
 0x40b   : > { %v7682_v40 = vrot.slane %v7654_v50, %v19424_v11  ;;  %v5949_v27 = vmul.f32 %v11314_v9, %v15950_v35  ;;  %11331 = vrcp.f32 %v4478_v22  ;;  %v16196_v53 = vadd.f32 %v19440_v18, %v15874_v62 }
 0x40c   : > { %v11316_v19 = vpop.eup %11315  ;;  %11333 = vpow2.f32 %v16064_v21  ;;  %v9120_v4 = vmul.f32 -1.442695, %v16161_v17  ;;  %v9119_v16 = vmul.f32 -1.442695, %v16171_v23  ;;  %v16206_v48 = vmul.f32 -1.442695, %v16175_v36 }
 0x40d   : > { %v7684_v35 = vcombine.low %v7675_v37, %v7682_v40  ;;  %v7420_v13 = vadd.f32 %v7419_v24, %v5949_v27  ;;  %v4491_v34 = vadd.f32 1.0, %v11316_v19  ;;  %11335 = vpow2.f32 %v16079_v30  ;;  %v19444_v27 = vld [vmem:[#allocation40_spill] sm:$0xff]  ;;  %v16236_v19 = vld [vmem:[%s18836_s5 + $0x100] sm:$0xff] }
 0x40e   : > { %v11318_v50 = vpop.eup %11317  ;;  %11337 = vpow2.f32 %v16092_v20  ;;  %v16211_v22 = vmul.f32 -1.442695, %v16179_v60  ;;  %v16214_v21 = vmul.f32 -1.442695, %v16186_v38  ;;  %v16217_v12 = vmul.f32 -1.442695, %v16190_v41 }
 0x40f   : > { %v11320_v9 = vpop.eup %11319  ;;  %v7698_v3 = vrot.slane %v7684_v35, %v19424_v11  ;;  %11339 = vrcp.f32 %v4491_v34  ;;  %v4493_v24 = vadd.f32 1.0, %v11318_v50  ;;  %v16221_v37 = vmul.f32 -1.442695, %v16196_v53  ;;  %v16265_v11 = vpop.f32.mrb[204].mxu0 }
 0x410   : > { %v11322_v30 = vpop.eup %11321  ;;  %v5948_v20 = vmul.f32 %v11320_v9, %v15959_v49  ;;  %11341 = vpow2.f32 %v16100_v44  ;;  %v16227_v40 = vadd.f32 %v19443_v2, %v15837_v42  ;;  %v16231_v18 = vadd.f32 %v19444_v27, %v15868_v54  ;;  %v19445_v44 = vld [vmem:[#allocation42_spill] sm:$0xff]  ;;  %v7795_v9 = vld [vmem:[%s18836_s5 + $0x108] sm:$0xff]  ;;  %v16250_v2 = vld [vmem:[%s18836_s5 + $0x190] sm:$0xff]  ;;  %19447 = vst [vmem:[#allocation41_spill] sm:$0xff] %v16265_v11 }
 0x411   : > { %v11324_v35 = vpop.eup %11323  ;;  %v7699_v34 = vcombine.low %v16089_v33, %v7698_v3  ;;  %v5950_v49 = vmul.f32 %v11322_v30, %v15968_v29  ;;  %11343 = vrcp.f32 %v4493_v24  ;;  %v16242_v50 = vadd.f32 %v19445_v44, %v15871_v55  ;;  %v16255_v33 = vld [vmem:[%s18836_s5 + $0x198] sm:$0xff]  ;;  %v19446_v30 = vld [vmem:[#allocation43_spill] sm:$0xff]  ;;  %v16263_v44 = vpop.f32.mrb[172].mxu1 }
 0x412   : > { %v11326_v29 = vpop.eup %11325  ;;  %v7384_v3 = vadd.f32 %v16150_v56, %v5948_v20  ;;  %v4492_v24 = vadd.f32 1.0, %v11324_v35  ;;  %11345 = vpow2.f32 %v16108_v61  ;;  %v16261_v27 = vadd.f32 %v19446_v30, %v15874_v62  ;;  %v16272_v56 = vpop.f32.mrb[173].mxu1 }
 0x413   : > { %v11328_v39 = vpop.eup %11327  ;;  %v16267_v43 = vmul.f32 0.004115226, %v7699_v34  ;;  %v7456_v25 = vadd.f32 %v16154_v26, %v5950_v49  ;;  %v5963_v7 = vmul.f32 %v11326_v29, %v15995_v52  ;;  %11347 = vpow2.f32 %v16166_v8  ;;  %19448 = vst [vmem:[#allocation9_spill] sm:$0xff] %v16272_v56  ;;  %v16274_v61 = vpop.f32.mrb[205].mxu0 }
 0x414   : > { %19449 = vst [vmem:[#allocation26_spill] sm:$0xff] %v16274_v61  ;;  %v11330_v20 = vpop.eup %11329  ;;  %v5965_v35 = vmul.f32 %v11328_v39, %v16003_v51  ;;  %11349 = vrcp.f32 %v4492_v24  ;;  %v9880_v30 = vpack.c.bf16 %v7795_v9, %v16236_v19  ;;  %v9882_v34 = vpack.c.bf16 %v16255_v33, %v16250_v2  ;;  %v16280_v11 = vpop.f32.mrb[174].mxu1  ;;  %v19452_v9 = vld [vmem:[#allocation60_spill] sm:$0xff] }
 0x415   : > { %19450 = vst [vmem:[#allocation27_spill] sm:$0xff] %v16280_v11  ;;  %v16282_v26 = vpop.f32.mrb[206].mxu0  ;;  %v11332_v52 = vpop.eup %11331  ;;  %v7349_v8 = vadd.f32 %v16156_v14, %v5963_v7  ;;  %v5964_v49 = vmul.f32 %v11330_v20, %v16009_v15  ;;  %11351 = vpow2.f32 %v9120_v4  ;;  %v8028_v29 = vrot.slane %v16267_v43, %v19383_v1  ;;  %v7797_v7 = vld [vmem:[%s18836_s5 + $0x118] sm:$0xff]  ;;  %v7814_v20 = vld [vmem:[%s18836_s5 + $0x1a0] sm:$0xff] }
 0x416   : > { %19451 = vst [vmem:[#allocation28_spill] sm:$0xff] %v16282_v26  ;;  %v11334_v51 = vpop.eup %11333  ;;  %v7421_v39 = vadd.f32 %v7420_v13, %v5965_v35  ;;  %v5966_v19 = vmul.f32 %v11332_v52, %v16015_v28  ;;  %11353 = vpow2.f32 %v9119_v16  ;;  %v8044_v2 = vrot.slane %v16267_v43, %v19452_v9  ;;  %v16291_v33 = vpop.f32.mrb[175].mxu1  ;;  %v7796_v28 = vld [vmem:[%s18836_s5 + $0x110] sm:$0xff]  ;;  %v7815_v35 = vld [vmem:[%s18836_s5 + $0x1a8] sm:$0xff] }
 0x417   : > { %19453 = vst [vmem:[#allocation67_spill] sm:$0xff] %v16291_v33  ;;  %v11336_v24 = vpop.eup %11335  ;;  %v16293_v26 = vadd.f32 %v7384_v3, %v5964_v49  ;;  %v4494_v14 = vadd.f32 1.0, %v11334_v51  ;;  %11355 = vpow2.f32 %v16206_v48  ;;  %8165 = vmatprep.mubr.f32.mxu1 %v8028_v29  ;;  %v8024_v15 = vrot.slane %v16267_v43, %v19375_v0  ;;  %v19454_v48 = vld [vmem:[#allocation6_spill] sm:$0xff]  ;;  %v16320_v29 = vpop.f32.mrb[207].mxu0  ;;  %v19459_v9 = vld [vmem:[#allocation24_spill] sm:$0xff] }
 0x418   : > { %v11338_v4 = vpop.eup %11337  ;;  %v16304_v16 = vadd.f32 %v7456_v25, %v5966_v19  ;;  %v4507_v13 = vadd.f32 1.0, %v11336_v24  ;;  %11357 = vpow2.f32 %v16211_v22  ;;  %8305 = vmatprep.mubr.f32.mxu0 %v8044_v2  ;;  %v8040_v3 = vrot.slane %v16267_v43, %v19454_v48  ;;  %19455 = vst [vmem:[#allocation38_spill] sm:$0xff] %v16320_v29 }
 0x419   : > { %v11340_v52 = vpop.eup %11339  ;;  %11359 = vrcp.f32 %v4494_v14  ;;  %v4509_v49 = vadd.f32 1.0, %v11338_v4  ;;  %v16316_v25 = vmul.f32 -1.442695, %v16227_v40  ;;  %8166 = vmatmul.mubr.f32.vlgmr.msra.gmra.mrb[0].mxu1 %v8024_v15  ;;  %v8036_v22 = vrot.slane %v16267_v43, %v19384_v47 }
 0x41a   : > { %v11342_v51 = vpop.eup %11341  ;;  %v5979_v19 = vmul.f32 %v11340_v52, %v16019_v46  ;;  %11361 = vrcp.f32 %v4507_v13  ;;  %v16324_v2 = vmul.f32 -1.442695, %v16231_v18  ;;  %9881 = vmatpush3.bf16.msra.mxu1 %v9880_v30  ;;  %8306 = vmatmul.mubr.f32.vlgmr.msra.gmra.mrb[32].mxu0 %v8040_v3  ;;  %v9884_v24 = vpack.c.bf16 %v7797_v7, %v7796_v28  ;;  %v7798_v46 = vld [vmem:[%s18836_s5 + $0x120] sm:$0xff]  ;;  %v7799_v13 = vld [vmem:[%s18836_s5 + $0x128] sm:$0xff] }
 0x41b   : > { %v11344_v14 = vpop.eup %11343  ;;  %11363 = vrcp.f32 %v4509_v49  ;;  %v4508_v4 = vadd.f32 1.0, %v11342_v51  ;;  %v16327_v15 = vmul.f32 -1.442695, %v16242_v50  ;;  %8235 = vmatprep.mubr.f32.mxu1 %v8036_v22  ;;  %9883 = vmatprep.subr.bf16.mxu1 %v9882_v34  ;;  %v9886_v0 = vpack.c.bf16 %v7815_v35, %v7814_v20  ;;  %v19456_v28 = vld [vmem:[#allocation3_spill] sm:$0xff]  ;;  %v7816_v34 = vld [vmem:[%s18836_s5 + $0x1b0] sm:$0xff]  ;;  %v7817_v20 = vld [vmem:[%s18836_s5 + $0x1b8] sm:$0xff] }
 0x41c   : > { %v11346_v30 = vpop.eup %11345  ;;  %v16335_v3 = vadd.f32 %v7349_v8, %v5979_v19  ;;  %v5981_v7 = vmul.f32 %v11344_v14, %v19456_v28  ;;  %11365 = vpow2.f32 %v16214_v21  ;;  %v16340_v52 = vmul.f32 -1.442695, %v16261_v27  ;;  %v19457_v8 = vld [vmem:[#allocation12_spill] sm:$0xff]  ;;  %v19458_v21 = vld [vmem:[#allocation11_spill] sm:$0xff] }
 0x41d   : > { %v11348_v35 = vpop.eup %11347  ;;  %11367 = vrcp.f32 %v4508_v4  ;;  %v4510_v49 = vadd.f32 1.0, %v11346_v30  ;;  %v16350_v22 = vadd.f32 %v19457_v8, %v15837_v42  ;;  %v16354_v51 = vadd.f32 %v19458_v21, %v15868_v54  ;;  %v19460_v30 = vld [vmem:[#allocation44_spill] sm:$0xff] }
 0x41e   : > { %v11350_v19 = vpop.eup %11349  ;;  %v16356_v14 = vadd.f32 %v7421_v39, %v5981_v7  ;;  %v4523_v28 = vadd.f32 1.0, %v11348_v35  ;;  %11369 = vpow2.f32 %v16217_v12  ;;  %9885 = vmatpush3.bf16.msra.mxu1 %v9884_v24  ;;  %v9888_v47 = vpack.c.bf16 %v7799_v13, %v7798_v46  ;;  %v7800_v39 = vld [vmem:[%s18836_s5 + $0x130] sm:$0xff]  ;;  %v7801_v12 = vld [vmem:[%s18836_s5 + $0x138] sm:$0xff]  ;;  %v7819_v7 = vld [vmem:[%s18836_s5 + $0x1c8] sm:$0xff] }
 0x41f   : > { %v11352_v1 = vpop.eup %11351  ;;  %v5980_v4 = vmul.f32 %v11350_v19, %v19459_v9  ;;  %11371 = vrcp.f32 %v4510_v49  ;;  %v16362_v8 = vadd.f32 %v19460_v30, %v15871_v55  ;;  %9887 = vmatprep.subr.bf16.mxu1 %v9886_v0  ;;  %v9890_v48 = vpack.c.bf16 %v7817_v20, %v7816_v34  ;;  %v19461_v9 = vld [vmem:[#allocation45_spill] sm:$0xff]  ;;  %v7818_v0 = vld [vmem:[%s18836_s5 + $0x1c0] sm:$0xff]  ;;  %v16380_v34 = vpop.f32.mrb[176].mxu1 }
 0x420   : > { %v11354_v24 = vpop.eup %11353  ;;  %11373 = vrcp.f32 %v4523_v28  ;;  %v4525_v46 = vadd.f32 1.0, %v11352_v1  ;;  %v16372_v13 = vadd.f32 %v19461_v9, %v15874_v62  ;;  %19462 = vst [vmem:[#allocation39_spill] sm:$0xff] %v16380_v34  ;;  %v16382_v20 = vpop.f32.mrb[208].mxu0  ;;  %v16387_v21 = vmul.f32 -1.442695, %v16350_v22 }
 0x421   : > { %19463 = vst [vmem:[#allocation69_spill] sm:$0xff] %v16382_v20  ;;  %v11356_v35 = vpop.eup %11355  ;;  %v7386_v49 = vadd.f32 %v16293_v26, %v5980_v4  ;;  %v4524_v1 = vadd.f32 1.0, %v11354_v24  ;;  %11375 = vpow2.f32 %v16221_v37  ;;  %v16390_v30 = vmul.f32 -1.442695, %v16354_v51  ;;  %v7802_v37 = vld [vmem:[%s18836_s5 + $0x140] sm:$0xff]  ;;  %v7803_v4 = vld [vmem:[%s18836_s5 + $0x148] sm:$0xff] }
 0x422   : > { %v11358_v19 = vpop.eup %11357  ;;  %11377 = vrcp.f32 %v4525_v46  ;;  %v4526_v28 = vadd.f32 1.0, %v11356_v35  ;;  %9889 = vmatpush3.bf16.msra.mxu1 %v9888_v47  ;;  %v9892_v9 = vpack.c.bf16 %v7801_v12, %v7800_v39  ;;  %v16393_v29 = vmul.f32 -1.442695, %v16362_v8  ;;  %v19464_v46 = vld [vmem:[#allocation74_spill] sm:$0xff] }
 0x423   : > { %v11360_v34 = vpop.eup %11359  ;;  %11379 = vrcp.f32 %v4524_v1  ;;  %v4539_v20 = vadd.f32 1.0, %v11358_v19  ;;  %9891 = vmatprep.subr.bf16.mxu1 %v9890_v48  ;;  %v9894_v26 = vpack.c.bf16 %v7819_v7, %v7818_v0  ;;  %v16403_v39 = vmul.f32 -1.442695, %v16372_v13  ;;  %v7820_v48 = vld [vmem:[%s18836_s5 + $0x1d0] sm:$0xff]  ;;  %v7821_v12 = vld [vmem:[%s18836_s5 + $0x1d8] sm:$0xff]  ;;  %v16411_v0 = vpop.f32.mrb[177].mxu1 }
 0x424   : > { %v11362_v24 = vpop.eup %11361  ;;  %v5982_v47 = vmul.f32 %v11360_v34, %v19464_v46  ;;  %11381 = vrcp.f32 %v4526_v28  ;;  %19465 = vst [vmem:[#allocation70_spill] sm:$0xff] %v16411_v0  ;;  %v16413_v7 = vpop.f32.mrb[209].mxu0  ;;  %v19467_v1 = vld [vmem:[#allocation75_spill] sm:$0xff]  ;;  %v19468_v34 = vld [vmem:[#allocation14_spill] sm:$0xff]  ;;  %v19469_v46 = vld [vmem:[#allocation13_spill] sm:$0xff] }
 0x425   : > { %19466 = vst [vmem:[#allocation40_spill] sm:$0xff] %v16413_v7  ;;  %v11364_v35 = vpop.eup %11363  ;;  %v5995_v19 = vmul.f32 %v11362_v24, %v19467_v1  ;;  %11383 = vrcp.f32 %v4539_v20  ;;  %v16418_v28 = vadd.f32 %v19468_v34, %v15837_v42  ;;  %v16422_v33 = vadd.f32 %v19469_v46, %v15868_v54  ;;  %v16427_v0 = vpop.f32.mrb[178].mxu1 }
 0x426   : > { %v11366_v11 = vpop.eup %11365  ;;  %v7458_v61 = vadd.f32 %v16304_v16, %v5982_v47  ;;  %v5997_v56 = vmul.f32 %v11364_v35, %v16061_v63  ;;  %11385 = vpow2.f32 %v16316_v25  ;;  %9893 = vmatpush3.bf16.msra.mxu1 %v9892_v9  ;;  %v9896_v7 = vpack.c.bf16 %v7803_v4, %v7802_v37  ;;  %v7804_v16 = vld [vmem:[%s18836_s5 + $0x150] sm:$0xff]  ;;  %v7805_v63 = vld [vmem:[%s18836_s5 + $0x158] sm:$0xff]  ;;  %v16437_v25 = vpop.f32.mrb[210].mxu0  ;;  %v7823_v4 = vld [vmem:[%s18836_s5 + $0x1e8] sm:$0xff] }
 0x427   : > { %v11368_v20 = vpop.eup %11367  ;;  %v7351_v24 = vadd.f32 %v16335_v3, %v5995_v19  ;;  %v4541_v1 = vadd.f32 1.0, %v11366_v11  ;;  %11387 = vpow2.f32 %v16324_v2  ;;  %9895 = vmatprep.subr.bf16.mxu1 %v9894_v26  ;;  %v9898_v34 = vpack.c.bf16 %v7821_v12, %v7820_v48  ;;  %v19470_v11 = vld [vmem:[#allocation68_spill] sm:$0xff]  ;;  %v7822_v26 = vld [vmem:[%s18836_s5 + $0x1e0] sm:$0xff]  ;;  %v16459_v46 = vpop.f32.mrb[179].mxu1 }
 0x428   : > { %v11370_v9 = vpop.eup %11369  ;;  %v7423_v37 = vadd.f32 %v16356_v14, %v5997_v56  ;;  %v5996_v3 = vmul.f32 %v11368_v20, %v16068_v6  ;;  %11389 = vpow2.f32 %v16327_v15  ;;  %v16444_v2 = vadd.f32 %v19470_v11, %v15871_v55  ;;  %v19471_v6 = vld [vmem:[#allocation10_spill] sm:$0xff]  ;;  %v16461_v20 = vpop.f32.mrb[211].mxu0 }
 0x429   : > { %v11372_v47 = vpop.eup %11371  ;;  %11391 = vrcp.f32 %v4541_v1  ;;  %v4540_v48 = vadd.f32 1.0, %v11370_v9  ;;  %v9182_v56 = vmul.f32 -1.442695, %v16418_v28  ;;  %v16455_v15 = vadd.f32 %v19471_v6, %v15874_v62  ;;  %19472 = vst [vmem:[#allocation42_spill] sm:$0xff] %v16461_v20 }
 0x42a   : > { %v11374_v14 = vpop.eup %11373  ;;  %v7387_v12 = vadd.f32 %v7386_v49, %v5996_v3  ;;  %v5998_v35 = vmul.f32 %v11372_v47, %v16075_v57  ;;  %11393 = vpow2.f32 %v16340_v52  ;;  %9897 = vmatpush3.bf16.msra.mxu1 %v9896_v7  ;;  %v9900_v19 = vpack.c.bf16 %v7805_v63, %v7804_v16  ;;  %v7806_v57 = vld [vmem:[%s18836_s5 + $0x160] sm:$0xff]  ;;  %v7807_v52 = vld [vmem:[%s18836_s5 + $0x168] sm:$0xff]  ;;  %v7825_v63 = vld [vmem:[%s18836_s5 + $0x1f8] sm:$0xff] }
 0x42b   : > { %v11376_v1 = vpop.eup %11375  ;;  %v6011_v9 = vmul.f32 %v11374_v14, %v16112_v59  ;;  %11395 = vrcp.f32 %v4540_v48  ;;  %v9184_v11 = vmul.f32 -1.442695, %v16422_v33  ;;  %9899 = vmatprep.subr.bf16.mxu1 %v9898_v34  ;;  %v9902_v6 = vpack.c.bf16 %v7823_v4, %v7822_v26  ;;  %v7824_v34 = vld [vmem:[%s18836_s5 + $0x1f0] sm:$0xff] }
 0x42c   : > { %v11378_v49 = vpop.eup %11377  ;;  %v7459_v7 = vadd.f32 %v7458_v61, %v5998_v35  ;;  %v4542_v16 = vadd.f32 1.0, %v11376_v1  ;;  %11397 = vpow2.f32 %v16387_v21  ;;  %v16473_v59 = vmul.f32 -1.442695, %v16444_v2  ;;  %v19473_v61 = vld [vmem:[#allocation46_spill] sm:$0xff] }
 0x42d   : > { %v11380_v3 = vpop.eup %11379  ;;  %v7352_v26 = vadd.f32 %v7351_v24, %v6011_v9  ;;  %v6013_v4 = vmul.f32 %v11378_v49, %v16161_v17  ;;  %11399 = vpow2.f32 %v16390_v30  ;;  %v16485_v21 = vadd.f32 %v19473_v61, %v15837_v42  ;;  %v7808_v30 = vld [vmem:[%s18836_s5 + $0x170] sm:$0xff] }
 0x42e   : > { %v11382_v47 = vpop.eup %11381  ;;  %v6012_v48 = vmul.f32 %v11380_v3, %v16171_v23  ;;  %11401 = vrcp.f32 %v4542_v16  ;;  %v16489_v14 = vmul.f32 -1.442695, %v16455_v15  ;;  %9901 = vmatpush3.bf16.msra.mxu1 %v9900_v19  ;;  %v9904_v35 = vpack.c.bf16 %v7807_v52, %v7806_v57  ;;  %v7809_v23 = vld [vmem:[%s18836_s5 + $0x178] sm:$0xff]  ;;  %v16517_v16 = vpop.f32.mrb[180].mxu1 }
 0x42f   : > { %v11384_v1 = vpop.eup %11383  ;;  %v7424_v20 = vadd.f32 %v7423_v37, %v6013_v4  ;;  %v6014_v24 = vmul.f32 %v11382_v47, %v16175_v36  ;;  %11403 = vpow2.f32 %v16393_v29  ;;  %9903 = vmatprep.subr.bf16.mxu1 %v9902_v6  ;;  %v9906_v17 = vpack.c.bf16 %v7825_v63, %v7824_v34  ;;  %v19474_v36 = vld [vmem:[#allocation16_spill] sm:$0xff]  ;;  %v7874_v29 = vld [vmem:[%s18836_s5 + $0x380] sm:$0xff]  ;;  %v16519_v34 = vpop.f32.mrb[212].mxu0 }
 0x430   : > { %v11386_v9 = vpop.eup %11385  ;;  %v7388_v49 = vadd.f32 %v7387_v12, %v6012_v48  ;;  %v6027_v19 = vmul.f32 %v11384_v1, %v16179_v60  ;;  %11405 = vpow2.f32 %v16403_v39  ;;  %v16503_v37 = vadd.f32 %v19474_v36, %v15868_v54  ;;  %v7875_v6 = vld [vmem:[%s18836_s5 + $0x388] sm:$0xff]  ;;  %v19475_v60 = vld [vmem:[#allocation47_spill] sm:$0xff]  ;;  %19476 = vst [vmem:[#allocation43_spill] sm:$0xff] %v16519_v34  ;;  %v16523_v47 = vpop.f32.mrb[181].mxu1 }
 0x431   : > { %v11388_v57 = vpop.eup %11387  ;;  %v16511_v52 = vadd.f32 %v7459_v7, %v6014_v24  ;;  %v4555_v12 = vadd.f32 1.0, %v11386_v9  ;;  %11407 = vpow2.f32 %v9182_v56  ;;  %v16515_v39 = vadd.f32 %v19475_v60, %v15871_v55  ;;  %19477 = vst [vmem:[#allocation3_spill] sm:$0xff] %v16523_v47  ;;  %v16525_v7 = vpop.f32.mrb[213].mxu0  ;;  %v7877_v9 = vld [vmem:[%s18836_s5 + $0x398] sm:$0xff] }
 0x432   : > { %v11390_v63 = vpop.eup %11389  ;;  %v16521_v3 = vadd.f32 %v7352_v26, %v6027_v19  ;;  %v4557_v4 = vadd.f32 1.0, %v11388_v57  ;;  %11409 = vpow2.f32 %v9184_v11  ;;  %9905 = vmatpush3.bf16.msra.mxu1 %v9904_v35  ;;  %v9908_v61 = vpack.c.bf16 %v7809_v23, %v7808_v30  ;;  %19478 = vst [vmem:[#allocation12_spill] sm:$0xff] %v16525_v7  ;;  %v7858_v26 = vld [vmem:[%s18836_s5 + $0x300] sm:$0xff]  ;;  %v7859_v11 = vld [vmem:[%s18836_s5 + $0x308] sm:$0xff]  ;;  %v16544_v19 = vpop.f32.mrb[182].mxu1 }
 0x433   : > { %v11392_v56 = vpop.eup %11391  ;;  %11411 = vrcp.f32 %v4555_v12  ;;  %v4556_v48 = vadd.f32 1.0, %v11390_v63  ;;  %v9198_v1 = vmul.f32 -1.442695, %v16485_v21  ;;  %9907 = vmatprep.subr.bf16.mxu1 %v9906_v17  ;;  %v9942_v24 = vpack.c.bf16 %v7875_v6, %v7874_v29  ;;  %v7876_v17 = vld [vmem:[%s18836_s5 + $0x390] sm:$0xff]  ;;  %19479 = vst [vmem:[#allocation11_spill] sm:$0xff] %v16544_v19  ;;  %v16553_v12 = vpop.f32.mrb[214].mxu0 }
 0x434   : > { %v11394_v35 = vpop.eup %11393  ;;  %v6029_v30 = vmul.f32 %v11392_v56, %v16186_v38  ;;  %11413 = vrcp.f32 %v4557_v4  ;;  %v16536_v23 = vmul.f32 -1.442695, %v16503_v37  ;;  %v16547_v6 = vmul.f32 -1.442695, %v16515_v39  ;;  %v19480_v38 = vld [vmem:[#allocation48_spill] sm:$0xff]  ;;  %19481 = vst [vmem:[#allocation24_spill] sm:$0xff] %v16553_v12 }
 0x435   : > { %v11396_v36 = vpop.eup %11395  ;;  %11415 = vrcp.f32 %v4556_v48  ;;  %v4558_v29 = vadd.f32 1.0, %v11394_v35  ;;  %v16551_v57 = vadd.f32 %v19480_v38, %v15874_v62  ;;  %v9944_v56 = vpack.c.bf16 %v7859_v11, %v7858_v26  ;;  %v19482_v19 = vld [vmem:[#allocation21_spill] sm:$0xff] }
 0x436   : > { %v11398_v60 = vpop.eup %11397  ;;  %v16555_v63 = vadd.f32 %v7424_v20, %v6029_v30  ;;  %v6028_v4 = vmul.f32 %v11396_v36, %v16190_v41  ;;  %11417 = vpow2.f32 %v16473_v59  ;;  %9909 = vmatpush3.bf16.msra.mxu1 %v9908_v61  ;;  %v8032_v7 = vrot.slane %v16267_v43, %v19482_v19  ;;  %v7860_v12 = vld [vmem:[%s18836_s5 + $0x310] sm:$0xff]  ;;  %v7861_v41 = vld [vmem:[%s18836_s5 + $0x318] sm:$0xff]  ;;  %v7879_v30 = vld [vmem:[%s18836_s5 + $0x3a8] sm:$0xff] }
 0x437   : > { %v11400_v48 = vpop.eup %11399  ;;  %11419 = vrcp.f32 %v4558_v29  ;;  %v4571_v35 = vadd.f32 1.0, %v11398_v60  ;;  %9943 = vmatprep.subr.bf16.mxu1 %v9942_v24  ;;  %v9946_v38 = vpack.c.bf16 %v7877_v9, %v7876_v17  ;;  %v19483_v26 = vld [vmem:[#allocation61_spill] sm:$0xff]  ;;  %v7878_v24 = vld [vmem:[%s18836_s5 + $0x3a0] sm:$0xff]  ;;  %v16587_v60 = vpop.f32.mrb[183].mxu1  ;;  %v19487_v19 = vld [vmem:[#allocation50_spill] sm:$0xff] }
 0x438   : > { %v11402_v20 = vpop.eup %11401  ;;  %v16567_v59 = vadd.f32 %v7388_v49, %v6028_v4  ;;  %v4573_v61 = vadd.f32 1.0, %v11400_v48  ;;  %11421 = vpow2.f32 %v16489_v14  ;;  %v8052_v11 = vrot.slane %v16267_v43, %v19483_v26  ;;  %v19484_v49 = vld [vmem:[#allocation29_spill] sm:$0xff]  ;;  %19486 = vst [vmem:[#allocation44_spill] sm:$0xff] %v16587_v60 }
 0x439   : > { %v11404_v17 = vpop.eup %11403  ;;  %v6030_v9 = vmul.f32 %v11402_v20, %v16196_v53  ;;  %11423 = vrcp.f32 %v4571_v35  ;;  %v16581_v36 = vadd.f32 %v19484_v49, %v15837_v42  ;;  %v19485_v14 = vld [vmem:[#allocation49_spill] sm:$0xff]  ;;  %8236 = vmatmul.mubr.f32.vlgmr.msra.gmra.mrb[2].mxu1 %v8032_v7  ;;  %v16591_v26 = vadd.f32 %v19487_v19, %v15871_v55  ;;  %v7862_v7 = vld [vmem:[%s18836_s5 + $0x320] sm:$0xff] }
 0x43a   : > { %v16585_v29 = vadd.f32 %v19485_v14, %v15868_v54  ;;  %v11406_v4 = vpop.eup %11405  ;;  %11425 = vrcp.f32 %v4573_v61  ;;  %v4572_v48 = vadd.f32 1.0, %v11404_v17  ;;  %9945 = vmatpush3.bf16.msra.mxu1 %v9944_v56  ;;  %8375 = vmatprep.mubr.f32.mxu1 %v8052_v11  ;;  %v9948_v53 = vpack.c.bf16 %v7861_v41, %v7860_v12  ;;  %v7863_v61 = vld [vmem:[%s18836_s5 + $0x328] sm:$0xff]  ;;  %v19488_v41 = vld [vmem:[#allocation51_spill] sm:$0xff] }
 0x43b   : > { %v11408_v35 = vpop.eup %11407  ;;  %v7461_v20 = vadd.f32 %v16511_v52, %v6030_v9  ;;  %v4574_v49 = vadd.f32 1.0, %v11406_v4  ;;  %11427 = vpow2.f32 %v9198_v1  ;;  %9947 = vmatprep.subr.bf16.mxu1 %v9946_v38  ;;  %v9950_v14 = vpack.c.bf16 %v7879_v30, %v7878_v24  ;;  %v7880_v1 = vld [vmem:[%s18836_s5 + $0x3b0] sm:$0xff]  ;;  %v7881_v38 = vld [vmem:[%s18836_s5 + $0x3b8] sm:$0xff]  ;;  %v16613_v9 = vpop.f32.mrb[215].mxu0 }
 0x43c   : > { %v11410_v19 = vpop.eup %11409  ;;  %11429 = vrcp.f32 %v4572_v48  ;;  %v4587_v56 = vadd.f32 1.0, %v11408_v35  ;;  %v9201_v12 = vmul.f32 -1.442695, %v16551_v57  ;;  %v16603_v52 = vadd.f32 %v19488_v41, %v15874_v62  ;;  %19489 = vst [vmem:[#allocation45_spill] sm:$0xff] %v16613_v9 }
 0x43d   : > { %v11412_v11 = vpop.eup %11411  ;;  %11431 = vrcp.f32 %v4574_v49  ;;  %v4589_v24 = vadd.f32 1.0, %v11410_v19  ;;  %v9214_v30 = vmul.f32 -1.442695, %v16581_v36  ;;  %v9216_v17 = vmul.f32 -1.442695, %v16585_v29  ;;  %v19490_v49 = vld [vmem:[#allocation52_spill] sm:$0xff] }
 0x43e   : > { %v11414_v4 = vpop.eup %11413  ;;  %v6043_v48 = vmul.f32 %v11412_v11, %v16227_v40  ;;  %11433 = vrcp.f32 %v4587_v56  ;;  %v16617_v35 = vmul.f32 -1.442695, %v16591_v26  ;;  %9949 = vmatpush3.bf16.msra.mxu1 %v9948_v53  ;;  %v9952_v41 = vpack.c.bf16 %v7863_v61, %v7862_v7  ;;  %v7864_v40 = vld [vmem:[%s18836_s5 + $0x330] sm:$0xff]  ;;  %v7865_v56 = vld [vmem:[%s18836_s5 + $0x338] sm:$0xff] }
 0x43f   : > { %v11416_v60 = vpop.eup %11415  ;;  %v6045_v47 = vmul.f32 %v11414_v4, %v16231_v18  ;;  %11435 = vrcp.f32 %v4589_v24  ;;  %v16622_v19 = vadd.f32 %v19490_v49, %v15837_v42  ;;  %9951 = vmatprep.subr.bf16.mxu1 %v9950_v14  ;;  %v9954_v34 = vpack.c.bf16 %v7881_v38, %v7880_v1  ;;  %v7882_v14 = vld [vmem:[%s18836_s5 + $0x3c0] sm:$0xff]  ;;  %v7883_v1 = vld [vmem:[%s18836_s5 + $0x3c8] sm:$0xff] }
 0x440   : > { %v11418_v53 = vpop.eup %11417  ;;  %v7354_v7 = vadd.f32 %v16521_v3, %v6043_v48  ;;  %v6044_v18 = vmul.f32 %v11416_v60, %v16242_v50  ;;  %11437 = vpow2.f32 %v16536_v23  ;;  %v16634_v61 = vmul.f32 -1.442695, %v16603_v52  ;;  %v19491_v50 = vld [vmem:[#allocation53_spill] sm:$0xff] }
 0x441   : > { %v11420_v38 = vpop.eup %11419  ;;  %v7426_v11 = vadd.f32 %v16555_v63, %v6045_v47  ;;  %v4588_v24 = vadd.f32 1.0, %v11418_v53  ;;  %11439 = vpow2.f32 %v16547_v6  ;;  %v16646_v3 = vadd.f32 %v19491_v50, %v15868_v54  ;;  %v7866_v6 = vld [vmem:[%s18836_s5 + $0x340] sm:$0xff]  ;;  %v7867_v63 = vld [vmem:[%s18836_s5 + $0x348] sm:$0xff]  ;;  %v16656_v53 = vpop.f32.mrb[184].mxu1 }
 0x442   : > { %v11422_v23 = vpop.eup %11421  ;;  %v7390_v60 = vadd.f32 %v16567_v59, %v6044_v18  ;;  %v6046_v4 = vmul.f32 %v11420_v38, %v16261_v27  ;;  %11441 = vpow2.f32 %v9201_v12  ;;  %9953 = vmatpush3.bf16.msra.mxu1 %v9952_v41  ;;  %v9956_v48 = vpack.c.bf16 %v7865_v56, %v7864_v40  ;;  %v16658_v59 = vpop.f32.mrb[216].mxu0  ;;  %v7884_v56 = vld [vmem:[%s18836_s5 + $0x3d0] sm:$0xff]  ;;  %v7885_v18 = vld [vmem:[%s18836_s5 + $0x3d8] sm:$0xff] }
 0x443   : > { %v11424_v49 = vpop.eup %11423  ;;  %11443 = vrcp.f32 %v4588_v24  ;;  %v4590_v9 = vadd.f32 1.0, %v11422_v23  ;;  %9955 = vmatprep.subr.bf16.mxu1 %v9954_v34  ;;  %v9958_v47 = vpack.c.bf16 %v7883_v1, %v7882_v14  ;;  %19492 = vst [vmem:[#allocation74_spill] sm:$0xff] %v16658_v59  ;;  %v19493_v34 = vld [vmem:[#allocation15_spill] sm:$0xff]  ;;  %v16671_v14 = vpop.f32.mrb[185].mxu1  ;;  %v9232_v38 = vmul.f32 -1.442695, %v16646_v3 }
 0x444   : > { %v11426_v27 = vpop.eup %11425  ;;  %v7462_v12 = vadd.f32 %v7461_v20, %v6046_v4  ;;  %v6059_v41 = vmul.f32 %v11424_v49, %v16350_v22  ;;  %11445 = vpow2.f32 %v9214_v30  ;;  %v16663_v40 = vadd.f32 %v19493_v34, %v15871_v55  ;;  %19494 = vst [vmem:[#allocation75_spill] sm:$0xff] %v16671_v14  ;;  %v16673_v1 = vpop.f32.mrb[217].mxu0 }
 0x445   : > { %19495 = vst [vmem:[#allocation14_spill] sm:$0xff] %v16673_v1  ;;  %v11428_v20 = vpop.eup %11427  ;;  %v6061_v22 = vmul.f32 %v11426_v27, %v16354_v51  ;;  %11447 = vrcp.f32 %v4590_v9  ;;  %v9230_v30 = vmul.f32 -1.442695, %v16622_v19  ;;  %v16678_v24 = vpop.f32.mrb[186].mxu1  ;;  %v9960_v49 = vpack.c.bf16 %v7867_v63, %v7866_v6  ;;  %v7868_v9 = vld [vmem:[%s18836_s5 + $0x350] sm:$0xff] }
 0x446   : > { %v11430_v50 = vpop.eup %11429  ;;  %v7355_v23 = vadd.f32 %v7354_v7, %v6059_v41  ;;  %v4603_v4 = vadd.f32 1.0, %v11428_v20  ;;  %11449 = vpow2.f32 %v9216_v17  ;;  %9957 = vmatpush3.bf16.msra.mxu1 %v9956_v48  ;;  %v16680_v34 = vpop.f32.mrb[218].mxu0  ;;  %v9962_v51 = vpack.c.bf16 %v7885_v18, %v7884_v56  ;;  %v7869_v17 = vld [vmem:[%s18836_s5 + $0x358] sm:$0xff]  ;;  %v19499_v18 = vld [vmem:[#allocation55_spill] sm:$0xff] }
 0x447   : > { %v11432_v14 = vpop.eup %11431  ;;  %v7427_v1 = vadd.f32 %v7426_v11, %v6061_v22  ;;  %v6060_v59 = vmul.f32 %v11430_v50, %v16362_v8  ;;  %11451 = vpow2.f32 %v16617_v35  ;;  %9959 = vmatprep.subr.bf16.mxu1 %v9958_v47  ;;  %v9231_v11 = vmul.f32 -1.442695, %v16663_v40  ;;  %v19496_v8 = vld [vmem:[#allocation54_spill] sm:$0xff]  ;;  %v7886_v35 = vld [vmem:[%s18836_s5 + $0x3e0] sm:$0xff]  ;;  %v7887_v47 = vld [vmem:[%s18836_s5 + $0x3e8] sm:$0xff]  ;;  %v16702_v63 = vpop.f32.mrb[187].mxu1 }
 0x448   : > { %v11434_v7 = vpop.eup %11433  ;;  %v6062_v48 = vmul.f32 %v11432_v14, %v16372_v13  ;;  %11453 = vrcp.f32 %v4603_v4  ;;  %v16694_v6 = vadd.f32 %v19496_v8, %v15874_v62  ;;  %19497 = vst [vmem:[#allocation13_spill] sm:$0xff] %v16702_v63  ;;  %v16704_v27 = vpop.f32.mrb[219].mxu0  ;;  %v16710_v14 = vadd.f32 %v19499_v18, %v15837_v42  ;;  %v7872_v18 = vld [vmem:[%s18836_s5 + $0x370] sm:$0xff] }
 0x449   : > { %19498 = vst [vmem:[#allocation68_spill] sm:$0xff] %v16704_v27  ;;  %v11436_v13 = vpop.eup %11435  ;;  %v7391_v41 = vadd.f32 %v7390_v60, %v6060_v59  ;;  %v6075_v56 = vmul.f32 %v11434_v7, %v16418_v28  ;;  %11455 = vpow2.f32 %v16634_v61  ;;  %v9964_v4 = vpack.c.bf16 %v7869_v17, %v7868_v9  ;;  %v7870_v61 = vld [vmem:[%s18836_s5 + $0x360] sm:$0xff]  ;;  %v7871_v60 = vld [vmem:[%s18836_s5 + $0x368] sm:$0xff] }
 0x44a   : > { %v11438_v20 = vpop.eup %11437  ;;  %v7463_v22 = vadd.f32 %v7462_v12, %v6062_v48  ;;  %v6077_v50 = vmul.f32 %v11436_v13, %v16422_v33  ;;  %11457 = vpow2.f32 %v9230_v30  ;;  %9961 = vmatpush3.bf16.msra.mxu1 %v9960_v49  ;;  %v9966_v28 = vpack.c.bf16 %v7887_v47, %v7886_v35  ;;  %v19500_v9 = vld [vmem:[#allocation56_spill] sm:$0xff]  ;;  %v16736_v35 = vpop.f32.mrb[188].mxu1 }
 0x44b   : > { %v11440_v8 = vpop.eup %11439  ;;  %v16713_v63 = vadd.f32 %v7355_v23, %v6075_v56  ;;  %v4605_v27 = vadd.f32 1.0, %v11438_v20  ;;  %11459 = vpow2.f32 %v9232_v38  ;;  %9963 = vmatprep.subr.bf16.mxu1 %v9962_v51  ;;  %v9233_v30 = vmul.f32 -1.442695, %v16694_v6  ;;  %v7888_v38 = vld [vmem:[%s18836_s5 + $0x3f0] sm:$0xff]  ;;  %v7889_v23 = vld [vmem:[%s18836_s5 + $0x3f8] sm:$0xff]  ;;  %v16738_v47 = vpop.f32.mrb[220].mxu0 }
 0x44c   : > { %v11442_v59 = vpop.eup %11441  ;;  %v16721_v33 = vadd.f32 %v7427_v1, %v6077_v50  ;;  %v4604_v12 = vadd.f32 1.0, %v11440_v8  ;;  %11461 = vpow2.f32 %v9231_v11  ;;  %v16732_v17 = vadd.f32 %v19500_v9, %v15868_v54  ;;  %v16747_v8 = vpop.f32.mrb[189].mxu1 }
 0x44d   : > { %v11444_v49 = vpop.eup %11443  ;;  %11463 = vrcp.f32 %v4605_v27  ;;  %v4606_v51 = vadd.f32 1.0, %v11442_v59  ;;  %v9246_v48 = vmul.f32 -1.442695, %v16710_v14  ;;  %v9968_v11 = vpack.c.bf16 %v7871_v60, %v7870_v61  ;;  %v19501_v59 = vld [vmem:[#allocation71_spill] sm:$0xff] }
 0x44e   : > { %v11446_v1 = vpop.eup %11445  ;;  %v6076_v7 = vmul.f32 %v11444_v49, %v16444_v2  ;;  %11465 = vrcp.f32 %v4604_v12  ;;  %9965 = vmatpush3.bf16.msra.mxu1 %v9964_v4  ;;  %v9970_v56 = vpack.c.bf16 %v7889_v23, %v7888_v38  ;;  %v7873_v2 = vld [vmem:[%s18836_s5 + $0x378] sm:$0xff]  ;;  %v16752_v12 = vadd.f32 %v19501_v59, %v15871_v55  ;;  %v2355_v38 = vpop.f32.mrb[190].mxu1 }
 0x44f   : > { %v11448_v13 = vpop.eup %11447  ;;  %11467 = vrcp.f32 %v4606_v51  ;;  %v4619_v27 = vadd.f32 1.0, %v11446_v1  ;;  %9967 = vmatprep.subr.bf16.mxu1 %v9966_v28  ;;  %v9248_v28 = vmul.f32 -1.442695, %v16732_v17 }
 0x450   : > { %v11450_v20 = vpop.eup %11449  ;;  %v7392_v50 = vadd.f32 %v7391_v41, %v6076_v7  ;;  %v6078_v4 = vmul.f32 %v11448_v13, %v16455_v15  ;;  %11469 = vpow2.f32 %v9233_v30  ;;  %v9972_v41 = vpack.c.bf16 %v7873_v2, %v7872_v18  ;;  %v16754_v15 = vpop.f32.mrb[221].mxu0  ;;  %v19502_v7 = vld [vmem:[#allocation17_spill] sm:$0xff] }
 0x451   : > { %v11452_v61 = vpop.eup %11451  ;;  %11471 = vrcp.f32 %v4619_v27  ;;  %v4621_v60 = vadd.f32 1.0, %v11450_v20  ;;  %v2356_v30 = vpop.f32.mrb[191].mxu1  ;;  %v16759_v13 = vadd.f32 %v19502_v7, %v15874_v62  ;;  %v9247_v38 = vmul.f32 -1.442695, %v16752_v12 }
 0x452   : > { %v11454_v23 = vpop.eup %11453  ;;  %v7464_v49 = vadd.f32 %v7463_v22, %v6078_v4  ;;  %v4620_v51 = vadd.f32 1.0, %v11452_v61  ;;  %11473 = vpow2.f32 %v9246_v48  ;;  %9969 = vmatpush3.bf16.msra.mxu1 %v9968_v11  ;;  %v2546_v27 = vpop.f32.mrb[222].mxu0  ;;  %v19503_v48 = vld [vmem:[#allocation72_spill] sm:$0xff] }
 0x453   : > { %v11456_v9 = vpop.eup %11455  ;;  %v6091_v1 = vmul.f32 %v11454_v23, %v16485_v21  ;;  %11475 = vrcp.f32 %v4621_v60  ;;  %9971 = vmatprep.subr.bf16.mxu1 %v9970_v56  ;;  %v16763_v11 = vadd.f32 %v19503_v48, %v15837_v42  ;;  %v2547_v18 = vpop.f32.mrb[223].mxu0  ;;  %v19504_v21 = vld [vmem:[#allocation18_spill] sm:$0xff]  ;;  %v19505_v23 = vld [vmem:[#allocation73_spill] sm:$0xff] }
 0x454   : > { %v11458_v20 = vpop.eup %11457  ;;  %11477 = vrcp.f32 %v4620_v51  ;;  %v4622_v22 = vadd.f32 1.0, %v11456_v9  ;;  %v16768_v60 = vadd.f32 %v19504_v21, %v15868_v54  ;;  %v16773_v51 = vadd.f32 %v19505_v23, %v15871_v55  ;;  %v19507_v18 = vld [vmem:[#allocation32_spill] sm:$0xff] }
 0x455   : > { %v11460_v2 = vpop.eup %11459  ;;  %v7357_v4 = vadd.f32 %v16713_v63, %v6091_v1  ;;  %v4635_v61 = vadd.f32 1.0, %v11458_v20  ;;  %11479 = vpow2.f32 %v9248_v28  ;;  %v9249_v63 = vmul.f32 -1.442695, %v16759_v13  ;;  %v19506_v28 = vld [vmem:[#allocation30_spill] sm:$0xff] }
 0x456   : > { %v11462_v59 = vpop.eup %11461  ;;  %11481 = vrcp.f32 %v4622_v22  ;;  %v4637_v56 = vadd.f32 1.0, %v11460_v2  ;;  %9973 = vmatpush3.bf16.msra.mxu1 %v9972_v41  ;;  %v8048_v1 = vrot.slane %v16267_v43, %v19506_v28  ;;  %v9262_v20 = vmul.f32 -1.442695, %v16763_v11 }
 0x457   : > { %v11464_v30 = vpop.eup %11463  ;;  %11483 = vrcp.f32 %v4635_v61  ;;  %v4636_v9 = vadd.f32 1.0, %v11462_v59  ;;  %v9264_v41 = vmul.f32 -1.442695, %v16768_v60  ;;  %v16784_v2 = vadd.f32 %v19507_v18, %v15874_v62 }
 0x458   : > { %v11466_v7 = vpop.eup %11465  ;;  %v6093_v27 = vmul.f32 %v11464_v30, %v16503_v37  ;;  %11485 = vrcp.f32 %v4637_v56  ;;  %v9263_v37 = vmul.f32 -1.442695, %v16773_v51 }
 0x459   : > { %v11468_v22 = vpop.eup %11467  ;;  %v6092_v48 = vmul.f32 %v11466_v7, %v16515_v39  ;;  %11487 = vrcp.f32 %v4636_v9  ;;  %8376 = vmatmul.mubr.f32.vlgmr.msra.gmra.mrb[4].mxu1 %v8048_v1  ;;  %v19508_v39 = vld [vmem:[#allocation33_spill] sm:$0xff] }
 0x45a   : > { %v11470_v61 = vpop.eup %11469  ;;  %v7429_v43 = vadd.f32 %v16721_v33, %v6093_v27  ;;  %v6094_v21 = vmul.f32 %v11468_v22, %v16551_v57  ;;  %11489 = vpow2.f32 %v9247_v38  ;;  %v16791_v30 = vadd.f32 %v19508_v39, %v15837_v42  ;;  %v19509_v33 = vld [vmem:[#allocation34_spill] sm:$0xff] }
 0x45b   : > { %v11472_v59 = vpop.eup %11471  ;;  %v7393_v56 = vadd.f32 %v7392_v50, %v6092_v48  ;;  %v4638_v23 = vadd.f32 1.0, %v11470_v61  ;;  %11491 = vpow2.f32 %v9249_v63  ;;  %v16796_v27 = vadd.f32 %v19509_v33, %v15868_v54  ;;  %v19510_v63 = vld [vmem:[#allocation35_spill] sm:$0xff]  ;;  %v16808_v61 = vpop.f32.mrb[192].mxu1 }
 0x45c   : > { %v11474_v9 = vpop.eup %11473  ;;  %v7465_v7 = vadd.f32 %v7464_v49, %v6094_v21  ;;  %v6107_v1 = vmul.f32 %v11472_v59, %v16581_v36  ;;  %11493 = vpow2.f32 %v9262_v20  ;;  %v9265_v50 = vmul.f32 -1.442695, %v16784_v2  ;;  %v19511_v36 = vld [vmem:[#allocation57_spill] sm:$0xff]  ;;  %v16810_v21 = vpop.f32.mrb[224].mxu0 }
 0x45d   : > { %v11476_v57 = vpop.eup %11475  ;;  %11495 = vrcp.f32 %v4638_v23  ;;  %v4651_v38 = vadd.f32 1.0, %v11474_v9  ;;  %v16801_v22 = vadd.f32 %v19510_v63, %v15871_v55  ;;  %v16806_v20 = vadd.f32 %v19511_v36, %v15874_v62  ;;  %19512 = vst [vmem:[#allocation10_spill] sm:$0xff] %v16810_v21  ;;  %v16814_v9 = vpop.f32.mrb[193].mxu1 }
 0x45e   : > { %v11478_v48 = vpop.eup %11477  ;;  %v7358_v18 = vadd.f32 %v7357_v4, %v6107_v1  ;;  %v6109_v49 = vmul.f32 %v11476_v57, %v16585_v29  ;;  %11497 = vpow2.f32 %v9264_v41  ;;  %v9278_v39 = vmul.f32 -1.442695, %v16791_v30  ;;  %19513 = vst [vmem:[#allocation46_spill] sm:$0xff] %v16814_v9  ;;  %v16816_v4 = vpop.f32.mrb[225].mxu0 }
 0x45f   : > { %v11480_v59 = vpop.eup %11479  ;;  %v6108_v23 = vmul.f32 %v11478_v48, %v16591_v26  ;;  %11499 = vrcp.f32 %v4651_v38  ;;  %19514 = vst [vmem:[#allocation16_spill] sm:$0xff] %v16816_v4  ;;  %v9280_v33 = vmul.f32 -1.442695, %v16796_v27  ;;  %v16819_v57 = vpop.f32.mrb[194].mxu1  ;;  %v9279_v38 = vmul.f32 -1.442695, %v16801_v22 }
 0x460   : > { %v11482_v29 = vpop.eup %11481  ;;  %v7430_v41 = vadd.f32 %v7429_v43, %v6109_v49  ;;  %v4653_v1 = vadd.f32 1.0, %v11480_v59  ;;  %11501 = vpow2.f32 %v9263_v37  ;;  %19515 = vst [vmem:[#allocation47_spill] sm:$0xff] %v16819_v57  ;;  %v16821_v63 = vpop.f32.mrb[226].mxu0  ;;  %v9281_v49 = vmul.f32 -1.442695, %v16806_v20  ;;  %v19519_v59 = vld [vmem:[#allocation4_spill] sm:$0xff] }
 0x461   : > { %19516 = vst [vmem:[#allocation48_spill] sm:$0xff] %v16821_v63  ;;  %v11484_v36 = vpop.eup %11483  ;;  %v7394_v21 = vadd.f32 %v7393_v56, %v6108_v23  ;;  %v6110_v26 = vmul.f32 %v11482_v29, %v16603_v52  ;;  %11503 = vpow2.f32 %v9265_v50  ;;  %v16825_v48 = vpop.f32.mrb[195].mxu1  ;;  %v16833_v63 = vadd.f32 %v19519_v59, %v15837_v42 }
 0x462   : > { %19517 = vst [vmem:[#allocation29_spill] sm:$0xff] %v16825_v48  ;;  %v16827_v4 = vpop.f32.mrb[227].mxu0  ;;  %v11486_v43 = vpop.eup %11485  ;;  %v6123_v37 = vmul.f32 %v11484_v36, %v16622_v19  ;;  %11505 = vrcp.f32 %v4653_v1 }
 0x463   : > { %19518 = vst [vmem:[#allocation49_spill] sm:$0xff] %v16827_v4  ;;  %v11488_v56 = vpop.eup %11487  ;;  %v7466_v23 = vadd.f32 %v7465_v7, %v6110_v26  ;;  %v6125_v52 = vmul.f32 %v11486_v43, %v16646_v3  ;;  %11507 = vpow2.f32 %v9278_v39  ;;  %v19520_v4 = vld [vmem:[#allocation58_spill] sm:$0xff]  ;;  %v9294_v3 = vmul.f32 -1.442695, %v16833_v63  ;;  %v16850_v26 = vpop.f32.mrb[228].mxu0 }
 0x464   : > { %v11490_v50 = vpop.eup %11489  ;;  %v7359_v29 = vadd.f32 %v7358_v18, %v6123_v37  ;;  %v6124_v48 = vmul.f32 %v11488_v56, %v16663_v40  ;;  %11509 = vpow2.f32 %v9280_v33  ;;  %v16839_v19 = vadd.f32 %v19520_v4, %v15868_v54  ;;  %v19521_v40 = vld [vmem:[#allocation59_spill] sm:$0xff]  ;;  %v16848_v4 = vpop.f32.mrb[196].mxu1  ;;  %19522 = vst [vmem:[#allocation50_spill] sm:$0xff] %v16850_v26 }
 0x465   : > { %v11492_v1 = vpop.eup %11491  ;;  %v7431_v36 = vadd.f32 %v7430_v41, %v6125_v52  ;;  %v4652_v57 = vadd.f32 1.0, %v11490_v50  ;;  %11511 = vpow2.f32 %v9279_v38  ;;  %v16846_v33 = vadd.f32 %v19521_v40, %v15871_v55  ;;  %v16857_v52 = vpop.f32.mrb[229].mxu0  ;;  %v19525_v40 = vld [vmem:[#allocation36_spill] sm:$0xff] }
 0x466   : > { %v11494_v59 = vpop.eup %11493  ;;  %v16841_v9 = vadd.f32 %v7394_v21, %v6124_v48  ;;  %v4654_v7 = vadd.f32 1.0, %v11492_v1  ;;  %11513 = vpow2.f32 %v9281_v49  ;;  %v9296_v21 = vmul.f32 -1.442695, %v16839_v19  ;;  %v16854_v48 = vpop.f32.mrb[197].mxu1  ;;  %19524 = vst [vmem:[#allocation52_spill] sm:$0xff] %v16857_v52 }
 0x467   : > { %v11496_v39 = vpop.eup %11495  ;;  %11515 = vrcp.f32 %v4652_v57  ;;  %v4667_v18 = vadd.f32 1.0, %v11494_v59  ;;  %19523 = vst [vmem:[#allocation51_spill] sm:$0xff] %v16854_v48 }
 0x468   : > { %v11498_v41 = vpop.eup %11497  ;;  %v6126_v38 = vmul.f32 %v11496_v39, %v16694_v6  ;;  %11517 = vrcp.f32 %v4654_v7  ;;  %v9295_v6 = vmul.f32 -1.442695, %v16846_v33 }
 0x469   : > { %v11500_v43 = vpop.eup %11499  ;;  %11519 = vrcp.f32 %v4667_v18  ;;  %v4669_v57 = vadd.f32 1.0, %v11498_v41  ;;  %v16862_v18 = vadd.f32 %v19525_v40, %v15874_v62 }
 0x46a   : > { %v11502_v37 = vpop.eup %11501  ;;  %v7467_v49 = vadd.f32 %v7466_v23, %v6126_v38  ;;  %v6139_v56 = vmul.f32 %v11500_v43, %v16710_v14  ;;  %11521 = vpow2.f32 %v9294_v3  ;;  %v19526_v14 = vld [vmem:[#allocation19_spill] sm:$0xff] }
 0x46b   : > { %v11504_v50 = vpop.eup %11503  ;;  %11523 = vrcp.f32 %v4669_v57  ;;  %v4668_v1 = vadd.f32 1.0, %v11502_v37  ;;  %v16867_v3 = vadd.f32 %v19526_v14, %v15837_v42  ;;  %v19527_v57 = vld [vmem:[#allocation5_spill] sm:$0xff] }
 0x46c   : > { %v11506_v59 = vpop.eup %11505  ;;  %v7360_v7 = vadd.f32 %v7359_v29, %v6139_v56  ;;  %v4670_v39 = vadd.f32 1.0, %v11504_v50  ;;  %11525 = vpow2.f32 %v9296_v21  ;;  %v16871_v29 = vadd.f32 %v19527_v57, %v15868_v54 }
 0x46d   : > { %v11508_v41 = vpop.eup %11507  ;;  %v6141_v23 = vmul.f32 %v11506_v59, %v16732_v17  ;;  %11527 = vrcp.f32 %v4668_v1  ;;  %v16875_v50 = vadd.f32 %v16094_v32, %v15871_v55  ;;  %v9297_v59 = vmul.f32 -1.442695, %v16862_v18 }
 0x46e   : > { %v11510_v38 = vpop.eup %11509  ;;  %11529 = vrcp.f32 %v4670_v39  ;;  %v4683_v43 = vadd.f32 1.0, %v11508_v41  ;;  %v19528_v39 = vld [vmem:[#allocation62_spill] sm:$0xff]  ;;  %v9312_v32 = vmul.f32 -1.442695, %v16871_v29 }
 0x46f   : > { %v11512_v21 = vpop.eup %11511  ;;  %v7432_v37 = vadd.f32 %v7431_v36, %v6141_v23  ;;  %v4685_v56 = vadd.f32 1.0, %v11510_v38  ;;  %11531 = vpow2.f32 %v9295_v6  ;;  %v16880_v40 = vadd.f32 %v19528_v39, %v15874_v62  ;;  %v16885_v38 = vpop.f32.mrb[198].mxu1  ;;  %v19530_v39 = vld [vmem:[#allocation63_spill] sm:$0xff] }
 0x470   : > { %v11514_v17 = vpop.eup %11513  ;;  %11533 = vrcp.f32 %v4683_v43  ;;  %v4684_v1 = vadd.f32 1.0, %v11512_v21  ;;  %v9310_v36 = vmul.f32 -1.442695, %v16867_v3  ;;  %19529 = vst [vmem:[#allocation53_spill] sm:$0xff] %v16885_v38  ;;  %v9311_v21 = vmul.f32 -1.442695, %v16875_v50 }
 0x471   : > { %v11516_v41 = vpop.eup %11515  ;;  %11535 = vrcp.f32 %v4685_v56  ;;  %v4686_v14 = vadd.f32 1.0, %v11514_v17  ;;  %v16891_v56 = vadd.f32 %v19530_v39, %v15837_v42  ;;  %v16893_v17 = vpop.f32.mrb[230].mxu0 }
 0x472   : > { %v11518_v23 = vpop.eup %11517  ;;  %v6140_v6 = vmul.f32 %v11516_v41, %v16752_v12  ;;  %11537 = vrcp.f32 %v4684_v1  ;;  %19531 = vst [vmem:[#allocation15_spill] sm:$0xff] %v16893_v17  ;;  %v9313_v41 = vmul.f32 -1.442695, %v16880_v40 }
 0x473   : > { %v11520_v43 = vpop.eup %11519  ;;  %v6142_v57 = vmul.f32 %v11518_v23, %v16759_v13  ;;  %11539 = vrcp.f32 %v4686_v14  ;;  %v19532_v14 = vld [vmem:[#allocation64_spill] sm:$0xff] }
 0x474   : > { %v11522_v52 = vpop.eup %11521  ;;  %v7396_v12 = vadd.f32 %v16841_v9, %v6140_v6  ;;  %v6155_v1 = vmul.f32 %v11520_v43, %v16763_v11  ;;  %11541 = vpow2.f32 %v9297_v59  ;;  %v16900_v23 = vadd.f32 %v19532_v14, %v15868_v54  ;;  %v19533_v9 = vld [vmem:[#allocation65_spill] sm:$0xff]  ;;  %v16907_v11 = vpop.f32.mrb[199].mxu1  ;;  %v19535_v43 = vld [vmem:[#allocation66_spill] sm:$0xff] }
 0x475   : > { %v11524_v38 = vpop.eup %11523  ;;  %v7468_v48 = vadd.f32 %v7467_v49, %v6142_v57  ;;  %v4699_v13 = vadd.f32 1.0, %v11522_v52  ;;  %11543 = vpow2.f32 %v9310_v36  ;;  %v16905_v6 = vadd.f32 %v19533_v9, %v15871_v55  ;;  %v16909_v59 = vpop.f32.mrb[231].mxu0 }
 0x476   : > { %v11526_v39 = vpop.eup %11525  ;;  %v7361_v26 = vadd.f32 %v7360_v7, %v6155_v1  ;;  %v6157_v17 = vmul.f32 %v11524_v38, %v16768_v60  ;;  %11545 = vpow2.f32 %v9312_v32  ;;  %19534 = vst [vmem:[#allocation54_spill] sm:$0xff] %v16909_v59  ;;  %v9326_v36 = vmul.f32 -1.442695, %v16891_v56 }
 0x477   : > { %v11528_v49 = vpop.eup %11527  ;;  %11547 = vrcp.f32 %v4699_v13  ;;  %v4701_v52 = vadd.f32 1.0, %v11526_v39  ;;  %v16914_v57 = vadd.f32 %v19535_v43, %v15874_v62  ;;  %v16919_v38 = vadd.f32 %v16140_v5, %v15837_v42 }
 0x478   : > { %v11530_v7 = vpop.eup %11529  ;;  %v7433_v60 = vadd.f32 %v7432_v37, %v6157_v17  ;;  %v6156_v32 = vmul.f32 %v11528_v49, %v16773_v51  ;;  %11549 = vpow2.f32 %v9311_v21  ;;  %v9328_v13 = vmul.f32 -1.442695, %v16900_v23 }
 0x479   : > { %v11532_v1 = vpop.eup %11531  ;;  %v6158_v14 = vmul.f32 %v11530_v7, %v16784_v2  ;;  %11551 = vrcp.f32 %v4701_v52  ;;  %v9327_v43 = vmul.f32 -1.442695, %v16905_v6  ;;  %v9329_v5 = vmul.f32 -1.442695, %v16914_v57 }
 0x47a   : > { %v11534_v39 = vpop.eup %11533  ;;  %v7397_v9 = vadd.f32 %v7396_v12, %v6156_v32  ;;  %v4700_v59 = vadd.f32 1.0, %v11532_v1  ;;  %11553 = vpow2.f32 %v9313_v41  ;;  %v9342_v2 = vmul.f32 -1.442695, %v16919_v38 }
 0x47b   : > { %v11536_v37 = vpop.eup %11535  ;;  %v7469_v17 = vadd.f32 %v7468_v48, %v6158_v14  ;;  %v6171_v51 = vmul.f32 %v11534_v39, %v16791_v30  ;;  %11555 = vpow2.f32 %v9326_v36  ;;  %v16930_v12 = vadd.f32 %v16142_v58, %v15868_v54  ;;  %v16933_v48 = vpop.f32.mrb[200].mxu1 }
 0x47c   : > { %v11538_v21 = vpop.eup %11537  ;;  %v6173_v49 = vmul.f32 %v11536_v37, %v16796_v27  ;;  %11557 = vrcp.f32 %v4700_v59  ;;  %v16935_v30 = vpop.f32.mrb[232].mxu0  ;;  %v16940_v59 = vadd.f32 %v16145_v31, %v15871_v55 }
 0x47d   : > { %v11540_v41 = vpop.eup %11539  ;;  %v7362_v52 = vadd.f32 %v7361_v26, %v6171_v51  ;;  %v6172_v7 = vmul.f32 %v11538_v21, %v16801_v22  ;;  %11559 = vpow2.f32 %v9328_v13  ;;  %v16942_v58 = vpop.f32.mrb[201].mxu1  ;;  %v9344_v31 = vmul.f32 -1.442695, %v16930_v12 }
 0x47e   : > { %v11542_v36 = vpop.eup %11541  ;;  %v7434_v32 = vadd.f32 %v7433_v60, %v6173_v49  ;;  %v6174_v27 = vmul.f32 %v11540_v41, %v16806_v20  ;;  %11561 = vpow2.f32 %v9327_v43  ;;  %v16944_v1 = vpop.f32.mrb[233].mxu0 }
 0x47f   : > { %v11544_v26 = vpop.eup %11543  ;;  %v7398_v22 = vadd.f32 %v7397_v9, %v6172_v7  ;;  %v4702_v14 = vadd.f32 1.0, %v11542_v36  ;;  %11563 = vpow2.f32 %v9329_v5  ;;  %v16946_v13 = vpop.f32.mrb[202].mxu1  ;;  %v16957_v9 = vadd.f32 %v16148_v10, %v15874_v62 }
 0x480   : > { %19536 = vst [vmem:[#allocation55_spill] sm:$0xff] %v16946_v13  ;;  %v16948_v39 = vpop.f32.mrb[234].mxu0  ;;  %v11546_v60 = vpop.eup %11545  ;;  %v16950_v37 = vadd.f32 %v7469_v17, %v6174_v27  ;;  %v4715_v20 = vadd.f32 1.0, %v11544_v26  ;;  %11565 = vpow2.f32 %v9342_v2  ;;  %v9343_v17 = vmul.f32 -1.442695, %v16940_v59 }
 0x481   : > { %19537 = vst [vmem:[#allocation56_spill] sm:$0xff] %v16948_v39  ;;  %v16953_v43 = vpop.f32.mrb[203].mxu1  ;;  %v11548_v51 = vpop.eup %11547  ;;  %11567 = vrcp.f32 %v4702_v14  ;;  %v4717_v21 = vadd.f32 1.0, %v11546_v60  ;;  %v9345_v60 = vmul.f32 -1.442695, %v16957_v9 }
 0x482   : > { %19538 = vst [vmem:[#allocation71_spill] sm:$0xff] %v16953_v43  ;;  %v16959_v5 = vpop.f32.mrb[235].mxu0  ;;  %v11550_v49 = vpop.eup %11549  ;;  %v6187_v41 = vmul.f32 %v11548_v51, %v16833_v63  ;;  %11569 = vrcp.f32 %v4715_v20  ;;  %v16967_v63 = vadd.f32 %v16163_v45, %v15837_v42  ;;  %v19542_v45 = vld [vmem:[#allocation31_spill] sm:$0xff] }
 0x483   : > { %19539 = vst [vmem:[#allocation17_spill] sm:$0xff] %v16959_v5  ;;  %v11552_v2 = vpop.eup %11551  ;;  %11571 = vrcp.f32 %v4717_v21  ;;  %v4716_v7 = vadd.f32 1.0, %v11550_v49  ;;  %v19541_v49 = vld [vmem:[#allocation8_spill] sm:$0xff] }
 0x484   : > { %v11554_v36 = vpop.eup %11553  ;;  %v7363_v27 = vadd.f32 %v7362_v52, %v6187_v41  ;;  %v6189_v26 = vmul.f32 %v11552_v2, %v16839_v19  ;;  %11573 = vpow2.f32 %v9344_v31  ;;  %v19540_v19 = vld [vmem:[#allocation25_spill] sm:$0xff] }
 0x485   : > { %v11556_v14 = vpop.eup %11555  ;;  %11575 = vrcp.f32 %v4716_v7  ;;  %v4718_v10 = vadd.f32 1.0, %v11554_v36  ;;  %v16972_v52 = vadd.f32 %v19540_v19, %v15868_v54  ;;  %v16980_v7 = vadd.f32 %v19542_v45, %v15874_v62 }
 0x486   : > { %v11558_v5 = vpop.eup %11557  ;;  %v7435_v43 = vadd.f32 %v7434_v32, %v6189_v26  ;;  %v4731_v39 = vadd.f32 1.0, %v11556_v14  ;;  %11577 = vpow2.f32 %v9343_v17  ;;  %v16976_v32 = vadd.f32 %v19541_v49, %v15871_v55 }
 0x487   : > { %v11560_v20 = vpop.eup %11559  ;;  %v6188_v51 = vmul.f32 %v11558_v5, %v16846_v33  ;;  %11579 = vrcp.f32 %v4718_v10  ;;  %v16982_v33 = vpop.f32.mrb[204].mxu1  ;;  %v9360_v10 = vmul.f32 -1.442695, %v16972_v52  ;;  %v9361_v49 = vmul.f32 -1.442695, %v16980_v7 }
 0x488   : > { %v11562_v31 = vpop.eup %11561  ;;  %11581 = vrcp.f32 %v4731_v39  ;;  %v4733_v21 = vadd.f32 1.0, %v11560_v20  ;;  %19543 = vst [vmem:[#allocation72_spill] sm:$0xff] %v16982_v33  ;;  %v9358_v39 = vmul.f32 -1.442695, %v16967_v63  ;;  %v9359_v19 = vmul.f32 -1.442695, %v16976_v32 }
 0x489   : > { %v11564_v41 = vpop.eup %11563  ;;  %v7399_v17 = vadd.f32 %v7398_v22, %v6188_v51  ;;  %v4732_v2 = vadd.f32 1.0, %v11562_v31  ;;  %11583 = vpow2.f32 %v9345_v60  ;;  %v16988_v22 = vadd.f32 %v16263_v44, %v15837_v42  ;;  %v16990_v60 = vpop.f32.mrb[236].mxu0 }
 0x48a   : > { %v11566_v5 = vpop.eup %11565  ;;  %11585 = vrcp.f32 %v4733_v21  ;;  %v4734_v36 = vadd.f32 1.0, %v11564_v41  ;;  %19544 = vst [vmem:[#allocation18_spill] sm:$0xff] %v16990_v60  ;;  %v19545_v41 = vld [vmem:[#allocation41_spill] sm:$0xff] }
 0x48b   : > { %v11568_v26 = vpop.eup %11567  ;;  %11587 = vrcp.f32 %v4732_v2  ;;  %v4747_v14 = vadd.f32 1.0, %v11566_v5  ;;  %v16998_v2 = vadd.f32 %v19545_v41, %v15868_v54  ;;  %v9374_v60 = vmul.f32 -1.442695, %v16988_v22  ;;  %v17009_v41 = vpop.f32.mrb[237].mxu0 }
 0x48c   : > { %v11570_v20 = vpop.eup %11569  ;;  %v6190_v51 = vmul.f32 %v11568_v26, %v16862_v18  ;;  %11589 = vrcp.f32 %v4734_v36  ;;  %v19546_v18 = vld [vmem:[#allocation9_spill] sm:$0xff]  ;;  %v17006_v26 = vpop.f32.mrb[205].mxu1  ;;  %19547 = vst [vmem:[#allocation73_spill] sm:$0xff] %v17009_v41 }
 0x48d   : > { %v11572_v31 = vpop.eup %11571  ;;  %v6203_v21 = vmul.f32 %v11570_v20, %v16867_v3  ;;  %11591 = vrcp.f32 %v4747_v14  ;;  %v17004_v36 = vadd.f32 %v19546_v18, %v15871_v55 }
 0x48e   : > { %v11574_v44 = vpop.eup %11573  ;;  %v7471_v45 = vadd.f32 %v16950_v37, %v6190_v51  ;;  %v6205_v5 = vmul.f32 %v11572_v31, %v16871_v29  ;;  %11593 = vpow2.f32 %v9358_v39  ;;  %v19548_v29 = vld [vmem:[#allocation26_spill] sm:$0xff] }
 0x48f   : > { %v11576_v3 = vpop.eup %11575  ;;  %v7364_v14 = vadd.f32 %v7363_v27, %v6203_v21  ;;  %v4749_v20 = vadd.f32 1.0, %v11574_v44  ;;  %11595 = vpow2.f32 %v9360_v10  ;;  %v17014_v39 = vadd.f32 %v19548_v29, %v15874_v62  ;;  %v19549_v10 = vld [vmem:[#allocation27_spill] sm:$0xff]  ;;  %v17021_v44 = vpop.f32.mrb[206].mxu1 }
 0x490   : > { %v11578_v33 = vpop.eup %11577  ;;  %v7436_v13 = vadd.f32 %v7435_v43, %v6205_v5  ;;  %v6204_v37 = vmul.f32 %v11576_v3, %v16875_v50  ;;  %11597 = vpow2.f32 %v9359_v19  ;;  %v9376_v27 = vmul.f32 -1.442695, %v16998_v2  ;;  %19550 = vst [vmem:[#allocation32_spill] sm:$0xff] %v17021_v44  ;;  %v19551_v19 = vld [vmem:[#allocation28_spill] sm:$0xff]  ;;  %v17028_v3 = vpop.f32.mrb[238].mxu0 }
 0x491   : > { %v11580_v51 = vpop.eup %11579  ;;  %11599 = vrcp.f32 %v4749_v20  ;;  %v4748_v31 = vadd.f32 1.0, %v11578_v33  ;;  %v17019_v21 = vadd.f32 %v19549_v10, %v15837_v42  ;;  %v17026_v5 = vadd.f32 %v19551_v19, %v15868_v54  ;;  %19552 = vst [vmem:[#allocation33_spill] sm:$0xff] %v17028_v3 }
 0x492   : > { %v11582_v18 = vpop.eup %11581  ;;  %v7400_v43 = vadd.f32 %v7399_v17, %v6204_v37  ;;  %v6206_v50 = vmul.f32 %v11580_v51, %v16880_v40  ;;  %11601 = vpow2.f32 %v9361_v49  ;;  %v9375_v29 = vmul.f32 -1.442695, %v17004_v36  ;;  %v17033_v40 = vpop.f32.mrb[207].mxu1 }
 0x493   : > { %v11584_v33 = vpop.eup %11583  ;;  %v6219_v20 = vmul.f32 %v11582_v18, %v16891_v56  ;;  %11603 = vrcp.f32 %v4748_v31  ;;  %v9377_v17 = vmul.f32 -1.442695, %v17014_v39  ;;  %19553 = vst [vmem:[#allocation34_spill] sm:$0xff] %v17033_v40  ;;  %v17035_v49 = vpop.f32.mrb[239].mxu0  ;;  %v9390_v56 = vmul.f32 -1.442695, %v17019_v21 }
 0x494   : > { %v11586_v10 = vpop.eup %11585  ;;  %v7472_v41 = vadd.f32 %v7471_v45, %v6206_v50  ;;  %v4750_v44 = vadd.f32 1.0, %v11584_v33  ;;  %11605 = vpow2.f32 %v9374_v60  ;;  %19554 = vst [vmem:[#allocation35_spill] sm:$0xff] %v17035_v49  ;;  %v9392_v45 = vmul.f32 -1.442695, %v17026_v5  ;;  %v19555_v60 = vld [vmem:[#allocation67_spill] sm:$0xff] }
 0x495   : > { %v11588_v37 = vpop.eup %11587  ;;  %v7365_v51 = vadd.f32 %v7364_v14, %v6219_v20  ;;  %v6221_v19 = vmul.f32 %v11586_v10, %v16900_v23  ;;  %11607 = vpow2.f32 %v9376_v27  ;;  %v17043_v50 = vadd.f32 %v19555_v60, %v15871_v55  ;;  %v19556_v20 = vld [vmem:[#allocation38_spill] sm:$0xff] }
 0x496   : > { %v11590_v31 = vpop.eup %11589  ;;  %v6220_v18 = vmul.f32 %v11588_v37, %v16905_v6  ;;  %11609 = vrcp.f32 %v4750_v44  ;;  %v17049_v6 = vadd.f32 %v19556_v20, %v15874_v62 }
 0x497   : > { %v11592_v33 = vpop.eup %11591  ;;  %v7437_v40 = vadd.f32 %v7436_v13, %v6221_v19  ;;  %v6222_v49 = vmul.f32 %v11590_v31, %v16914_v57  ;;  %11611 = vpow2.f32 %v9375_v29  ;;  %v9391_v57 = vmul.f32 -1.442695, %v17043_v50  ;;  %v17054_v29 = vpop.f32.mrb[208].mxu1  ;;  %v19557_v19 = vld [vmem:[#allocation39_spill] sm:$0xff] }
 0x498   : > { %v11594_v14 = vpop.eup %11593  ;;  %v7401_v23 = vadd.f32 %v7400_v43, %v6220_v18  ;;  %v6235_v27 = vmul.f32 %v11592_v33, %v16919_v38  ;;  %11613 = vpow2.f32 %v9377_v17  ;;  %v17056_v43 = vpop.f32.mrb[240].mxu0  ;;  %v17060_v31 = vadd.f32 %v19557_v19, %v15837_v42 }
 0x499   : > { %v11596_v44 = vpop.eup %11595  ;;  %v7473_v10 = vadd.f32 %v7472_v41, %v6222_v49  ;;  %v4763_v37 = vadd.f32 1.0, %v11594_v14  ;;  %11615 = vpow2.f32 %v9390_v56  ;;  %v17062_v41 = vpop.f32.mrb[209].mxu1  ;;  %v9393_v18 = vmul.f32 -1.442695, %v17049_v6 }
 0x49a   : > { %v11598_v60 = vpop.eup %11597  ;;  %v17051_v3 = vadd.f32 %v7365_v51, %v6235_v27  ;;  %v4765_v13 = vadd.f32 1.0, %v11596_v44  ;;  %11617 = vpow2.f32 %v9392_v45  ;;  %v17064_v49 = vpop.f32.mrb[241].mxu0 }
 0x49b   : > { %v11600_v38 = vpop.eup %11599  ;;  %11619 = vrcp.f32 %v4763_v37  ;;  %v4764_v17 = vadd.f32 1.0, %v11598_v60  ;;  %19558 = vst [vmem:[#allocation57_spill] sm:$0xff] %v17064_v49  ;;  %v17068_v45 = vpop.f32.mrb[210].mxu1 }
 0x49c   : > { %v11602_v51 = vpop.eup %11601  ;;  %v6237_v56 = vmul.f32 %v11600_v38, %v16930_v12  ;;  %11621 = vrcp.f32 %v4765_v13  ;;  %19559 = vst [vmem:[#allocation4_spill] sm:$0xff] %v17068_v45  ;;  %v17071_v37 = vpop.f32.mrb[242].mxu0  ;;  %v9406_v12 = vmul.f32 -1.442695, %v17060_v31  ;;  %v19561_v45 = vld [vmem:[#allocation69_spill] sm:$0xff] }
 0x49d   : > { %v11604_v33 = vpop.eup %11603  ;;  %11623 = vrcp.f32 %v4764_v17  ;;  %v4766_v14 = vadd.f32 1.0, %v11602_v51  ;;  %19560 = vst [vmem:[#allocation58_spill] sm:$0xff] %v17071_v37  ;;  %v17076_v17 = vadd.f32 %v19561_v45, %v15868_v54  ;;  %v17089_v45 = vadd.f32 %v16427_v0, %v15837_v42 }
 0x49e   : > { %v11606_v27 = vpop.eup %11605  ;;  %v7438_v20 = vadd.f32 %v7437_v40, %v6237_v56  ;;  %v6236_v44 = vmul.f32 %v11604_v33, %v16940_v59  ;;  %11625 = vpow2.f32 %v9391_v57  ;;  %v19562_v59 = vld [vmem:[#allocation70_spill] sm:$0xff] }
 0x49f   : > { %v11608_v60 = vpop.eup %11607  ;;  %11627 = vrcp.f32 %v4766_v14  ;;  %v4779_v19 = vadd.f32 1.0, %v11606_v27  ;;  %v17081_v57 = vadd.f32 %v19562_v59, %v15871_v55  ;;  %v19563_v14 = vld [vmem:[#allocation40_spill] sm:$0xff]  ;;  %v17099_v59 = vpop.f32.mrb[211].mxu1 }
 0x4a0   : > { %v11610_v13 = vpop.eup %11609  ;;  %v7402_v38 = vadd.f32 %v7401_v23, %v6236_v44  ;;  %v4781_v49 = vadd.f32 1.0, %v11608_v60  ;;  %11629 = vpow2.f32 %v9393_v18  ;;  %v17085_v23 = vadd.f32 %v19563_v14, %v15874_v62  ;;  %19564 = vst [vmem:[#allocation59_spill] sm:$0xff] %v17099_v59 }
 0x4a1   : > { %v11612_v51 = vpop.eup %11611  ;;  %v6238_v40 = vmul.f32 %v11610_v13, %v16957_v9  ;;  %11631 = vrcp.f32 %v4779_v19  ;;  %v9408_v19 = vmul.f32 -1.442695, %v17076_v17  ;;  %v17105_v14 = vadd.f32 %v16459_v46, %v15871_v55 }
 0x4a2   : > { %v11614_v56 = vpop.eup %11613  ;;  %11633 = vrcp.f32 %v4781_v49  ;;  %v4780_v33 = vadd.f32 1.0, %v11612_v51  ;;  %v17094_v49 = vadd.f32 %v16437_v25, %v15868_v54  ;;  %v9409_v0 = vmul.f32 -1.442695, %v17085_v23 }
 0x4a3   : > { %v11616_v18 = vpop.eup %11615  ;;  %v7474_v27 = vadd.f32 %v7473_v10, %v6238_v40  ;;  %v4782_v44 = vadd.f32 1.0, %v11614_v56  ;;  %11635 = vpow2.f32 %v9406_v12  ;;  %v9407_v10 = vmul.f32 -1.442695, %v17081_v57 }
 0x4a4   : > { %v11618_v9 = vpop.eup %11617  ;;  %11637 = vrcp.f32 %v4780_v33  ;;  %v4795_v60 = vadd.f32 1.0, %v11616_v18  ;;  %v9422_v25 = vmul.f32 -1.442695, %v17089_v45  ;;  %v17107_v18 = vpop.f32.mrb[243].mxu0 }
 0x4a5   : > { %v11620_v13 = vpop.eup %11619  ;;  %11639 = vrcp.f32 %v4782_v44  ;;  %v4797_v51 = vadd.f32 1.0, %v11618_v9  ;;  %19565 = vst [vmem:[#allocation36_spill] sm:$0xff] %v17107_v18 }
 0x4a6   : > { %v11622_v40 = vpop.eup %11621  ;;  %v6251_v12 = vmul.f32 %v11620_v13, %v16967_v63  ;;  %11641 = vrcp.f32 %v4795_v60  ;;  %v9424_v60 = vmul.f32 -1.442695, %v17094_v49 }
 0x4a7   : > { %v11624_v56 = vpop.eup %11623  ;;  %v6253_v33 = vmul.f32 %v11622_v40, %v16972_v52  ;;  %11643 = vrcp.f32 %v4797_v51  ;;  %v19566_v51 = vld [vmem:[#allocation42_spill] sm:$0xff] }
 0x4a8   : > { %v11626_v44 = vpop.eup %11625  ;;  %v7367_v63 = vadd.f32 %v17051_v3, %v6251_v12  ;;  %v6252_v9 = vmul.f32 %v11624_v56, %v16976_v32  ;;  %11645 = vpow2.f32 %v9408_v19  ;;  %v17114_v40 = vadd.f32 %v19566_v51, %v15874_v62 }
 0x4a9   : > { %v11628_v13 = vpop.eup %11627  ;;  %v7439_v59 = vadd.f32 %v7438_v20, %v6253_v33  ;;  %v4796_v52 = vadd.f32 1.0, %v11626_v44  ;;  %11647 = vpow2.f32 %v9407_v10  ;;  %v17119_v3 = vadd.f32 %v16517_v16, %v15837_v42  ;;  %v19567_v10 = vld [vmem:[#allocation43_spill] sm:$0xff] }
 0x4aa   : > { %v11630_v46 = vpop.eup %11629  ;;  %v7403_v37 = vadd.f32 %v7402_v38, %v6252_v9  ;;  %v6254_v18 = vmul.f32 %v11628_v13, %v16980_v7  ;;  %11649 = vpow2.f32 %v9409_v0  ;;  %v9423_v20 = vmul.f32 -1.442695, %v17105_v14  ;;  %v19568_v7 = vld [vmem:[#allocation3_spill] sm:$0xff] }
 0x4ab   : > { %v11632_v32 = vpop.eup %11631  ;;  %11651 = vrcp.f32 %v4796_v52  ;;  %v4798_v19 = vadd.f32 1.0, %v11630_v46  ;;  %v17124_v12 = vadd.f32 %v19567_v10, %v15868_v54  ;;  %v17129_v0 = vadd.f32 %v19568_v7, %v15871_v55 }
 0x4ac   : > { %v11634_v56 = vpop.eup %11633  ;;  %v7475_v33 = vadd.f32 %v7474_v27, %v6254_v18  ;;  %v6267_v38 = vmul.f32 %v11632_v32, %v16988_v22  ;;  %11653 = vpow2.f32 %v9422_v25  ;;  %v9425_v9 = vmul.f32 -1.442695, %v17114_v40  ;;  %v17134_v27 = vpop.f32.mrb[212].mxu1 }
 0x4ad   : > { %v11636_v16 = vpop.eup %11635  ;;  %v6269_v44 = vmul.f32 %v11634_v56, %v16998_v2  ;;  %11655 = vrcp.f32 %v4798_v19  ;;  %v9438_v46 = vmul.f32 -1.442695, %v17119_v3  ;;  %19569 = vst [vmem:[#allocation19_spill] sm:$0xff] %v17134_v27  ;;  %v17136_v22 = vpop.f32.mrb[244].mxu0  ;;  %v9440_v2 = vmul.f32 -1.442695, %v17124_v12 }
 0x4ae   : > { %v11638_v13 = vpop.eup %11637  ;;  %v7368_v52 = vadd.f32 %v7367_v63, %v6267_v38  ;;  %v4811_v51 = vadd.f32 1.0, %v11636_v16  ;;  %11657 = vpow2.f32 %v9424_v60  ;;  %19570 = vst [vmem:[#allocation5_spill] sm:$0xff] %v17136_v22  ;;  %v17140_v19 = vpop.f32.mrb[213].mxu1  ;;  %v9439_v56 = vmul.f32 -1.442695, %v17129_v0  ;;  %v19573_v38 = vld [vmem:[#allocation12_spill] sm:$0xff] }
 0x4af   : > { %v11640_v25 = vpop.eup %11639  ;;  %v7440_v18 = vadd.f32 %v7439_v59, %v6269_v44  ;;  %v6268_v32 = vmul.f32 %v11638_v13, %v17004_v36  ;;  %11659 = vpow2.f32 %v9423_v20  ;;  %19571 = vst [vmem:[#allocation62_spill] sm:$0xff] %v17140_v19  ;;  %v17142_v10 = vpop.f32.mrb[245].mxu0  ;;  %v17148_v7 = vadd.f32 %v19573_v38, %v15874_v62  ;;  %v19578_v38 = vld [vmem:[#allocation11_spill] sm:$0xff] }
 0x4b0   : > { %19572 = vst [vmem:[#allocation63_spill] sm:$0xff] %v17142_v10  ;;  %v11642_v63 = vpop.eup %11641  ;;  %v6270_v60 = vmul.f32 %v11640_v25, %v17014_v39  ;;  %11661 = vrcp.f32 %v4811_v51  ;;  %v17150_v59 = vpop.f32.mrb[214].mxu1  ;;  %v17162_v19 = vadd.f32 %v19578_v38, %v15837_v42 }
 0x4b1   : > { %19574 = vst [vmem:[#allocation64_spill] sm:$0xff] %v17150_v59  ;;  %v17152_v36 = vpop.f32.mrb[246].mxu0  ;;  %v11644_v20 = vpop.eup %11643  ;;  %v7404_v16 = vadd.f32 %v7403_v37, %v6268_v32  ;;  %v6283_v44 = vmul.f32 %v11642_v63, %v17019_v21  ;;  %11663 = vpow2.f32 %v9425_v9  ;;  %v9441_v32 = vmul.f32 -1.442695, %v17148_v7 }
 0x4b2   : > { %19575 = vst [vmem:[#allocation65_spill] sm:$0xff] %v17152_v36  ;;  %v17155_v13 = vpop.f32.mrb[215].mxu1  ;;  %v17157_v10 = vpop.f32.mrb[247].mxu0  ;;  %v7476_v51 = vadd.f32 %v7475_v33, %v6270_v60  ;;  %v6285_v25 = vmul.f32 %v11644_v20, %v17026_v5  ;;  %11665 = vpow2.f32 %v9438_v46  ;;  %v19579_v5 = vld [vmem:[#allocation24_spill] sm:$0xff] }
 0x4b3   : > { %19576 = vst [vmem:[#allocation66_spill] sm:$0xff] %v17155_v13  ;;  %19577 = vst [vmem:[#allocation25_spill] sm:$0xff] %v17157_v10  ;;  %v11646_v39 = vpop.eup %11645  ;;  %v7369_v36 = vadd.f32 %v7368_v52, %v6283_v44  ;;  %11667 = vpow2.f32 %v9440_v2  ;;  %v17169_v46 = vadd.f32 %v19579_v5, %v15868_v54  ;;  %v9454_v52 = vmul.f32 -1.442695, %v17162_v19 }
 0x4b4   : > { %v11648_v59 = vpop.eup %11647  ;;  %v4813_v22 = vadd.f32 1.0, %v11646_v39  ;;  %v17164_v21 = vadd.f32 %v7440_v18, %v6285_v25  ;;  %11669 = vpow2.f32 %v9439_v56  ;;  %v17176_v39 = vpop.f32.mrb[248].mxu0 }
 0x4b5   : > { %v11650_v37 = vpop.eup %11649  ;;  %v4812_v9 = vadd.f32 1.0, %v11648_v59  ;;  %19581 = vst [vmem:[#allocation31_spill] sm:$0xff] %v17176_v39 }
 0x4b6   : > { %v11652_v63 = vpop.eup %11651  ;;  %11671 = vrcp.f32 %v4813_v22  ;;  %v4814_v33 = vadd.f32 1.0, %v11650_v37  ;;  %v17174_v22 = vpop.f32.mrb[216].mxu1 }
 0x4b7   : > { %v11654_v60 = vpop.eup %11653  ;;  %v6284_v20 = vmul.f32 %v11652_v63, %v17043_v50  ;;  %11673 = vrcp.f32 %v4812_v9  ;;  %19580 = vst [vmem:[#allocation8_spill] sm:$0xff] %v17174_v22  ;;  %v9456_v50 = vmul.f32 -1.442695, %v17169_v46  ;;  %v17179_v37 = vpop.f32.mrb[217].mxu1 }
 0x4b8   : > { %v11656_v2 = vpop.eup %11655  ;;  %11675 = vrcp.f32 %v4814_v33  ;;  %v4827_v18 = vadd.f32 1.0, %v11654_v60  ;;  %19582 = vst [vmem:[#allocation41_spill] sm:$0xff] %v17179_v37  ;;  %v19584_v60 = vld [vmem:[#allocation45_spill] sm:$0xff]  ;;  %v19588_v37 = vld [vmem:[#allocation14_spill] sm:$0xff] }
 0x4b9   : > { %v11658_v59 = vpop.eup %11657  ;;  %v7405_v56 = vadd.f32 %v7404_v16, %v6284_v20  ;;  %v6286_v44 = vmul.f32 %v11656_v2, %v17049_v6  ;;  %11677 = vpow2.f32 %v9441_v32  ;;  %v19583_v16 = vld [vmem:[#allocation44_spill] sm:$0xff]  ;;  %v17188_v20 = vadd.f32 %v19584_v60, %v15874_v62 }
 0x4ba   : > { %v11660_v25 = vpop.eup %11659  ;;  %11679 = vrcp.f32 %v4827_v18  ;;  %v4829_v38 = vadd.f32 1.0, %v11658_v59  ;;  %v17183_v5 = vadd.f32 %v19583_v16, %v15871_v55 }
 0x4bb   : > { %v11662_v9 = vpop.eup %11661  ;;  %v7477_v63 = vadd.f32 %v7476_v51, %v6286_v44  ;;  %v4828_v33 = vadd.f32 1.0, %v11660_v25  ;;  %11681 = vpow2.f32 %v9454_v52  ;;  %v17192_v51 = vadd.f32 %v16656_v53, %v15837_v42  ;;  %v19585_v25 = vld [vmem:[#allocation74_spill] sm:$0xff] }
 0x4bc   : > { %v11664_v6 = vpop.eup %11663  ;;  %v6299_v32 = vmul.f32 %v11662_v9, %v17060_v31  ;;  %11683 = vrcp.f32 %v4829_v38  ;;  %v17196_v16 = vadd.f32 %v19585_v25, %v15868_v54  ;;  %v9455_v9 = vmul.f32 -1.442695, %v17183_v5 }
 0x4bd   : > { %v11666_v2 = vpop.eup %11665  ;;  %11685 = vrcp.f32 %v4828_v33  ;;  %v4830_v18 = vadd.f32 1.0, %v11664_v6  ;;  %v19586_v33 = vld [vmem:[#allocation75_spill] sm:$0xff] }
 0x4be   : > { %v11668_v52 = vpop.eup %11667  ;;  %v7370_v59 = vadd.f32 %v7369_v36, %v6299_v32  ;;  %v4843_v44 = vadd.f32 1.0, %v11666_v2  ;;  %11687 = vpow2.f32 %v9456_v50  ;;  %v17201_v6 = vadd.f32 %v19586_v33, %v15871_v55  ;;  %v17204_v32 = vpop.f32.mrb[249].mxu0 }
 0x4bf   : > { %v11670_v31 = vpop.eup %11669  ;;  %11689 = vrcp.f32 %v4830_v18  ;;  %v4845_v38 = vadd.f32 1.0, %v11668_v52  ;;  %v9457_v36 = vmul.f32 -1.442695, %v17188_v20  ;;  %19587 = vst [vmem:[#allocation9_spill] sm:$0xff] %v17204_v32  ;;  %v9470_v18 = vmul.f32 -1.442695, %v17192_v51 }
 0x4c0   : > { %v11672_v60 = vpop.eup %11671  ;;  %11691 = vrcp.f32 %v4843_v44  ;;  %v4844_v53 = vadd.f32 1.0, %v11670_v31  ;;  %v9472_v33 = vmul.f32 -1.442695, %v17196_v16  ;;  %v17212_v44 = vadd.f32 %v19588_v37, %v15874_v62  ;;  %v17223_v37 = vpop.f32.mrb[250].mxu0 }
 0x4c1   : > { %v11674_v50 = vpop.eup %11673  ;;  %v6301_v2 = vmul.f32 %v11672_v60, %v17076_v17  ;;  %11693 = vrcp.f32 %v4845_v38  ;;  %v9471_v17 = vmul.f32 -1.442695, %v17201_v6  ;;  %v17217_v38 = vpop.f32.mrb[218].mxu1  ;;  %19590 = vst [vmem:[#allocation27_spill] sm:$0xff] %v17223_v37 }
 0x4c2   : > { %v11676_v52 = vpop.eup %11675  ;;  %v6300_v25 = vmul.f32 %v11674_v50, %v17081_v57  ;;  %11695 = vrcp.f32 %v4844_v53  ;;  %19589 = vst [vmem:[#allocation26_spill] sm:$0xff] %v17217_v38  ;;  %v17221_v53 = vadd.f32 %v16678_v24, %v15837_v42 }
 0x4c3   : > { %v11678_v31 = vpop.eup %11677  ;;  %v7442_v39 = vadd.f32 %v17164_v21, %v6301_v2  ;;  %v6302_v32 = vmul.f32 %v11676_v52, %v17085_v23  ;;  %11697 = vpow2.f32 %v9455_v9  ;;  %v17228_v23 = vadd.f32 %v16680_v34, %v15868_v54  ;;  %v19591_v2 = vld [vmem:[#allocation13_spill] sm:$0xff]  ;;  %v17235_v52 = vpop.f32.mrb[219].mxu1 }
 0x4c4   : > { %v11680_v60 = vpop.eup %11679  ;;  %v7406_v22 = vadd.f32 %v7405_v56, %v6300_v25  ;;  %v4846_v57 = vadd.f32 1.0, %v11678_v31  ;;  %11699 = vpow2.f32 %v9457_v36  ;;  %v9473_v36 = vmul.f32 -1.442695, %v17212_v44  ;;  %19592 = vst [vmem:[#allocation28_spill] sm:$0xff] %v17235_v52 }
 0x4c5   : > { %v11682_v50 = vpop.eup %11681  ;;  %v7478_v10 = vadd.f32 %v7477_v63, %v6302_v32  ;;  %v6315_v21 = vmul.f32 %v11680_v60, %v17089_v45  ;;  %11701 = vpow2.f32 %v9470_v18  ;;  %v17233_v24 = vadd.f32 %v19591_v2, %v15871_v55  ;;  %v19593_v32 = vld [vmem:[#allocation68_spill] sm:$0xff]  ;;  %v17242_v18 = vpop.f32.mrb[251].mxu0 }
 0x4c6   : > { %v11684_v9 = vpop.eup %11683  ;;  %11703 = vrcp.f32 %v4846_v57  ;;  %v4859_v56 = vadd.f32 1.0, %v11682_v50  ;;  %v17240_v34 = vadd.f32 %v19593_v32, %v15874_v62  ;;  %19594 = vst [vmem:[#allocation67_spill] sm:$0xff] %v17242_v18  ;;  %v9486_v57 = vmul.f32 -1.442695, %v17221_v53 }
 0x4c7   : > { %v11686_v25 = vpop.eup %11685  ;;  %v7371_v63 = vadd.f32 %v7370_v59, %v6315_v21  ;;  %v6317_v45 = vmul.f32 %v11684_v9, %v17094_v49  ;;  %11705 = vpow2.f32 %v9472_v33  ;;  %v9488_v59 = vmul.f32 -1.442695, %v17228_v23 }
 0x4c8   : > { %v11688_v31 = vpop.eup %11687  ;;  %v6316_v60 = vmul.f32 %v11686_v25, %v17105_v14  ;;  %11707 = vrcp.f32 %v4859_v56  ;;  %v9487_v9 = vmul.f32 -1.442695, %v17233_v24  ;;  %v9489_v14 = vmul.f32 -1.442695, %v17240_v34 }
 0x4c9   : > { %v11690_v50 = vpop.eup %11689  ;;  %v7443_v2 = vadd.f32 %v7442_v39, %v6317_v45  ;;  %v4861_v52 = vadd.f32 1.0, %v11688_v31  ;;  %11709 = vpow2.f32 %v9471_v17  ;;  %v17253_v39 = vadd.f32 %v16736_v35, %v15837_v42  ;;  %v17263_v45 = vpop.f32.mrb[252].mxu0 }
 0x4ca   : > { %v11692_v49 = vpop.eup %11691  ;;  %v7407_v33 = vadd.f32 %v7406_v22, %v6316_v60  ;;  %v6318_v21 = vmul.f32 %v11690_v50, %v17114_v40  ;;  %11711 = vpow2.f32 %v9473_v36  ;;  %19596 = vst [vmem:[#allocation39_spill] sm:$0xff] %v17263_v45  ;;  %v12260_v50 = vld [vmem:[%s18835_s4 + $0x8] sm:$0xff] }
 0x4cb   : > { %v11694_v32 = vpop.eup %11693  ;;  %v6331_v18 = vmul.f32 %v11692_v49, %v17119_v3  ;;  %11713 = vrcp.f32 %v4861_v52  ;;  %v17259_v3 = vadd.f32 %v16738_v47, %v15868_v54  ;;  %v17261_v52 = vpop.f32.mrb[220].mxu1  ;;  %v9502_v54 = vmul.f32 -1.442695, %v17253_v39 }
 0x4cc   : > { %v11696_v17 = vpop.eup %11695  ;;  %v7479_v56 = vadd.f32 %v7478_v10, %v6318_v21  ;;  %v6333_v25 = vmul.f32 %v11694_v32, %v17124_v12  ;;  %11715 = vpow2.f32 %v9486_v57  ;;  %19595 = vst [vmem:[#allocation38_spill] sm:$0xff] %v17261_v52  ;;  %v17265_v10 = vpop.f32.mrb[221].mxu1 }
 0x4cd   : > { %v11698_v22 = vpop.eup %11697  ;;  %v7372_v40 = vadd.f32 %v7371_v63, %v6331_v18  ;;  %v6332_v36 = vmul.f32 %v11696_v17, %v17129_v0  ;;  %11717 = vpow2.f32 %v9488_v59  ;;  %19597 = vst [vmem:[#allocation69_spill] sm:$0xff] %v17265_v10  ;;  %v17267_v12 = vpop.f32.mrb[253].mxu0 }
 0x4ce   : > { %v11700_v42 = vpop.eup %11699  ;;  %v7444_v35 = vadd.f32 %v7443_v2, %v6333_v25  ;;  %v4860_v31 = vadd.f32 1.0, %v11698_v22  ;;  %11719 = vpow2.f32 %v9487_v9  ;;  %19598 = vst [vmem:[#allocation70_spill] sm:$0xff] %v17267_v12  ;;  %v17272_v47 = vpop.f32.mrb[222].mxu1  ;;  %v19601_v2 = vld [vmem:[#allocation6_spill] sm:$0xff]  ;;  %v17287_v9 = vrot.slane %v12260_v50, %v19506_v28  ;;  %v19603_v22 = vld [vmem:[#allocation60_spill] sm:$0xff] }
 0x4cf   : > { %v11702_v63 = vpop.eup %11701  ;;  %v17269_v18 = vadd.f32 %v7407_v33, %v6332_v36  ;;  %v4862_v0 = vadd.f32 1.0, %v11700_v42  ;;  %11721 = vpow2.f32 %v9489_v14  ;;  %19599 = vst [vmem:[#allocation40_spill] sm:$0xff] %v17272_v47  ;;  %v17274_v60 = vpop.f32.mrb[254].mxu0  ;;  %v17280_v59 = vrot.slane %v12260_v50, %v19601_v2  ;;  %v19604_v42 = vld [vmem:[#allocation61_spill] sm:$0xff] }
 0x4d0   : > { %19600 = vst [vmem:[#allocation42_spill] sm:$0xff] %v17274_v60  ;;  %v11704_v57 = vpop.eup %11703  ;;  %11723 = vrcp.f32 %v4860_v31  ;;  %v4875_v49 = vadd.f32 1.0, %v11702_v63  ;;  %v17284_v33 = vadd.f32 %v16747_v8, %v15871_v55  ;;  %v9504_v14 = vmul.f32 -1.442695, %v17259_v3  ;;  %v17291_v17 = vpop.f32.mrb[223].mxu1  ;;  %v19612_v60 = vld [vmem:[#allocation49_spill] sm:$0xff] }
 0x4d1   : > { %v11706_v21 = vpop.eup %11705  ;;  %v6334_v32 = vmul.f32 %v11704_v57, %v17148_v7  ;;  %11725 = vrcp.f32 %v4862_v0  ;;  %19602 = vst [vmem:[#allocation43_spill] sm:$0xff] %v17291_v17  ;;  %v17294_v36 = vrot.slane %v12260_v50, %v19603_v22  ;;  %v17297_v31 = vrot.slane %v12260_v50, %v19604_v42  ;;  %v17304_v0 = vpop.f32.mrb[255].mxu0 }
 0x4d2   : > { %v11708_v25 = vpop.eup %11707  ;;  %11727 = vrcp.f32 %v4875_v49  ;;  %v4877_v55 = vadd.f32 1.0, %v11706_v21  ;;  %v17302_v7 = vadd.f32 %v16754_v15, %v15874_v62  ;;  %19605 = vst [vmem:[#allocation3_spill] sm:$0xff] %v17304_v0  ;;  %v9503_v22 = vmul.f32 -1.442695, %v17284_v33 }
 0x4d3   : > { %v11710_v8 = vpop.eup %11709  ;;  %v7480_v63 = vadd.f32 %v7479_v56, %v6334_v32  ;;  %v6347_v28 = vmul.f32 %v11708_v25, %v17162_v19  ;;  %11729 = vpow2.f32 %v9502_v54  ;;  %v17309_v50 = vadd.f32 %v16808_v61, %v17280_v59  ;;  %v19606_v19 = vld [vmem:[#allocation10_spill] sm:$0xff] }
 0x4d4   : > { %v11712_v57 = vpop.eup %11711  ;;  %11731 = vrcp.f32 %v4877_v55  ;;  %v4876_v2 = vadd.f32 1.0, %v11710_v8  ;;  %v17313_v54 = vadd.f32 %v19606_v19, %v17287_v9  ;;  %v19607_v32 = vld [vmem:[#allocation46_spill] sm:$0xff]  ;;  %v19608_v55 = vld [vmem:[#allocation16_spill] sm:$0xff]  ;;  %v17346_v47 = vadd.f32 %v19612_v60, %v17297_v31 }
 0x4d5   : > { %v11714_v49 = vpop.eup %11713  ;;  %v7373_v56 = vadd.f32 %v7372_v40, %v6347_v28  ;;  %v4878_v21 = vadd.f32 1.0, %v11712_v57  ;;  %11733 = vpow2.f32 %v9504_v14  ;;  %v17318_v25 = vadd.f32 %v19607_v32, %v17294_v36  ;;  %v19609_v40 = vld [vmem:[#allocation47_spill] sm:$0xff] }
 0x4d6   : > { %v11716_v62 = vpop.eup %11715  ;;  %v6349_v15 = vmul.f32 %v11714_v49, %v17169_v46  ;;  %11735 = vrcp.f32 %v4876_v2  ;;  %v17322_v61 = vadd.f32 %v19608_v55, %v17297_v31  ;;  %v17326_v14 = vadd.f32 %v19609_v40, %v17280_v59 }
 0x4d7   : > { %v11718_v8 = vpop.eup %11717  ;;  %11737 = vrcp.f32 %v4878_v21  ;;  %v4891_v28 = vadd.f32 1.0, %v11716_v62  ;;  %v9505_v46 = vmul.f32 -1.442695, %v17302_v7  ;;  %v9026_v32 = vmul.f32 -1.442695, %v17309_v50 }
 0x4d8   : > { %v11720_v57 = vpop.eup %11719  ;;  %v7445_v19 = vadd.f32 %v7444_v35, %v6349_v15  ;;  %v4893_v42 = vadd.f32 1.0, %v11718_v8  ;;  %11739 = vpow2.f32 %v9503_v22  ;;  %v9028_v55 = vmul.f32 -1.442695, %v17313_v54  ;;  %v19610_v15 = vld [vmem:[#allocation48_spill] sm:$0xff] }
 0x4d9   : > { %v11722_v2 = vpop.eup %11721  ;;  %11741 = vrcp.f32 %v4891_v28  ;;  %v4892_v49 = vadd.f32 1.0, %v11720_v57  ;;  %v9027_v62 = vmul.f32 -1.442695, %v17318_v25  ;;  %v9029_v40 = vmul.f32 -1.442695, %v17322_v61 }
 0x4da   : > { %v11724_v0 = vpop.eup %11723  ;;  %11743 = vrcp.f32 %v4893_v42  ;;  %v4894_v21 = vadd.f32 1.0, %v11722_v2  ;;  %v9042_v22 = vmul.f32 -1.442695, %v17326_v14  ;;  %v17337_v8 = vadd.f32 %v19610_v15, %v17287_v9  ;;  %v19611_v42 = vld [vmem:[#allocation29_spill] sm:$0xff] }
 0x4db   : > { %v11726_v17 = vpop.eup %11725  ;;  %v6348_v35 = vmul.f32 %v11724_v0, %v17183_v5  ;;  %11745 = vrcp.f32 %v4892_v49  ;;  %v17342_v2 = vadd.f32 %v19611_v42, %v17294_v36  ;;  %v17352_v15 = vadd.f32 %v16848_v4, %v17280_v59  ;;  %v19613_v42 = vld [vmem:[#allocation50_spill] sm:$0xff] }
 0x4dc   : > { %v11728_v28 = vpop.eup %11727  ;;  %v6350_v57 = vmul.f32 %v11726_v17, %v17188_v20  ;;  %11747 = vrcp.f32 %v4894_v21  ;;  %v17356_v12 = vadd.f32 %v19613_v42, %v17287_v9 }
 0x4dd   : > { %v11730_v5 = vpop.eup %11729  ;;  %v7409_v0 = vadd.f32 %v17269_v18, %v6348_v35  ;;  %v6363_v49 = vmul.f32 %v11728_v28, %v17192_v51  ;;  %11749 = vpow2.f32 %v9505_v46  ;;  %v9044_v51 = vmul.f32 -1.442695, %v17337_v8  ;;  %v17360_v18 = vpop.f32.mrb[224].mxu1  ;;  %v19616_v35 = vld [vmem:[#allocation51_spill] sm:$0xff] }
 0x4de   : > { %v11732_v20 = vpop.eup %11731  ;;  %v7481_v17 = vadd.f32 %v7480_v63, %v6350_v57  ;;  %v4907_v21 = vadd.f32 1.0, %v11730_v5  ;;  %11751 = vpow2.f32 %v9026_v32  ;;  %19614 = vst [vmem:[#allocation12_spill] sm:$0xff] %v17360_v18  ;;  %v17362_v46 = vpop.f32.mrb[0].mxu0  ;;  %v9043_v32 = vmul.f32 -1.442695, %v17342_v2 }
 0x4df   : > { %v11734_v60 = vpop.eup %11733  ;;  %v7374_v10 = vadd.f32 %v7373_v56, %v6363_v49  ;;  %v6365_v45 = vmul.f32 %v11732_v20, %v17196_v16  ;;  %11753 = vpow2.f32 %v9028_v55  ;;  %19615 = vst [vmem:[#allocation11_spill] sm:$0xff] %v17362_v46  ;;  %v17367_v28 = vadd.f32 %v19616_v35, %v17294_v36  ;;  %v17369_v57 = vpop.f32.mrb[225].mxu1 }
 0x4e0   : > { %v11736_v4 = vpop.eup %11735  ;;  %11755 = vrcp.f32 %v4907_v21  ;;  %v4909_v63 = vadd.f32 1.0, %v11734_v60  ;;  %19617 = vst [vmem:[#allocation24_spill] sm:$0xff] %v17369_v57  ;;  %v17371_v56 = vpop.f32.mrb[1].mxu0  ;;  %v9045_v49 = vmul.f32 -1.442695, %v17346_v47 }
 0x4e1   : > { %19618 = vst [vmem:[#allocation44_spill] sm:$0xff] %v17371_v56  ;;  %v11738_v16 = vpop.eup %11737  ;;  %v7446_v55 = vadd.f32 %v7445_v19, %v6365_v45  ;;  %v6364_v5 = vmul.f32 %v11736_v4, %v17201_v6  ;;  %11757 = vpow2.f32 %v9027_v62  ;;  %v9058_v42 = vmul.f32 -1.442695, %v17352_v15  ;;  %v17378_v35 = vpop.f32.mrb[226].mxu1  ;;  %v19621_v6 = vld [vmem:[#allocation52_spill] sm:$0xff] }
 0x4e2   : > { %v11740_v20 = vpop.eup %11739  ;;  %v6366_v21 = vmul.f32 %v11738_v16, %v17212_v44  ;;  %11759 = vrcp.f32 %v4909_v63  ;;  %v9060_v60 = vmul.f32 -1.442695, %v17356_v12  ;;  %19619 = vst [vmem:[#allocation45_spill] sm:$0xff] %v17378_v35  ;;  %v17380_v57 = vpop.f32.mrb[2].mxu0  ;;  %v17384_v19 = vadd.f32 %v19621_v6, %v17297_v31 }
 0x4e3   : > { %19620 = vst [vmem:[#allocation74_spill] sm:$0xff] %v17380_v57  ;;  %v11742_v56 = vpop.eup %11741  ;;  %v7410_v46 = vadd.f32 %v7409_v0, %v6364_v5  ;;  %v4908_v45 = vadd.f32 1.0, %v11740_v20  ;;  %11761 = vpow2.f32 %v9029_v40  ;;  %v9059_v63 = vmul.f32 -1.442695, %v17367_v28  ;;  %v17388_v16 = vpop.f32.mrb[227].mxu1  ;;  %v19624_v40 = vld [vmem:[#allocation53_spill] sm:$0xff] }
 0x4e4   : > { %v11744_v62 = vpop.eup %11743  ;;  %v7482_v4 = vadd.f32 %v7481_v17, %v6366_v21  ;;  %v6379_v44 = vmul.f32 %v11742_v56, %v17221_v53  ;;  %11763 = vpow2.f32 %v9042_v22  ;;  %19622 = vst [vmem:[#allocation75_spill] sm:$0xff] %v17388_v16  ;;  %v17390_v35 = vpop.f32.mrb[3].mxu0  ;;  %v17395_v5 = vadd.f32 %v19624_v40, %v17280_v59  ;;  %v19625_v20 = vld [vmem:[#allocation15_spill] sm:$0xff] }
 0x4e5   : > { %19623 = vst [vmem:[#allocation14_spill] sm:$0xff] %v17390_v35  ;;  %v11746_v57 = vpop.eup %11745  ;;  %v6381_v0 = vmul.f32 %v11744_v62, %v17228_v23  ;;  %11765 = vrcp.f32 %v4908_v45  ;;  %v17399_v17 = vadd.f32 %v19625_v20, %v17287_v9  ;;  %v17404_v21 = vadd.f32 %v16907_v11, %v17294_v36  ;;  %v19626_v62 = vld [vmem:[#allocation54_spill] sm:$0xff] }
 0x4e6   : > { %v11748_v53 = vpop.eup %11747  ;;  %v7375_v22 = vadd.f32 %v7374_v10, %v6379_v44  ;;  %v6380_v56 = vmul.f32 %v11746_v57, %v17233_v24  ;;  %11767 = vpow2.f32 %v9044_v51  ;;  %v17409_v40 = vadd.f32 %v19626_v62, %v17297_v31 }
 0x4e7   : > { %v11750_v6 = vpop.eup %11749  ;;  %v7447_v23 = vadd.f32 %v7446_v55, %v6381_v0  ;;  %v6382_v45 = vmul.f32 %v11748_v53, %v17240_v34  ;;  %11769 = vpow2.f32 %v9043_v32  ;;  %v17413_v24 = vadd.f32 %v16933_v48, %v17280_v59  ;;  %v17427_v48 = vpop.f32.mrb[228].mxu1 }
 0x4e8   : > { %v11752_v20 = vpop.eup %11751  ;;  %v7411_v35 = vadd.f32 %v7410_v46, %v6380_v56  ;;  %v4910_v16 = vadd.f32 1.0, %v11750_v6  ;;  %11771 = vpow2.f32 %v9045_v49  ;;  %v17418_v34 = vmul.f32 -1.442695, %v17384_v19  ;;  %19627 = vst [vmem:[#allocation13_spill] sm:$0xff] %v17427_v48  ;;  %v17429_v49 = vpop.f32.mrb[4].mxu0 }
 0x4e9   : > { %v11754_v10 = vpop.eup %11753  ;;  %v17415_v11 = vadd.f32 %v7482_v4, %v6382_v45  ;;  %v4431_v51 = vadd.f32 1.0, %v11752_v20  ;;  %11773 = vpow2.f32 %v9058_v42  ;;  %v17421_v55 = vmul.f32 -1.442695, %v17395_v5  ;;  %19628 = vst [vmem:[#allocation68_spill] sm:$0xff] %v17429_v49  ;;  %v17438_v0 = vpop.f32.mrb[229].mxu1 }
 0x4ea   : > { %v11756_v32 = vpop.eup %11755  ;;  %11775 = vrcp.f32 %v4910_v16  ;;  %v4433_v57 = vadd.f32 1.0, %v11754_v10  ;;  %v17425_v46 = vadd.f32 %v16935_v30, %v17287_v9  ;;  %v17433_v44 = vmul.f32 -1.442695, %v17399_v17  ;;  %19629 = vst [vmem:[#allocation10_spill] sm:$0xff] %v17438_v0  ;;  %v17440_v53 = vpop.f32.mrb[5].mxu0 }
 0x4eb   : > { %v11758_v4 = vpop.eup %11757  ;;  %v6395_v42 = vmul.f32 %v11756_v32, %v17253_v39  ;;  %11777 = vrcp.f32 %v4431_v51  ;;  %v17436_v16 = vmul.f32 -1.442695, %v17404_v21  ;;  %19630 = vst [vmem:[#allocation46_spill] sm:$0xff] %v17440_v53  ;;  %v17443_v6 = vmul.f32 -1.442695, %v17409_v40  ;;  %v17458_v0 = vpop.f32.mrb[230].mxu1 }
 0x4ec   : > { %v11760_v30 = vpop.eup %11759  ;;  %11779 = vrcp.f32 %v4433_v57  ;;  %v4432_v56 = vadd.f32 1.0, %v11758_v4  ;;  %v17446_v45 = vmul.f32 -1.442695, %v17413_v24  ;;  %v17453_v51 = vadd.f32 %v16942_v58, %v17294_v36  ;;  %19632 = vst [vmem:[#allocation16_spill] sm:$0xff] %v17458_v0  ;;  %v17480_v38 = vpop.f32.mrb[6].mxu0 }
 0x4ed   : > { %v11762_v39 = vpop.eup %11761  ;;  %v7049_v20 = vsel %vm6498_vm2, %v6395_v42, 0.0  ;;  %v6397_v10 = vmul.f32 %v11760_v30, %v17259_v3  ;;  %11781 = vpow2.f32 %v9060_v60  ;;  %v17456_v53 = vmul.f32 -1.442695, %v17425_v46  ;;  %19637 = vst [vmem:[#allocation29_spill] sm:$0xff] %v17480_v38 }
 0x4ee   : > { %v11764_v32 = vpop.eup %11763  ;;  %v7376_v57 = vadd.f32 %v7375_v22, %v7049_v20  ;;  %11783 = vrcp.f32 %v4432_v56  ;;  %v4434_v4 = vadd.f32 1.0, %v11762_v39  ;;  %v17464_v3 = vadd.f32 %v16944_v1, %v17297_v31 }
 0x4ef   : > { %v11766_v49 = vpop.eup %11765  ;;  %v7051_v42 = vsel %vm6498_vm2, %v6397_v10, 0.0  ;;  %v4447_v48 = vadd.f32 1.0, %v11764_v32  ;;  %11785 = vpow2.f32 %v9059_v63  ;;  %v17468_v20 = vmul.f32 -1.442695, %v17453_v51  ;;  %v19633_v10 = vld [vmem:[#allocation55_spill] sm:$0xff] }
 0x4f0   : > { %v11768_v58 = vpop.eup %11767  ;;  %v7377_v60 = vrot.slane %v7376_v57, 4  ;;  %v7448_v22 = vadd.f32 %v7447_v23, %v7051_v42  ;;  %v6396_v30 = vmul.f32 %v11766_v49, %v17284_v33  ;;  %11787 = vrcp.f32 %v4434_v4 }
 0x4f1   : > { %v11770_v56 = vpop.eup %11769  ;;  %11789 = vrcp.f32 %v4447_v48  ;;  %v4449_v39 = vadd.f32 1.0, %v11768_v58  ;;  %v17472_v32 = vadd.f32 %v19633_v10, %v17280_v59  ;;  %v19635_v48 = vld [vmem:[#allocation56_spill] sm:$0xff] }
 0x4f2   : > { %v11772_v63 = vpop.eup %11771  ;;  %v7378_v0 = vadd.f32 %v7377_v60, %v7376_v57  ;;  %v7449_v1 = vrot.slane %v7448_v22, 4  ;;  %v7050_v18 = vsel %vm6498_vm2, %v6396_v30, 0.0  ;;  %v4448_v23 = vadd.f32 1.0, %v11770_v56 }
 0x4f3   : > { %19634 = vst [vmem:[#allocation47_spill] sm:$0xff] %v17472_v32  ;;  %v11774_v42 = vpop.eup %11773  ;;  %v7412_v33 = vadd.f32 %v7411_v35, %v7050_v18  ;;  %11791 = vrcp.f32 %v4449_v39  ;;  %v4450_v49 = vadd.f32 1.0, %v11772_v63  ;;  %v17478_v4 = vadd.f32 %v19635_v48, %v17287_v9 }
 0x4f4   : > { %v11776_v58 = vpop.eup %11775  ;;  %v7379_v52 = vrot.slane %v7378_v0, 2  ;;  %v7450_v37 = vadd.f32 %v7449_v1, %v7448_v22  ;;  %11793 = vrcp.f32 %v4448_v23  ;;  %v4463_v10 = vadd.f32 1.0, %v11774_v42  ;;  %v17495_v42 = vpop.f32.mrb[231].mxu1 }
 0x4f5   : > { %19636 = vst [vmem:[#allocation48_spill] sm:$0xff] %v17478_v4  ;;  %v11778_v57 = vpop.eup %11777  ;;  %v7413_v60 = vrot.slane %v7412_v33, 4  ;;  %v6398_v30 = vmul.f32 %v11776_v58, %v17302_v7  ;;  %11795 = vrcp.f32 %v4450_v49  ;;  %v17484_v18 = vmul.f32 -1.442695, %v17464_v3  ;;  %19638 = vst [vmem:[#allocation49_spill] sm:$0xff] %v17495_v42  ;;  %v19639_v58 = vld [vmem:[#allocation71_spill] sm:$0xff] }
 0x4f6   : > { %v11780_v35 = vpop.eup %11779  ;;  %v7380_v56 = vadd.f32 %v7379_v52, %v7378_v0  ;;  %v7451_v39 = vrot.slane %v7450_v37, 2  ;;  %11797 = vrcp.f32 %v4463_v10  ;;  %v17487_v63 = vmul.f32 -1.442695, %v17472_v32 }
 0x4f7   : > { %v11782_v22 = vpop.eup %11781  ;;  %v7414_v1 = vadd.f32 %v7413_v60, %v7412_v33  ;;  %v7052_v23 = vsel %vm6498_vm2, %v6398_v30, 0.0  ;;  %11799 = vpow2.f32 %v17418_v34  ;;  %v17493_v7 = vmul.f32 -1.442695, %v17478_v4  ;;  %v17502_v33 = vpop.f32.mrb[7].mxu0  ;;  %v19641_v34 = vld [vmem:[#allocation17_spill] sm:$0xff] }
 0x4f8   : > { %v11784_v49 = vpop.eup %11783  ;;  %v7452_v48 = vadd.f32 %v7451_v39, %v7450_v37  ;;  %v7484_v52 = vadd.f32 %v17415_v11, %v7052_v23  ;;  %v4465_v0 = vadd.f32 1.0, %v11782_v22  ;;  %v17500_v10 = vadd.f32 %v19639_v58, %v17294_v36  ;;  %19640 = vst [vmem:[#allocation50_spill] sm:$0xff] %v17502_v33 }
 0x4f9   : > { %v11786_v60 = vpop.eup %11785  ;;  %v7381_v30 = vrot.slane %v7380_v56, 1  ;;  %v7415_v62 = vrot.slane %v7414_v1, 2  ;;  %11801 = vpow2.f32 %v17421_v55  ;;  %v17507_v38 = vadd.f32 %v19641_v34, %v17297_v31 }
 0x4fa   : > { %v11788_v42 = vpop.eup %11787  ;;  %v7485_v37 = vrot.slane %v7484_v52, 4  ;;  %v5919_v11 = vmul.f32 %v11778_v57, %v17309_v50  ;;  %v5921_v39 = vmul.f32 %v11780_v35, %v17313_v54  ;;  %11803 = vrcp.f32 %v4465_v0 }
 0x4fb   : > { %v11790_v22 = vpop.eup %11789  ;;  %v7453_v23 = vrot.slane %v7452_v48, 1  ;;  %v7416_v58 = vadd.f32 %v7415_v62, %v7414_v1  ;;  %v4464_v33 = vadd.f32 1.0, %v11786_v60  ;;  %11805 = vpow2.f32 %v17433_v44  ;;  %v17518_v44 = vpop.f32.mrb[232].mxu1 }
 0x4fc   : > { %v7486_v13 = vadd.f32 %v7485_v37, %v7484_v52  ;;  %v5920_v55 = vmul.f32 %v11784_v49, %v17318_v25  ;;  %v5935_v27 = vmul.f32 %v11790_v22, %v17326_v14  ;;  %11807 = vpow2.f32 %v17436_v16  ;;  %v17520_v25 = vpop.f32.mrb[8].mxu0 }
 0x4fd   : > { %v11792_v34 = vpop.eup %11791  ;;  %v7382_v4 = vadd.f32 %v7381_v30, %v7380_v56  ;;  %v7417_v32 = vrot.slane %v7416_v58, 1  ;;  %v5922_v50 = vmul.f32 %v11788_v42, %v17322_v61  ;;  %11809 = vrcp.f32 %v4464_v33  ;;  %v17524_v61 = vpop.f32.mrb[233].mxu1 }
 0x4fe   : > { %v11794_v54 = vpop.eup %11793  ;;  %v7487_v57 = vrot.slane %v7486_v13, 2  ;;  %v7491_v35 = vadd.f32 %v5935_v27, %v5919_v11  ;;  %v5937_v62 = vmul.f32 %v11792_v34, %v17337_v8  ;;  %11811 = vpow2.f32 %v17443_v6  ;;  %v17526_v42 = vpop.f32.mrb[9].mxu0 }
 0x4ff   : > { %v11796_v14 = vpop.eup %11795  ;;  %v7454_v1 = vadd.f32 %v7453_v23, %v7452_v48  ;;  %v7418_v16 = vadd.f32 %v7417_v32, %v7416_v58  ;;  %v5936_v56 = vmul.f32 %v11794_v54, %v17342_v2  ;;  %11813 = vpow2.f32 %v17446_v45  ;;  %v17530_v52 = vpop.f32.mrb[234].mxu1  ;;  %v19642_v58 = vld [vmem:[#allocation37_spill] sm:$0xff] }
 0x500   : > { %v11798_v27 = vpop.eup %11797  ;;  %v7488_v49 = vadd.f32 %v7487_v57, %v7486_v13  ;;  %v7563_v8 = vadd.f32 %v5937_v62, %v5921_v39  ;;  %v5938_v6 = vmul.f32 %v11796_v14, %v17346_v47  ;;  %11815 = vpow2.f32 %v17456_v53  ;;  %v17532_v0 = vpop.f32.mrb[10].mxu0 }
 0x501   : > { %v11800_v32 = vpop.eup %11799  ;;  %v7700_v48 = vcombine.low %v7382_v4, %v7418_v16  ;;  %v7527_v2 = vadd.f32 %v5936_v56, %v5920_v55  ;;  %v5951_v45 = vmul.f32 %v11798_v27, %v17352_v15  ;;  %11817 = vpow2.f32 %v17468_v20  ;;  %v17536_v33 = vpop.f32.mrb[235].mxu1  ;;  %v19645_v16 = vld [vmem:[#allocation72_spill] sm:$0xff] }
 0x502   : > { %v7489_v60 = vrot.slane %v7488_v49, 1  ;;  %v17538_v13 = vadd.f32 %v5938_v6, %v5922_v50  ;;  %v4466_v30 = vadd.f32 1.0, %v11800_v32  ;;  %11819 = vpow2.f32 %v17484_v18  ;;  %v17541_v47 = vpop.f32.mrb[11].mxu0  ;;  %v17563_v56 = vpop.f32.mrb[236].mxu1 }
 0x503   : > { %v11802_v53 = vpop.eup %11801  ;;  %v17543_v37 = vadd.f32 %v7491_v35, %v5951_v45  ;;  %11821 = vpow2.f32 %v17487_v63  ;;  %v9107_v4 = vmul.f32 -1.442695, %v17500_v10  ;;  %v9109_v18 = vmul.f32 -1.442695, %v17507_v38  ;;  %v17565_v27 = vpop.f32.mrb[12].mxu0  ;;  %v19647_v45 = vld [vmem:[#allocation18_spill] sm:$0xff] }
 0x504   : > { %v11804_v15 = vpop.eup %11803  ;;  %v7490_v11 = vadd.f32 %v7489_v60, %v7488_v49  ;;  %11823 = vrcp.f32 %v4466_v30  ;;  %v4479_v20 = vadd.f32 1.0, %v11802_v53  ;;  %v17551_v55 = vrot.slane %v7700_v48, %v19642_v58  ;;  %19646 = vst [vmem:[#allocation53_spill] sm:$0xff] %v17565_v27 }
 0x505   : > { %v11806_v39 = vpop.eup %11805  ;;  %v5953_v22 = vmul.f32 %v11804_v15, %v17356_v12  ;;  %11825 = vpow2.f32 %v17493_v7  ;;  %v17571_v60 = vadd.f32 %v19647_v45, %v17287_v9 }
 0x506   : > { %v11808_v23 = vpop.eup %11807  ;;  %19643 = vst [vmem:[#allocation51_spill] sm:$0xff] %v17551_v55  ;;  %v7701_v34 = vcombine.low %v7454_v1, %v7490_v11  ;;  %11827 = vrcp.f32 %v4479_v20  ;;  %v4481_v63 = vadd.f32 1.0, %v11806_v39  ;;  %v17561_v1 = vadd.f32 %v19645_v16, %v17280_v59  ;;  %v19648_v20 = vld [vmem:[#allocation73_spill] sm:$0xff] }
 0x507   : > { %v11810_v50 = vpop.eup %11809  ;;  %v17553_v54 = vadd.f32 %v7563_v8, %v5953_v22  ;;  %v4480_v57 = vadd.f32 1.0, %v11808_v23  ;;  %11829 = vpow2.f32 %v9107_v4  ;;  %v17575_v4 = vadd.f32 %v17006_v26, %v17294_v36  ;;  %v19649_v23 = vld [vmem:[#allocation32_spill] sm:$0xff] }
 0x508   : > { %v11812_v35 = vpop.eup %11811  ;;  %v17556_v62 = vrot.slane %v7701_v34, %v19642_v58  ;;  %v5952_v12 = vmul.f32 %v11810_v50, %v17367_v28  ;;  %11831 = vrcp.f32 %v4481_v63  ;;  %v17580_v39 = vadd.f32 %v19648_v20, %v17297_v31  ;;  %v19654_v20 = vld [vmem:[#allocation35_spill] sm:$0xff] }
 0x509   : > { %v11814_v7 = vpop.eup %11813  ;;  %11833 = vrcp.f32 %v4480_v57  ;;  %v4482_v14 = vadd.f32 1.0, %v11812_v35  ;;  %v17584_v34 = vadd.f32 %v19649_v23, %v17280_v59  ;;  %v9124_v50 = vmul.f32 -1.442695, %v17571_v60  ;;  %v19650_v57 = vld [vmem:[#allocation33_spill] sm:$0xff] }
 0x50a   : > { %19644 = vst [vmem:[#allocation52_spill] sm:$0xff] %v17556_v62  ;;  %v11816_v49 = vpop.eup %11815  ;;  %v7528_v6 = vadd.f32 %v7527_v2, %v5952_v12  ;;  %v4495_v32 = vadd.f32 1.0, %v11814_v7  ;;  %11835 = vpow2.f32 %v9109_v18  ;;  %v9122_v2 = vmul.f32 -1.442695, %v17561_v1  ;;  %v17592_v12 = vpop.f32.mrb[237].mxu1 }
 0x50b   : > { %v11818_v28 = vpop.eup %11817  ;;  %11837 = vrcp.f32 %v4482_v14  ;;  %v4497_v48 = vadd.f32 1.0, %v11816_v49  ;;  %v17590_v35 = vadd.f32 %v19650_v57, %v17287_v9  ;;  %19651 = vst [vmem:[#allocation15_spill] sm:$0xff] %v17592_v12  ;;  %v9123_v16 = vmul.f32 -1.442695, %v17575_v4  ;;  %v19652_v49 = vld [vmem:[#allocation34_spill] sm:$0xff]  ;;  %v19742_v12 = vld [vmem:[#allocation29_spill] sm:$0xff] }
 0x50c   : > { %v11820_v30 = vpop.eup %11819  ;;  %11839 = vrcp.f32 %v4495_v32  ;;  %v4496_v53 = vadd.f32 1.0, %v11818_v28  ;;  %v17597_v32 = vadd.f32 %v19652_v49, %v17294_v36  ;;  %v17599_v28 = vpop.f32.mrb[13].mxu0  ;;  %v17625_v49 = vadd.f32 %v17056_v43, %v17287_v9  ;;  %v19659_v43 = vld [vmem:[#allocation57_spill] sm:$0xff] }
 0x50d   : > { %v11822_v15 = vpop.eup %11821  ;;  %11841 = vrcp.f32 %v4497_v48  ;;  %v4498_v11 = vadd.f32 1.0, %v11820_v30  ;;  %19653 = vst [vmem:[#allocation54_spill] sm:$0xff] %v17599_v28  ;;  %v9125_v30 = vmul.f32 -1.442695, %v17580_v39 }
 0x50e   : > { %v11824_v22 = vpop.eup %11823  ;;  %11843 = vrcp.f32 %v4496_v53  ;;  %v4511_v18 = vadd.f32 1.0, %v11822_v15 }
 0x50f   : > { %v11826_v63 = vpop.eup %11825  ;;  %v5954_v26 = vmul.f32 %v11824_v22, %v17384_v19  ;;  %11845 = vrcp.f32 %v4498_v11  ;;  %v9138_v11 = vmul.f32 -1.442695, %v17584_v34  ;;  %v17607_v22 = vadd.f32 %v19654_v20, %v17297_v31 }
 0x510   : > { %v11828_v7 = vpop.eup %11827  ;;  %11847 = vrcp.f32 %v4511_v18  ;;  %v4513_v14 = vadd.f32 1.0, %v11826_v63 }
 0x511   : > { %v11830_v19 = vpop.eup %11829  ;;  %v7600_v48 = vadd.f32 %v17538_v13, %v5954_v26  ;;  %v5967_v45 = vmul.f32 %v11828_v7, %v17395_v5  ;;  %11849 = vpow2.f32 %v9122_v2  ;;  %v9140_v5 = vmul.f32 -1.442695, %v17590_v35  ;;  %v17612_v13 = vpop.f32.mrb[238].mxu1 }
 0x512   : > { %v11832_v53 = vpop.eup %11831  ;;  %11851 = vrcp.f32 %v4513_v14  ;;  %v4512_v15 = vadd.f32 1.0, %v11830_v19  ;;  %19655 = vst [vmem:[#allocation55_spill] sm:$0xff] %v17612_v13  ;;  %v17614_v2 = vpop.f32.mrb[14].mxu0  ;;  %v9139_v7 = vmul.f32 -1.442695, %v17597_v32  ;;  %v17620_v14 = vadd.f32 %v17054_v29, %v17280_v59 }
 0x513   : > { %v11834_v18 = vpop.eup %11833  ;;  %v7493_v23 = vadd.f32 %v17543_v37, %v5967_v45  ;;  %v5969_v63 = vmul.f32 %v11832_v53, %v17399_v17  ;;  %11853 = vpow2.f32 %v9124_v50  ;;  %19656 = vst [vmem:[#allocation56_spill] sm:$0xff] %v17614_v2  ;;  %v9141_v53 = vmul.f32 -1.442695, %v17607_v22  ;;  %v17631_v29 = vpop.f32.mrb[15].mxu0 }
 0x514   : > { %v11836_v26 = vpop.eup %11835  ;;  %v5968_v57 = vmul.f32 %v11834_v18, %v17404_v21  ;;  %11855 = vrcp.f32 %v4512_v15  ;;  %v17629_v15 = vpop.f32.mrb[239].mxu1  ;;  %19658 = vst [vmem:[#allocation17_spill] sm:$0xff] %v17631_v29 }
 0x515   : > { %v11838_v37 = vpop.eup %11837  ;;  %v7565_v17 = vadd.f32 %v17553_v54, %v5969_v63  ;;  %v4514_v50 = vadd.f32 1.0, %v11836_v26  ;;  %11857 = vpow2.f32 %v9123_v16  ;;  %19657 = vst [vmem:[#allocation71_spill] sm:$0xff] %v17629_v15  ;;  %v17636_v16 = vadd.f32 %v17062_v41, %v17294_v36  ;;  %v19708_v15 = vld [vmem:[#allocation40_spill] sm:$0xff] }
 0x516   : > { %v11840_v19 = vpop.eup %11839  ;;  %v7529_v45 = vadd.f32 %v7528_v6, %v5968_v57  ;;  %v5970_v21 = vmul.f32 %v11838_v37, %v17409_v40  ;;  %11859 = vpow2.f32 %v9125_v30  ;;  %v17640_v6 = vadd.f32 %v19659_v43, %v17297_v31 }
 0x517   : > { %v11842_v20 = vpop.eup %11841  ;;  %v5983_v54 = vmul.f32 %v11840_v19, %v17413_v24  ;;  %11861 = vrcp.f32 %v4514_v50  ;;  %v9154_v63 = vmul.f32 -1.442695, %v17620_v14  ;;  %v9156_v37 = vmul.f32 -1.442695, %v17625_v49 }
 0x518   : > { %v11844_v40 = vpop.eup %11843  ;;  %v7601_v30 = vadd.f32 %v7600_v48, %v5970_v21  ;;  %v5985_v18 = vmul.f32 %v11842_v20, %v17425_v46  ;;  %11863 = vpow2.f32 %v9138_v11  ;;  %v19660_v48 = vld [vmem:[#allocation47_spill] sm:$0xff]  ;;  %v9155_v46 = vmul.f32 -1.442695, %v17636_v16 }
 0x519   : > { %v11846_v26 = vpop.eup %11845  ;;  %v7494_v57 = vadd.f32 %v7493_v23, %v5983_v54  ;;  %v5984_v24 = vmul.f32 %v11844_v40, %v17453_v51  ;;  %11865 = vpow2.f32 %v9140_v5  ;;  %v19661_v51 = vld [vmem:[#allocation4_spill] sm:$0xff]  ;;  %v17653_v54 = vpop.f32.mrb[240].mxu1  ;;  %v17847_v2 = vadd.f32 %v19708_v15, %v17280_v59 }
 0x51a   : > { %v11848_v41 = vpop.eup %11847  ;;  %v7566_v50 = vadd.f32 %v7565_v17, %v5985_v18  ;;  %v5986_v19 = vmul.f32 %v11846_v26, %v17464_v3  ;;  %11867 = vpow2.f32 %v9139_v7  ;;  %v17651_v5 = vadd.f32 %v19661_v51, %v17280_v59  ;;  %19662 = vst [vmem:[#allocation72_spill] sm:$0xff] %v17653_v54  ;;  %v17655_v17 = vpop.f32.mrb[16].mxu0 }
 0x51b   : > { %v11850_v43 = vpop.eup %11849  ;;  %v7530_v8 = vadd.f32 %v7529_v45, %v5984_v24  ;;  %v5999_v21 = vmul.f32 %v11848_v41, %v19660_v48  ;;  %11869 = vpow2.f32 %v9141_v53  ;;  %19663 = vst [vmem:[#allocation18_spill] sm:$0xff] %v17655_v17  ;;  %v19664_v45 = vld [vmem:[#allocation48_spill] sm:$0xff]  ;;  %v9157_v53 = vmul.f32 -1.442695, %v17640_v6  ;;  %v17661_v18 = vpop.f32.mrb[241].mxu1 }
 0x51c   : > { %v11852_v11 = vpop.eup %11851  ;;  %v7602_v20 = vadd.f32 %v7601_v30, %v5986_v19  ;;  %v4527_v23 = vadd.f32 1.0, %v11850_v43  ;;  %11871 = vpow2.f32 %v9154_v63  ;;  %19665 = vst [vmem:[#allocation73_spill] sm:$0xff] %v17661_v18  ;;  %v17663_v30 = vpop.f32.mrb[17].mxu0 }
 0x51d   : > { %v11854_v3 = vpop.eup %11853  ;;  %v17657_v7 = vadd.f32 %v7494_v57, %v5999_v21  ;;  %v6001_v40 = vmul.f32 %v11852_v11, %v19664_v45  ;;  %11873 = vpow2.f32 %v9156_v37  ;;  %19666 = vst [vmem:[#allocation32_spill] sm:$0xff] %v17663_v30  ;;  %v17665_v24 = vpop.f32.mrb[242].mxu1  ;;  %v9170_v21 = vmul.f32 -1.442695, %v17651_v5 }
 0x51e   : > { %v11856_v63 = vpop.eup %11855  ;;  %11875 = vrcp.f32 %v4527_v23  ;;  %v4529_v26 = vadd.f32 1.0, %v11854_v3  ;;  %19667 = vst [vmem:[#allocation33_spill] sm:$0xff] %v17665_v24  ;;  %v17667_v41 = vpop.f32.mrb[18].mxu0 }
 0x51f   : > { %19668 = vst [vmem:[#allocation34_spill] sm:$0xff] %v17667_v41  ;;  %v11858_v19 = vpop.eup %11857  ;;  %v7567_v43 = vadd.f32 %v7566_v50, %v6001_v40  ;;  %v6000_v57 = vmul.f32 %v11856_v63, %v17500_v10  ;;  %11877 = vpow2.f32 %v9155_v46  ;;  %v17674_v62 = vpop.f32.mrb[243].mxu1  ;;  %v19670_v46 = vld [vmem:[#allocation58_spill] sm:$0xff]  ;;  %v19678_v41 = vld [vmem:[#allocation64_spill] sm:$0xff] }
 0x520   : > { %v11860_v48 = vpop.eup %11859  ;;  %11879 = vrcp.f32 %v4529_v26  ;;  %v4528_v37 = vadd.f32 1.0, %v11858_v19  ;;  %19669 = vst [vmem:[#allocation35_spill] sm:$0xff] %v17674_v62  ;;  %v17678_v40 = vadd.f32 %v19670_v46, %v17287_v9  ;;  %v17716_v24 = vadd.f32 %v19678_v41, %v17280_v59 }
 0x521   : > { %v11862_v11 = vpop.eup %11861  ;;  %v17671_v51 = vadd.f32 %v7530_v8, %v6000_v57  ;;  %v4530_v45 = vadd.f32 1.0, %v11860_v48  ;;  %11881 = vpow2.f32 %v9157_v53  ;;  %v19671_v57 = vld [vmem:[#allocation59_spill] sm:$0xff]  ;;  %v19672_v48 = vld [vmem:[#allocation36_spill] sm:$0xff] }
 0x522   : > { %v11864_v23 = vpop.eup %11863  ;;  %v6002_v3 = vmul.f32 %v11862_v11, %v17507_v38  ;;  %11883 = vrcp.f32 %v4528_v37  ;;  %v17682_v38 = vadd.f32 %v19671_v57, %v17294_v36  ;;  %v17686_v37 = vadd.f32 %v19672_v48, %v17297_v31  ;;  %v17697_v48 = vpop.f32.mrb[19].mxu0 }
 0x523   : > { %v11866_v50 = vpop.eup %11865  ;;  %11885 = vrcp.f32 %v4530_v45  ;;  %v4543_v10 = vadd.f32 1.0, %v11864_v23  ;;  %v19673_v23 = vld [vmem:[#allocation19_spill] sm:$0xff]  ;;  %19675 = vst [vmem:[#allocation57_spill] sm:$0xff] %v17697_v48 }
 0x524   : > { %v11868_v63 = vpop.eup %11867  ;;  %v7603_v26 = vadd.f32 %v7602_v20, %v6002_v3  ;;  %v4545_v19 = vadd.f32 1.0, %v11866_v50  ;;  %11887 = vpow2.f32 %v9170_v21  ;;  %v17690_v46 = vadd.f32 %v19673_v23, %v17280_v59 }
 0x525   : > { %v11870_v8 = vpop.eup %11869  ;;  %11889 = vrcp.f32 %v4543_v10  ;;  %v4544_v53 = vadd.f32 1.0, %v11868_v63  ;;  %v9172_v3 = vmul.f32 -1.442695, %v17678_v40  ;;  %v19674_v63 = vld [vmem:[#allocation5_spill] sm:$0xff]  ;;  %v9171_v23 = vmul.f32 -1.442695, %v17682_v38 }
 0x526   : > { %v11872_v11 = vpop.eup %11871  ;;  %11891 = vrcp.f32 %v4545_v19  ;;  %v4546_v45 = vadd.f32 1.0, %v11870_v8  ;;  %v17695_v57 = vadd.f32 %v19674_v63, %v17287_v9 }
 0x527   : > { %v11874_v20 = vpop.eup %11873  ;;  %11893 = vrcp.f32 %v4544_v53  ;;  %v4559_v21 = vadd.f32 1.0, %v11872_v11  ;;  %v9173_v53 = vmul.f32 -1.442695, %v17686_v37 }
 0x528   : > { %v11876_v50 = vpop.eup %11875  ;;  %11895 = vrcp.f32 %v4546_v45  ;;  %v4561_v10 = vadd.f32 1.0, %v11874_v20  ;;  %v9186_v45 = vmul.f32 -1.442695, %v17690_v46  ;;  %v19676_v20 = vld [vmem:[#allocation62_spill] sm:$0xff] }
 0x529   : > { %v11878_v19 = vpop.eup %11877  ;;  %v6015_v8 = vmul.f32 %v11876_v50, %v17561_v1  ;;  %11897 = vrcp.f32 %v4559_v21  ;;  %v17705_v58 = vadd.f32 %v19676_v20, %v17294_v36  ;;  %v19677_v1 = vld [vmem:[#allocation63_spill] sm:$0xff] }
 0x52a   : > { %v11880_v11 = vpop.eup %11879  ;;  %11899 = vrcp.f32 %v4561_v10  ;;  %v4560_v55 = vadd.f32 1.0, %v11878_v19  ;;  %v17711_v21 = vadd.f32 %v19677_v1, %v17297_v31  ;;  %v9188_v19 = vmul.f32 -1.442695, %v17695_v57 }
 0x52b   : > { %v11882_v63 = vpop.eup %11881  ;;  %v7496_v48 = vadd.f32 %v17657_v7, %v6015_v8  ;;  %v6017_v62 = vmul.f32 %v11880_v11, %v17571_v60  ;;  %11901 = vpow2.f32 %v9172_v3  ;;  %v19679_v60 = vld [vmem:[#allocation65_spill] sm:$0xff] }
 0x52c   : > { %v11884_v50 = vpop.eup %11883  ;;  %11903 = vrcp.f32 %v4560_v55  ;;  %v4562_v10 = vadd.f32 1.0, %v11882_v63  ;;  %v17721_v3 = vadd.f32 %v19679_v60, %v17287_v9  ;;  %v9187_v55 = vmul.f32 -1.442695, %v17705_v58  ;;  %v19680_v63 = vld [vmem:[#allocation66_spill] sm:$0xff] }
 0x52d   : > { %v11886_v20 = vpop.eup %11885  ;;  %v7568_v30 = vadd.f32 %v7567_v43, %v6017_v62  ;;  %v6016_v7 = vmul.f32 %v11884_v50, %v17575_v4  ;;  %11905 = vpow2.f32 %v9171_v23  ;;  %v17727_v1 = vadd.f32 %v19680_v63, %v17294_v36  ;;  %v17731_v23 = vpop.f32.mrb[244].mxu1 }
 0x52e   : > { %v11888_v8 = vpop.eup %11887  ;;  %v6018_v11 = vmul.f32 %v11886_v20, %v17580_v39  ;;  %11907 = vrcp.f32 %v4562_v10  ;;  %v9189_v4 = vmul.f32 -1.442695, %v17711_v21  ;;  %19681 = vst [vmem:[#allocation47_spill] sm:$0xff] %v17731_v23  ;;  %v17733_v50 = vpop.f32.mrb[20].mxu0  ;;  %v9202_v20 = vmul.f32 -1.442695, %v17716_v24 }
 0x52f   : > { %v11890_v41 = vpop.eup %11889  ;;  %v7532_v62 = vadd.f32 %v17671_v51, %v6016_v7  ;;  %v4575_v43 = vadd.f32 1.0, %v11888_v8  ;;  %11909 = vpow2.f32 %v9173_v53  ;;  %19682 = vst [vmem:[#allocation4_spill] sm:$0xff] %v17733_v50  ;;  %v17737_v63 = vpop.f32.mrb[245].mxu1  ;;  %v9204_v7 = vmul.f32 -1.442695, %v17721_v3  ;;  %v19685_v8 = vld [vmem:[#allocation25_spill] sm:$0xff] }
 0x530   : > { %v11892_v60 = vpop.eup %11891  ;;  %v7604_v39 = vadd.f32 %v7603_v26, %v6018_v11  ;;  %v6031_v10 = vmul.f32 %v11890_v41, %v17584_v34  ;;  %11911 = vpow2.f32 %v9186_v45  ;;  %19683 = vst [vmem:[#allocation48_spill] sm:$0xff] %v17737_v63  ;;  %v17739_v18 = vpop.f32.mrb[21].mxu0  ;;  %v17745_v50 = vadd.f32 %v19685_v8, %v17297_v31 }
 0x531   : > { %19684 = vst [vmem:[#allocation58_spill] sm:$0xff] %v17739_v18  ;;  %v11894_v51 = vpop.eup %11893  ;;  %v6033_v53 = vmul.f32 %v11892_v60, %v17590_v35  ;;  %11913 = vrcp.f32 %v4575_v43  ;;  %v17747_v26 = vpop.f32.mrb[246].mxu1  ;;  %v9203_v18 = vmul.f32 -1.442695, %v17727_v1  ;;  %v19688_v60 = vld [vmem:[#allocation8_spill] sm:$0xff] }
 0x532   : > { %19686 = vst [vmem:[#allocation59_spill] sm:$0xff] %v17747_v26  ;;  %v17749_v34 = vpop.f32.mrb[22].mxu0  ;;  %v11896_v45 = vpop.eup %11895  ;;  %v7497_v11 = vadd.f32 %v7496_v48, %v6031_v10  ;;  %v6032_v41 = vmul.f32 %v11894_v51, %v17597_v32  ;;  %11915 = vpow2.f32 %v9188_v19  ;;  %v17756_v8 = vadd.f32 %v19688_v60, %v17280_v59 }
 0x533   : > { %19687 = vst [vmem:[#allocation36_spill] sm:$0xff] %v17749_v34  ;;  %v11898_v63 = vpop.eup %11897  ;;  %v7569_v35 = vadd.f32 %v7568_v30, %v6033_v53  ;;  %v6034_v43 = vmul.f32 %v11896_v45, %v17607_v22  ;;  %11917 = vpow2.f32 %v9187_v55  ;;  %v17758_v23 = vpop.f32.mrb[247].mxu1  ;;  %v9205_v22 = vmul.f32 -1.442695, %v17745_v50  ;;  %v19691_v45 = vld [vmem:[#allocation31_spill] sm:$0xff] }
 0x534   : > { %19689 = vst [vmem:[#allocation19_spill] sm:$0xff] %v17758_v23  ;;  %v17760_v26 = vpop.f32.mrb[23].mxu0  ;;  %v11900_v34 = vpop.eup %11899  ;;  %v7533_v48 = vadd.f32 %v7532_v62, %v6032_v41  ;;  %v6047_v32 = vmul.f32 %v11898_v63, %v17620_v14  ;;  %11919 = vpow2.f32 %v9189_v4  ;;  %v17767_v60 = vadd.f32 %v19691_v45, %v17287_v9 }
 0x535   : > { %19690 = vst [vmem:[#allocation5_spill] sm:$0xff] %v17760_v26  ;;  %v11902_v19 = vpop.eup %11901  ;;  %v7605_v10 = vadd.f32 %v7604_v39, %v6034_v43  ;;  %v6049_v30 = vmul.f32 %v11900_v34, %v17625_v49  ;;  %11921 = vpow2.f32 %v9202_v20  ;;  %v9218_v4 = vmul.f32 -1.442695, %v17756_v8  ;;  %v17776_v34 = vpop.f32.mrb[248].mxu1 }
 0x536   : > { %v11904_v55 = vpop.eup %11903  ;;  %v7498_v51 = vadd.f32 %v7497_v11, %v6047_v32  ;;  %v4577_v53 = vadd.f32 1.0, %v11902_v19  ;;  %11923 = vpow2.f32 %v9204_v7  ;;  %19692 = vst [vmem:[#allocation62_spill] sm:$0xff] %v17776_v34  ;;  %v17778_v11 = vpop.f32.mrb[24].mxu0 }
 0x537   : > { %v11906_v26 = vpop.eup %11905  ;;  %v17769_v62 = vadd.f32 %v7569_v35, %v6049_v30  ;;  %v6048_v14 = vmul.f32 %v11904_v55, %v17636_v16  ;;  %11925 = vpow2.f32 %v9203_v18  ;;  %19693 = vst [vmem:[#allocation63_spill] sm:$0xff] %v17778_v11  ;;  %v9220_v16 = vmul.f32 -1.442695, %v17767_v60  ;;  %v17781_v18 = vpop.f32.mrb[249].mxu1  ;;  %v19696_v30 = vld [vmem:[#allocation41_spill] sm:$0xff] }
 0x538   : > { %v11908_v49 = vpop.eup %11907  ;;  %11927 = vrcp.f32 %v4577_v53  ;;  %v4576_v39 = vadd.f32 1.0, %v11906_v26  ;;  %19694 = vst [vmem:[#allocation64_spill] sm:$0xff] %v17781_v18  ;;  %v19697_v55 = vld [vmem:[#allocation9_spill] sm:$0xff] }
 0x539   : > { %v11910_v20 = vpop.eup %11909  ;;  %v17773_v63 = vadd.f32 %v7533_v48, %v6048_v14  ;;  %v6050_v7 = vmul.f32 %v11908_v49, %v17640_v6  ;;  %11929 = vpow2.f32 %v9205_v22  ;;  %v17785_v48 = vpop.f32.mrb[25].mxu0  ;;  %v17790_v22 = vadd.f32 %v19696_v30, %v17294_v36  ;;  %v19698_v14 = vld [vmem:[#allocation26_spill] sm:$0xff]  ;;  %v19699_v49 = vld [vmem:[#allocation27_spill] sm:$0xff] }
 0x53a   : > { %v11912_v41 = vpop.eup %11911  ;;  %11931 = vrcp.f32 %v4576_v39  ;;  %v4578_v35 = vadd.f32 1.0, %v11910_v20  ;;  %19695 = vst [vmem:[#allocation65_spill] sm:$0xff] %v17785_v48  ;;  %v17794_v53 = vadd.f32 %v19697_v55, %v17297_v31  ;;  %v17802_v39 = vadd.f32 %v19699_v49, %v17287_v9  ;;  %v19702_v55 = vld [vmem:[#allocation38_spill] sm:$0xff]  ;;  %v17837_v54 = vpop.f32.mrb[26].mxu0 }
 0x53b   : > { %v11914_v43 = vpop.eup %11913  ;;  %v17783_v32 = vadd.f32 %v7605_v10, %v6050_v7  ;;  %v4591_v26 = vadd.f32 1.0, %v11912_v41  ;;  %11933 = vpow2.f32 %v9218_v4  ;;  %v17798_v4 = vadd.f32 %v19698_v14, %v17280_v59  ;;  %v19700_v41 = vld [vmem:[#allocation28_spill] sm:$0xff]  ;;  %19706 = vst [vmem:[#allocation25_spill] sm:$0xff] %v17837_v54 }
 0x53c   : > { %v11916_v6 = vpop.eup %11915  ;;  %v6063_v19 = vmul.f32 %v11914_v43, %v17651_v5  ;;  %11935 = vrcp.f32 %v4578_v35  ;;  %v17808_v35 = vadd.f32 %v19700_v41, %v17294_v36  ;;  %v17816_v14 = vadd.f32 %v19702_v55, %v17280_v59 }
 0x53d   : > { %v11918_v45 = vpop.eup %11917  ;;  %11937 = vrcp.f32 %v4591_v26  ;;  %v4593_v10 = vadd.f32 1.0, %v11916_v6  ;;  %v19701_v6 = vld [vmem:[#allocation67_spill] sm:$0xff]  ;;  %v9236_v18 = vmul.f32 -1.442695, %v17802_v39 }
 0x53e   : > { %v11920_v5 = vpop.eup %11919  ;;  %v17804_v20 = vadd.f32 %v7498_v51, %v6063_v19  ;;  %v4592_v7 = vadd.f32 1.0, %v11918_v45  ;;  %11939 = vpow2.f32 %v9220_v16  ;;  %v17812_v30 = vadd.f32 %v19701_v6, %v17297_v31  ;;  %v19703_v19 = vld [vmem:[#allocation39_spill] sm:$0xff] }
 0x53f   : > { %v11922_v43 = vpop.eup %11921  ;;  %11941 = vrcp.f32 %v4593_v10  ;;  %v4594_v26 = vadd.f32 1.0, %v11920_v5  ;;  %v9219_v16 = vmul.f32 -1.442695, %v17790_v22  ;;  %v17821_v45 = vadd.f32 %v19703_v19, %v17287_v9 }
 0x540   : > { %v11924_v49 = vpop.eup %11923  ;;  %11943 = vrcp.f32 %v4592_v7  ;;  %v4607_v51 = vadd.f32 1.0, %v11922_v43  ;;  %v9221_v5 = vmul.f32 -1.442695, %v17794_v53  ;;  %v9234_v6 = vmul.f32 -1.442695, %v17798_v4 }
 0x541   : > { %v11926_v41 = vpop.eup %11925  ;;  %11945 = vrcp.f32 %v4594_v26  ;;  %v4609_v10 = vadd.f32 1.0, %v11924_v49  ;;  %v9235_v7 = vmul.f32 -1.442695, %v17808_v35  ;;  %v9237_v19 = vmul.f32 -1.442695, %v17812_v30  ;;  %v17830_v49 = vpop.f32.mrb[250].mxu1 }
 0x542   : > { %v11928_v48 = vpop.eup %11927  ;;  %11947 = vrcp.f32 %v4607_v51  ;;  %v4608_v55 = vadd.f32 1.0, %v11926_v41  ;;  %v9250_v26 = vmul.f32 -1.442695, %v17816_v14  ;;  %19704 = vst [vmem:[#allocation66_spill] sm:$0xff] %v17830_v49  ;;  %v9252_v51 = vmul.f32 -1.442695, %v17821_v45 }
 0x543   : > { %v11930_v43 = vpop.eup %11929  ;;  %v6065_v11 = vmul.f32 %v11928_v48, %v17678_v40  ;;  %11949 = vrcp.f32 %v4609_v10  ;;  %v19705_v41 = vld [vmem:[#allocation69_spill] sm:$0xff]  ;;  %v19707_v10 = vld [vmem:[#allocation70_spill] sm:$0xff] }
 0x544   : > { %v11932_v34 = vpop.eup %11931  ;;  %11951 = vrcp.f32 %v4608_v55  ;;  %v4610_v23 = vadd.f32 1.0, %v11930_v43  ;;  %v17835_v17 = vadd.f32 %v19705_v41, %v17294_v36  ;;  %v17843_v49 = vadd.f32 %v19707_v10, %v17297_v31  ;;  %v19709_v41 = vld [vmem:[#allocation42_spill] sm:$0xff] }
 0x545   : > { %v11934_v29 = vpop.eup %11933  ;;  %v7571_v40 = vadd.f32 %v17769_v62, %v6065_v11  ;;  %v6064_v48 = vmul.f32 %v11932_v34, %v17682_v38  ;;  %11953 = vpow2.f32 %v9219_v16  ;;  %v17851_v54 = vadd.f32 %v19709_v41, %v17287_v9  ;;  %v19710_v34 = vld [vmem:[#allocation43_spill] sm:$0xff] }
 0x546   : > { %v11936_v55 = vpop.eup %11935  ;;  %11955 = vrcp.f32 %v4610_v23  ;;  %v4623_v43 = vadd.f32 1.0, %v11934_v29  ;;  %v17857_v11 = vadd.f32 %v19710_v34, %v17294_v36  ;;  %v17859_v23 = vpop.f32.mrb[251].mxu1  ;;  %v9251_v10 = vmul.f32 -1.442695, %v17835_v17  ;;  %v19713_v41 = vld [vmem:[#allocation3_spill] sm:$0xff] }
 0x547   : > { %v11938_v13 = vpop.eup %11937  ;;  %v7535_v62 = vadd.f32 %v17773_v63, %v6064_v48  ;;  %v6066_v38 = vmul.f32 %v11936_v55, %v17686_v37  ;;  %11957 = vpow2.f32 %v9221_v5  ;;  %19711 = vst [vmem:[#allocation8_spill] sm:$0xff] %v17859_v23  ;;  %v17861_v29 = vpop.f32.mrb[27].mxu0  ;;  %v17867_v63 = vadd.f32 %v19713_v41, %v17297_v31 }
 0x548   : > { %19712 = vst [vmem:[#allocation31_spill] sm:$0xff] %v17861_v29  ;;  %v11940_v15 = vpop.eup %11939  ;;  %v6079_v16 = vmul.f32 %v11938_v13, %v17690_v46  ;;  %11959 = vrcp.f32 %v4623_v43  ;;  %v9253_v55 = vmul.f32 -1.442695, %v17843_v49  ;;  %v9266_v13 = vmul.f32 -1.442695, %v17847_v2 }
 0x549   : > { %v11942_v37 = vpop.eup %11941  ;;  %v7607_v5 = vadd.f32 %v17783_v32, %v6066_v38  ;;  %v4625_v48 = vadd.f32 1.0, %v11940_v15  ;;  %11961 = vpow2.f32 %v9234_v6  ;;  %v9268_v41 = vmul.f32 -1.442695, %v17851_v54 }
 0x54a   : > { %v11944_v34 = vpop.eup %11943  ;;  %v7500_v29 = vadd.f32 %v17804_v20, %v6079_v16  ;;  %v6081_v23 = vmul.f32 %v11942_v37, %v17695_v57  ;;  %11963 = vpow2.f32 %v9236_v18  ;;  %v17877_v32 = vmul.f32 -1.442695, %v17857_v11 }
 0x54b   : > { %v11946_v46 = vpop.eup %11945  ;;  %v6080_v43 = vmul.f32 %v11944_v34, %v17705_v58  ;;  %11965 = vrcp.f32 %v4625_v48  ;;  %v17881_v20 = vmul.f32 -1.442695, %v17867_v63  ;;  %v19714_v58 = vld [vmem:[#allocation12_spill] sm:$0xff] }
 0x54c   : > { %v11948_v6 = vpop.eup %11947  ;;  %v7572_v38 = vadd.f32 %v7571_v40, %v6081_v23  ;;  %v6082_v15 = vmul.f32 %v11946_v46, %v17711_v21  ;;  %11967 = vpow2.f32 %v9235_v7  ;;  %v17886_v37 = vadd.f32 %v19714_v58, %v17280_v59  ;;  %v19715_v21 = vld [vmem:[#allocation11_spill] sm:$0xff]  ;;  %v17893_v40 = vpop.f32.mrb[252].mxu1  ;;  %v19718_v46 = vld [vmem:[#allocation24_spill] sm:$0xff] }
 0x54d   : > { %v11950_v57 = vpop.eup %11949  ;;  %v7536_v18 = vadd.f32 %v7535_v62, %v6080_v43  ;;  %v6095_v16 = vmul.f32 %v11948_v6, %v17716_v24  ;;  %11969 = vpow2.f32 %v9237_v19  ;;  %v17891_v7 = vadd.f32 %v19715_v21, %v17287_v9  ;;  %19716 = vst [vmem:[#allocation41_spill] sm:$0xff] %v17893_v40  ;;  %v17895_v23 = vpop.f32.mrb[28].mxu0  ;;  %v19724_v21 = vld [vmem:[#allocation45_spill] sm:$0xff] }
 0x54e   : > { %v11952_v48 = vpop.eup %11951  ;;  %v7608_v34 = vadd.f32 %v7607_v5, %v6082_v15  ;;  %v6097_v28 = vmul.f32 %v11950_v57, %v17721_v3  ;;  %11971 = vpow2.f32 %v9250_v26  ;;  %19717 = vst [vmem:[#allocation9_spill] sm:$0xff] %v17895_v23  ;;  %v17900_v43 = vadd.f32 %v19718_v46, %v17294_v36  ;;  %v17902_v5 = vpop.f32.mrb[253].mxu1  ;;  %v19722_v57 = vld [vmem:[#allocation44_spill] sm:$0xff] }
 0x54f   : > { %v11954_v62 = vpop.eup %11953  ;;  %v7501_v24 = vadd.f32 %v7500_v29, %v6095_v16  ;;  %v6096_v19 = vmul.f32 %v11952_v48, %v17727_v1  ;;  %11973 = vpow2.f32 %v9252_v51  ;;  %19720 = vst [vmem:[#allocation27_spill] sm:$0xff] %v17902_v5  ;;  %v17904_v3 = vpop.f32.mrb[29].mxu0  ;;  %v17908_v58 = vadd.f32 %v19722_v57, %v17297_v31  ;;  %v19726_v57 = vld [vmem:[#allocation74_spill] sm:$0xff] }
 0x550   : > { %19719 = vst [vmem:[#allocation26_spill] sm:$0xff] %v17900_v43  ;;  %19721 = vst [vmem:[#allocation28_spill] sm:$0xff] %v17904_v3  ;;  %v11956_v26 = vpop.eup %11955  ;;  %v7573_v6 = vadd.f32 %v7572_v38, %v6097_v28  ;;  %v4624_v15 = vadd.f32 1.0, %v11954_v62  ;;  %11975 = vpow2.f32 %v9251_v10  ;;  %v2737_v29 = vpop.f32.mrb[254].mxu1  ;;  %v17915_v46 = vadd.f32 %v19724_v21, %v17280_v59 }
 0x551   : > { %19723 = vst [vmem:[#allocation67_spill] sm:$0xff] %v17908_v58  ;;  %v2928_v16 = vpop.f32.mrb[30].mxu0  ;;  %v11958_v1 = vpop.eup %11957  ;;  %v17910_v51 = vadd.f32 %v7536_v18, %v6096_v19  ;;  %v6098_v48 = vmul.f32 %v11956_v26, %v17745_v50  ;;  %11977 = vpow2.f32 %v9253_v55  ;;  %v17918_v62 = vmul.f32 -1.442695, %v17886_v37 }
 0x552   : > { %19725 = vst [vmem:[#allocation38_spill] sm:$0xff] %v17915_v46  ;;  %v2738_v3 = vpop.f32.mrb[255].mxu1  ;;  %v2929_v28 = vpop.f32.mrb[31].mxu0  ;;  %11979 = vrcp.f32 %v4624_v15  ;;  %v4626_v10 = vadd.f32 1.0, %v11958_v1  ;;  %v17922_v29 = vadd.f32 %v19726_v57, %v17287_v9  ;;  %v17928_v55 = vmul.f32 -1.442695, %v17891_v7 }
 0x553   : > { %v11960_v38 = vpop.eup %11959  ;;  %v17924_v19 = vadd.f32 %v7608_v34, %v6098_v48  ;;  %11981 = vpow2.f32 %v9266_v13  ;;  %v17931_v15 = vmul.f32 -1.442695, %v17900_v43  ;;  %v17934_v16 = vmul.f32 -1.442695, %v17908_v58 }
 0x554   : > { %19727 = vst [vmem:[#allocation39_spill] sm:$0xff] %v17922_v29  ;;  %v11962_v18 = vpop.eup %11961  ;;  %v6111_v50 = vmul.f32 %v11960_v38, %v17756_v8  ;;  %11983 = vrcp.f32 %v4626_v10  ;;  %v17939_v8 = vmul.f32 -1.442695, %v17915_v46  ;;  %v17943_v28 = vmul.f32 -1.442695, %v17922_v29  ;;  %v19728_v38 = vld [vmem:[#allocation75_spill] sm:$0xff] }
 0x555   : > { %v11964_v3 = vpop.eup %11963  ;;  %v4639_v26 = vadd.f32 1.0, %v11962_v18  ;;  %11985 = vpow2.f32 %v9268_v41  ;;  %v17947_v10 = vadd.f32 %v19728_v38, %v17294_v36  ;;  %v19730_v18 = vld [vmem:[#allocation14_spill] sm:$0xff]  ;;  %v19734_v38 = vld [vmem:[#allocation68_spill] sm:$0xff] }
 0x556   : > { %v11966_v1 = vpop.eup %11965  ;;  %v17936_v21 = vadd.f32 %v7501_v24, %v6111_v50  ;;  %v4641_v34 = vadd.f32 1.0, %v11964_v3  ;;  %v17951_v41 = vadd.f32 %v19730_v18, %v17297_v31  ;;  %v19732_v50 = vld [vmem:[#allocation13_spill] sm:$0xff]  ;;  %v17962_v5 = vadd.f32 %v19734_v38, %v17287_v9  ;;  %v19736_v18 = vld [vmem:[#allocation10_spill] sm:$0xff] }
 0x557   : > { %v11968_v13 = vpop.eup %11967  ;;  %v6113_v48 = vmul.f32 %v11966_v1, %v17767_v60  ;;  %11987 = vrcp.f32 %v4639_v26  ;;  %19729 = vst [vmem:[#allocation69_spill] sm:$0xff] %v17947_v10  ;;  %v17955_v3 = vadd.f32 %v19732_v50, %v17280_v59  ;;  %v17966_v23 = vadd.f32 %v19736_v18, %v17294_v36  ;;  %v19738_v50 = vld [vmem:[#allocation46_spill] sm:$0xff] }
 0x558   : > { %v11970_v57 = vpop.eup %11969  ;;  %11989 = vrcp.f32 %v4641_v34  ;;  %v4640_v24 = vadd.f32 1.0, %v11968_v13  ;;  %19731 = vst [vmem:[#allocation70_spill] sm:$0xff] %v17951_v41  ;;  %19735 = vst [vmem:[#allocation42_spill] sm:$0xff] %v17962_v5  ;;  %v17970_v40 = vadd.f32 %v19738_v50, %v17297_v31  ;;  %v17980_v18 = vmul.f32 -1.442695, %v17951_v41 }
 0x559   : > { %19733 = vst [vmem:[#allocation40_spill] sm:$0xff] %v17955_v3  ;;  %v11972_v60 = vpop.eup %11971  ;;  %v17957_v26 = vadd.f32 %v7573_v6, %v6113_v48  ;;  %v4642_v1 = vadd.f32 1.0, %v11970_v57  ;;  %11991 = vpow2.f32 %v17877_v32  ;;  %19737 = vst [vmem:[#allocation43_spill] sm:$0xff] %v17966_v23  ;;  %v17973_v32 = vmul.f32 -1.442695, %v17947_v10  ;;  %v19740_v57 = vld [vmem:[#allocation16_spill] sm:$0xff] }
 0x55a   : > { %v11974_v34 = vpop.eup %11973  ;;  %11993 = vrcp.f32 %v4640_v24  ;;  %v4655_v13 = vadd.f32 1.0, %v11972_v60  ;;  %19739 = vst [vmem:[#allocation3_spill] sm:$0xff] %v17970_v40  ;;  %v17977_v38 = vadd.f32 %v19740_v57, %v17280_v59  ;;  %v17984_v50 = vadd.f32 %v19742_v12, %v17287_v9 }
 0x55b   : > { %v11976_v6 = vpop.eup %11975  ;;  %11995 = vrcp.f32 %v4642_v1  ;;  %v4657_v48 = vadd.f32 1.0, %v11974_v34  ;;  %v17987_v34 = vmul.f32 -1.442695, %v17955_v3  ;;  %v17990_v10 = vmul.f32 -1.442695, %v17962_v5  ;;  %v19744_v3 = vld [vmem:[#allocation49_spill] sm:$0xff] }
 0x55c   : > { %19741 = vst [vmem:[#allocation12_spill] sm:$0xff] %v17977_v38  ;;  %v11978_v24 = vpop.eup %11977  ;;  %11997 = vrcp.f32 %v4655_v13  ;;  %v4656_v60 = vadd.f32 1.0, %v11976_v6  ;;  %19743 = vst [vmem:[#allocation11_spill] sm:$0xff] %v17984_v50  ;;  %v17994_v6 = vmul.f32 -1.442695, %v17966_v23  ;;  %v18004_v5 = vadd.f32 %v19744_v3, %v17294_v36  ;;  %v19745_v23 = vld [vmem:[#allocation50_spill] sm:$0xff] }
 0x55d   : > { %v11980_v27 = vpop.eup %11979  ;;  %11999 = vrcp.f32 %v4657_v48  ;;  %v4658_v1 = vadd.f32 1.0, %v11978_v24  ;;  %v17997_v41 = vmul.f32 -1.442695, %v17970_v40  ;;  %v18000_v24 = vmul.f32 -1.442695, %v17977_v38  ;;  %v9562_v40 = vpop.f32.mrb[0].mxu1 }
 0x55e   : > { %v11982_v57 = vpop.eup %11981  ;;  %v6112_v13 = vmul.f32 %v11980_v27, %v17790_v22  ;;  %12001 = vrcp.f32 %v4656_v60  ;;  %v18010_v60 = vmul.f32 -1.442695, %v17984_v50  ;;  %v18014_v46 = vadd.f32 %v19745_v23, %v17297_v31 }
 0x55f   : > { %v11984_v12 = vpop.eup %11983  ;;  %12003 = vrcp.f32 %v4658_v1  ;;  %v4671_v48 = vadd.f32 1.0, %v11982_v57  ;;  %v9632_v1 = vpop.f32.mrb[32].mxu0  ;;  %v18018_v3 = vadd.f32 %v17518_v44, %v17280_v59  ;;  %v18028_v23 = vadd.f32 %v17520_v25, %v17287_v9 }
 0x560   : > { %v11986_v29 = vpop.eup %11985  ;;  %v7538_v27 = vadd.f32 %v17910_v51, %v6112_v13  ;;  %v6114_v22 = vmul.f32 %v11984_v12, %v17794_v53  ;;  %12005 = vpow2.f32 %v17881_v20  ;;  %v9563_v51 = vpop.f32.mrb[1].mxu1  ;;  %v18042_v25 = vadd.f32 %v17524_v61, %v17294_v36 }
 0x561   : > { %v11988_v57 = vpop.eup %11987  ;;  %12007 = vrcp.f32 %v4671_v48  ;;  %v4673_v38 = vadd.f32 1.0, %v11986_v29  ;;  %v9633_v53 = vpop.f32.mrb[33].mxu0  ;;  %v18023_v50 = vadd.f32 %v9563_v51, %v9562_v40 }
 0x562   : > { %v11990_v13 = vpop.eup %11989  ;;  %v7610_v20 = vadd.f32 %v17924_v19, %v6114_v22  ;;  %v6127_v12 = vmul.f32 %v11988_v57, %v17798_v4  ;;  %12009 = vpow2.f32 %v17918_v62  ;;  %v18030_v44 = vadd.f32 %v9633_v53, %v9632_v1 }
 0x563   : > { %v11992_v29 = vpop.eup %11991  ;;  %v6129_v48 = vmul.f32 %v11990_v13, %v17802_v39  ;;  %12011 = vrcp.f32 %v4673_v38  ;;  %v18035_v4 = vmul.f32 -1.442695, %v18004_v5  ;;  %v18049_v22 = vmul.f32 -1.442695, %v18018_v3  ;;  %v7939_v13 = vld [vmem:[%s18836_s5 + $0x588] sm:$0xff] }
 0x564   : > { %v11994_v58 = vpop.eup %11993  ;;  %v7503_v43 = vadd.f32 %v17936_v21, %v6127_v12  ;;  %v4672_v19 = vadd.f32 1.0, %v11992_v29  ;;  %12013 = vpow2.f32 %v17928_v55  ;;  %v18046_v55 = vmul.f32 -1.442695, %v18014_v46  ;;  %v7891_v12 = vld [vmem:[%s18836_s5 + $0x408] sm:$0xff] }
 0x565   : > { %v11996_v40 = vpop.eup %11995  ;;  %v7575_v62 = vadd.f32 %v17957_v26, %v6129_v48  ;;  %v6128_v39 = vmul.f32 %v11994_v58, %v17808_v35  ;;  %12015 = vpow2.f32 %v17931_v15  ;;  %v18054_v58 = vmul.f32 -1.442695, %v18028_v23 }
 0x566   : > { %v11998_v38 = vpop.eup %11997  ;;  %v6130_v21 = vmul.f32 %v11996_v40, %v17812_v30  ;;  %12017 = vrcp.f32 %v4672_v19  ;;  %v18060_v57 = vadd.f32 %v17526_v42, %v17297_v31  ;;  %v7938_v42 = vld [vmem:[%s18836_s5 + $0x580] sm:$0xff]  ;;  %v7923_v40 = vld [vmem:[%s18836_s5 + $0x508] sm:$0xff] }
 0x567   : > { %v12000_v1 = vpop.eup %11999  ;;  %v7539_v26 = vadd.f32 %v7538_v27, %v6128_v39  ;;  %v6143_v35 = vmul.f32 %v11998_v38, %v17816_v14  ;;  %12019 = vpow2.f32 %v17934_v16  ;;  %v18065_v14 = vmul.f32 -1.442695, %v18042_v25  ;;  %v7906_v16 = vld [vmem:[%s18836_s5 + $0x480] sm:$0xff] }
 0x568   : > { %v12002_v61 = vpop.eup %12001  ;;  %v7611_v15 = vadd.f32 %v7610_v20, %v6130_v21  ;;  %v6145_v30 = vmul.f32 %v12000_v1, %v17821_v45  ;;  %12021 = vpow2.f32 %v17939_v8  ;;  %v7907_v45 = vld [vmem:[%s18836_s5 + $0x488] sm:$0xff]  ;;  %v7890_v20 = vld [vmem:[%s18836_s5 + $0x400] sm:$0xff] }
 0x569   : > { %v12004_v51 = vpop.eup %12003  ;;  %v7504_v53 = vadd.f32 %v7503_v43, %v6143_v35  ;;  %v6144_v27 = vmul.f32 %v12002_v61, %v17835_v17  ;;  %12023 = vpow2.f32 %v17943_v28  ;;  %v9974_v28 = vpack.c.bf16 %v7907_v45, %v7906_v16  ;;  %v7908_v61 = vld [vmem:[%s18836_s5 + $0x490] sm:$0xff]  ;;  %v7941_v16 = vld [vmem:[%s18836_s5 + $0x598] sm:$0xff] }
 0x56a   : > { %v12006_v43 = vpop.eup %12005  ;;  %v7576_v8 = vadd.f32 %v7575_v62, %v6145_v30  ;;  %v6146_v17 = vmul.f32 %v12004_v51, %v17843_v49  ;;  %12025 = vpow2.f32 %v17973_v32  ;;  %v10006_v49 = vpack.c.bf16 %v7939_v13, %v7938_v42  ;;  %v7922_v32 = vld [vmem:[%s18836_s5 + $0x500] sm:$0xff]  ;;  %v7892_v45 = vld [vmem:[%s18836_s5 + $0x410] sm:$0xff]  ;;  %v7893_v42 = vld [vmem:[%s18836_s5 + $0x418] sm:$0xff] }
 0x56b   : > { %v12008_v29 = vpop.eup %12007  ;;  %v18087_v48 = vadd.f32 %v7539_v26, %v6144_v27  ;;  %v4674_v19 = vadd.f32 1.0, %v12006_v43  ;;  %12027 = vpow2.f32 %v17980_v18  ;;  %9975 = vmatprep.subr.bf16.mxu0 %v9974_v28  ;;  %v9976_v21 = vpack.c.bf16 %v7891_v12, %v7890_v20  ;;  %v7925_v28 = vld [vmem:[%s18836_s5 + $0x518] sm:$0xff] }
 0x56c   : > { %v12010_v62 = vpop.eup %12009  ;;  %v18096_v39 = vadd.f32 %v7611_v15, %v6146_v17  ;;  %v6159_v38 = vmul.f32 %v12008_v29, %v17847_v2  ;;  %12029 = vpow2.f32 %v17987_v34  ;;  %v18101_v26 = vmul.f32 -1.442695, %v18060_v57  ;;  %10007 = vmatprep.subr.bf16.mxu1 %v10006_v49  ;;  %v7909_v2 = vld [vmem:[%s18836_s5 + $0x498] sm:$0xff]  ;;  %v7940_v34 = vld [vmem:[%s18836_s5 + $0x590] sm:$0xff] }
 0x56d   : > { %v12012_v1 = vpop.eup %12011  ;;  %12031 = vrcp.f32 %v4674_v19  ;;  %v4687_v18 = vadd.f32 1.0, %v12010_v62  ;;  %v10008_v35 = vpack.c.bf16 %v7923_v40, %v7922_v32  ;;  %9977 = vmatpush3.bf16.msra.mxu0 %v9976_v21  ;;  %v9978_v27 = vpack.c.bf16 %v7909_v2, %v7908_v61  ;;  %v7924_v17 = vld [vmem:[%s18836_s5 + $0x510] sm:$0xff]  ;;  %v7943_v21 = vld [vmem:[%s18836_s5 + $0x5a8] sm:$0xff] }
 0x56e   : > { %v12014_v15 = vpop.eup %12013  ;;  %v18112_v30 = vadd.f32 %v7504_v53, %v6159_v38  ;;  %v6161_v51 = vmul.f32 %v12012_v1, %v17851_v54  ;;  %12033 = vpow2.f32 %v17990_v10  ;;  %v10010_v54 = vpack.c.bf16 %v7941_v16, %v7940_v34  ;;  %v7894_v1 = vld [vmem:[%s18836_s5 + $0x420] sm:$0xff] }
 0x56f   : > { %v12016_v53 = vpop.eup %12015  ;;  %12035 = vrcp.f32 %v4687_v18  ;;  %v4689_v43 = vadd.f32 1.0, %v12014_v15  ;;  %10009 = vmatpush3.bf16.msra.mxu1 %v10008_v35  ;;  %v9980_v10 = vpack.c.bf16 %v7893_v42, %v7892_v45  ;;  %9979 = vmatprep.subr.bf16.mxu0 %v9978_v27  ;;  %v10012_v29 = vpack.c.bf16 %v7925_v28, %v7924_v17  ;;  %v7895_v18 = vld [vmem:[%s18836_s5 + $0x428] sm:$0xff]  ;;  %v7926_v34 = vld [vmem:[%s18836_s5 + $0x520] sm:$0xff] }
 0x570   : > { %v12018_v13 = vpop.eup %12017  ;;  %v18131_v20 = vadd.f32 %v7576_v8, %v6161_v51  ;;  %v4688_v12 = vadd.f32 1.0, %v12016_v53  ;;  %12037 = vpow2.f32 %v17994_v6  ;;  %v18137_v32 = vadd.f32 %v17530_v52, %v17280_v59  ;;  %10011 = vmatprep.subr.bf16.mxu1 %v10010_v54  ;;  %v7910_v8 = vld [vmem:[%s18836_s5 + $0x4a0] sm:$0xff]  ;;  %v7911_v6 = vld [vmem:[%s18836_s5 + $0x4a8] sm:$0xff]  ;;  %v7913_v54 = vld [vmem:[%s18836_s5 + $0x4b8] sm:$0xff] }
 0x571   : > { %v12020_v19 = vpop.eup %12019  ;;  %v6160_v49 = vmul.f32 %v12018_v13, %v17857_v11  ;;  %12039 = vrcp.f32 %v4689_v43  ;;  %v18141_v40 = vadd.f32 %v17532_v0, %v17287_v9  ;;  %v7942_v11 = vld [vmem:[%s18836_s5 + $0x5a0] sm:$0xff]  ;;  %v18154_v0 = vadd.f32 %v17536_v33, %v17294_v36  ;;  %9981 = vmatpush3.bf16.msra.mxu0 %v9980_v10  ;;  %v7927_v15 = vld [vmem:[%s18836_s5 + $0x528] sm:$0xff]  ;;  %v7912_v43 = vld [vmem:[%s18836_s5 + $0x4b0] sm:$0xff] }
 0x572   : > { %v12022_v62 = vpop.eup %12021  ;;  %12041 = vrcp.f32 %v4688_v12  ;;  %v4690_v52 = vadd.f32 1.0, %v12020_v19  ;;  %v9982_v38 = vpack.c.bf16 %v7911_v6, %v7910_v8  ;;  %v10014_v2 = vpack.c.bf16 %v7943_v21, %v7942_v11  ;;  %v7944_v10 = vld [vmem:[%s18836_s5 + $0x5b0] sm:$0xff]  ;;  %v7945_v12 = vld [vmem:[%s18836_s5 + $0x5b8] sm:$0xff] }
 0x573   : > { %v12024_v35 = vpop.eup %12023  ;;  %v18166_v61 = vadd.f32 %v18087_v48, %v6160_v49  ;;  %v4703_v33 = vadd.f32 1.0, %v12022_v62  ;;  %12043 = vpow2.f32 %v17997_v41  ;;  %10013 = vmatpush3.bf16.msra.mxu1 %v10012_v29  ;;  %v9984_v16 = vpack.c.bf16 %v7895_v18, %v7894_v1  ;;  %v7896_v29 = vld [vmem:[%s18836_s5 + $0x430] sm:$0xff]  ;;  %v7897_v19 = vld [vmem:[%s18836_s5 + $0x438] sm:$0xff]  ;;  %v8018_v18 = vld [vmem:[%s18837_s6] sm:$0x1] }
 0x574   : > { %v12026_v51 = vpop.eup %12025  ;;  %12045 = vrcp.f32 %v4690_v52  ;;  %v4705_v27 = vadd.f32 1.0, %v12024_v35  ;;  %9983 = vmatprep.subr.bf16.mxu0 %v9982_v38  ;;  %v10016_v48 = vpack.c.bf16 %v7927_v15, %v7926_v34  ;;  %v18176_v41 = vmul.f32 -1.442695, %v18137_v32  ;;  %10015 = vmatprep.subr.bf16.mxu1 %v10014_v2  ;;  %v7928_v62 = vld [vmem:[%s18836_s5 + $0x530] sm:$0xff]  ;;  %v7929_v52 = vld [vmem:[%s18836_s5 + $0x538] sm:$0xff] }
 0x575   : > { %v12028_v45 = vpop.eup %12027  ;;  %12047 = vrcp.f32 %v4703_v33  ;;  %v4704_v42 = vadd.f32 1.0, %v12026_v51  ;;  %v18180_v53 = vadd.f32 %v17541_v47, %v17297_v31  ;;  %v18192_v13 = vmul.f32 -1.442695, %v18141_v40  ;;  %9985 = vmatpush3.bf16.msra.mxu0 %v9984_v16  ;;  %v7915_v51 = vld [vmem:[%s18836_s5 + $0x4c8] sm:$0xff] }
 0x576   : > { %v12030_v17 = vpop.eup %12029  ;;  %12049 = vrcp.f32 %v4705_v27  ;;  %v4706_v28 = vadd.f32 1.0, %v12028_v45  ;;  %v9986_v47 = vpack.c.bf16 %v7913_v54, %v7912_v43  ;;  %v10018_v6 = vpack.c.bf16 %v7945_v12, %v7944_v10  ;;  %v7946_v27 = vld [vmem:[%s18836_s5 + $0x5c0] sm:$0xff]  ;;  %v7899_v54 = vld [vmem:[%s18836_s5 + $0x448] sm:$0xff] }
 0x577   : > { %v12032_v49 = vpop.eup %12031  ;;  %12051 = vrcp.f32 %v4704_v42  ;;  %v4719_v8 = vadd.f32 1.0, %v12030_v17  ;;  %10017 = vmatpush3.bf16.msra.mxu1 %v10016_v48  ;;  %v9988_v11 = vpack.c.bf16 %v7897_v19, %v7896_v29  ;;  %v18211_v1 = vmul.f32 -1.442695, %v18154_v0  ;;  %v7947_v42 = vld [vmem:[%s18836_s5 + $0x5c8] sm:$0xff]  ;;  %v7898_v43 = vld [vmem:[%s18836_s5 + $0x440] sm:$0xff] }
 0x578   : > { %v12034_v38 = vpop.eup %12033  ;;  %v6162_v21 = vmul.f32 %v12032_v49, %v17867_v63  ;;  %12053 = vrcp.f32 %v4706_v28  ;;  %9987 = vmatprep.subr.bf16.mxu0 %v9986_v47  ;;  %v10020_v35 = vpack.c.bf16 %v7929_v52, %v7928_v62  ;;  %v18217_v34 = vmul.f32 -1.442695, %v18180_v53  ;;  %10019 = vmatprep.subr.bf16.mxu1 %v10018_v6  ;;  %v7914_v63 = vld [vmem:[%s18836_s5 + $0x4c0] sm:$0xff]  ;;  %v7931_v28 = vld [vmem:[%s18836_s5 + $0x548] sm:$0xff] }
 0x579   : > { %v12036_v33 = vpop.eup %12035  ;;  %12055 = vrcp.f32 %v4719_v8  ;;  %v4721_v2 = vadd.f32 1.0, %v12034_v38  ;;  %v18221_v15 = vadd.f32 %v17563_v56, %v17280_v59  ;;  %9989 = vmatpush3.bf16.msra.mxu0 %v9988_v11  ;;  %v9990_v56 = vpack.c.bf16 %v7915_v51, %v7914_v63  ;;  %v7930_v17 = vld [vmem:[%s18836_s5 + $0x540] sm:$0xff]  ;;  %v19746_v8 = vld [vmem:[#allocation26_spill] sm:$0xff] }
 0x57a   : > { %v12038_v16 = vpop.eup %12037  ;;  %v7613_v48 = vadd.f32 %v18096_v39, %v6162_v21  ;;  %v6175_v45 = vmul.f32 %v12036_v33, %v17886_v37  ;;  %12057 = vpow2.f32 %v18000_v24  ;;  %v10022_v37 = vpack.c.bf16 %v7947_v42, %v7946_v27  ;;  %v7901_v33 = vld [vmem:[%s18836_s5 + $0x458] sm:$0xff]  ;;  %v19747_v63 = vld [vmem:[#allocation67_spill] sm:$0xff] }
 0x57b   : > { %v12040_v10 = vpop.eup %12039  ;;  %12059 = vrcp.f32 %v4721_v2  ;;  %v4720_v39 = vadd.f32 1.0, %v12038_v16  ;;  %10021 = vmatpush3.bf16.msra.mxu1 %v10020_v35  ;;  %v9992_v24 = vpack.c.bf16 %v7899_v54, %v7898_v43  ;;  %9991 = vmatprep.subr.bf16.mxu0 %v9990_v56  ;;  %v10024_v19 = vpack.c.bf16 %v7931_v28, %v7930_v17  ;;  %v7900_v35 = vld [vmem:[%s18836_s5 + $0x450] sm:$0xff]  ;;  %v19748_v42 = vld [vmem:[#allocation38_spill] sm:$0xff]  ;;  %v7918_v28 = vld [vmem:[%s18836_s5 + $0x4e0] sm:$0xff] }
 0x57c   : > { %v12042_v47 = vpop.eup %12041  ;;  %v7506_v12 = vadd.f32 %v18112_v30, %v6175_v45  ;;  %v6177_v29 = vmul.f32 %v12040_v10, %v17891_v7  ;;  %12061 = vpow2.f32 %v18010_v60  ;;  %v18255_v11 = vmul.f32 -1.442695, %v18221_v15  ;;  %10023 = vmatprep.subr.bf16.mxu1 %v10022_v37  ;;  %v7916_v30 = vld [vmem:[%s18836_s5 + $0x4d0] sm:$0xff]  ;;  %v7917_v7 = vld [vmem:[%s18836_s5 + $0x4d8] sm:$0xff]  ;;  %v19749_v37 = vld [vmem:[#allocation39_spill] sm:$0xff] }
 0x57d   : > { %v12044_v49 = vpop.eup %12043  ;;  %v6176_v6 = vmul.f32 %v12042_v47, %v19746_v8  ;;  %12063 = vrcp.f32 %v4720_v39  ;;  %v8168_v62 = vadd.f32 %v18023_v50, %v8018_v18  ;;  %v7948_v60 = vld [vmem:[%s18836_s5 + $0x5d0] sm:$0xff]  ;;  %9993 = vmatpush3.bf16.msra.mxu0 %v9992_v24  ;;  %v9994_v50 = vpack.c.bf16 %v7917_v7, %v7916_v30  ;;  %v7949_v18 = vld [vmem:[%s18836_s5 + $0x5d8] sm:$0xff]  ;;  %v7919_v47 = vld [vmem:[%s18836_s5 + $0x4e8] sm:$0xff] }
 0x57e   : > { %v12046_v52 = vpop.eup %12045  ;;  %v7578_v38 = vadd.f32 %v18131_v20, %v6177_v29  ;;  %v4722_v21 = vadd.f32 1.0, %v12044_v49  ;;  %12065 = vpow2.f32 %v18035_v4  ;;  %v9597_v4 = vpop.f32.mrb[2].mxu1  ;;  %v10026_v27 = vpack.c.bf16 %v7949_v18, %v7948_v60  ;;  %v7932_v16 = vld [vmem:[%s18836_s5 + $0x550] sm:$0xff]  ;;  %v7933_v45 = vld [vmem:[%s18836_s5 + $0x558] sm:$0xff]  ;;  %v7950_v29 = vld [vmem:[%s18836_s5 + $0x5e0] sm:$0xff] }
 0x57f   : > { %v12048_v2 = vpop.eup %12047  ;;  %v7542_v20 = vadd.f32 %v18166_v61, %v6176_v6  ;;  %v6178_v51 = vmul.f32 %v12046_v52, %v19747_v63  ;;  %12067 = vpow2.f32 %v18046_v55  ;;  %10025 = vmatpush3.bf16.msra.mxu1 %v10024_v19  ;;  %v9598_v61 = vpop.f32.mrb[3].mxu1  ;;  %9995 = vmatprep.subr.bf16.mxu0 %v9994_v50  ;;  %v9996_v54 = vpack.c.bf16 %v7901_v33, %v7900_v35  ;;  %v19750_v49 = vld [vmem:[#allocation69_spill] sm:$0xff]  ;;  %v7951_v6 = vld [vmem:[%s18836_s5 + $0x5e8] sm:$0xff]  ;;  %v7902_v30 = vld [vmem:[%s18836_s5 + $0x460] sm:$0xff] }
 0x580   : > { %v12050_v56 = vpop.eup %12049  ;;  %v6191_v43 = vmul.f32 %v12048_v2, %v19748_v42  ;;  %12069 = vrcp.f32 %v4722_v21  ;;  %v10028_v10 = vpack.c.bf16 %v7933_v45, %v7932_v16  ;;  %v9599_v17 = vadd.f32 %v9598_v61, %v9597_v4  ;;  %10027 = vmatprep.subr.bf16.mxu1 %v10026_v27  ;;  %v7903_v7 = vld [vmem:[%s18836_s5 + $0x468] sm:$0xff]  ;;  %v19751_v52 = vld [vmem:[#allocation70_spill] sm:$0xff]  ;;  %v7934_v50 = vld [vmem:[%s18836_s5 + $0x560] sm:$0xff] }
 0x581   : > { %v12052_v55 = vpop.eup %12051  ;;  %v7614_v39 = vadd.f32 %v7613_v48, %v6178_v51  ;;  %v6193_v24 = vmul.f32 %v12050_v56, %v19749_v37  ;;  %12071 = vpow2.f32 %v18049_v22  ;;  %9997 = vmatpush3.bf16.msra.mxu0 %v9996_v54  ;;  %v9998_v22 = vpack.c.bf16 %v7919_v47, %v7918_v28  ;;  %v7935_v18 = vld [vmem:[%s18836_s5 + $0x568] sm:$0xff]  ;;  %v7920_v27 = vld [vmem:[%s18836_s5 + $0x4f0] sm:$0xff]  ;;  %v19753_v56 = vld [vmem:[#allocation42_spill] sm:$0xff] }
 0x582   : > { %v12054_v19 = vpop.eup %12053  ;;  %v7507_v48 = vadd.f32 %v7506_v12, %v6191_v43  ;;  %v6192_v8 = vmul.f32 %v12052_v55, %v19750_v49  ;;  %12073 = vpow2.f32 %v18054_v58  ;;  %v8238_v58 = vadd.f32 %v9599_v17, %v8168_v62  ;;  %v19752_v2 = vld [vmem:[#allocation40_spill] sm:$0xff]  ;;  %v7953_v43 = vld [vmem:[%s18836_s5 + $0x5f8] sm:$0xff]  ;;  %v7904_v61 = vld [vmem:[%s18836_s5 + $0x470] sm:$0xff] }
 0x583   : > { %v12056_v60 = vpop.eup %12055  ;;  %v7579_v12 = vadd.f32 %v7578_v38, %v6193_v24  ;;  %v6194_v21 = vmul.f32 %v12054_v19, %v19751_v52  ;;  %12075 = vpow2.f32 %v18065_v14  ;;  %10029 = vmatpush3.bf16.msra.mxu1 %v10028_v10  ;;  %9999 = vmatprep.subr.bf16.mxu0 %v9998_v22  ;;  %v10030_v38 = vpack.c.bf16 %v7951_v6, %v7950_v29  ;;  %v7905_v54 = vld [vmem:[%s18836_s5 + $0x478] sm:$0xff]  ;;  %v7936_v37 = vld [vmem:[%s18836_s5 + $0x570] sm:$0xff]  ;;  %v19754_v47 = vld [vmem:[#allocation43_spill] sm:$0xff] }
 0x584   : > { %v12058_v35 = vpop.eup %12057  ;;  %v7543_v33 = vadd.f32 %v7542_v20, %v6192_v8  ;;  %v6207_v63 = vmul.f32 %v12056_v60, %v19752_v2  ;;  %12077 = vpow2.f32 %v18101_v26  ;;  %v10000_v4 = vpack.c.bf16 %v7903_v7, %v7902_v30  ;;  %v7921_v20 = vld [vmem:[%s18836_s5 + $0x4f8] sm:$0xff]  ;;  %v7952_v26 = vld [vmem:[%s18836_s5 + $0x5f0] sm:$0xff]  ;;  %v7970_v22 = vld [vmem:[%s18836_s5 + $0x680] sm:$0xff] }
 0x585   : > { %v12060_v51 = vpop.eup %12059  ;;  %v7615_v14 = vadd.f32 %v7614_v39, %v6194_v21  ;;  %v4735_v62 = vadd.f32 1.0, %v12058_v35  ;;  %12079 = vpow2.f32 %v18176_v41  ;;  %10031 = vmatprep.subr.bf16.mxu1 %v10030_v38  ;;  %v10032_v41 = vpack.c.bf16 %v7935_v18, %v7934_v50  ;;  %v7937_v24 = vld [vmem:[%s18836_s5 + $0x578] sm:$0xff]  ;;  %v7971_v6 = vld [vmem:[%s18836_s5 + $0x688] sm:$0xff]  ;;  %v19755_v18 = vld [vmem:[#allocation3_spill] sm:$0xff] }
 0x586   : > { %v12062_v16 = vpop.eup %12061  ;;  %v18330_v45 = vadd.f32 %v7507_v48, %v6207_v63  ;;  %v6209_v42 = vmul.f32 %v12060_v51, %v19753_v56  ;;  %12081 = vpow2.f32 %v18192_v13  ;;  %10001 = vmatpush3.bf16.msra.mxu0 %v10000_v4  ;;  %v10002_v39 = vpack.c.bf16 %v7921_v20, %v7920_v27  ;;  %v8003_v21 = vld [vmem:[%s18836_s5 + $0x788] sm:$0xff]  ;;  %v19759_v56 = vld [vmem:[#allocation55_spill] sm:$0xff] }
 0x587   : > { %v12064_v10 = vpop.eup %12063  ;;  %12083 = vrcp.f32 %v4735_v62  ;;  %v4737_v55 = vadd.f32 1.0, %v12062_v16  ;;  %v10034_v13 = vpack.c.bf16 %v7953_v43, %v7952_v26  ;;  %10033 = vmatpush3.bf16.msra.mxu1 %v10032_v41  ;;  %v10004_v19 = vpack.c.bf16 %v7905_v54, %v7904_v61  ;;  %v19757_v62 = vld [vmem:[#allocation15_spill] sm:$0xff]  ;;  %v19758_v26 = vld [vmem:[#allocation54_spill] sm:$0xff] }
 0x588   : > { %v12066_v17 = vpop.eup %12065  ;;  %v18349_v28 = vadd.f32 %v7579_v12, %v6209_v42  ;;  %v6208_v29 = vmul.f32 %v12064_v10, %v19754_v47  ;;  %12085 = vpow2.f32 %v18211_v1  ;;  %10003 = vmatprep.subr.bf16.mxu0 %v10002_v39  ;;  %v10036_v8 = vpack.c.bf16 %v7937_v24, %v7936_v37  ;;  %v8002_v1 = vld [vmem:[%s18836_s5 + $0x780] sm:$0xff]  ;;  %v19760_v39 = vld [vmem:[#allocation56_spill] sm:$0xff] }
 0x589   : > { %v12068_v48 = vpop.eup %12067  ;;  %12087 = vrcp.f32 %v4737_v55  ;;  %v4736_v49 = vadd.f32 1.0, %v12066_v17  ;;  %10035 = vmatprep.subr.bf16.mxu1 %v10034_v13  ;;  %v18363_v30 = vadd.f32 %v18030_v44, %v8238_v58  ;;  %v10038_v52 = vpack.c.bf16 %v7971_v6, %v7970_v22  ;;  %v19756_v58 = vld [vmem:[#allocation53_spill] sm:$0xff]  ;;  %v19761_v24 = vld [vmem:[#allocation12_spill] sm:$0xff] }
 0x58a   : > { %v12070_v7 = vpop.eup %12069  ;;  %v18365_v60 = vadd.f32 %v7543_v33, %v6208_v29  ;;  %v4738_v12 = vadd.f32 1.0, %v12068_v48  ;;  %12089 = vpow2.f32 %v18217_v34  ;;  %10005 = vmatpush3.bf16.msra.mxu0 %v10004_v19  ;;  %v10070_v2 = vpack.c.bf16 %v8003_v21, %v8002_v1  ;;  %v19763_v22 = vld [vmem:[#allocation17_spill] sm:$0xff]  ;;  %v19765_v21 = vld [vmem:[#allocation72_spill] sm:$0xff] }
 0x58b   : > { %v12072_v50 = vpop.eup %12071  ;;  %v6210_v35 = vmul.f32 %v12070_v7, %v19755_v18  ;;  %12091 = vrcp.f32 %v4736_v49  ;;  %v18374_v33 = vadd.f32 %v19756_v58, %v17287_v9  ;;  %10037 = vmatpush3.bf16.msra.mxu1 %v10036_v8  ;;  %10039 = vmatprep.subr.bf16.mxu0 %v10038_v52  ;;  %v18379_v4 = vadd.f32 %v19757_v62, %v17294_v36  ;;  %v19762_v49 = vld [vmem:[#allocation71_spill] sm:$0xff] }
 0x58c   : > { %v12074_v63 = vpop.eup %12073  ;;  %12093 = vrcp.f32 %v4738_v12  ;;  %v4751_v44 = vadd.f32 1.0, %v12072_v50  ;;  %10071 = vmatprep.subr.bf16.mxu1 %v10070_v2  ;;  %v18383_v16 = vadd.f32 %v19758_v26, %v17297_v31  ;;  %v18387_v42 = vadd.f32 %v19759_v56, %v17280_v59  ;;  %v19764_v12 = vld [vmem:[#allocation11_spill] sm:$0xff] }
 0x58d   : > { %v12076_v34 = vpop.eup %12075  ;;  %v7616_v38 = vadd.f32 %v7615_v14, %v6210_v35  ;;  %v4753_v51 = vadd.f32 1.0, %v12074_v63  ;;  %12095 = vpow2.f32 %v18255_v11  ;;  %v9380_v61 = vmul.f32 -1.442695, %v18374_v33  ;;  %v19766_v63 = vld [vmem:[#allocation18_spill] sm:$0xff] }
 0x58e   : > { %v12078_v27 = vpop.eup %12077  ;;  %12097 = vrcp.f32 %v4751_v44  ;;  %v4752_v20 = vadd.f32 1.0, %v12076_v34  ;;  %v9379_v55 = vmul.f32 -1.442695, %v18379_v4  ;;  %v18393_v13 = vadd.f32 %v19760_v39, %v17287_v9 }
 0x58f   : > { %v12080_v14 = vpop.eup %12079  ;;  %12099 = vrcp.f32 %v4753_v51  ;;  %v4754_v41 = vadd.f32 1.0, %v12078_v27  ;;  %v9381_v47 = vmul.f32 -1.442695, %v18383_v16  ;;  %v9394_v29 = vmul.f32 -1.442695, %v18387_v42  ;;  %v19767_v51 = vld [vmem:[#allocation73_spill] sm:$0xff] }
 0x590   : > { %v12082_v11 = vpop.eup %12081  ;;  %12101 = vrcp.f32 %v4752_v20  ;;  %v4767_v43 = vadd.f32 1.0, %v12080_v14  ;;  %v18400_v8 = vadd.f32 %v19762_v49, %v17294_v36  ;;  %v18404_v6 = vadd.f32 %v19763_v22, %v17297_v31  ;;  %v9667_v49 = vpop.f32.mrb[4].mxu1 }
 0x591   : > { %v12084_v54 = vpop.eup %12083  ;;  %12103 = vrcp.f32 %v4754_v41  ;;  %v4769_v10 = vadd.f32 1.0, %v12082_v11  ;;  %v18410_v50 = vadd.f32 %v19765_v21, %v17280_v59  ;;  %v9396_v2 = vmul.f32 -1.442695, %v18393_v13 }
 0x592   : > { %v12086_v37 = vpop.eup %12085  ;;  %v6223_v17 = vmul.f32 %v12084_v54, %v19761_v24  ;;  %12105 = vrcp.f32 %v4767_v43  ;;  %v18415_v44 = vadd.f32 %v19766_v63, %v17287_v9  ;;  %v18421_v62 = vadd.f32 %v19767_v51, %v17294_v36  ;;  %v19768_v54 = vld [vmem:[#allocation32_spill] sm:$0xff] }
 0x593   : > { %v12088_v19 = vpop.eup %12087  ;;  %12107 = vrcp.f32 %v4769_v10  ;;  %v4768_v48 = vadd.f32 1.0, %v12086_v37  ;;  %v9395_v26 = vmul.f32 -1.442695, %v18400_v8  ;;  %v9397_v56 = vmul.f32 -1.442695, %v18404_v6 }
 0x594   : > { %v12090_v1 = vpop.eup %12089  ;;  %v7509_v7 = vadd.f32 %v18330_v45, %v6223_v17  ;;  %v6225_v52 = vmul.f32 %v12088_v19, %v19764_v12  ;;  %12109 = vpow2.f32 %v9380_v61  ;;  %v9412_v39 = vmul.f32 -1.442695, %v18415_v44  ;;  %v9668_v12 = vpop.f32.mrb[5].mxu1 }
 0x595   : > { %v12092_v18 = vpop.eup %12091  ;;  %12111 = vrcp.f32 %v4768_v48  ;;  %v4770_v35 = vadd.f32 1.0, %v12090_v1 }
 0x596   : > { %v12094_v58 = vpop.eup %12093  ;;  %v7581_v34 = vadd.f32 %v18349_v28, %v6225_v52  ;;  %v6224_v45 = vmul.f32 %v12092_v18, %v18004_v5  ;;  %12113 = vpow2.f32 %v9379_v55  ;;  %v9410_v5 = vmul.f32 -1.442695, %v18410_v50 }
 0x597   : > { %v12096_v27 = vpop.eup %12095  ;;  %v6226_v20 = vmul.f32 %v12094_v58, %v18014_v46  ;;  %12115 = vrcp.f32 %v4770_v35  ;;  %v18431_v46 = vadd.f32 %v19768_v54, %v17297_v31 }
 0x598   : > { %v12098_v14 = vpop.eup %12097  ;;  %v7545_v41 = vadd.f32 %v18365_v60, %v6224_v45  ;;  %v4783_v11 = vadd.f32 1.0, %v12096_v27  ;;  %12117 = vpow2.f32 %v9381_v47  ;;  %v9411_v60 = vmul.f32 -1.442695, %v18421_v62 }
 0x599   : > { %v12100_v28 = vpop.eup %12099  ;;  %v7617_v43 = vadd.f32 %v7616_v38, %v6226_v20  ;;  %v6239_v61 = vmul.f32 %v12098_v14, %v18018_v3  ;;  %12119 = vpow2.f32 %v9394_v29  ;;  %v19769_v3 = vld [vmem:[#allocation33_spill] sm:$0xff] }
 0x59a   : > { %v12102_v10 = vpop.eup %12101  ;;  %v6241_v55 = vmul.f32 %v12100_v28, %v18028_v23  ;;  %12121 = vrcp.f32 %v4783_v11  ;;  %v18439_v38 = vadd.f32 %v19769_v3, %v17280_v59  ;;  %v19770_v23 = vld [vmem:[#allocation34_spill] sm:$0xff] }
 0x59b   : > { %v12104_v37 = vpop.eup %12103  ;;  %v7510_v24 = vadd.f32 %v7509_v7, %v6239_v61  ;;  %v6240_v17 = vmul.f32 %v12102_v10, %v18042_v25  ;;  %12123 = vpow2.f32 %v9396_v2  ;;  %v18444_v48 = vadd.f32 %v19770_v23, %v17287_v9  ;;  %v19771_v10 = vld [vmem:[#allocation35_spill] sm:$0xff]  ;;  %v19774_v23 = vld [vmem:[#allocation4_spill] sm:$0xff] }
 0x59c   : > { %v12106_v47 = vpop.eup %12105  ;;  %v7582_v29 = vadd.f32 %v7581_v34, %v6241_v55  ;;  %v6242_v19 = vmul.f32 %v12104_v37, %v18060_v57  ;;  %12125 = vpow2.f32 %v9395_v26  ;;  %v9413_v25 = vmul.f32 -1.442695, %v18431_v46 }
 0x59d   : > { %v12108_v22 = vpop.eup %12107  ;;  %v7546_v1 = vadd.f32 %v7545_v41, %v6240_v17  ;;  %v6255_v7 = vmul.f32 %v12106_v47, %v18137_v32  ;;  %12127 = vpow2.f32 %v9397_v56  ;;  %v9669_v57 = vadd.f32 %v9668_v12, %v9667_v49  ;;  %v19772_v17 = vld [vmem:[#allocation57_spill] sm:$0xff] }
 0x59e   : > { %v12110_v52 = vpop.eup %12109  ;;  %v7618_v21 = vadd.f32 %v7617_v43, %v6242_v19  ;;  %v6257_v18 = vmul.f32 %v12108_v22, %v18141_v40  ;;  %12129 = vpow2.f32 %v9410_v5  ;;  %v9426_v58 = vmul.f32 -1.442695, %v18439_v38 }
 0x59f   : > { %v12112_v35 = vpop.eup %12111  ;;  %v7511_v2 = vadd.f32 %v7510_v24, %v6255_v7  ;;  %v4785_v63 = vadd.f32 1.0, %v12110_v52  ;;  %12131 = vpow2.f32 %v9412_v39  ;;  %v18452_v51 = vadd.f32 %v9669_v57, %v18363_v30  ;;  %v19775_v52 = vld [vmem:[#allocation48_spill] sm:$0xff] }
 0x5a0   : > { %v12114_v34 = vpop.eup %12113  ;;  %v7583_v45 = vadd.f32 %v7582_v29, %v6257_v18  ;;  %v6256_v32 = vmul.f32 %v12112_v35, %v18154_v0  ;;  %12133 = vpow2.f32 %v9411_v60  ;;  %v9428_v11 = vmul.f32 -1.442695, %v18444_v48 }
 0x5a1   : > { %v12116_v27 = vpop.eup %12115  ;;  %12135 = vrcp.f32 %v4785_v63  ;;  %v4784_v20 = vadd.f32 1.0, %v12114_v34  ;;  %v18463_v3 = vadd.f32 %v19772_v17, %v17297_v31  ;;  %v18471_v49 = vadd.f32 %v19774_v23, %v17287_v9 }
 0x5a2   : > { %v12118_v40 = vpop.eup %12117  ;;  %v7547_v26 = vadd.f32 %v7546_v1, %v6256_v32  ;;  %v6258_v56 = vmul.f32 %v12116_v27, %v18180_v53  ;;  %12137 = vpow2.f32 %v9413_v25  ;;  %v18459_v53 = vadd.f32 %v19771_v10, %v17294_v36  ;;  %v19776_v32 = vld [vmem:[#allocation58_spill] sm:$0xff] }
 0x5a3   : > { %v12120_v14 = vpop.eup %12119  ;;  %12139 = vrcp.f32 %v4784_v20  ;;  %v4786_v41 = vadd.f32 1.0, %v12118_v40  ;;  %v9429_v35 = vmul.f32 -1.442695, %v18463_v3  ;;  %v9444_v34 = vmul.f32 -1.442695, %v18471_v49 }
 0x5a4   : > { %v12122_v5 = vpop.eup %12121  ;;  %v7619_v28 = vadd.f32 %v7618_v21, %v6258_v56  ;;  %v4799_v0 = vadd.f32 1.0, %v12120_v14  ;;  %12141 = vpow2.f32 %v9426_v58  ;;  %v9427_v7 = vmul.f32 -1.442695, %v18459_v53 }
 0x5a5   : > { %v12124_v43 = vpop.eup %12123  ;;  %v6271_v30 = vmul.f32 %v12122_v5, %v18221_v15  ;;  %12143 = vrcp.f32 %v4786_v41  ;;  %v19773_v15 = vld [vmem:[#allocation47_spill] sm:$0xff]  ;;  %v18476_v21 = vadd.f32 %v19775_v52, %v17294_v36  ;;  %v18484_v27 = vadd.f32 %v19776_v32, %v17297_v31 }
 0x5a6   : > { %v12126_v61 = vpop.eup %12125  ;;  %12145 = vrcp.f32 %v4799_v0  ;;  %v4801_v54 = vadd.f32 1.0, %v12124_v43  ;;  %v18467_v47 = vadd.f32 %v19773_v15, %v17280_v59  ;;  %v19778_v0 = vld [vmem:[#allocation36_spill] sm:$0xff] }
 0x5a7   : > { %v12128_v55 = vpop.eup %12127  ;;  %v7512_v39 = vadd.f32 %v7511_v2, %v6271_v30  ;;  %v4800_v60 = vadd.f32 1.0, %v12126_v61  ;;  %12147 = vpow2.f32 %v9428_v11  ;;  %v9443_v5 = vmul.f32 -1.442695, %v18476_v21 }
 0x5a8   : > { %v12130_v37 = vpop.eup %12129  ;;  %12149 = vrcp.f32 %v4801_v54  ;;  %v4802_v24 = vadd.f32 1.0, %v12128_v55  ;;  %v9442_v2 = vmul.f32 -1.442695, %v18467_v47  ;;  %v18494_v43 = vadd.f32 %v19778_v0, %v17287_v9 }
 0x5a9   : > { %v12132_v29 = vpop.eup %12131  ;;  %12151 = vrcp.f32 %v4800_v60  ;;  %v4815_v19 = vadd.f32 1.0, %v12130_v37  ;;  %v9445_v60 = vmul.f32 -1.442695, %v18484_v27  ;;  %v19780_v37 = vld [vmem:[#allocation5_spill] sm:$0xff] }
 0x5aa   : > { %v12134_v22 = vpop.eup %12133  ;;  %12153 = vrcp.f32 %v4802_v24  ;;  %v4817_v1 = vadd.f32 1.0, %v12132_v29  ;;  %v18505_v24 = vadd.f32 %v19780_v37, %v17297_v31 }
 0x5ab   : > { %v12136_v25 = vpop.eup %12135  ;;  %12155 = vrcp.f32 %v4815_v19  ;;  %v4816_v12 = vadd.f32 1.0, %v12134_v22 }
 0x5ac   : > { %v12138_v18 = vpop.eup %12137  ;;  %v6273_v57 = vmul.f32 %v12136_v25, %v18374_v33  ;;  %12157 = vrcp.f32 %v4817_v1  ;;  %v19777_v33 = vld [vmem:[#allocation59_spill] sm:$0xff]  ;;  %v19781_v25 = vld [vmem:[#allocation62_spill] sm:$0xff] }
 0x5ad   : > { %v12140_v63 = vpop.eup %12139  ;;  %12159 = vrcp.f32 %v4816_v12  ;;  %v4818_v58 = vadd.f32 1.0, %v12138_v18  ;;  %v18489_v14 = vadd.f32 %v19777_v33, %v17280_v59 }
 0x5ae   : > { %v12142_v20 = vpop.eup %12141  ;;  %v7584_v40 = vadd.f32 %v7583_v45, %v6273_v57  ;;  %v6272_v56 = vmul.f32 %v12140_v63, %v18379_v4  ;;  %12161 = vpow2.f32 %v9427_v7  ;;  %v19779_v4 = vld [vmem:[#allocation19_spill] sm:$0xff] }
 0x5af   : > { %v12144_v41 = vpop.eup %12143  ;;  %12163 = vrcp.f32 %v4818_v58  ;;  %v4831_v11 = vadd.f32 1.0, %v12142_v20  ;;  %v18499_v54 = vadd.f32 %v19779_v4, %v17294_v36 }
 0x5b0   : > { %v12146_v30 = vpop.eup %12145  ;;  %v7548_v61 = vadd.f32 %v7547_v26, %v6272_v56  ;;  %v6274_v45 = vmul.f32 %v12144_v41, %v18383_v16  ;;  %12165 = vpow2.f32 %v9429_v35  ;;  %v9458_v16 = vmul.f32 -1.442695, %v18489_v14  ;;  %v19783_v41 = vld [vmem:[#allocation64_spill] sm:$0xff] }
 0x5b1   : > { %v12148_v10 = vpop.eup %12147  ;;  %v6287_v55 = vmul.f32 %v12146_v30, %v18387_v42  ;;  %12167 = vrcp.f32 %v4831_v11  ;;  %v9460_v42 = vmul.f32 -1.442695, %v18494_v43  ;;  %v9459_v7 = vmul.f32 -1.442695, %v18499_v54 }
 0x5b2   : > { %v12150_v17 = vpop.eup %12149  ;;  %v7620_v15 = vadd.f32 %v7619_v28, %v6274_v45  ;;  %v4833_v26 = vadd.f32 1.0, %v12148_v10  ;;  %12169 = vpow2.f32 %v9442_v2  ;;  %v18514_v28 = vadd.f32 %v19781_v25, %v17280_v59 }
 0x5b3   : > { %v12152_v29 = vpop.eup %12151  ;;  %v7513_v19 = vadd.f32 %v7512_v39, %v6287_v55  ;;  %v6289_v23 = vmul.f32 %v12150_v17, %v18393_v13  ;;  %12171 = vpow2.f32 %v9444_v34  ;;  %v9461_v13 = vmul.f32 -1.442695, %v18505_v24 }
 0x5b4   : > { %v12154_v22 = vpop.eup %12153  ;;  %v6288_v1 = vmul.f32 %v12152_v29, %v18400_v8  ;;  %12173 = vrcp.f32 %v4833_v26  ;;  %v19782_v8 = vld [vmem:[#allocation63_spill] sm:$0xff]  ;;  %v18528_v11 = vadd.f32 %v19783_v41, %v17294_v36 }
 0x5b5   : > { %v12156_v12 = vpop.eup %12155  ;;  %v7585_v52 = vadd.f32 %v7584_v40, %v6289_v23  ;;  %v6290_v18 = vmul.f32 %v12154_v22, %v18404_v6  ;;  %12175 = vpow2.f32 %v9443_v5  ;;  %v18521_v2 = vadd.f32 %v19782_v8, %v17287_v9  ;;  %v19784_v23 = vld [vmem:[#allocation65_spill] sm:$0xff]  ;;  %v19788_v41 = vld [vmem:[#allocation31_spill] sm:$0xff] }
 0x5b6   : > { %v12158_v39 = vpop.eup %12157  ;;  %v7549_v57 = vadd.f32 %v7548_v61, %v6288_v1  ;;  %v6303_v35 = vmul.f32 %v12156_v12, %v18410_v50  ;;  %12177 = vpow2.f32 %v9445_v60  ;;  %v9474_v40 = vmul.f32 -1.442695, %v18514_v28  ;;  %v19785_v12 = vld [vmem:[#allocation66_spill] sm:$0xff] }
 0x5b7   : > { %v12160_v63 = vpop.eup %12159  ;;  %v7621_v58 = vadd.f32 %v7620_v15, %v6290_v18  ;;  %v6305_v34 = vmul.f32 %v12158_v39, %v18415_v44  ;;  %12179 = vpow2.f32 %v9458_v16  ;;  %v9476_v30 = vmul.f32 -1.442695, %v18521_v2 }
 0x5b8   : > { %v12162_v32 = vpop.eup %12161  ;;  %v7514_v20 = vadd.f32 %v7513_v19, %v6303_v35  ;;  %v6304_v6 = vmul.f32 %v12160_v63, %v18421_v62  ;;  %12181 = vpow2.f32 %v9460_v42  ;;  %v9475_v37 = vmul.f32 -1.442695, %v18528_v11 }
 0x5b9   : > { %v12164_v56 = vpop.eup %12163  ;;  %v7586_v33 = vadd.f32 %v7585_v52, %v6305_v34  ;;  %v4832_v50 = vadd.f32 1.0, %v12162_v32  ;;  %12183 = vpow2.f32 %v9459_v7  ;;  %v18541_v52 = vadd.f32 %v19785_v12, %v17280_v59  ;;  %v19787_v34 = vld [vmem:[#allocation8_spill] sm:$0xff] }
 0x5ba   : > { %v12166_v5 = vpop.eup %12165  ;;  %v7550_v0 = vadd.f32 %v7549_v57, %v6304_v6  ;;  %v6306_v44 = vmul.f32 %v12164_v56, %v18431_v46  ;;  %12185 = vpow2.f32 %v9461_v13  ;;  %v19786_v13 = vld [vmem:[#allocation25_spill] sm:$0xff]  ;;  %v18550_v32 = vadd.f32 %v19787_v34, %v17294_v36 }
 0x5bb   : > { %v12168_v61 = vpop.eup %12167  ;;  %12187 = vrcp.f32 %v4832_v50  ;;  %v4834_v62 = vadd.f32 1.0, %v12166_v5  ;;  %v18545_v39 = vadd.f32 %v19786_v13, %v17287_v9  ;;  %v18557_v5 = vadd.f32 %v19788_v41, %v17297_v31 }
 0x5bc   : > { %v12170_v45 = vpop.eup %12169  ;;  %v7622_v4 = vadd.f32 %v7621_v58, %v6306_v44  ;;  %v6319_v10 = vmul.f32 %v12168_v61, %v18439_v38  ;;  %12189 = vpow2.f32 %v9474_v40  ;;  %v18537_v38 = vadd.f32 %v19784_v23, %v17297_v31 }
 0x5bd   : > { %v12172_v55 = vpop.eup %12171  ;;  %12191 = vrcp.f32 %v4834_v62  ;;  %v4847_v60 = vadd.f32 1.0, %v12170_v45  ;;  %v9490_v40 = vmul.f32 -1.442695, %v18541_v52  ;;  %v9492_v50 = vmul.f32 -1.442695, %v18545_v39  ;;  %v19789_v62 = vld [vmem:[#allocation41_spill] sm:$0xff] }
 0x5be   : > { %v12174_v17 = vpop.eup %12173  ;;  %v7515_v15 = vadd.f32 %v7514_v20, %v6319_v10  ;;  %v4849_v26 = vadd.f32 1.0, %v12172_v55  ;;  %12193 = vpow2.f32 %v9476_v30  ;;  %v9477_v8 = vmul.f32 -1.442695, %v18537_v38 }
 0x5bf   : > { %v12176_v46 = vpop.eup %12175  ;;  %v6321_v16 = vmul.f32 %v12174_v17, %v18444_v48  ;;  %12195 = vrcp.f32 %v4847_v60  ;;  %v9491_v55 = vmul.f32 -1.442695, %v18550_v32  ;;  %v19790_v60 = vld [vmem:[#allocation9_spill] sm:$0xff] }
 0x5c0   : > { %v12178_v29 = vpop.eup %12177  ;;  %12197 = vrcp.f32 %v4849_v26  ;;  %v4848_v19 = vadd.f32 1.0, %v12176_v46 }
 0x5c1   : > { %v12180_v42 = vpop.eup %12179  ;;  %v7587_v22 = vadd.f32 %v7586_v33, %v6321_v16  ;;  %v4850_v1 = vadd.f32 1.0, %v12178_v29  ;;  %12199 = vpow2.f32 %v9475_v37  ;;  %v18567_v37 = vadd.f32 %v19790_v60, %v17287_v9 }
 0x5c2   : > { %v12182_v7 = vpop.eup %12181  ;;  %12201 = vrcp.f32 %v4848_v19  ;;  %v4863_v25 = vadd.f32 1.0, %v12180_v42  ;;  %v9493_v29 = vmul.f32 -1.442695, %v18557_v5  ;;  %v19792_v19 = vld [vmem:[#allocation28_spill] sm:$0xff] }
 0x5c3   : > { %v12184_v48 = vpop.eup %12183  ;;  %12203 = vrcp.f32 %v4850_v1  ;;  %v4865_v18 = vadd.f32 1.0, %v12182_v7  ;;  %v18578_v23 = vadd.f32 %v19792_v19, %v17297_v31 }
 0x5c4   : > { %v12186_v57 = vpop.eup %12185  ;;  %12205 = vrcp.f32 %v4863_v25  ;;  %v4864_v35 = vadd.f32 1.0, %v12184_v48 }
 0x5c5   : > { %v12188_v63 = vpop.eup %12187  ;;  %12207 = vrcp.f32 %v4865_v18  ;;  %v4866_v58 = vadd.f32 1.0, %v12186_v57  ;;  %v9509_v13 = vmul.f32 -1.442695, %v18578_v23 }
 0x5c6   : > { %v12190_v20 = vpop.eup %12189  ;;  %v6320_v6 = vmul.f32 %v12188_v63, %v18459_v53  ;;  %12209 = vrcp.f32 %v4864_v35  ;;  %v18562_v53 = vadd.f32 %v19789_v62, %v17280_v59 }
 0x5c7   : > { %v12192_v56 = vpop.eup %12191  ;;  %12211 = vrcp.f32 %v4866_v58  ;;  %v4879_v33 = vadd.f32 1.0, %v12190_v20 }
 0x5c8   : > { %v12194_v44 = vpop.eup %12193  ;;  %v7551_v30 = vadd.f32 %v7550_v0, %v6320_v6  ;;  %v6322_v61 = vmul.f32 %v12192_v56, %v18463_v3  ;;  %12213 = vpow2.f32 %v9477_v8  ;;  %v19791_v3 = vld [vmem:[#allocation27_spill] sm:$0xff] }
 0x5c9   : > { %v12196_v45 = vpop.eup %12195  ;;  %12215 = vrcp.f32 %v4879_v33  ;;  %v4881_v10 = vadd.f32 1.0, %v12194_v44  ;;  %v18572_v46 = vadd.f32 %v19791_v3, %v17294_v36 }
 0x5ca   : > { %v12198_v17 = vpop.eup %12197  ;;  %v7623_v26 = vadd.f32 %v7622_v4, %v6322_v61  ;;  %v6335_v0 = vmul.f32 %v12196_v45, %v18467_v47  ;;  %12217 = vpow2.f32 %v9490_v40  ;;  %v9506_v47 = vmul.f32 -1.442695, %v18562_v53 }
 0x5cb   : > { %v12200_v59 = vpop.eup %12199  ;;  %v6337_v16 = vmul.f32 %v12198_v17, %v18471_v49  ;;  %12219 = vrcp.f32 %v4881_v10  ;;  %v9508_v49 = vmul.f32 -1.442695, %v18567_v37  ;;  %v9507_v31 = vmul.f32 -1.442695, %v18572_v46 }
 0x5cc   : > { %v12202_v9 = vpop.eup %12201  ;;  %v7516_v42 = vadd.f32 %v7515_v15, %v6335_v0  ;;  %v4880_v4 = vadd.f32 1.0, %v12200_v59  ;;  %12221 = vpow2.f32 %v9492_v50 }
 0x5cd   : > { %v12204_v1 = vpop.eup %12203  ;;  %v7588_v7 = vadd.f32 %v7587_v22, %v6337_v16  ;;  %v6336_v36 = vmul.f32 %v12202_v9, %v18476_v21  ;;  %12223 = vpow2.f32 %v9491_v55 }
 0x5ce   : > { %v12206_v25 = vpop.eup %12205  ;;  %v6338_v12 = vmul.f32 %v12204_v1, %v18484_v27  ;;  %12225 = vrcp.f32 %v4880_v4 }
 0x5cf   : > { %v12208_v48 = vpop.eup %12207  ;;  %v7552_v18 = vadd.f32 %v7551_v30, %v6336_v36  ;;  %v6351_v15 = vmul.f32 %v12206_v25, %v18489_v14  ;;  %12227 = vpow2.f32 %v9493_v29 }
 0x5d0   : > { %v12210_v57 = vpop.eup %12209  ;;  %v7624_v22 = vadd.f32 %v7623_v26, %v6338_v12  ;;  %v6353_v21 = vmul.f32 %v12208_v48, %v18494_v43  ;;  %12229 = vpow2.f32 %v9506_v47 }
 0x5d1   : > { %v12212_v35 = vpop.eup %12211  ;;  %v7517_v8 = vadd.f32 %v7516_v42, %v6351_v15  ;;  %v6352_v63 = vmul.f32 %v12210_v57, %v18499_v54  ;;  %12231 = vpow2.f32 %v9508_v49 }
 0x5d2   : > { %v12214_v27 = vpop.eup %12213  ;;  %v7589_v58 = vadd.f32 %v7588_v7, %v6353_v21  ;;  %v6354_v34 = vmul.f32 %v12212_v35, %v18505_v24  ;;  %12233 = vpow2.f32 %v9507_v31 }
 0x5d3   : > { %v12216_v20 = vpop.eup %12215  ;;  %v7553_v14 = vadd.f32 %v7552_v18, %v6352_v63  ;;  %v4882_v6 = vadd.f32 1.0, %v12214_v27  ;;  %12235 = vpow2.f32 %v9509_v13 }
 0x5d4   : > { %v12218_v40 = vpop.eup %12217  ;;  %v7625_v56 = vadd.f32 %v7624_v22, %v6354_v34  ;;  %v6367_v33 = vmul.f32 %v12216_v20, %v18514_v28 }
 0x5d5   : > { %v12220_v43 = vpop.eup %12219  ;;  %12237 = vrcp.f32 %v4882_v6  ;;  %v4895_v50 = vadd.f32 1.0, %v12218_v40 }
 0x5d6   : > { %v12222_v41 = vpop.eup %12221  ;;  %v7518_v44 = vadd.f32 %v7517_v8, %v6367_v33  ;;  %v6369_v54 = vmul.f32 %v12220_v43, %v18521_v2 }
 0x5d7   : > { %v12224_v30 = vpop.eup %12223  ;;  %12239 = vrcp.f32 %v4895_v50  ;;  %v4897_v61 = vadd.f32 1.0, %v12222_v41 }
 0x5d8   : > { %v12226_v24 = vpop.eup %12225  ;;  %v7590_v62 = vadd.f32 %v7589_v58, %v6369_v54  ;;  %v4896_v45 = vadd.f32 1.0, %v12224_v30 }
 0x5d9   : > { %v12228_v10 = vpop.eup %12227  ;;  %v6368_v55 = vmul.f32 %v12226_v24, %v18528_v11  ;;  %12241 = vrcp.f32 %v4897_v61 }
 0x5da   : > { %v12230_v60 = vpop.eup %12229  ;;  %12243 = vrcp.f32 %v4896_v45  ;;  %v4898_v28 = vadd.f32 1.0, %v12228_v10 }
 0x5db   : > { %v12232_v17 = vpop.eup %12231  ;;  %v7554_v26 = vadd.f32 %v7553_v14, %v6368_v55  ;;  %v4911_v0 = vadd.f32 1.0, %v12230_v60 }
 0x5dc   : > { %v12234_v3 = vpop.eup %12233  ;;  %12245 = vrcp.f32 %v4898_v28  ;;  %v4913_v59 = vadd.f32 1.0, %v12232_v17 }
 0x5dd   : > { %v12236_v2 = vpop.eup %12235  ;;  %12247 = vrcp.f32 %v4911_v0  ;;  %v4912_v16 = vadd.f32 1.0, %v12234_v3  ;;  %v19794_v3 = vld [vmem:[#allocation37_spill] sm:$0xff] }
 0x5de   : > { %12249 = vrcp.f32 %v4913_v59  ;;  %v4914_v29 = vadd.f32 1.0, %v12236_v2 }
 0x5df   : > { %v12238_v19 = vpop.eup %12237  ;;  %12251 = vrcp.f32 %v4912_v16 }
 0x5e0   : > { %v6370_v9 = vmul.f32 %v12238_v19, %v18537_v38  ;;  %12253 = vrcp.f32 %v4914_v29  ;;  %v19795_v29 = vld [vmem:[#allocation51_spill] sm:$0xff]  ;;  %v19796_v19 = vld [vmem:[#allocation52_spill] sm:$0xff] }
 0x5e1   : > { %v12240_v11 = vpop.eup %12239 }
 0x5e2   : > { %v7626_v42 = vadd.f32 %v7625_v56, %v6370_v9  ;;  %v6383_v4 = vmul.f32 %v12240_v11, %v18541_v52  ;;  %v19797_v9 = vcombine.low %v19795_v29, %v19796_v19 }
 0x5e3   : > { %v12242_v47 = vpop.eup %12241 }
 0x5e4   : > { %v12244_v1 = vpop.eup %12243  ;;  %v7519_v7 = vadd.f32 %v7518_v44, %v6383_v4  ;;  %v6385_v36 = vmul.f32 %v12242_v47, %v18545_v39  ;;  %v7740_v11 = vrot.slane %v19797_v9, %v19794_v3  ;;  %v7954_v4 = vld [vmem:[%s18836_s5 + $0x600] sm:$0xff] }
 0x5e5   : > { %v6384_v49 = vmul.f32 %v12244_v1, %v18550_v32  ;;  %v7955_v1 = vld [vmem:[%s18836_s5 + $0x608] sm:$0xff]  ;;  %v7962_v9 = vld [vmem:[%s18836_s5 + $0x640] sm:$0xff] }
 0x5e6   : > { %v12246_v25 = vpop.eup %12245  ;;  %v7591_v12 = vadd.f32 %v7590_v62, %v6385_v36  ;;  %v7987_v36 = vld [vmem:[%s18836_s5 + $0x708] sm:$0xff] }
 0x5e7   : > { %v12248_v31 = vpop.eup %12247  ;;  %v7555_v48 = vadd.f32 %v7554_v26, %v6384_v49  ;;  %v6386_v18 = vmul.f32 %v12246_v25, %v18557_v5  ;;  %v7972_v25 = vld [vmem:[%s18836_s5 + $0x690] sm:$0xff] }
 0x5e8   : > { %v12250_v15 = vpop.eup %12249  ;;  %v6399_v38 = vmul.f32 %v12248_v31, %v18562_v53 }
 0x5e9   : > { %v12252_v13 = vpop.eup %12251  ;;  %v7627_v57 = vadd.f32 %v7626_v42, %v6386_v18  ;;  %v6401_v52 = vmul.f32 %v12250_v15, %v18567_v37  ;;  %v8004_v18 = vld [vmem:[%s18836_s5 + $0x790] sm:$0xff]  ;;  %v8005_v15 = vld [vmem:[%s18836_s5 + $0x798] sm:$0xff] }
 0x5ea   : > { %v12254_v22 = vpop.eup %12253  ;;  %v7053_v35 = vsel %vm6498_vm2, %v6399_v38, 0.0  ;;  %v6400_v39 = vmul.f32 %v12252_v13, %v18572_v46  ;;  %v19798_v38 = vld [vmem:[#allocation22_spill] sm:$0xff] }
 0x5eb   : > { %v7520_v32 = vadd.f32 %v7519_v7, %v7053_v35  ;;  %v7055_v8 = vsel %vm6498_vm2, %v6401_v52, 0.0  ;;  %v6402_v63 = vmul.f32 %v12254_v22, %v18578_v23  ;;  %v7986_v7 = vld [vmem:[%s18836_s5 + $0x700] sm:$0xff]  ;;  %v19800_v22 = vld [vmem:[#allocation20_spill] sm:$0xff]  ;;  %v19801_v35 = vld [vmem:[#allocation21_spill] sm:$0xff] }
 0x5ec   : > { %v7592_v5 = vadd.f32 %v7591_v12, %v7055_v8  ;;  %v7054_v53 = vsel %vm6498_vm2, %v6400_v39, 0.0  ;;  %v10040_v12 = vpack.c.bf16 %v7955_v1, %v7954_v4  ;;  %v10072_v31 = vpack.c.bf16 %v7987_v36, %v7986_v7  ;;  %v7957_v8 = vld [vmem:[%s18836_s5 + $0x618] sm:$0xff]  ;;  %v7995_v1 = vld [vmem:[%s18836_s5 + $0x748] sm:$0xff]  ;;  %v7980_v7 = vld [vmem:[%s18836_s5 + $0x6d0] sm:$0xff] }
 0x5ed   : > { %v7521_v27 = vrot.slane %v7520_v32, 4  ;;  %v7556_v58 = vadd.f32 %v7555_v48, %v7054_v53  ;;  %v7056_v37 = vsel %vm6498_vm2, %v6402_v63, 0.0  ;;  %v7973_v48 = vld [vmem:[%s18836_s5 + $0x698] sm:$0xff]  ;;  %v7988_v63 = vld [vmem:[%s18836_s5 + $0x710] sm:$0xff]  ;;  %v7974_v53 = vld [vmem:[%s18836_s5 + $0x6a0] sm:$0xff] }
 0x5ee   : > { %v7593_v34 = vrot.slane %v7592_v5, 4  ;;  %v7628_v20 = vadd.f32 %v7627_v57, %v7056_v37  ;;  %v19799_v57 = vld [vmem:[#allocation23_spill] sm:$0xff]  ;;  %v7975_v37 = vld [vmem:[%s18836_s5 + $0x6a8] sm:$0xff]  ;;  %v7981_v36 = vld [vmem:[%s18836_s5 + $0x6d8] sm:$0xff] }
 0x5ef   : > { %v7522_v14 = vadd.f32 %v7521_v27, %v7520_v32  ;;  %v7557_v6 = vrot.slane %v7556_v58, 4  ;;  %v7956_v32 = vld [vmem:[%s18836_s5 + $0x610] sm:$0xff]  ;;  %v10042_v27 = vpack.c.bf16 %v7973_v48, %v7972_v25 }
 0x5f0   : > { %v7594_v46 = vadd.f32 %v7593_v34, %v7592_v5  ;;  %v7629_v40 = vrot.slane %v7628_v20, 4  ;;  %v7989_v5 = vld [vmem:[%s18836_s5 + $0x718] sm:$0xff]  ;;  %v8006_v34 = vld [vmem:[%s18836_s5 + $0x7a0] sm:$0xff]  ;;  %v8012_v25 = vld [vmem:[%s18836_s5 + $0x7d0] sm:$0xff] }
 0x5f1   : > { %v7523_v56 = vrot.slane %v7522_v14, 2  ;;  %v7558_v33 = vadd.f32 %v7557_v6, %v7556_v58  ;;  %v10074_v58 = vpack.c.bf16 %v8005_v15, %v8004_v18  ;;  %v7964_v18 = vld [vmem:[%s18836_s5 + $0x650] sm:$0xff]  ;;  %v7965_v15 = vld [vmem:[%s18836_s5 + $0x658] sm:$0xff] }
 0x5f2   : > { %v7595_v43 = vrot.slane %v7594_v46, 2  ;;  %v7630_v50 = vadd.f32 %v7629_v40, %v7628_v20  ;;  %v8007_v20 = vld [vmem:[%s18836_s5 + $0x7a8] sm:$0xff] }
 0x5f3   : > { %v7524_v23 = vadd.f32 %v7523_v56, %v7522_v14  ;;  %v7559_v41 = vrot.slane %v7558_v33, 2  ;;  %v19802_v14 = vld [vmem:[#allocation60_spill] sm:$0xff]  ;;  %v10044_v56 = vpack.c.bf16 %v7957_v8, %v7956_v32  ;;  %v10060_v8 = vpack.c.bf16 %v7965_v15, %v7964_v18 }
 0x5f4   : > { %v7596_v44 = vadd.f32 %v7595_v43, %v7594_v46  ;;  %v7631_v54 = vrot.slane %v7630_v50, 2  ;;  %v19803_v46 = vld [vmem:[#allocation61_spill] sm:$0xff]  ;;  %v7958_v43 = vld [vmem:[%s18836_s5 + $0x620] sm:$0xff]  ;;  %v8015_v32 = vld [vmem:[%s18836_s5 + $0x7e8] sm:$0xff] }
 0x5f5   : > { %v7525_v30 = vrot.slane %v7524_v23, 1  ;;  %v7560_v61 = vadd.f32 %v7559_v41, %v7558_v33  ;;  %v10076_v33 = vpack.c.bf16 %v7989_v5, %v7988_v63  ;;  %v10078_v41 = vpack.c.bf16 %v8007_v20, %v8006_v34  ;;  %v7966_v5 = vld [vmem:[%s18836_s5 + $0x660] sm:$0xff]  ;;  %v7999_v34 = vld [vmem:[%s18836_s5 + $0x768] sm:$0xff]  ;;  %v7984_v20 = vld [vmem:[%s18836_s5 + $0x6f0] sm:$0xff] }
 0x5f6   : > { %v7597_v24 = vrot.slane %v7596_v44, 1  ;;  %v7632_v62 = vadd.f32 %v7631_v54, %v7630_v50  ;;  %v7959_v50 = vld [vmem:[%s18836_s5 + $0x628] sm:$0xff] }
 0x5f7   : > { %v7526_v45 = vadd.f32 %v7525_v30, %v7524_v23  ;;  %v7561_v10 = vrot.slane %v7560_v61, 1  ;;  %v10046_v23 = vpack.c.bf16 %v7975_v37, %v7974_v53  ;;  %v7991_v54 = vld [vmem:[%s18836_s5 + $0x728] sm:$0xff]  ;;  %v7976_v30 = vld [vmem:[%s18836_s5 + $0x6b0] sm:$0xff]  ;;  %v7998_v37 = vld [vmem:[%s18836_s5 + $0x760] sm:$0xff] }
 0x5f8   : > { %v7598_v55 = vadd.f32 %v7597_v24, %v7596_v44  ;;  %v7633_v60 = vrot.slane %v7632_v62, 1  ;;  %v7990_v44 = vld [vmem:[%s18836_s5 + $0x720] sm:$0xff]  ;;  %v8008_v24 = vld [vmem:[%s18836_s5 + $0x7b0] sm:$0xff]  ;;  %v7967_v53 = vld [vmem:[%s18836_s5 + $0x668] sm:$0xff] }
 0x5f9   : > { %v7562_v28 = vadd.f32 %v7561_v10, %v7560_v61  ;;  %v7977_v61 = vld [vmem:[%s18836_s5 + $0x6b8] sm:$0xff]  ;;  %v10080_v10 = vpack.c.bf16 %v7991_v54, %v7990_v44 }
 0x5fa   : > { %v7634_v17 = vadd.f32 %v7633_v60, %v7632_v62  ;;  %v8009_v62 = vld [vmem:[%s18836_s5 + $0x7b8] sm:$0xff] }
 0x5fb   : > { %v7702_v26 = vcombine.low %v7526_v45, %v7562_v28  ;;  %v10048_v45 = vpack.c.bf16 %v7959_v50, %v7958_v43  ;;  %v7961_v60 = vld [vmem:[%s18836_s5 + $0x638] sm:$0xff]  ;;  %v10050_v28 = vpack.c.bf16 %v7977_v61, %v7976_v30 }
 0x5fc   : > { %v7703_v0 = vcombine.low %v7598_v55, %v7634_v17  ;;  %v7960_v55 = vld [vmem:[%s18836_s5 + $0x630] sm:$0xff]  ;;  %v10082_v17 = vpack.c.bf16 %v8009_v62, %v8008_v24  ;;  %v8001_v44 = vld [vmem:[%s18836_s5 + $0x778] sm:$0xff] }
 0x5fd   : > { %v7724_v59 = vrot.slane %v7702_v26, %v19794_v3  ;;  %v7992_v26 = vld [vmem:[%s18836_s5 + $0x730] sm:$0xff]  ;;  %v10052_v29 = vpack.c.bf16 %v7961_v60, %v7960_v55  ;;  %v19804_v61 = vld [vmem:[#allocation6_spill] sm:$0xff] }
 0x5fe   : > { %v7731_v2 = vrot.slane %v7703_v0, %v19794_v3  ;;  %v7993_v0 = vld [vmem:[%s18836_s5 + $0x738] sm:$0xff] }
 0x5ff   : > { %v10084_v19 = vpack.c.bf16 %v7993_v0, %v7992_v26  ;;  %v19805_v62 = vld [vmem:[#allocation30_spill] sm:$0xff] }
 0x600   : > { %v7733_v16 = vcombine.low %v7724_v59, %v7731_v2  ;;  %v7979_v59 = vld [vmem:[%s18836_s5 + $0x6c8] sm:$0xff]  ;;  %v8010_v2 = vld [vmem:[%s18836_s5 + $0x7c0] sm:$0xff] }
 0x602   : > { %v7747_v42 = vrot.slane %v7733_v16, %v19794_v3  ;;  %v7978_v3 = vld [vmem:[%s18836_s5 + $0x6c0] sm:$0xff]  ;;  %v8011_v16 = vld [vmem:[%s18836_s5 + $0x7c8] sm:$0xff] }
 0x603   : > { %v10086_v4 = vpack.c.bf16 %v8011_v16, %v8010_v2 }
 0x604   : > { %v7748_v47 = vcombine.low %v7740_v11, %v7747_v42  ;;  %v7963_v11 = vld [vmem:[%s18836_s5 + $0x648] sm:$0xff]  ;;  %v10054_v42 = vpack.c.bf16 %v7979_v59, %v7978_v3 }
 0x606   : > { %v18629_v49 = vmul.f32 0.004115226, %v7748_v47  ;;  %v7994_v47 = vld [vmem:[%s18836_s5 + $0x740] sm:$0xff] }
 0x607   : > { %v10088_v48 = vpack.c.bf16 %v7995_v1, %v7994_v47 }
 0x608   : > { %v8060_v13 = vrot.slane %v18629_v49, %v19798_v38  ;;  %v8068_v52 = vrot.slane %v18629_v49, %v19799_v57  ;;  %v8056_v21 = vrot.slane %v18629_v49, %v19800_v22  ;;  %v8064_v39 = vrot.slane %v18629_v49, %v19801_v35  ;;  %v7996_v57 = vld [vmem:[%s18836_s5 + $0x750] sm:$0xff]  ;;  %v7983_v35 = vld [vmem:[%s18836_s5 + $0x6e8] sm:$0xff] }
 0x609   : > { %v8076_v6 = vrot.slane %v18629_v49, %v19802_v14  ;;  %v8084_v40 = vrot.slane %v18629_v49, %v19803_v46  ;;  %v10058_v38 = vpack.c.bf16 %v7981_v36, %v7980_v7  ;;  %v7985_v14 = vld [vmem:[%s18836_s5 + $0x6f8] sm:$0xff]  ;;  %v8072_v24 = vrot.slane %v18629_v49, %v19804_v61 }
 0x60a   : > { %8445 = vmatprep.mubr.f32.mxu0 %v8060_v13  ;;  %8515 = vmatprep.mubr.f32.mxu1 %v8068_v52  ;;  %v7997_v52 = vld [vmem:[%s18836_s5 + $0x758] sm:$0xff]  ;;  %v10066_v43 = vpack.c.bf16 %v7985_v14, %v7984_v20 }
 0x60b   : > { %8446 = vmatmul.mubr.f32.vlgmr.msra.gmra.mrb[34].mxu0 %v8056_v21  ;;  %8516 = vmatmul.mubr.f32.vlgmr.msra.gmra.mrb[6].mxu1 %v8064_v39  ;;  %v7982_v21 = vld [vmem:[%s18836_s5 + $0x6e0] sm:$0xff]  ;;  %v10092_v63 = vpack.c.bf16 %v7997_v52, %v7996_v57  ;;  %v8017_v46 = vld [vmem:[%s18836_s5 + $0x7f8] sm:$0xff] }
 0x60c   : > { %10041 = vmatpush3.bf16.msra.mxu0 %v10040_v12  ;;  %10073 = vmatpush3.bf16.msra.mxu1 %v10072_v31  ;;  %v8013_v12 = vld [vmem:[%s18836_s5 + $0x7d8] sm:$0xff]  ;;  %v10056_v31 = vpack.c.bf16 %v7963_v11, %v7962_v9  ;;  %v8014_v39 = vld [vmem:[%s18836_s5 + $0x7e0] sm:$0xff] }
 0x60d   : > { %8585 = vmatprep.mubr.f32.mxu0 %v8076_v6  ;;  %8655 = vmatprep.mubr.f32.mxu1 %v8084_v40  ;;  %v10090_v13 = vpack.c.bf16 %v8013_v12, %v8012_v25  ;;  %v8016_v6 = vld [vmem:[%s18836_s5 + $0x7f0] sm:$0xff]  ;;  %v10064_v40 = vpack.c.bf16 %v7967_v53, %v7966_v5 }
 0x60e   : > { %10043 = vmatprep.subr.bf16.mxu0 %v10042_v27  ;;  %10075 = vmatprep.subr.bf16.mxu1 %v10074_v58  ;;  %v10062_v27 = vpack.c.bf16 %v7983_v35, %v7982_v21  ;;  %v10094_v58 = vpack.c.bf16 %v8015_v32, %v8014_v39  ;;  %v10098_v50 = vpack.c.bf16 %v8017_v46, %v8016_v6 }
 0x610   : > { %10045 = vmatpush3.bf16.msra.mxu0 %v10044_v56  ;;  %10077 = vmatpush3.bf16.msra.mxu1 %v10076_v33  ;;  %v10096_v56 = vpack.c.bf16 %v7999_v34, %v7998_v37  ;;  %v7968_v33 = vld [vmem:[%s18836_s5 + $0x670] sm:$0xff] }
 0x611   : > { %10047 = vmatprep.subr.bf16.mxu0 %v10046_v23  ;;  %10079 = vmatprep.subr.bf16.mxu1 %v10078_v41  ;;  %v7969_v23 = vld [vmem:[%s18836_s5 + $0x678] sm:$0xff]  ;;  %v8000_v41 = vld [vmem:[%s18836_s5 + $0x770] sm:$0xff] }
 0x612   : > { %v10068_v54 = vpack.c.bf16 %v7969_v23, %v7968_v33  ;;  %v10100_v30 = vpack.c.bf16 %v8001_v44, %v8000_v41 }
 0x614   : > { %10049 = vmatpush3.bf16.msra.mxu0 %v10048_v45  ;;  %10081 = vmatpush3.bf16.msra.mxu1 %v10080_v10  ;;  %v8080_v45 = vrot.slane %v18629_v49, %v19805_v62 }
 0x615   : > { %10051 = vmatprep.subr.bf16.mxu0 %v10050_v28  ;;  %10083 = vmatprep.subr.bf16.mxu1 %v10082_v17 }
 0x618   : > { %10053 = vmatpush3.bf16.msra.mxu0 %v10052_v29  ;;  %10085 = vmatpush3.bf16.msra.mxu1 %v10084_v19  ;;  %v19806_v19 = vlaneseq }
 0x619   : > { %10055 = vmatprep.subr.bf16.mxu0 %v10054_v42  ;;  %10087 = vmatprep.subr.bf16.mxu1 %v10086_v4 }
 0x61a   : > { %v8662_v9 = vand.u32 127, %v19806_v19 }
 0x61c   : > { %10057 = vmatpush3.bf16.msra.mxu0 %v10056_v31  ;;  %10089 = vmatpush3.bf16.msra.mxu1 %v10088_v48  ;;  %vm8663_vm3 = vcmp.lt.s32.totalorder %v8662_v9, 6 }
 0x61d   : > { %10059 = vmatprep.subr.bf16.mxu0 %v10058_v38  ;;  %10091 = vmatprep.subr.bf16.mxu1 %v10090_v13 }
 0x620   : > { %10061 = vmatpush3.bf16.msra.mxu0 %v10060_v8  ;;  %10093 = vmatpush3.bf16.msra.mxu1 %v10092_v63 }
 0x621   : > { %10063 = vmatprep.subr.bf16.mxu0 %v10062_v27  ;;  %10095 = vmatprep.subr.bf16.mxu1 %v10094_v58 }
 0x624   : > { %10065 = vmatpush3.bf16.msra.mxu0 %v10064_v40  ;;  %10097 = vmatpush3.bf16.msra.mxu1 %v10096_v56 }
 0x625   : > { %10067 = vmatprep.subr.bf16.mxu0 %v10066_v43  ;;  %10099 = vmatprep.subr.bf16.mxu1 %v10098_v50 }
 0x628   : > { %10069 = vmatpush3.bf16.msra.mxu0 %v10068_v54  ;;  %10101 = vmatpush3.bf16.msra.mxu1 %v10100_v30 }
 0x62b   : > { %8586 = vmatmul.mubr.f32.vlgmr.msra.gmra.mrb[36].mxu0 %v8072_v24  ;;  %8656 = vmatmul.mubr.f32.vlgmr.msra.gmra.mrb[8].mxu1 %v8080_v45 }
 0x6de   : > { %v9702_v10 = vpop.f32.mrb[34].mxu0  ;;  %v9737_v55 = vpop.f32.mrb[6].mxu1 }
 0x6df   : > { %v9703_v60 = vpop.f32.mrb[35].mxu0  ;;  %v9738_v28 = vpop.f32.mrb[7].mxu1 }
 0x6e0   : > { %v9704_v17 = vadd.f32 %v9703_v60, %v9702_v10  ;;  %v9739_v26 = vadd.f32 %v9738_v28, %v9737_v55 }
 0x6e2   : > { %v8448_v0 = vadd.f32 %v9704_v17, %v18452_v51 }
 0x6e4   : > { %v8518_v3 = vadd.f32 %v9739_v26, %v8448_v0 }
 0x6fe   : > { %v9772_v59 = vpop.f32.mrb[36].mxu0  ;;  %v9807_v2 = vpop.f32.mrb[8].mxu1 }
 0x6ff   : > { %v9773_v16 = vpop.f32.mrb[37].mxu0  ;;  %v9808_v29 = vpop.f32.mrb[9].mxu1 }
 0x700   : > { %v9774_v11 = vadd.f32 %v9773_v16, %v9772_v59  ;;  %v9809_v42 = vadd.f32 %v9808_v29, %v9807_v2 }
 0x702   : > { %v8588_v49 = vadd.f32 %v9774_v11, %v8518_v3 }
 0x704   : > { %v8658_v4 = vadd.f32 %v9809_v42, %v8588_v49 }
 0x706   : > { %v8664_v47 = vsel %vm8663_vm3, %v8658_v4, -1e+30 }
 0x707   : > { %v8666_v1 = vsel %vm8665_vm4, %v8664_v47, -inf }
 0x708   : > { %8667 = vmax.xlane.f32.xlu0 %v8666_v1 }
 0x795   : > { %v8668_v7 = vpop.xlane.xlu0 %8667 }
 0x796   : > { %v8669_v36 = vsub.f32 %v8664_v47, %v8668_v7 }
 0x798   : > { %v8670_v51 = vmul.f32 1.442695, %v8669_v36 }
 0x79a   : > { %12255 = vpow2.f32 %v8670_v51 }
 0x7a4   : > { %v12256_v25 = vpop.eup %12255 }
 0x7a5   : > { %v8672_v12 = vsel %vm8665_vm4, %v12256_v25, 0.0 }
 0x7a6   : > { %8673 = vadd.xlane.f32.xlu0 %v8672_v12 }
 0x833   : > { %v8674_v31 = vpop.xlane.xlu0 %8673 }
 0x834   : > { %12257 = vrcp.f32 %v8674_v31 }
 0x83e   : > { %v12258_v48 = vpop.eup %12257 }
 0x83f   : > { %v8676_v18 = vmul.f32 %v12258_v48, %v12256_v25 }
 0x841   : > { %v8680_v15 = vrot.slane %v8676_v18, %v19800_v22 }
 0x843   : > { %8681 = vst [vmem:[%s304_s22] sm:$0xff] %v8680_v15 }
 0x844 PF: > { %s17_s26 = sadd.s32 1, %s12283_s26   ;;  %s19807_s24 = smov %s12279_s25 }
 0x845   : > { %p14_p5 = scmp.ge.s32.totalorder %s17_s26, 4   ;;  %s19808_s25 = smov %s19810_s27 }
 0x847   :  { %16 = sbr.rel (!%p14_p5) target bundleno = 2 (0x2), region = 86 }

</bundles_post_ra>
